<compile_context>
chip_gen: v6e
topology: v6e:2x2x1
jax: 0.10.0
libtpu: 0.0.40
codegen_flags: <defaults>
</compile_context>

<pallas_src>
import functools

import jax
import jax.numpy as jnp
from jax.experimental import pallas as pl
from jax.experimental.pallas import tpu as pltpu

Z_DIM = 100
EPS = 1e-5

_VMEM = pl.BlockSpec(memory_space=pltpu.MemorySpace.VMEM)

# Largest kernel tap used by an even / odd output parity (kernel 4, stride 2).
_MAXK = (3, 2)


# ----------------------------------------------------------------------------
# Kernel 1: (x * emb(y)) fused with block1 = ConvT(100->256, k4, s1, p0) from a
#           1x1 input == outer-product GEMM (B,100)@(100, 4*4*256), fused with
#           train-mode BatchNorm (single-pass stats, folded affine) + ReLU.
# ----------------------------------------------------------------------------
def _block1_kernel(x_ref, e_ref, w_ref, g_ref, b_ref, o_ref, *, n_rows):
    # x/e: (B, 100) f32   w: (100, 16*256) bf16 cols=(oh,ow,co)   g/b: (1, 256) f32
    h = (x_ref[...] * e_ref[...]).astype(jnp.bfloat16)      # fused latent conditioning
    acc = jnp.dot(h, w_ref[...], preferred_element_type=jnp.float32)
    c = g_ref.shape[-1]                                      # 256
    s = jnp.zeros((1, c), jnp.float32)
    sq = jnp.zeros((1, c), jnp.float32)
    blocks = []
    for k in range(16):                                      # 16 spatial positions
        blk = acc[:, k * c:(k + 1) * c]                      # lane-aligned slice
        blocks.append(blk)
        s = s + jnp.sum(blk, axis=0, keepdims=True)
        sq = sq + jnp.sum(blk * blk, axis=0, keepdims=True)
    inv_n = 1.0 / n_rows
    mean = s * inv_n
    var = sq * inv_n - mean * mean                           # biased (train-mode BN)
    scale = g_ref[...] * jax.lax.rsqrt(var + EPS)
    bias = b_ref[...] - mean * scale
    normed = [jnp.maximum(blk * scale + bias, 0.0) for blk in blocks]
    o_ref[...] = jnp.concatenate(normed, axis=-1).astype(o_ref.dtype)


def block1(x_flat, emb_rows, w1, gamma, beta):
    B = x_flat.shape[0]
    out = pl.pallas_call(
        functools.partial(_block1_kernel, n_rows=B * 16),
        out_shape=jax.ShapeDtypeStruct((B, 16 * 256), jnp.bfloat16),
        in_specs=[_VMEM] * 5,
        out_specs=_VMEM,
        cost_estimate=pl.CostEstimate(
            flops=2 * B * Z_DIM * 16 * 256 + B * Z_DIM,
            transcendentals=256,
            bytes_accessed=(4 * 2 * B * Z_DIM + 2 * Z_DIM * 16 * 256
                            + 2 * B * 16 * 256 + 8 * 256)),
    )(x_flat, emb_rows, w1, gamma, beta)
    return out.reshape(B, 4, 4, 256)                         # NHWC


# ----------------------------------------------------------------------------
# Kernels 2-4: fractionally-strided ConvTranspose2d (stride 2, k 4) via
# sub-pixel decomposition: four dense GEMMs (one per output parity class),
# fused BatchNorm over all parities + ReLU, or Tanh for the last layer.
# ----------------------------------------------------------------------------
def _subpix_bn_relu_kernel(p_ref, w_ref, g_ref, b_ref, o_ref, acc_ref, *, n_rows):
    # p: (4, M, 4*Cin) bf16   w: (4, 4*Cin, 128) bf16   g/b: (1, 128) f32
    # o: (4, M, 128) bf16     acc (scratch): (4, M, 128) f32
    c = g_ref.shape[-1]
    s = jnp.zeros((1, c), jnp.float32)
    sq = jnp.zeros((1, c), jnp.float32)
    for par in range(4):                                     # (ph, pw) parity classes
        a = jnp.dot(p_ref[par], w_ref[par], preferred_element_type=jnp.float32)
        acc_ref[par] = a
        s = s + jnp.sum(a, axis=0, keepdims=True)
        sq = sq + jnp.sum(a * a, axis=0, keepdims=True)
    inv_n = 1.0 / n_rows
    mean = s * inv_n
    var = sq * inv_n - mean * mean                           # biased (train-mode BN)
    scale = g_ref[...] * jax.lax.rsqrt(var + EPS)            # padded lanes: gamma=0 -> 0
    bias = b_ref[...] - mean * scale
    for par in range(4):
        o_ref[par] = jnp.maximum(acc_ref[par] * scale + bias, 0.0).astype(o_ref.dtype)


def _subpix_tanh_kernel(p_ref, w_ref, o_ref):
    for par in range(4):
        a = jnp.dot(p_ref[par], w_ref[par], preferred_element_type=jnp.float32)
        o_ref[par] = jnp.tanh(a)


# ----------------------------------------------------------------------------
# XLA glue: zero-free im2col (only the non-zero taps) and parity re-interleave.
# ----------------------------------------------------------------------------
def _subpixel_patches(xb, hs, ws):
    # patches[ph*2+pw, (b,i,j), (dh,dw,ci)] = xb[b, ph+dh+i, pw+dw+j, ci]
    B, _, _, cin = xb.shape
    blocks = []
    for ph in (0, 1):
        for pw in (0, 1):
            taps = [xb[:, ph + dh:ph + dh + hs, pw + dw:pw + dw + ws, :]
                    for dh in (0, 1) for dw in (0, 1)]
            blocks.append(jnp.concatenate(taps, axis=-1).reshape(B * hs * ws, 4 * cin))
    return jnp.stack(blocks, axis=0)                         # (4, B*hs*ws, 4*cin)


def _interleave_parities(o, B, hs, ws):
    # o[ph*2+pw, (b,i,j), c] -> full[b, 2*i+ph, 2*j+pw, c]
    c = o.shape[-1]
    o = o.reshape(2, 2, B, hs, ws, c)
    o = jnp.transpose(o, (2, 3, 0, 4, 1, 5))
    return o.reshape(B, 2 * hs, 2 * ws, c)


def convt_bn_relu(x, w_sub, gamma, beta, *, hs, ws, pad_input, keep):
    B, _, _, cin = x.shape
    cpad = w_sub.shape[-1]
    xb = jnp.pad(x, ((0, 0), (1, 1), (1, 1), (0, 0))) if pad_input else x
    patches = _subpixel_patches(xb, hs, ws)                  # (4, M, 4*cin) bf16
    M = B * hs * ws
    out = pl.pallas_call(
        functools.partial(_subpix_bn_relu_kernel, n_rows=4 * M),
        out_shape=jax.ShapeDtypeStruct((4, M, cpad), jnp.bfloat16),
        in_specs=[_VMEM] * 4,
        out_specs=_VMEM,
        scratch_shapes=[pltpu.VMEM((4, M, cpad), jnp.float32)],
        cost_estimate=pl.CostEstimate(
            flops=2 * 4 * M * 4 * cin * cpad,
            transcendentals=cpad,
            bytes_accessed=2 * (4 * M * 4 * cin + 16 * cin * cpad + 4 * M * cpad) + 8 * cpad),
    )(patches, w_sub, gamma, beta)
    full = _interleave_parities(out, B, hs, ws)
    return full[..., :keep]


def convt_tanh(x, w_sub, *, hs, ws, pad_input):
    B, _, _, cin = x.shape
    cpad = w_sub.shape[-1]
    xb = jnp.pad(x, ((0, 0), (1, 1), (1, 1), (0, 0))) if pad_input else x
    patches = _subpixel_patches(xb, hs, ws)
    M = B * hs * ws
    out = pl.pallas_call(
        _subpix_tanh_kernel,
        out_shape=jax.ShapeDtypeStruct((4, M, cpad), jnp.float32),
        in_specs=[_VMEM] * 2,
        out_specs=_VMEM,
        cost_estimate=pl.CostEstimate(
            flops=2 * 4 * M * 4 * cin * cpad,
            transcendentals=4 * M * cpad,
            bytes_accessed=2 * (4 * M * 4 * cin + 16 * cin * cpad) + 4 * 4 * M * cpad),
    )(patches, w_sub)
    return _interleave_parities(out, B, hs, ws)


# ----------------------------------------------------------------------------
# Parameters (deterministic synthetic init; shapes follow the nn.Module) and
# one-time packing into GEMM-ready form (hoisted out of the jitted forward).
# ----------------------------------------------------------------------------
def init_params(key):
    ks = jax.random.split(key, 5)

    def w_ct(k, cin, cout, ksize):
        # ConvTranspose2d weight layout in PyTorch: (in_ch, out_ch, kH, kW)
        return jax.random.normal(k, (cin, cout, ksize, ksize), jnp.float32) * 0.02

    return {
        "emb": jax.random.normal(ks[0], (10, Z_DIM), jnp.float32),   # Embedding(10, z_dim)
        "w1": w_ct(ks[1], Z_DIM, 256, 4),
        "g1": jnp.ones((256,), jnp.float32), "b1": jnp.zeros((256,), jnp.float32),
        "w2": w_ct(ks[2], 256, 128, 4),
        "g2": jnp.ones((128,), jnp.float32), "b2": jnp.zeros((128,), jnp.float32),
        "w3": w_ct(ks[3], 128, 64, 4),
        "g3": jnp.ones((64,), jnp.float32), "b3": jnp.zeros((64,), jnp.float32),
        "w4": w_ct(ks[4], 64, 1, 4),
    }


def _pack_subpixel_weight(w, cout_pad):
    # (cin, cout, 4, 4) ConvT weight -> (4 parities, 4*cin, cout_pad) bf16, GEMM-ready.
    cin, cout = int(w.shape[0]), int(w.shape[1])
    blocks = []
    for ph in (0, 1):
        for pw in (0, 1):
            taps = [w[:, :, _MAXK[ph] - 2 * dh, _MAXK[pw] - 2 * dw]
                    for dh in (0, 1) for dw in (0, 1)]
            sub = jnp.concatenate(taps, axis=0)              # (4*cin, cout), rows (dh,dw,ci)
            if cout_pad > cout:
                sub = jnp.pad(sub, ((0, 0), (0, cout_pad - cout)))
            blocks.append(sub)
    return jnp.stack(blocks, axis=0).astype(jnp.bfloat16)


def _pad_vec(v, n):
    return jnp.pad(v, (0, n - v.shape[0])).reshape(1, n).astype(jnp.float32)


def pack_params(p):
    return {
        "emb": p["emb"],
        "w1": jnp.transpose(p["w1"], (0, 2, 3, 1)).reshape(Z_DIM, 16 * 256).astype(jnp.bfloat16),
        "g1": p["g1"].reshape(1, 256).astype(jnp.float32),
        "b1": p["b1"].reshape(1, 256).astype(jnp.float32),
        "w2": _pack_subpixel_weight(p["w2"], 128),
        "g2": p["g2"].reshape(1, 128).astype(jnp.float32),
        "b2": p["b2"].reshape(1, 128).astype(jnp.float32),
        "w3": _pack_subpixel_weight(p["w3"], 128),
        "g3": _pad_vec(p["g3"], 128),                        # padded channels: gamma=0
        "b3": _pad_vec(p["b3"], 128),
        "w4": _pack_subpixel_weight(p["w4"], 128),
    }


# ----------------------------------------------------------------------------
# Forward pass (matches Generator.forward at z_dim == 100).
# ----------------------------------------------------------------------------
@jax.jit
def generator_forward(packed, x, y):
    # x: (B, 100, 1, 1) NCHW latent, y: (B,) int32 class labels in [0, 10)
    emb = packed["emb"][y]                                   # embedding lookup (XLA gather)
    x_flat = x[:, :, 0, 0]                                   # (B, 100) f32

    # x * y.view(-1,100,1,1) fused into the block1 kernel.
    h = block1(x_flat, emb, packed["w1"], packed["g1"], packed["b1"])     # (B, 4, 4, 256)
    h = convt_bn_relu(h, packed["w2"], packed["g2"], packed["b2"],
                      hs=4, ws=4, pad_input=True, keep=128)               # (B, 8, 8, 128)
    h = convt_bn_relu(h, packed["w3"], packed["g3"], packed["b3"],
                      hs=8, ws=8, pad_input=True, keep=64)                # (B, 16, 16, 64)
    h = convt_tanh(h, packed["w4"], hs=14, ws=14, pad_input=False)        # (B, 28, 28, 128)

    return jnp.transpose(h[..., :1], (0, 3, 1, 2))                        # NCHW (B, 1, 28, 28)


if __name__ == "__main__":
    key = jax.random.PRNGKey(0)
    kp, kx, ky = jax.random.split(key, 3)
    params = init_params(kp)
    packed = pack_params(params)        # one-time GEMM-ready repack (hoisted out of forward)

    B = 2
    x = jax.random.normal(kx, (B, Z_DIM, 1, 1), jnp.float32)
    y = jax.random.randint(ky, (B,), 0, 10, dtype=jnp.int32)

    out = generator_forward(packed, x, y)
    out = jax.block_until_ready(out)

    assert out.shape == (B, 1, 28, 28), out.shape
    assert bool(jnp.all(jnp.isfinite(out)))
    assert bool(jnp.all(jnp.abs(out) <= 1.0))  # tanh range
    print("KERNEL_OK")
</pallas_src>

<mosaic_0001>
module attributes {stable_mosaic.version = 11 : i64} {
  func.func @_block1_kernel(%arg0: memref<2x100xf32, #tpu.memory_space<vmem>>, %arg1: memref<2x100xf32, #tpu.memory_space<vmem>>, %arg2: memref<100x4096xbf16, #tpu.memory_space<vmem>>, %arg3: memref<1x256xf32, #tpu.memory_space<vmem>>, %arg4: memref<1x256xf32, #tpu.memory_space<vmem>>, %arg5: memref<2x4096xbf16, #tpu.memory_space<vmem>>) attributes {dimension_semantics = [], scalar_prefetch = 0 : i64, scratch_operands = 0 : i64, tpu.core_type = #tpu.core_type<tc>} {
    %c0 = arith.constant 0 : index
    %c0_0 = arith.constant 0 : index
    %0 = vector.load %arg0[%c0, %c0_0] : memref<2x100xf32, #tpu.memory_space<vmem>>, vector<2x100xf32>
    %c0_1 = arith.constant 0 : index
    %c0_2 = arith.constant 0 : index
    %1 = vector.load %arg1[%c0_1, %c0_2] : memref<2x100xf32, #tpu.memory_space<vmem>>, vector<2x100xf32>
    %2 = arith.mulf %0, %1 : vector<2x100xf32>
    %3 = arith.truncf %2 : vector<2x100xf32> to vector<2x100xbf16>
    %c0_3 = arith.constant 0 : index
    %c0_4 = arith.constant 0 : index
    %4 = vector.load %arg2[%c0_3, %c0_4] : memref<100x4096xbf16, #tpu.memory_space<vmem>>, vector<100x4096xbf16>
    %cst = arith.constant dense<0.000000e+00> : vector<2x4096xf32>
    %5 = tpu.matmul %3, %4, %cst {dimension_numbers = #tpu.dot_dimension_numbers<[1], [0], [0], [1], [0, 0, 1, 1], [], []>} : vector<2x100xbf16>, vector<100x4096xbf16>, vector<2x4096xf32> -> vector<2x4096xf32>
    %cst_5 = arith.constant 0.000000e+00 : f32
    %6 = vector.broadcast %cst_5 : f32 to vector<1x256xf32>
    %cst_6 = arith.constant 0.000000e+00 : f32
    %7 = vector.broadcast %cst_6 : f32 to vector<1x256xf32>
    %8 = vector.extract_strided_slice %5 {offsets = [0, 0], sizes = [2, 256], strides = [1, 1]} : vector<2x4096xf32> to vector<2x256xf32>
    %cst_7 = arith.constant dense<0.000000e+00> : vector<256xf32>
    %9 = vector.multi_reduction <add>, %8, %cst_7 [0] : vector<2x256xf32> to vector<256xf32>
    %10 = vector.shape_cast %9 : vector<256xf32> to vector<1x256xf32>
    %11 = arith.addf %6, %10 : vector<1x256xf32>
    %12 = arith.mulf %8, %8 : vector<2x256xf32>
    %cst_8 = arith.constant dense<0.000000e+00> : vector<256xf32>
    %13 = vector.multi_reduction <add>, %12, %cst_8 [0] : vector<2x256xf32> to vector<256xf32>
    %14 = vector.shape_cast %13 : vector<256xf32> to vector<1x256xf32>
    %15 = arith.addf %7, %14 : vector<1x256xf32>
    %16 = vector.extract_strided_slice %5 {offsets = [0, 256], sizes = [2, 256], strides = [1, 1]} : vector<2x4096xf32> to vector<2x256xf32>
    %cst_9 = arith.constant dense<0.000000e+00> : vector<256xf32>
    %17 = vector.multi_reduction <add>, %16, %cst_9 [0] : vector<2x256xf32> to vector<256xf32>
    %18 = vector.shape_cast %17 : vector<256xf32> to vector<1x256xf32>
    %19 = arith.addf %11, %18 : vector<1x256xf32>
    %20 = arith.mulf %16, %16 : vector<2x256xf32>
    %cst_10 = arith.constant dense<0.000000e+00> : vector<256xf32>
    %21 = vector.multi_reduction <add>, %20, %cst_10 [0] : vector<2x256xf32> to vector<256xf32>
    %22 = vector.shape_cast %21 : vector<256xf32> to vector<1x256xf32>
    %23 = arith.addf %15, %22 : vector<1x256xf32>
    %24 = vector.extract_strided_slice %5 {offsets = [0, 512], sizes = [2, 256], strides = [1, 1]} : vector<2x4096xf32> to vector<2x256xf32>
    %cst_11 = arith.constant dense<0.000000e+00> : vector<256xf32>
    %25 = vector.multi_reduction <add>, %24, %cst_11 [0] : vector<2x256xf32> to vector<256xf32>
    %26 = vector.shape_cast %25 : vector<256xf32> to vector<1x256xf32>
    %27 = arith.addf %19, %26 : vector<1x256xf32>
    %28 = arith.mulf %24, %24 : vector<2x256xf32>
    %cst_12 = arith.constant dense<0.000000e+00> : vector<256xf32>
    %29 = vector.multi_reduction <add>, %28, %cst_12 [0] : vector<2x256xf32> to vector<256xf32>
    %30 = vector.shape_cast %29 : vector<256xf32> to vector<1x256xf32>
    %31 = arith.addf %23, %30 : vector<1x256xf32>
    %32 = vector.extract_strided_slice %5 {offsets = [0, 768], sizes = [2, 256], strides = [1, 1]} : vector<2x4096xf32> to vector<2x256xf32>
    %cst_13 = arith.constant dense<0.000000e+00> : vector<256xf32>
    %33 = vector.multi_reduction <add>, %32, %cst_13 [0] : vector<2x256xf32> to vector<256xf32>
    %34 = vector.shape_cast %33 : vector<256xf32> to vector<1x256xf32>
    %35 = arith.addf %27, %34 : vector<1x256xf32>
    %36 = arith.mulf %32, %32 : vector<2x256xf32>
    %cst_14 = arith.constant dense<0.000000e+00> : vector<256xf32>
    %37 = vector.multi_reduction <add>, %36, %cst_14 [0] : vector<2x256xf32> to vector<256xf32>
    %38 = vector.shape_cast %37 : vector<256xf32> to vector<1x256xf32>
    %39 = arith.addf %31, %38 : vector<1x256xf32>
    %40 = vector.extract_strided_slice %5 {offsets = [0, 1024], sizes = [2, 256], strides = [1, 1]} : vector<2x4096xf32> to vector<2x256xf32>
    %cst_15 = arith.constant dense<0.000000e+00> : vector<256xf32>
    %41 = vector.multi_reduction <add>, %40, %cst_15 [0] : vector<2x256xf32> to vector<256xf32>
    %42 = vector.shape_cast %41 : vector<256xf32> to vector<1x256xf32>
    %43 = arith.addf %35, %42 : vector<1x256xf32>
    %44 = arith.mulf %40, %40 : vector<2x256xf32>
    %cst_16 = arith.constant dense<0.000000e+00> : vector<256xf32>
    %45 = vector.multi_reduction <add>, %44, %cst_16 [0] : vector<2x256xf32> to vector<256xf32>
    %46 = vector.shape_cast %45 : vector<256xf32> to vector<1x256xf32>
    %47 = arith.addf %39, %46 : vector<1x256xf32>
    %48 = vector.extract_strided_slice %5 {offsets = [0, 1280], sizes = [2, 256], strides = [1, 1]} : vector<2x4096xf32> to vector<2x256xf32>
    %cst_17 = arith.constant dense<0.000000e+00> : vector<256xf32>
    %49 = vector.multi_reduction <add>, %48, %cst_17 [0] : vector<2x256xf32> to vector<256xf32>
    %50 = vector.shape_cast %49 : vector<256xf32> to vector<1x256xf32>
    %51 = arith.addf %43, %50 : vector<1x256xf32>
    %52 = arith.mulf %48, %48 : vector<2x256xf32>
    %cst_18 = arith.constant dense<0.000000e+00> : vector<256xf32>
    %53 = vector.multi_reduction <add>, %52, %cst_18 [0] : vector<2x256xf32> to vector<256xf32>
    %54 = vector.shape_cast %53 : vector<256xf32> to vector<1x256xf32>
    %55 = arith.addf %47, %54 : vector<1x256xf32>
    %56 = vector.extract_strided_slice %5 {offsets = [0, 1536], sizes = [2, 256], strides = [1, 1]} : vector<2x4096xf32> to vector<2x256xf32>
    %cst_19 = arith.constant dense<0.000000e+00> : vector<256xf32>
    %57 = vector.multi_reduction <add>, %56, %cst_19 [0] : vector<2x256xf32> to vector<256xf32>
    %58 = vector.shape_cast %57 : vector<256xf32> to vector<1x256xf32>
    %59 = arith.addf %51, %58 : vector<1x256xf32>
    %60 = arith.mulf %56, %56 : vector<2x256xf32>
    %cst_20 = arith.constant dense<0.000000e+00> : vector<256xf32>
    %61 = vector.multi_reduction <add>, %60, %cst_20 [0] : vector<2x256xf32> to vector<256xf32>
    %62 = vector.shape_cast %61 : vector<256xf32> to vector<1x256xf32>
    %63 = arith.addf %55, %62 : vector<1x256xf32>
    %64 = vector.extract_strided_slice %5 {offsets = [0, 1792], sizes = [2, 256], strides = [1, 1]} : vector<2x4096xf32> to vector<2x256xf32>
    %cst_21 = arith.constant dense<0.000000e+00> : vector<256xf32>
    %65 = vector.multi_reduction <add>, %64, %cst_21 [0] : vector<2x256xf32> to vector<256xf32>
    %66 = vector.shape_cast %65 : vector<256xf32> to vector<1x256xf32>
    %67 = arith.addf %59, %66 : vector<1x256xf32>
    %68 = arith.mulf %64, %64 : vector<2x256xf32>
    %cst_22 = arith.constant dense<0.000000e+00> : vector<256xf32>
    %69 = vector.multi_reduction <add>, %68, %cst_22 [0] : vector<2x256xf32> to vector<256xf32>
    %70 = vector.shape_cast %69 : vector<256xf32> to vector<1x256xf32>
    %71 = arith.addf %63, %70 : vector<1x256xf32>
    %72 = vector.extract_strided_slice %5 {offsets = [0, 2048], sizes = [2, 256], strides = [1, 1]} : vector<2x4096xf32> to vector<2x256xf32>
    %cst_23 = arith.constant dense<0.000000e+00> : vector<256xf32>
    %73 = vector.multi_reduction <add>, %72, %cst_23 [0] : vector<2x256xf32> to vector<256xf32>
    %74 = vector.shape_cast %73 : vector<256xf32> to vector<1x256xf32>
    %75 = arith.addf %67, %74 : vector<1x256xf32>
    %76 = arith.mulf %72, %72 : vector<2x256xf32>
    %cst_24 = arith.constant dense<0.000000e+00> : vector<256xf32>
    %77 = vector.multi_reduction <add>, %76, %cst_24 [0] : vector<2x256xf32> to vector<256xf32>
    %78 = vector.shape_cast %77 : vector<256xf32> to vector<1x256xf32>
    %79 = arith.addf %71, %78 : vector<1x256xf32>
    %80 = vector.extract_strided_slice %5 {offsets = [0, 2304], sizes = [2, 256], strides = [1, 1]} : vector<2x4096xf32> to vector<2x256xf32>
    %cst_25 = arith.constant dense<0.000000e+00> : vector<256xf32>
    %81 = vector.multi_reduction <add>, %80, %cst_25 [0] : vector<2x256xf32> to vector<256xf32>
    %82 = vector.shape_cast %81 : vector<256xf32> to vector<1x256xf32>
    %83 = arith.addf %75, %82 : vector<1x256xf32>
    %84 = arith.mulf %80, %80 : vector<2x256xf32>
    %cst_26 = arith.constant dense<0.000000e+00> : vector<256xf32>
    %85 = vector.multi_reduction <add>, %84, %cst_26 [0] : vector<2x256xf32> to vector<256xf32>
    %86 = vector.shape_cast %85 : vector<256xf32> to vector<1x256xf32>
    %87 = arith.addf %79, %86 : vector<1x256xf32>
    %88 = vector.extract_strided_slice %5 {offsets = [0, 2560], sizes = [2, 256], strides = [1, 1]} : vector<2x4096xf32> to vector<2x256xf32>
    %cst_27 = arith.constant dense<0.000000e+00> : vector<256xf32>
    %89 = vector.multi_reduction <add>, %88, %cst_27 [0] : vector<2x256xf32> to vector<256xf32>
    %90 = vector.shape_cast %89 : vector<256xf32> to vector<1x256xf32>
    %91 = arith.addf %83, %90 : vector<1x256xf32>
    %92 = arith.mulf %88, %88 : vector<2x256xf32>
    %cst_28 = arith.constant dense<0.000000e+00> : vector<256xf32>
    %93 = vector.multi_reduction <add>, %92, %cst_28 [0] : vector<2x256xf32> to vector<256xf32>
    %94 = vector.shape_cast %93 : vector<256xf32> to vector<1x256xf32>
    %95 = arith.addf %87, %94 : vector<1x256xf32>
    %96 = vector.extract_strided_slice %5 {offsets = [0, 2816], sizes = [2, 256], strides = [1, 1]} : vector<2x4096xf32> to vector<2x256xf32>
    %cst_29 = arith.constant dense<0.000000e+00> : vector<256xf32>
    %97 = vector.multi_reduction <add>, %96, %cst_29 [0] : vector<2x256xf32> to vector<256xf32>
    %98 = vector.shape_cast %97 : vector<256xf32> to vector<1x256xf32>
    %99 = arith.addf %91, %98 : vector<1x256xf32>
    %100 = arith.mulf %96, %96 : vector<2x256xf32>
    %cst_30 = arith.constant dense<0.000000e+00> : vector<256xf32>
    %101 = vector.multi_reduction <add>, %100, %cst_30 [0] : vector<2x256xf32> to vector<256xf32>
    %102 = vector.shape_cast %101 : vector<256xf32> to vector<1x256xf32>
    %103 = arith.addf %95, %102 : vector<1x256xf32>
    %104 = vector.extract_strided_slice %5 {offsets = [0, 3072], sizes = [2, 256], strides = [1, 1]} : vector<2x4096xf32> to vector<2x256xf32>
    %cst_31 = arith.constant dense<0.000000e+00> : vector<256xf32>
    %105 = vector.multi_reduction <add>, %104, %cst_31 [0] : vector<2x256xf32> to vector<256xf32>
    %106 = vector.shape_cast %105 : vector<256xf32> to vector<1x256xf32>
    %107 = arith.addf %99, %106 : vector<1x256xf32>
    %108 = arith.mulf %104, %104 : vector<2x256xf32>
    %cst_32 = arith.constant dense<0.000000e+00> : vector<256xf32>
    %109 = vector.multi_reduction <add>, %108, %cst_32 [0] : vector<2x256xf32> to vector<256xf32>
    %110 = vector.shape_cast %109 : vector<256xf32> to vector<1x256xf32>
    %111 = arith.addf %103, %110 : vector<1x256xf32>
    %112 = vector.extract_strided_slice %5 {offsets = [0, 3328], sizes = [2, 256], strides = [1, 1]} : vector<2x4096xf32> to vector<2x256xf32>
    %cst_33 = arith.constant dense<0.000000e+00> : vector<256xf32>
    %113 = vector.multi_reduction <add>, %112, %cst_33 [0] : vector<2x256xf32> to vector<256xf32>
    %114 = vector.shape_cast %113 : vector<256xf32> to vector<1x256xf32>
    %115 = arith.addf %107, %114 : vector<1x256xf32>
    %116 = arith.mulf %112, %112 : vector<2x256xf32>
    %cst_34 = arith.constant dense<0.000000e+00> : vector<256xf32>
    %117 = vector.multi_reduction <add>, %116, %cst_34 [0] : vector<2x256xf32> to vector<256xf32>
    %118 = vector.shape_cast %117 : vector<256xf32> to vector<1x256xf32>
    %119 = arith.addf %111, %118 : vector<1x256xf32>
    %120 = vector.extract_strided_slice %5 {offsets = [0, 3584], sizes = [2, 256], strides = [1, 1]} : vector<2x4096xf32> to vector<2x256xf32>
    %cst_35 = arith.constant dense<0.000000e+00> : vector<256xf32>
    %121 = vector.multi_reduction <add>, %120, %cst_35 [0] : vector<2x256xf32> to vector<256xf32>
    %122 = vector.shape_cast %121 : vector<256xf32> to vector<1x256xf32>
    %123 = arith.addf %115, %122 : vector<1x256xf32>
    %124 = arith.mulf %120, %120 : vector<2x256xf32>
    %cst_36 = arith.constant dense<0.000000e+00> : vector<256xf32>
    %125 = vector.multi_reduction <add>, %124, %cst_36 [0] : vector<2x256xf32> to vector<256xf32>
    %126 = vector.shape_cast %125 : vector<256xf32> to vector<1x256xf32>
    %127 = arith.addf %119, %126 : vector<1x256xf32>
    %128 = vector.extract_strided_slice %5 {offsets = [0, 3840], sizes = [2, 256], strides = [1, 1]} : vector<2x4096xf32> to vector<2x256xf32>
    %cst_37 = arith.constant dense<0.000000e+00> : vector<256xf32>
    %129 = vector.multi_reduction <add>, %128, %cst_37 [0] : vector<2x256xf32> to vector<256xf32>
    %130 = vector.shape_cast %129 : vector<256xf32> to vector<1x256xf32>
    %131 = arith.addf %123, %130 : vector<1x256xf32>
    %132 = arith.mulf %128, %128 : vector<2x256xf32>
    %cst_38 = arith.constant dense<0.000000e+00> : vector<256xf32>
    %133 = vector.multi_reduction <add>, %132, %cst_38 [0] : vector<2x256xf32> to vector<256xf32>
    %134 = vector.shape_cast %133 : vector<256xf32> to vector<1x256xf32>
    %135 = arith.addf %127, %134 : vector<1x256xf32>
    %cst_39 = arith.constant 3.125000e-02 : f32
    %136 = vector.broadcast %cst_39 : f32 to vector<1x256xf32>
    %137 = arith.mulf %131, %136 : vector<1x256xf32>
    %cst_40 = arith.constant 3.125000e-02 : f32
    %138 = vector.broadcast %cst_40 : f32 to vector<1x256xf32>
    %139 = arith.mulf %135, %138 : vector<1x256xf32>
    %140 = arith.mulf %137, %137 : vector<1x256xf32>
    %141 = arith.subf %139, %140 : vector<1x256xf32>
    %c0_41 = arith.constant 0 : index
    %c0_42 = arith.constant 0 : index
    %142 = vector.load %arg3[%c0_41, %c0_42] : memref<1x256xf32, #tpu.memory_space<vmem>>, vector<1x256xf32>
    %cst_43 = arith.constant 9.99999974E-6 : f32
    %143 = vector.broadcast %cst_43 : f32 to vector<1x256xf32>
    %144 = arith.addf %141, %143 : vector<1x256xf32>
    %145 = math.rsqrt %144 : vector<1x256xf32>
    %146 = arith.mulf %142, %145 : vector<1x256xf32>
    %c0_44 = arith.constant 0 : index
    %c0_45 = arith.constant 0 : index
    %147 = vector.load %arg4[%c0_44, %c0_45] : memref<1x256xf32, #tpu.memory_space<vmem>>, vector<1x256xf32>
    %148 = arith.mulf %137, %146 : vector<1x256xf32>
    %149 = arith.subf %147, %148 : vector<1x256xf32>
    %150 = vector.broadcast %146 : vector<1x256xf32> to vector<2x256xf32>
    %151 = arith.mulf %8, %150 : vector<2x256xf32>
    %152 = vector.broadcast %149 : vector<1x256xf32> to vector<2x256xf32>
    %153 = arith.addf %151, %152 : vector<2x256xf32>
    %cst_46 = arith.constant 0.000000e+00 : f32
    %154 = vector.broadcast %cst_46 : f32 to vector<2x256xf32>
    %155 = arith.maximumf %153, %154 : vector<2x256xf32>
    %156 = vector.broadcast %146 : vector<1x256xf32> to vector<2x256xf32>
    %157 = arith.mulf %16, %156 : vector<2x256xf32>
    %158 = vector.broadcast %149 : vector<1x256xf32> to vector<2x256xf32>
    %159 = arith.addf %157, %158 : vector<2x256xf32>
    %cst_47 = arith.constant 0.000000e+00 : f32
    %160 = vector.broadcast %cst_47 : f32 to vector<2x256xf32>
    %161 = arith.maximumf %159, %160 : vector<2x256xf32>
    %162 = vector.broadcast %146 : vector<1x256xf32> to vector<2x256xf32>
    %163 = arith.mulf %24, %162 : vector<2x256xf32>
    %164 = vector.broadcast %149 : vector<1x256xf32> to vector<2x256xf32>
    %165 = arith.addf %163, %164 : vector<2x256xf32>
    %cst_48 = arith.constant 0.000000e+00 : f32
    %166 = vector.broadcast %cst_48 : f32 to vector<2x256xf32>
    %167 = arith.maximumf %165, %166 : vector<2x256xf32>
    %168 = vector.broadcast %146 : vector<1x256xf32> to vector<2x256xf32>
    %169 = arith.mulf %32, %168 : vector<2x256xf32>
    %170 = vector.broadcast %149 : vector<1x256xf32> to vector<2x256xf32>
    %171 = arith.addf %169, %170 : vector<2x256xf32>
    %cst_49 = arith.constant 0.000000e+00 : f32
    %172 = vector.broadcast %cst_49 : f32 to vector<2x256xf32>
    %173 = arith.maximumf %171, %172 : vector<2x256xf32>
    %174 = vector.broadcast %146 : vector<1x256xf32> to vector<2x256xf32>
    %175 = arith.mulf %40, %174 : vector<2x256xf32>
    %176 = vector.broadcast %149 : vector<1x256xf32> to vector<2x256xf32>
    %177 = arith.addf %175, %176 : vector<2x256xf32>
    %cst_50 = arith.constant 0.000000e+00 : f32
    %178 = vector.broadcast %cst_50 : f32 to vector<2x256xf32>
    %179 = arith.maximumf %177, %178 : vector<2x256xf32>
    %180 = vector.broadcast %146 : vector<1x256xf32> to vector<2x256xf32>
    %181 = arith.mulf %48, %180 : vector<2x256xf32>
    %182 = vector.broadcast %149 : vector<1x256xf32> to vector<2x256xf32>
    %183 = arith.addf %181, %182 : vector<2x256xf32>
    %cst_51 = arith.constant 0.000000e+00 : f32
    %184 = vector.broadcast %cst_51 : f32 to vector<2x256xf32>
    %185 = arith.maximumf %183, %184 : vector<2x256xf32>
    %186 = vector.broadcast %146 : vector<1x256xf32> to vector<2x256xf32>
    %187 = arith.mulf %56, %186 : vector<2x256xf32>
    %188 = vector.broadcast %149 : vector<1x256xf32> to vector<2x256xf32>
    %189 = arith.addf %187, %188 : vector<2x256xf32>
    %cst_52 = arith.constant 0.000000e+00 : f32
    %190 = vector.broadcast %cst_52 : f32 to vector<2x256xf32>
    %191 = arith.maximumf %189, %190 : vector<2x256xf32>
    %192 = vector.broadcast %146 : vector<1x256xf32> to vector<2x256xf32>
    %193 = arith.mulf %64, %192 : vector<2x256xf32>
    %194 = vector.broadcast %149 : vector<1x256xf32> to vector<2x256xf32>
    %195 = arith.addf %193, %194 : vector<2x256xf32>
    %cst_53 = arith.constant 0.000000e+00 : f32
    %196 = vector.broadcast %cst_53 : f32 to vector<2x256xf32>
    %197 = arith.maximumf %195, %196 : vector<2x256xf32>
    %198 = vector.broadcast %146 : vector<1x256xf32> to vector<2x256xf32>
    %199 = arith.mulf %72, %198 : vector<2x256xf32>
    %200 = vector.broadcast %149 : vector<1x256xf32> to vector<2x256xf32>
    %201 = arith.addf %199, %200 : vector<2x256xf32>
    %cst_54 = arith.constant 0.000000e+00 : f32
    %202 = vector.broadcast %cst_54 : f32 to vector<2x256xf32>
    %203 = arith.maximumf %201, %202 : vector<2x256xf32>
    %204 = vector.broadcast %146 : vector<1x256xf32> to vector<2x256xf32>
    %205 = arith.mulf %80, %204 : vector<2x256xf32>
    %206 = vector.broadcast %149 : vector<1x256xf32> to vector<2x256xf32>
    %207 = arith.addf %205, %206 : vector<2x256xf32>
    %cst_55 = arith.constant 0.000000e+00 : f32
    %208 = vector.broadcast %cst_55 : f32 to vector<2x256xf32>
    %209 = arith.maximumf %207, %208 : vector<2x256xf32>
    %210 = vector.broadcast %146 : vector<1x256xf32> to vector<2x256xf32>
    %211 = arith.mulf %88, %210 : vector<2x256xf32>
    %212 = vector.broadcast %149 : vector<1x256xf32> to vector<2x256xf32>
    %213 = arith.addf %211, %212 : vector<2x256xf32>
    %cst_56 = arith.constant 0.000000e+00 : f32
    %214 = vector.broadcast %cst_56 : f32 to vector<2x256xf32>
    %215 = arith.maximumf %213, %214 : vector<2x256xf32>
    %216 = vector.broadcast %146 : vector<1x256xf32> to vector<2x256xf32>
    %217 = arith.mulf %96, %216 : vector<2x256xf32>
    %218 = vector.broadcast %149 : vector<1x256xf32> to vector<2x256xf32>
    %219 = arith.addf %217, %218 : vector<2x256xf32>
    %cst_57 = arith.constant 0.000000e+00 : f32
    %220 = vector.broadcast %cst_57 : f32 to vector<2x256xf32>
    %221 = arith.maximumf %219, %220 : vector<2x256xf32>
    %222 = vector.broadcast %146 : vector<1x256xf32> to vector<2x256xf32>
    %223 = arith.mulf %104, %222 : vector<2x256xf32>
    %224 = vector.broadcast %149 : vector<1x256xf32> to vector<2x256xf32>
    %225 = arith.addf %223, %224 : vector<2x256xf32>
    %cst_58 = arith.constant 0.000000e+00 : f32
    %226 = vector.broadcast %cst_58 : f32 to vector<2x256xf32>
    %227 = arith.maximumf %225, %226 : vector<2x256xf32>
    %228 = vector.broadcast %146 : vector<1x256xf32> to vector<2x256xf32>
    %229 = arith.mulf %112, %228 : vector<2x256xf32>
    %230 = vector.broadcast %149 : vector<1x256xf32> to vector<2x256xf32>
    %231 = arith.addf %229, %230 : vector<2x256xf32>
    %cst_59 = arith.constant 0.000000e+00 : f32
    %232 = vector.broadcast %cst_59 : f32 to vector<2x256xf32>
    %233 = arith.maximumf %231, %232 : vector<2x256xf32>
    %234 = vector.broadcast %146 : vector<1x256xf32> to vector<2x256xf32>
    %235 = arith.mulf %120, %234 : vector<2x256xf32>
    %236 = vector.broadcast %149 : vector<1x256xf32> to vector<2x256xf32>
    %237 = arith.addf %235, %236 : vector<2x256xf32>
    %cst_60 = arith.constant 0.000000e+00 : f32
    %238 = vector.broadcast %cst_60 : f32 to vector<2x256xf32>
    %239 = arith.maximumf %237, %238 : vector<2x256xf32>
    %240 = vector.broadcast %146 : vector<1x256xf32> to vector<2x256xf32>
    %241 = arith.mulf %128, %240 : vector<2x256xf32>
    %242 = vector.broadcast %149 : vector<1x256xf32> to vector<2x256xf32>
    %243 = arith.addf %241, %242 : vector<2x256xf32>
    %cst_61 = arith.constant 0.000000e+00 : f32
    %244 = vector.broadcast %cst_61 : f32 to vector<2x256xf32>
    %245 = arith.maximumf %243, %244 : vector<2x256xf32>
    %246 = tpu.concatenate %155, %161, %167, %173, %179, %185, %191, %197, %203, %209, %215, %221, %227, %233, %239, %245 in 1 : vector<2x256xf32>, vector<2x256xf32>, vector<2x256xf32>, vector<2x256xf32>, vector<2x256xf32>, vector<2x256xf32>, vector<2x256xf32>, vector<2x256xf32>, vector<2x256xf32>, vector<2x256xf32>, vector<2x256xf32>, vector<2x256xf32>, vector<2x256xf32>, vector<2x256xf32>, vector<2x256xf32>, vector<2x256xf32> -> vector<2x4096xf32>
    %247 = arith.truncf %246 : vector<2x4096xf32> to vector<2x4096xbf16>
    %c0_62 = arith.constant 0 : index
    %c0_63 = arith.constant 0 : index
    %248 = vector.load %arg5[%c0_62, %c0_63] : memref<2x4096xbf16, #tpu.memory_space<vmem>>, vector<2x4096xbf16>
    tpu.vector_store %arg5[%c0_62, %c0_63], %247 {strides = array<i32>} : memref<2x4096xbf16, #tpu.memory_space<vmem>>, vector<2x4096xbf16>,
    return
  }
}

module attributes {stable_mosaic.version = 11 : i64} {
  func.func @_subpix_bn_relu_kernel(%arg0: memref<4x32x1024xbf16, #tpu.memory_space<vmem>>, %arg1: memref<4x1024x128xbf16, #tpu.memory_space<vmem>>, %arg2: memref<1x128xf32, #tpu.memory_space<vmem>>, %arg3: memref<1x128xf32, #tpu.memory_space<vmem>>, %arg4: memref<4x32x128xbf16, #tpu.memory_space<vmem>>, %arg5: memref<4x32x128xf32, #tpu.memory_space<vmem>>) attributes {dimension_semantics = [], scalar_prefetch = 0 : i64, scratch_operands = 1 : i64, tpu.core_type = #tpu.core_type<tc>} {
    %cst = arith.constant 0.000000e+00 : f32
    %0 = vector.broadcast %cst : f32 to vector<1x128xf32>
    %cst_0 = arith.constant 0.000000e+00 : f32
    %1 = vector.broadcast %cst_0 : f32 to vector<1x128xf32>
    %c0 = arith.constant 0 : index
    %c0_1 = arith.constant 0 : index
    %c0_2 = arith.constant 0 : index
    %2 = vector.load %arg0[%c0, %c0_1, %c0_2] : memref<4x32x1024xbf16, #tpu.memory_space<vmem>>, vector<1x32x1024xbf16>
    %3 = vector.shape_cast %2 : vector<1x32x1024xbf16> to vector<32x1024xbf16>
    %c0_3 = arith.constant 0 : index
    %c0_4 = arith.constant 0 : index
    %c0_5 = arith.constant 0 : index
    %4 = vector.load %arg1[%c0_3, %c0_4, %c0_5] : memref<4x1024x128xbf16, #tpu.memory_space<vmem>>, vector<1x1024x128xbf16>
    %5 = vector.shape_cast %4 : vector<1x1024x128xbf16> to vector<1024x128xbf16>
    %cst_6 = arith.constant dense<0.000000e+00> : vector<32x128xf32>
    %6 = tpu.matmul %3, %5, %cst_6 {dimension_numbers = #tpu.dot_dimension_numbers<[1], [0], [0], [1], [0, 0, 1, 1], [], []>} : vector<32x1024xbf16>, vector<1024x128xbf16>, vector<32x128xf32> -> vector<32x128xf32>
    %c0_7 = arith.constant 0 : index
    %c0_8 = arith.constant 0 : index
    %c0_9 = arith.constant 0 : index
    %7 = vector.load %arg5[%c0_7, %c0_8, %c0_9] : memref<4x32x128xf32, #tpu.memory_space<vmem>>, vector<1x32x128xf32>
    %8 = vector.shape_cast %7 : vector<1x32x128xf32> to vector<32x128xf32>
    %9 = vector.shape_cast %6 : vector<32x128xf32> to vector<1x32x128xf32>
    tpu.vector_store %arg5[%c0_7, %c0_8, %c0_9], %9 {strides = array<i32>} : memref<4x32x128xf32, #tpu.memory_space<vmem>>, vector<1x32x128xf32>,
    %cst_10 = arith.constant dense<0.000000e+00> : vector<128xf32>
    %10 = vector.multi_reduction <add>, %6, %cst_10 [0] : vector<32x128xf32> to vector<128xf32>
    %11 = vector.shape_cast %10 : vector<128xf32> to vector<1x128xf32>
    %12 = arith.addf %0, %11 : vector<1x128xf32>
    %13 = arith.mulf %6, %6 : vector<32x128xf32>
    %cst_11 = arith.constant dense<0.000000e+00> : vector<128xf32>
    %14 = vector.multi_reduction <add>, %13, %cst_11 [0] : vector<32x128xf32> to vector<128xf32>
    %15 = vector.shape_cast %14 : vector<128xf32> to vector<1x128xf32>
    %16 = arith.addf %1, %15 : vector<1x128xf32>
    %c1 = arith.constant 1 : index
    %c0_12 = arith.constant 0 : index
    %c0_13 = arith.constant 0 : index
    %17 = vector.load %arg0[%c1, %c0_12, %c0_13] : memref<4x32x1024xbf16, #tpu.memory_space<vmem>>, vector<1x32x1024xbf16>
    %18 = vector.shape_cast %17 : vector<1x32x1024xbf16> to vector<32x1024xbf16>
    %c1_14 = arith.constant 1 : index
    %c0_15 = arith.constant 0 : index
    %c0_16 = arith.constant 0 : index
    %19 = vector.load %arg1[%c1_14, %c0_15, %c0_16] : memref<4x1024x128xbf16, #tpu.memory_space<vmem>>, vector<1x1024x128xbf16>
    %20 = vector.shape_cast %19 : vector<1x1024x128xbf16> to vector<1024x128xbf16>
    %cst_17 = arith.constant dense<0.000000e+00> : vector<32x128xf32>
    %21 = tpu.matmul %18, %20, %cst_17 {dimension_numbers = #tpu.dot_dimension_numbers<[1], [0], [0], [1], [0, 0, 1, 1], [], []>} : vector<32x1024xbf16>, vector<1024x128xbf16>, vector<32x128xf32> -> vector<32x128xf32>
    %c1_18 = arith.constant 1 : index
    %c0_19 = arith.constant 0 : index
    %c0_20 = arith.constant 0 : index
    %22 = vector.load %arg5[%c1_18, %c0_19, %c0_20] : memref<4x32x128xf32, #tpu.memory_space<vmem>>, vector<1x32x128xf32>
    %23 = vector.shape_cast %22 : vector<1x32x128xf32> to vector<32x128xf32>
    %24 = vector.shape_cast %21 : vector<32x128xf32> to vector<1x32x128xf32>
    tpu.vector_store %arg5[%c1_18, %c0_19, %c0_20], %24 {strides = array<i32>} : memref<4x32x128xf32, #tpu.memory_space<vmem>>, vector<1x32x128xf32>,
    %cst_21 = arith.constant dense<0.000000e+00> : vector<128xf32>
    %25 = vector.multi_reduction <add>, %21, %cst_21 [0] : vector<32x128xf32> to vector<128xf32>
    %26 = vector.shape_cast %25 : vector<128xf32> to vector<1x128xf32>
    %27 = arith.addf %12, %26 : vector<1x128xf32>
    %28 = arith.mulf %21, %21 : vector<32x128xf32>
    %cst_22 = arith.constant dense<0.000000e+00> : vector<128xf32>
    %29 = vector.multi_reduction <add>, %28, %cst_22 [0] : vector<32x128xf32> to vector<128xf32>
    %30 = vector.shape_cast %29 : vector<128xf32> to vector<1x128xf32>
    %31 = arith.addf %16, %30 : vector<1x128xf32>
    %c2 = arith.constant 2 : index
    %c0_23 = arith.constant 0 : index
    %c0_24 = arith.constant 0 : index
    %32 = vector.load %arg0[%c2, %c0_23, %c0_24] : memref<4x32x1024xbf16, #tpu.memory_space<vmem>>, vector<1x32x1024xbf16>
    %33 = vector.shape_cast %32 : vector<1x32x1024xbf16> to vector<32x1024xbf16>
    %c2_25 = arith.constant 2 : index
    %c0_26 = arith.constant 0 : index
    %c0_27 = arith.constant 0 : index
    %34 = vector.load %arg1[%c2_25, %c0_26, %c0_27] : memref<4x1024x128xbf16, #tpu.memory_space<vmem>>, vector<1x1024x128xbf16>
    %35 = vector.shape_cast %34 : vector<1x1024x128xbf16> to vector<1024x128xbf16>
    %cst_28 = arith.constant dense<0.000000e+00> : vector<32x128xf32>
    %36 = tpu.matmul %33, %35, %cst_28 {dimension_numbers = #tpu.dot_dimension_numbers<[1], [0], [0], [1], [0, 0, 1, 1], [], []>} : vector<32x1024xbf16>, vector<1024x128xbf16>, vector<32x128xf32> -> vector<32x128xf32>
    %c2_29 = arith.constant 2 : index
    %c0_30 = arith.constant 0 : index
    %c0_31 = arith.constant 0 : index
    %37 = vector.load %arg5[%c2_29, %c0_30, %c0_31] : memref<4x32x128xf32, #tpu.memory_space<vmem>>, vector<1x32x128xf32>
    %38 = vector.shape_cast %37 : vector<1x32x128xf32> to vector<32x128xf32>
    %39 = vector.shape_cast %36 : vector<32x128xf32> to vector<1x32x128xf32>
    tpu.vector_store %arg5[%c2_29, %c0_30, %c0_31], %39 {strides = array<i32>} : memref<4x32x128xf32, #tpu.memory_space<vmem>>, vector<1x32x128xf32>,
    %cst_32 = arith.constant dense<0.000000e+00> : vector<128xf32>
    %40 = vector.multi_reduction <add>, %36, %cst_32 [0] : vector<32x128xf32> to vector<128xf32>
    %41 = vector.shape_cast %40 : vector<128xf32> to vector<1x128xf32>
    %42 = arith.addf %27, %41 : vector<1x128xf32>
    %43 = arith.mulf %36, %36 : vector<32x128xf32>
    %cst_33 = arith.constant dense<0.000000e+00> : vector<128xf32>
    %44 = vector.multi_reduction <add>, %43, %cst_33 [0] : vector<32x128xf32> to vector<128xf32>
    %45 = vector.shape_cast %44 : vector<128xf32> to vector<1x128xf32>
    %46 = arith.addf %31, %45 : vector<1x128xf32>
    %c3 = arith.constant 3 : index
    %c0_34 = arith.constant 0 : index
    %c0_35 = arith.constant 0 : index
    %47 = vector.load %arg0[%c3, %c0_34, %c0_35] : memref<4x32x1024xbf16, #tpu.memory_space<vmem>>, vector<1x32x1024xbf16>
    %48 = vector.shape_cast %47 : vector<1x32x1024xbf16> to vector<32x1024xbf16>
    %c3_36 = arith.constant 3 : index
    %c0_37 = arith.constant 0 : index
    %c0_38 = arith.constant 0 : index
    %49 = vector.load %arg1[%c3_36, %c0_37, %c0_38] : memref<4x1024x128xbf16, #tpu.memory_space<vmem>>, vector<1x1024x128xbf16>
    %50 = vector.shape_cast %49 : vector<1x1024x128xbf16> to vector<1024x128xbf16>
    %cst_39 = arith.constant dense<0.000000e+00> : vector<32x128xf32>
    %51 = tpu.matmul %48, %50, %cst_39 {dimension_numbers = #tpu.dot_dimension_numbers<[1], [0], [0], [1], [0, 0, 1, 1], [], []>} : vector<32x1024xbf16>, vector<1024x128xbf16>, vector<32x128xf32> -> vector<32x128xf32>
    %c3_40 = arith.constant 3 : index
    %c0_41 = arith.constant 0 : index
    %c0_42 = arith.constant 0 : index
    %52 = vector.load %arg5[%c3_40, %c0_41, %c0_42] : memref<4x32x128xf32, #tpu.memory_space<vmem>>, vector<1x32x128xf32>
    %53 = vector.shape_cast %52 : vector<1x32x128xf32> to vector<32x128xf32>
    %54 = vector.shape_cast %51 : vector<32x128xf32> to vector<1x32x128xf32>
    tpu.vector_store %arg5[%c3_40, %c0_41, %c0_42], %54 {strides = array<i32>} : memref<4x32x128xf32, #tpu.memory_space<vmem>>, vector<1x32x128xf32>,
    %cst_43 = arith.constant dense<0.000000e+00> : vector<128xf32>
    %55 = vector.multi_reduction <add>, %51, %cst_43 [0] : vector<32x128xf32> to vector<128xf32>
    %56 = vector.shape_cast %55 : vector<128xf32> to vector<1x128xf32>
    %57 = arith.addf %42, %56 : vector<1x128xf32>
    %58 = arith.mulf %51, %51 : vector<32x128xf32>
    %cst_44 = arith.constant dense<0.000000e+00> : vector<128xf32>
    %59 = vector.multi_reduction <add>, %58, %cst_44 [0] : vector<32x128xf32> to vector<128xf32>
    %60 = vector.shape_cast %59 : vector<128xf32> to vector<1x128xf32>
    %61 = arith.addf %46, %60 : vector<1x128xf32>
    %cst_45 = arith.constant 7.812500e-03 : f32
    %62 = vector.broadcast %cst_45 : f32 to vector<1x128xf32>
    %63 = arith.mulf %57, %62 : vector<1x128xf32>
    %cst_46 = arith.constant 7.812500e-03 : f32
    %64 = vector.broadcast %cst_46 : f32 to vector<1x128xf32>
    %65 = arith.mulf %61, %64 : vector<1x128xf32>
    %66 = arith.mulf %63, %63 : vector<1x128xf32>
    %67 = arith.subf %65, %66 : vector<1x128xf32>
    %c0_47 = arith.constant 0 : index
    %c0_48 = arith.constant 0 : index
    %68 = vector.load %arg2[%c0_47, %c0_48] : memref<1x128xf32, #tpu.memory_space<vmem>>, vector<1x128xf32>
    %cst_49 = arith.constant 9.99999974E-6 : f32
    %69 = vector.broadcast %cst_49 : f32 to vector<1x128xf32>
    %70 = arith.addf %67, %69 : vector<1x128xf32>
    %71 = math.rsqrt %70 : vector<1x128xf32>
    %72 = arith.mulf %68, %71 : vector<1x128xf32>
    %c0_50 = arith.constant 0 : index
    %c0_51 = arith.constant 0 : index
    %73 = vector.load %arg3[%c0_50, %c0_51] : memref<1x128xf32, #tpu.memory_space<vmem>>, vector<1x128xf32>
    %74 = arith.mulf %63, %72 : vector<1x128xf32>
    %75 = arith.subf %73, %74 : vector<1x128xf32>
    %c0_52 = arith.constant 0 : index
    %c0_53 = arith.constant 0 : index
    %c0_54 = arith.constant 0 : index
    %76 = vector.load %arg5[%c0_52, %c0_53, %c0_54] : memref<4x32x128xf32, #tpu.memory_space<vmem>>, vector<1x32x128xf32>
    %77 = vector.shape_cast %76 : vector<1x32x128xf32> to vector<32x128xf32>
    %78 = vector.broadcast %72 : vector<1x128xf32> to vector<32x128xf32>
    %79 = arith.mulf %77, %78 : vector<32x128xf32>
    %80 = vector.broadcast %75 : vector<1x128xf32> to vector<32x128xf32>
    %81 = arith.addf %79, %80 : vector<32x128xf32>
    %cst_55 = arith.constant 0.000000e+00 : f32
    %82 = vector.broadcast %cst_55 : f32 to vector<32x128xf32>
    %83 = arith.maximumf %81, %82 : vector<32x128xf32>
    %84 = arith.truncf %83 : vector<32x128xf32> to vector<32x128xbf16>
    %c0_56 = arith.constant 0 : index
    %c0_57 = arith.constant 0 : index
    %c0_58 = arith.constant 0 : index
    %85 = vector.load %arg4[%c0_56, %c0_57, %c0_58] : memref<4x32x128xbf16, #tpu.memory_space<vmem>>, vector<1x32x128xbf16>
    %86 = vector.shape_cast %85 : vector<1x32x128xbf16> to vector<32x128xbf16>
    %87 = vector.shape_cast %84 : vector<32x128xbf16> to vector<1x32x128xbf16>
    tpu.vector_store %arg4[%c0_56, %c0_57, %c0_58], %87 {strides = array<i32>} : memref<4x32x128xbf16, #tpu.memory_space<vmem>>, vector<1x32x128xbf16>,
    %c1_59 = arith.constant 1 : index
    %c0_60 = arith.constant 0 : index
    %c0_61 = arith.constant 0 : index
    %88 = vector.load %arg5[%c1_59, %c0_60, %c0_61] : memref<4x32x128xf32, #tpu.memory_space<vmem>>, vector<1x32x128xf32>
    %89 = vector.shape_cast %88 : vector<1x32x128xf32> to vector<32x128xf32>
    %90 = vector.broadcast %72 : vector<1x128xf32> to vector<32x128xf32>
    %91 = arith.mulf %89, %90 : vector<32x128xf32>
    %92 = vector.broadcast %75 : vector<1x128xf32> to vector<32x128xf32>
    %93 = arith.addf %91, %92 : vector<32x128xf32>
    %cst_62 = arith.constant 0.000000e+00 : f32
    %94 = vector.broadcast %cst_62 : f32 to vector<32x128xf32>
    %95 = arith.maximumf %93, %94 : vector<32x128xf32>
    %96 = arith.truncf %95 : vector<32x128xf32> to vector<32x128xbf16>
    %c1_63 = arith.constant 1 : index
    %c0_64 = arith.constant 0 : index
    %c0_65 = arith.constant 0 : index
    %97 = vector.load %arg4[%c1_63, %c0_64, %c0_65] : memref<4x32x128xbf16, #tpu.memory_space<vmem>>, vector<1x32x128xbf16>
    %98 = vector.shape_cast %97 : vector<1x32x128xbf16> to vector<32x128xbf16>
    %99 = vector.shape_cast %96 : vector<32x128xbf16> to vector<1x32x128xbf16>
    tpu.vector_store %arg4[%c1_63, %c0_64, %c0_65], %99 {strides = array<i32>} : memref<4x32x128xbf16, #tpu.memory_space<vmem>>, vector<1x32x128xbf16>,
    %c2_66 = arith.constant 2 : index
    %c0_67 = arith.constant 0 : index
    %c0_68 = arith.constant 0 : index
    %100 = vector.load %arg5[%c2_66, %c0_67, %c0_68] : memref<4x32x128xf32, #tpu.memory_space<vmem>>, vector<1x32x128xf32>
    %101 = vector.shape_cast %100 : vector<1x32x128xf32> to vector<32x128xf32>
    %102 = vector.broadcast %72 : vector<1x128xf32> to vector<32x128xf32>
    %103 = arith.mulf %101, %102 : vector<32x128xf32>
    %104 = vector.broadcast %75 : vector<1x128xf32> to vector<32x128xf32>
    %105 = arith.addf %103, %104 : vector<32x128xf32>
    %cst_69 = arith.constant 0.000000e+00 : f32
    %106 = vector.broadcast %cst_69 : f32 to vector<32x128xf32>
    %107 = arith.maximumf %105, %106 : vector<32x128xf32>
    %108 = arith.truncf %107 : vector<32x128xf32> to vector<32x128xbf16>
    %c2_70 = arith.constant 2 : index
    %c0_71 = arith.constant 0 : index
    %c0_72 = arith.constant 0 : index
    %109 = vector.load %arg4[%c2_70, %c0_71, %c0_72] : memref<4x32x128xbf16, #tpu.memory_space<vmem>>, vector<1x32x128xbf16>
    %110 = vector.shape_cast %109 : vector<1x32x128xbf16> to vector<32x128xbf16>
    %111 = vector.shape_cast %108 : vector<32x128xbf16> to vector<1x32x128xbf16>
    tpu.vector_store %arg4[%c2_70, %c0_71, %c0_72], %111 {strides = array<i32>} : memref<4x32x128xbf16, #tpu.memory_space<vmem>>, vector<1x32x128xbf16>,
    %c3_73 = arith.constant 3 : index
    %c0_74 = arith.constant 0 : index
    %c0_75 = arith.constant 0 : index
    %112 = vector.load %arg5[%c3_73, %c0_74, %c0_75] : memref<4x32x128xf32, #tpu.memory_space<vmem>>, vector<1x32x128xf32>
    %113 = vector.shape_cast %112 : vector<1x32x128xf32> to vector<32x128xf32>
    %114 = vector.broadcast %72 : vector<1x128xf32> to vector<32x128xf32>
    %115 = arith.mulf %113, %114 : vector<32x128xf32>
    %116 = vector.broadcast %75 : vector<1x128xf32> to vector<32x128xf32>
    %117 = arith.addf %115, %116 : vector<32x128xf32>
    %cst_76 = arith.constant 0.000000e+00 : f32
    %118 = vector.broadcast %cst_76 : f32 to vector<32x128xf32>
    %119 = arith.maximumf %117, %118 : vector<32x128xf32>
    %120 = arith.truncf %119 : vector<32x128xf32> to vector<32x128xbf16>
    %c3_77 = arith.constant 3 : index
    %c0_78 = arith.constant 0 : index
    %c0_79 = arith.constant 0 : index
    %121 = vector.load %arg4[%c3_77, %c0_78, %c0_79] : memref<4x32x128xbf16, #tpu.memory_space<vmem>>, vector<1x32x128xbf16>
    %122 = vector.shape_cast %121 : vector<1x32x128xbf16> to vector<32x128xbf16>
    %123 = vector.shape_cast %120 : vector<32x128xbf16> to vector<1x32x128xbf16>
    tpu.vector_store %arg4[%c3_77, %c0_78, %c0_79], %123 {strides = array<i32>} : memref<4x32x128xbf16, #tpu.memory_space<vmem>>, vector<1x32x128xbf16>,
    return
  }
}

module attributes {stable_mosaic.version = 11 : i64} {
  func.func @_subpix_bn_relu_kernel(%arg0: memref<4x128x512xbf16, #tpu.memory_space<vmem>>, %arg1: memref<4x512x128xbf16, #tpu.memory_space<vmem>>, %arg2: memref<1x128xf32, #tpu.memory_space<vmem>>, %arg3: memref<1x128xf32, #tpu.memory_space<vmem>>, %arg4: memref<4x128x128xbf16, #tpu.memory_space<vmem>>, %arg5: memref<4x128x128xf32, #tpu.memory_space<vmem>>) attributes {dimension_semantics = [], scalar_prefetch = 0 : i64, scratch_operands = 1 : i64, tpu.core_type = #tpu.core_type<tc>} {
    %cst = arith.constant 0.000000e+00 : f32
    %0 = vector.broadcast %cst : f32 to vector<1x128xf32>
    %cst_0 = arith.constant 0.000000e+00 : f32
    %1 = vector.broadcast %cst_0 : f32 to vector<1x128xf32>
    %c0 = arith.constant 0 : index
    %c0_1 = arith.constant 0 : index
    %c0_2 = arith.constant 0 : index
    %2 = vector.load %arg0[%c0, %c0_1, %c0_2] : memref<4x128x512xbf16, #tpu.memory_space<vmem>>, vector<1x128x512xbf16>
    %3 = vector.shape_cast %2 : vector<1x128x512xbf16> to vector<128x512xbf16>
    %c0_3 = arith.constant 0 : index
    %c0_4 = arith.constant 0 : index
    %c0_5 = arith.constant 0 : index
    %4 = vector.load %arg1[%c0_3, %c0_4, %c0_5] : memref<4x512x128xbf16, #tpu.memory_space<vmem>>, vector<1x512x128xbf16>
    %5 = vector.shape_cast %4 : vector<1x512x128xbf16> to vector<512x128xbf16>
    %cst_6 = arith.constant dense<0.000000e+00> : vector<128x128xf32>
    %6 = tpu.matmul %3, %5, %cst_6 {dimension_numbers = #tpu.dot_dimension_numbers<[1], [0], [0], [1], [0, 0, 1, 1], [], []>} : vector<128x512xbf16>, vector<512x128xbf16>, vector<128x128xf32> -> vector<128x128xf32>
    %c0_7 = arith.constant 0 : index
    %c0_8 = arith.constant 0 : index
    %c0_9 = arith.constant 0 : index
    %7 = vector.load %arg5[%c0_7, %c0_8, %c0_9] : memref<4x128x128xf32, #tpu.memory_space<vmem>>, vector<1x128x128xf32>
    %8 = vector.shape_cast %7 : vector<1x128x128xf32> to vector<128x128xf32>
    %9 = vector.shape_cast %6 : vector<128x128xf32> to vector<1x128x128xf32>
    tpu.vector_store %arg5[%c0_7, %c0_8, %c0_9], %9 {strides = array<i32>} : memref<4x128x128xf32, #tpu.memory_space<vmem>>, vector<1x128x128xf32>,
    %cst_10 = arith.constant dense<0.000000e+00> : vector<128xf32>
    %10 = vector.multi_reduction <add>, %6, %cst_10 [0] : vector<128x128xf32> to vector<128xf32>
    %11 = vector.shape_cast %10 : vector<128xf32> to vector<1x128xf32>
    %12 = arith.addf %0, %11 : vector<1x128xf32>
    %13 = arith.mulf %6, %6 : vector<128x128xf32>
    %cst_11 = arith.constant dense<0.000000e+00> : vector<128xf32>
    %14 = vector.multi_reduction <add>, %13, %cst_11 [0] : vector<128x128xf32> to vector<128xf32>
    %15 = vector.shape_cast %14 : vector<128xf32> to vector<1x128xf32>
    %16 = arith.addf %1, %15 : vector<1x128xf32>
    %c1 = arith.constant 1 : index
    %c0_12 = arith.constant 0 : index
    %c0_13 = arith.constant 0 : index
    %17 = vector.load %arg0[%c1, %c0_12, %c0_13] : memref<4x128x512xbf16, #tpu.memory_space<vmem>>, vector<1x128x512xbf16>
    %18 = vector.shape_cast %17 : vector<1x128x512xbf16> to vector<128x512xbf16>
    %c1_14 = arith.constant 1 : index
    %c0_15 = arith.constant 0 : index
    %c0_16 = arith.constant 0 : index
    %19 = vector.load %arg1[%c1_14, %c0_15, %c0_16] : memref<4x512x128xbf16, #tpu.memory_space<vmem>>, vector<1x512x128xbf16>
    %20 = vector.shape_cast %19 : vector<1x512x128xbf16> to vector<512x128xbf16>
    %cst_17 = arith.constant dense<0.000000e+00> : vector<128x128xf32>
    %21 = tpu.matmul %18, %20, %cst_17 {dimension_numbers = #tpu.dot_dimension_numbers<[1], [0], [0], [1], [0, 0, 1, 1], [], []>} : vector<128x512xbf16>, vector<512x128xbf16>, vector<128x128xf32> -> vector<128x128xf32>
    %c1_18 = arith.constant 1 : index
    %c0_19 = arith.constant 0 : index
    %c0_20 = arith.constant 0 : index
    %22 = vector.load %arg5[%c1_18, %c0_19, %c0_20] : memref<4x128x128xf32, #tpu.memory_space<vmem>>, vector<1x128x128xf32>
    %23 = vector.shape_cast %22 : vector<1x128x128xf32> to vector<128x128xf32>
    %24 = vector.shape_cast %21 : vector<128x128xf32> to vector<1x128x128xf32>
    tpu.vector_store %arg5[%c1_18, %c0_19, %c0_20], %24 {strides = array<i32>} : memref<4x128x128xf32, #tpu.memory_space<vmem>>, vector<1x128x128xf32>,
    %cst_21 = arith.constant dense<0.000000e+00> : vector<128xf32>
    %25 = vector.multi_reduction <add>, %21, %cst_21 [0] : vector<128x128xf32> to vector<128xf32>
    %26 = vector.shape_cast %25 : vector<128xf32> to vector<1x128xf32>
    %27 = arith.addf %12, %26 : vector<1x128xf32>
    %28 = arith.mulf %21, %21 : vector<128x128xf32>
    %cst_22 = arith.constant dense<0.000000e+00> : vector<128xf32>
    %29 = vector.multi_reduction <add>, %28, %cst_22 [0] : vector<128x128xf32> to vector<128xf32>
    %30 = vector.shape_cast %29 : vector<128xf32> to vector<1x128xf32>
    %31 = arith.addf %16, %30 : vector<1x128xf32>
    %c2 = arith.constant 2 : index
    %c0_23 = arith.constant 0 : index
    %c0_24 = arith.constant 0 : index
    %32 = vector.load %arg0[%c2, %c0_23, %c0_24] : memref<4x128x512xbf16, #tpu.memory_space<vmem>>, vector<1x128x512xbf16>
    %33 = vector.shape_cast %32 : vector<1x128x512xbf16> to vector<128x512xbf16>
    %c2_25 = arith.constant 2 : index
    %c0_26 = arith.constant 0 : index
    %c0_27 = arith.constant 0 : index
    %34 = vector.load %arg1[%c2_25, %c0_26, %c0_27] : memref<4x512x128xbf16, #tpu.memory_space<vmem>>, vector<1x512x128xbf16>
    %35 = vector.shape_cast %34 : vector<1x512x128xbf16> to vector<512x128xbf16>
    %cst_28 = arith.constant dense<0.000000e+00> : vector<128x128xf32>
    %36 = tpu.matmul %33, %35, %cst_28 {dimension_numbers = #tpu.dot_dimension_numbers<[1], [0], [0], [1], [0, 0, 1, 1], [], []>} : vector<128x512xbf16>, vector<512x128xbf16>, vector<128x128xf32> -> vector<128x128xf32>
    %c2_29 = arith.constant 2 : index
    %c0_30 = arith.constant 0 : index
    %c0_31 = arith.constant 0 : index
    %37 = vector.load %arg5[%c2_29, %c0_30, %c0_31] : memref<4x128x128xf32, #tpu.memory_space<vmem>>, vector<1x128x128xf32>
    %38 = vector.shape_cast %37 : vector<1x128x128xf32> to vector<128x128xf32>
    %39 = vector.shape_cast %36 : vector<128x128xf32> to vector<1x128x128xf32>
    tpu.vector_store %arg5[%c2_29, %c0_30, %c0_31], %39 {strides = array<i32>} : memref<4x128x128xf32, #tpu.memory_space<vmem>>, vector<1x128x128xf32>,
    %cst_32 = arith.constant dense<0.000000e+00> : vector<128xf32>
    %40 = vector.multi_reduction <add>, %36, %cst_32 [0] : vector<128x128xf32> to vector<128xf32>
    %41 = vector.shape_cast %40 : vector<128xf32> to vector<1x128xf32>
    %42 = arith.addf %27, %41 : vector<1x128xf32>
    %43 = arith.mulf %36, %36 : vector<128x128xf32>
    %cst_33 = arith.constant dense<0.000000e+00> : vector<128xf32>
    %44 = vector.multi_reduction <add>, %43, %cst_33 [0] : vector<128x128xf32> to vector<128xf32>
    %45 = vector.shape_cast %44 : vector<128xf32> to vector<1x128xf32>
    %46 = arith.addf %31, %45 : vector<1x128xf32>
    %c3 = arith.constant 3 : index
    %c0_34 = arith.constant 0 : index
    %c0_35 = arith.constant 0 : index
    %47 = vector.load %arg0[%c3, %c0_34, %c0_35] : memref<4x128x512xbf16, #tpu.memory_space<vmem>>, vector<1x128x512xbf16>
    %48 = vector.shape_cast %47 : vector<1x128x512xbf16> to vector<128x512xbf16>
    %c3_36 = arith.constant 3 : index
    %c0_37 = arith.constant 0 : index
    %c0_38 = arith.constant 0 : index
    %49 = vector.load %arg1[%c3_36, %c0_37, %c0_38] : memref<4x512x128xbf16, #tpu.memory_space<vmem>>, vector<1x512x128xbf16>
    %50 = vector.shape_cast %49 : vector<1x512x128xbf16> to vector<512x128xbf16>
    %cst_39 = arith.constant dense<0.000000e+00> : vector<128x128xf32>
    %51 = tpu.matmul %48, %50, %cst_39 {dimension_numbers = #tpu.dot_dimension_numbers<[1], [0], [0], [1], [0, 0, 1, 1], [], []>} : vector<128x512xbf16>, vector<512x128xbf16>, vector<128x128xf32> -> vector<128x128xf32>
    %c3_40 = arith.constant 3 : index
    %c0_41 = arith.constant 0 : index
    %c0_42 = arith.constant 0 : index
    %52 = vector.load %arg5[%c3_40, %c0_41, %c0_42] : memref<4x128x128xf32, #tpu.memory_space<vmem>>, vector<1x128x128xf32>
    %53 = vector.shape_cast %52 : vector<1x128x128xf32> to vector<128x128xf32>
    %54 = vector.shape_cast %51 : vector<128x128xf32> to vector<1x128x128xf32>
    tpu.vector_store %arg5[%c3_40, %c0_41, %c0_42], %54 {strides = array<i32>} : memref<4x128x128xf32, #tpu.memory_space<vmem>>, vector<1x128x128xf32>,
    %cst_43 = arith.constant dense<0.000000e+00> : vector<128xf32>
    %55 = vector.multi_reduction <add>, %51, %cst_43 [0] : vector<128x128xf32> to vector<128xf32>
    %56 = vector.shape_cast %55 : vector<128xf32> to vector<1x128xf32>
    %57 = arith.addf %42, %56 : vector<1x128xf32>
    %58 = arith.mulf %51, %51 : vector<128x128xf32>
    %cst_44 = arith.constant dense<0.000000e+00> : vector<128xf32>
    %59 = vector.multi_reduction <add>, %58, %cst_44 [0] : vector<128x128xf32> to vector<128xf32>
    %60 = vector.shape_cast %59 : vector<128xf32> to vector<1x128xf32>
    %61 = arith.addf %46, %60 : vector<1x128xf32>
    %cst_45 = arith.constant 0.001953125 : f32
    %62 = vector.broadcast %cst_45 : f32 to vector<1x128xf32>
    %63 = arith.mulf %57, %62 : vector<1x128xf32>
    %cst_46 = arith.constant 0.001953125 : f32
    %64 = vector.broadcast %cst_46 : f32 to vector<1x128xf32>
    %65 = arith.mulf %61, %64 : vector<1x128xf32>
    %66 = arith.mulf %63, %63 : vector<1x128xf32>
    %67 = arith.subf %65, %66 : vector<1x128xf32>
    %c0_47 = arith.constant 0 : index
    %c0_48 = arith.constant 0 : index
    %68 = vector.load %arg2[%c0_47, %c0_48] : memref<1x128xf32, #tpu.memory_space<vmem>>, vector<1x128xf32>
    %cst_49 = arith.constant 9.99999974E-6 : f32
    %69 = vector.broadcast %cst_49 : f32 to vector<1x128xf32>
    %70 = arith.addf %67, %69 : vector<1x128xf32>
    %71 = math.rsqrt %70 : vector<1x128xf32>
    %72 = arith.mulf %68, %71 : vector<1x128xf32>
    %c0_50 = arith.constant 0 : index
    %c0_51 = arith.constant 0 : index
    %73 = vector.load %arg3[%c0_50, %c0_51] : memref<1x128xf32, #tpu.memory_space<vmem>>, vector<1x128xf32>
    %74 = arith.mulf %63, %72 : vector<1x128xf32>
    %75 = arith.subf %73, %74 : vector<1x128xf32>
    %c0_52 = arith.constant 0 : index
    %c0_53 = arith.constant 0 : index
    %c0_54 = arith.constant 0 : index
    %76 = vector.load %arg5[%c0_52, %c0_53, %c0_54] : memref<4x128x128xf32, #tpu.memory_space<vmem>>, vector<1x128x128xf32>
    %77 = vector.shape_cast %76 : vector<1x128x128xf32> to vector<128x128xf32>
    %78 = vector.broadcast %72 : vector<1x128xf32> to vector<128x128xf32>
    %79 = arith.mulf %77, %78 : vector<128x128xf32>
    %80 = vector.broadcast %75 : vector<1x128xf32> to vector<128x128xf32>
    %81 = arith.addf %79, %80 : vector<128x128xf32>
    %cst_55 = arith.constant 0.000000e+00 : f32
    %82 = vector.broadcast %cst_55 : f32 to vector<128x128xf32>
    %83 = arith.maximumf %81, %82 : vector<128x128xf32>
    %84 = arith.truncf %83 : vector<128x128xf32> to vector<128x128xbf16>
    %c0_56 = arith.constant 0 : index
    %c0_57 = arith.constant 0 : index
    %c0_58 = arith.constant 0 : index
    %85 = vector.load %arg4[%c0_56, %c0_57, %c0_58] : memref<4x128x128xbf16, #tpu.memory_space<vmem>>, vector<1x128x128xbf16>
    %86 = vector.shape_cast %85 : vector<1x128x128xbf16> to vector<128x128xbf16>
    %87 = vector.shape_cast %84 : vector<128x128xbf16> to vector<1x128x128xbf16>
    tpu.vector_store %arg4[%c0_56, %c0_57, %c0_58], %87 {strides = array<i32>} : memref<4x128x128xbf16, #tpu.memory_space<vmem>>, vector<1x128x128xbf16>,
    %c1_59 = arith.constant 1 : index
    %c0_60 = arith.constant 0 : index
    %c0_61 = arith.constant 0 : index
    %88 = vector.load %arg5[%c1_59, %c0_60, %c0_61] : memref<4x128x128xf32, #tpu.memory_space<vmem>>, vector<1x128x128xf32>
    %89 = vector.shape_cast %88 : vector<1x128x128xf32> to vector<128x128xf32>
    %90 = vector.broadcast %72 : vector<1x128xf32> to vector<128x128xf32>
    %91 = arith.mulf %89, %90 : vector<128x128xf32>
    %92 = vector.broadcast %75 : vector<1x128xf32> to vector<128x128xf32>
    %93 = arith.addf %91, %92 : vector<128x128xf32>
    %cst_62 = arith.constant 0.000000e+00 : f32
    %94 = vector.broadcast %cst_62 : f32 to vector<128x128xf32>
    %95 = arith.maximumf %93, %94 : vector<128x128xf32>
    %96 = arith.truncf %95 : vector<128x128xf32> to vector<128x128xbf16>
    %c1_63 = arith.constant 1 : index
    %c0_64 = arith.constant 0 : index
    %c0_65 = arith.constant 0 : index
    %97 = vector.load %arg4[%c1_63, %c0_64, %c0_65] : memref<4x128x128xbf16, #tpu.memory_space<vmem>>, vector<1x128x128xbf16>
    %98 = vector.shape_cast %97 : vector<1x128x128xbf16> to vector<128x128xbf16>
    %99 = vector.shape_cast %96 : vector<128x128xbf16> to vector<1x128x128xbf16>
    tpu.vector_store %arg4[%c1_63, %c0_64, %c0_65], %99 {strides = array<i32>} : memref<4x128x128xbf16, #tpu.memory_space<vmem>>, vector<1x128x128xbf16>,
    %c2_66 = arith.constant 2 : index
    %c0_67 = arith.constant 0 : index
    %c0_68 = arith.constant 0 : index
    %100 = vector.load %arg5[%c2_66, %c0_67, %c0_68] : memref<4x128x128xf32, #tpu.memory_space<vmem>>, vector<1x128x128xf32>
    %101 = vector.shape_cast %100 : vector<1x128x128xf32> to vector<128x128xf32>
    %102 = vector.broadcast %72 : vector<1x128xf32> to vector<128x128xf32>
    %103 = arith.mulf %101, %102 : vector<128x128xf32>
    %104 = vector.broadcast %75 : vector<1x128xf32> to vector<128x128xf32>
    %105 = arith.addf %103, %104 : vector<128x128xf32>
    %cst_69 = arith.constant 0.000000e+00 : f32
    %106 = vector.broadcast %cst_69 : f32 to vector<128x128xf32>
    %107 = arith.maximumf %105, %106 : vector<128x128xf32>
    %108 = arith.truncf %107 : vector<128x128xf32> to vector<128x128xbf16>
    %c2_70 = arith.constant 2 : index
    %c0_71 = arith.constant 0 : index
    %c0_72 = arith.constant 0 : index
    %109 = vector.load %arg4[%c2_70, %c0_71, %c0_72] : memref<4x128x128xbf16, #tpu.memory_space<vmem>>, vector<1x128x128xbf16>
    %110 = vector.shape_cast %109 : vector<1x128x128xbf16> to vector<128x128xbf16>
    %111 = vector.shape_cast %108 : vector<128x128xbf16> to vector<1x128x128xbf16>
    tpu.vector_store %arg4[%c2_70, %c0_71, %c0_72], %111 {strides = array<i32>} : memref<4x128x128xbf16, #tpu.memory_space<vmem>>, vector<1x128x128xbf16>,
    %c3_73 = arith.constant 3 : index
    %c0_74 = arith.constant 0 : index
    %c0_75 = arith.constant 0 : index
    %112 = vector.load %arg5[%c3_73, %c0_74, %c0_75] : memref<4x128x128xf32, #tpu.memory_space<vmem>>, vector<1x128x128xf32>
    %113 = vector.shape_cast %112 : vector<1x128x128xf32> to vector<128x128xf32>
    %114 = vector.broadcast %72 : vector<1x128xf32> to vector<128x128xf32>
    %115 = arith.mulf %113, %114 : vector<128x128xf32>
    %116 = vector.broadcast %75 : vector<1x128xf32> to vector<128x128xf32>
    %117 = arith.addf %115, %116 : vector<128x128xf32>
    %cst_76 = arith.constant 0.000000e+00 : f32
    %118 = vector.broadcast %cst_76 : f32 to vector<128x128xf32>
    %119 = arith.maximumf %117, %118 : vector<128x128xf32>
    %120 = arith.truncf %119 : vector<128x128xf32> to vector<128x128xbf16>
    %c3_77 = arith.constant 3 : index
    %c0_78 = arith.constant 0 : index
    %c0_79 = arith.constant 0 : index
    %121 = vector.load %arg4[%c3_77, %c0_78, %c0_79] : memref<4x128x128xbf16, #tpu.memory_space<vmem>>, vector<1x128x128xbf16>
    %122 = vector.shape_cast %121 : vector<1x128x128xbf16> to vector<128x128xbf16>
    %123 = vector.shape_cast %120 : vector<128x128xbf16> to vector<1x128x128xbf16>
    tpu.vector_store %arg4[%c3_77, %c0_78, %c0_79], %123 {strides = array<i32>} : memref<4x128x128xbf16, #tpu.memory_space<vmem>>, vector<1x128x128xbf16>,
    return
  }
}

module attributes {stable_mosaic.version = 11 : i64} {
  func.func @_subpix_tanh_kernel(%arg0: memref<4x392x256xbf16, #tpu.memory_space<vmem>>, %arg1: memref<4x256x128xbf16, #tpu.memory_space<vmem>>, %arg2: memref<4x392x128xf32, #tpu.memory_space<vmem>>) attributes {dimension_semantics = [], scalar_prefetch = 0 : i64, scratch_operands = 0 : i64, tpu.core_type = #tpu.core_type<tc>} {
    %c0 = arith.constant 0 : index
    %c0_0 = arith.constant 0 : index
    %c0_1 = arith.constant 0 : index
    %0 = vector.load %arg0[%c0, %c0_0, %c0_1] : memref<4x392x256xbf16, #tpu.memory_space<vmem>>, vector<1x392x256xbf16>
    %1 = vector.shape_cast %0 : vector<1x392x256xbf16> to vector<392x256xbf16>
    %c0_2 = arith.constant 0 : index
    %c0_3 = arith.constant 0 : index
    %c0_4 = arith.constant 0 : index
    %2 = vector.load %arg1[%c0_2, %c0_3, %c0_4] : memref<4x256x128xbf16, #tpu.memory_space<vmem>>, vector<1x256x128xbf16>
    %3 = vector.shape_cast %2 : vector<1x256x128xbf16> to vector<256x128xbf16>
    %cst = arith.constant dense<0.000000e+00> : vector<392x128xf32>
    %4 = tpu.matmul %1, %3, %cst {dimension_numbers = #tpu.dot_dimension_numbers<[1], [0], [0], [1], [0, 0, 1, 1], [], []>} : vector<392x256xbf16>, vector<256x128xbf16>, vector<392x128xf32> -> vector<392x128xf32>
    %5 = math.tanh %4 : vector<392x128xf32>
    %c0_5 = arith.constant 0 : index
    %c0_6 = arith.constant 0 : index
    %c0_7 = arith.constant 0 : index
    %6 = vector.load %arg2[%c0_5, %c0_6, %c0_7] : memref<4x392x128xf32, #tpu.memory_space<vmem>>, vector<1x392x128xf32>
    %7 = vector.shape_cast %6 : vector<1x392x128xf32> to vector<392x128xf32>
    %8 = vector.shape_cast %5 : vector<392x128xf32> to vector<1x392x128xf32>
    tpu.vector_store %arg2[%c0_5, %c0_6, %c0_7], %8 {strides = array<i32>} : memref<4x392x128xf32, #tpu.memory_space<vmem>>, vector<1x392x128xf32>,
    %c1 = arith.constant 1 : index
    %c0_8 = arith.constant 0 : index
    %c0_9 = arith.constant 0 : index
    %9 = vector.load %arg0[%c1, %c0_8, %c0_9] : memref<4x392x256xbf16, #tpu.memory_space<vmem>>, vector<1x392x256xbf16>
    %10 = vector.shape_cast %9 : vector<1x392x256xbf16> to vector<392x256xbf16>
    %c1_10 = arith.constant 1 : index
    %c0_11 = arith.constant 0 : index
    %c0_12 = arith.constant 0 : index
    %11 = vector.load %arg1[%c1_10, %c0_11, %c0_12] : memref<4x256x128xbf16, #tpu.memory_space<vmem>>, vector<1x256x128xbf16>
    %12 = vector.shape_cast %11 : vector<1x256x128xbf16> to vector<256x128xbf16>
    %cst_13 = arith.constant dense<0.000000e+00> : vector<392x128xf32>
    %13 = tpu.matmul %10, %12, %cst_13 {dimension_numbers = #tpu.dot_dimension_numbers<[1], [0], [0], [1], [0, 0, 1, 1], [], []>} : vector<392x256xbf16>, vector<256x128xbf16>, vector<392x128xf32> -> vector<392x128xf32>
    %14 = math.tanh %13 : vector<392x128xf32>
    %c1_14 = arith.constant 1 : index
    %c0_15 = arith.constant 0 : index
    %c0_16 = arith.constant 0 : index
    %15 = vector.load %arg2[%c1_14, %c0_15, %c0_16] : memref<4x392x128xf32, #tpu.memory_space<vmem>>, vector<1x392x128xf32>
    %16 = vector.shape_cast %15 : vector<1x392x128xf32> to vector<392x128xf32>
    %17 = vector.shape_cast %14 : vector<392x128xf32> to vector<1x392x128xf32>
    tpu.vector_store %arg2[%c1_14, %c0_15, %c0_16], %17 {strides = array<i32>} : memref<4x392x128xf32, #tpu.memory_space<vmem>>, vector<1x392x128xf32>,
    %c2 = arith.constant 2 : index
    %c0_17 = arith.constant 0 : index
    %c0_18 = arith.constant 0 : index
    %18 = vector.load %arg0[%c2, %c0_17, %c0_18] : memref<4x392x256xbf16, #tpu.memory_space<vmem>>, vector<1x392x256xbf16>
    %19 = vector.shape_cast %18 : vector<1x392x256xbf16> to vector<392x256xbf16>
    %c2_19 = arith.constant 2 : index
    %c0_20 = arith.constant 0 : index
    %c0_21 = arith.constant 0 : index
    %20 = vector.load %arg1[%c2_19, %c0_20, %c0_21] : memref<4x256x128xbf16, #tpu.memory_space<vmem>>, vector<1x256x128xbf16>
    %21 = vector.shape_cast %20 : vector<1x256x128xbf16> to vector<256x128xbf16>
    %cst_22 = arith.constant dense<0.000000e+00> : vector<392x128xf32>
    %22 = tpu.matmul %19, %21, %cst_22 {dimension_numbers = #tpu.dot_dimension_numbers<[1], [0], [0], [1], [0, 0, 1, 1], [], []>} : vector<392x256xbf16>, vector<256x128xbf16>, vector<392x128xf32> -> vector<392x128xf32>
    %23 = math.tanh %22 : vector<392x128xf32>
    %c2_23 = arith.constant 2 : index
    %c0_24 = arith.constant 0 : index
    %c0_25 = arith.constant 0 : index
    %24 = vector.load %arg2[%c2_23, %c0_24, %c0_25] : memref<4x392x128xf32, #tpu.memory_space<vmem>>, vector<1x392x128xf32>
    %25 = vector.shape_cast %24 : vector<1x392x128xf32> to vector<392x128xf32>
    %26 = vector.shape_cast %23 : vector<392x128xf32> to vector<1x392x128xf32>
    tpu.vector_store %arg2[%c2_23, %c0_24, %c0_25], %26 {strides = array<i32>} : memref<4x392x128xf32, #tpu.memory_space<vmem>>, vector<1x392x128xf32>,
    %c3 = arith.constant 3 : index
    %c0_26 = arith.constant 0 : index
    %c0_27 = arith.constant 0 : index
    %27 = vector.load %arg0[%c3, %c0_26, %c0_27] : memref<4x392x256xbf16, #tpu.memory_space<vmem>>, vector<1x392x256xbf16>
    %28 = vector.shape_cast %27 : vector<1x392x256xbf16> to vector<392x256xbf16>
    %c3_28 = arith.constant 3 : index
    %c0_29 = arith.constant 0 : index
    %c0_30 = arith.constant 0 : index
    %29 = vector.load %arg1[%c3_28, %c0_29, %c0_30] : memref<4x256x128xbf16, #tpu.memory_space<vmem>>, vector<1x256x128xbf16>
    %30 = vector.shape_cast %29 : vector<1x256x128xbf16> to vector<256x128xbf16>
    %cst_31 = arith.constant dense<0.000000e+00> : vector<392x128xf32>
    %31 = tpu.matmul %28, %30, %cst_31 {dimension_numbers = #tpu.dot_dimension_numbers<[1], [0], [0], [1], [0, 0, 1, 1], [], []>} : vector<392x256xbf16>, vector<256x128xbf16>, vector<392x128xf32> -> vector<392x128xf32>
    %32 = math.tanh %31 : vector<392x128xf32>
    %c3_32 = arith.constant 3 : index
    %c0_33 = arith.constant 0 : index
    %c0_34 = arith.constant 0 : index
    %33 = vector.load %arg2[%c3_32, %c0_33, %c0_34] : memref<4x392x128xf32, #tpu.memory_space<vmem>>, vector<1x392x128xf32>
    %34 = vector.shape_cast %33 : vector<1x392x128xf32> to vector<392x128xf32>
    %35 = vector.shape_cast %32 : vector<392x128xf32> to vector<1x392x128xf32>
    tpu.vector_store %arg2[%c3_32, %c0_33, %c0_34], %35 {strides = array<i32>} : memref<4x392x128xf32, #tpu.memory_space<vmem>>, vector<1x392x128xf32>,
    return
  }
}

</mosaic_0001>

<bundles_post_ra>
// kernel: generator_forward.4
= control target key start
LH: loop header
LB: loop body
LE: loop exit
PB: predicated region body
PF: predicated region fallthrough
CT: control target
= control target key end

     0   :  { %10 = vsyncpa [#allocation3], 0  ;;  %s3932_s0 = inlined_call_operand.vmem [shape: f32[2,100], index: 0, kind: input, shape index: {}]   ;;  %s3933_s1 = inlined_call_operand.vmem [shape: f32[2,100], index: 1, kind: input, shape index: {}]   ;;  %s3934_s2 = inlined_call_operand.hbm [shape: bf16[100,4096], index: 2, kind: input, shape index: {}]   ;;  %s3935_s3 = inlined_call_operand.hbm [shape: f32[1,256], index: 3, kind: input, shape index: {}]   ;;  %s3936_s4 = inlined_call_operand.hbm [shape: f32[1,256], index: 4, kind: input, shape index: {}]   ;;  %s3937_s5 = inlined_call_operand.vmem [shape: bf16[2,4096], index: 5, kind: output, shape index: {}]  }
   0x1   :  { %11 = vsyncpa [#allocation5], 0  ;;  %s3436_s18 = smov [#allocation4]   ;;  %s3437_s20 = smov [#allocation2]  }
   0x2   :  { %s34_s19 = sshll.u32 %s3436_s18, 4  ;;  %s21_s21 = sshll.u32 %s3437_s20, 4  ;;  %s35_s19 = int_to_ptr.vmem [resolvable:$true] %s34_s19  ;;  %s22_s21 = int_to_ptr.vmem [resolvable:$true] %s21_s21 }
   0x3   :  { %s3380_s22 = scalar_lea.vmem %s35_s19, 32  ;;  %p3385_p1 = scmp.lt.s32.totalorder %s35_s19, %s35_s19 }
   0x4   :  { %p3381_p0 = scmp.ne.s32.totalorder %s35_s19, %s3380_s22  ;;  %p3386_p2 = scmp.lt.s32.totalorder %s3380_s22, %s3380_s22 }
   0x6   :  { %p3387_p3 = por %p3386_p2, %p3385_p1 }
   0x8   :  { %p3388_p4 = pnand %p3387_p3, %p3381_p0 }
   0xa   :  { %3391 = shalt.err (!%p3388_p4)
}
   0xb   :  { %37 = dma.hbm_to_vmem [thread:$0]  %s3935_s3, 32, %s35_s19, [#allocation5]  }
   0xc   :  { %s3400_s25 = scalar_lea.vmem %s22_s21, 26624  ;;  %p3405_p6 = scmp.lt.s32.totalorder %s22_s21, %s22_s21 }
   0xd   :  { %p3401_p5 = scmp.ne.s32.totalorder %s22_s21, %s3400_s25  ;;  %p3406_p7 = scmp.lt.s32.totalorder %s3400_s25, %s3400_s25 }
   0xf   :  { %p3407_p8 = por %p3406_p7, %p3405_p6 }
  0x11   :  { %p3408_p9 = pnand %p3407_p8, %p3401_p5 }
  0x13   :  { %3411 = shalt.err (!%p3408_p9)
}
  0x14   :  { %s3438_s26 = smov 2048   ;;  %s3439_s27 = smov 128  }
  0x15   :  { %27 = dma.hbm_to_vmem [thread:$0]  %s3934_s2, 26624, %s22_s21, [#allocation3], %s3438_s26, %s3438_s26, %s3439_s27  }
  0x16   :  { %s3440_s30 = smov [#allocation6]  }
  0x17   :  { %s44_s6 = sshll.u32 %s3440_s30, 4  ;;  %s45_s6 = int_to_ptr.vmem [resolvable:$true] %s44_s6 }
  0x18   :  { %s3420_s7 = scalar_lea.vmem %s45_s6, 32  ;;  %p3425_p11 = scmp.lt.s32.totalorder %s45_s6, %s45_s6 }
  0x19   :  { %p3421_p10 = scmp.ne.s32.totalorder %s45_s6, %s3420_s7  ;;  %p3426_p12 = scmp.lt.s32.totalorder %s3420_s7, %s3420_s7 }
  0x1b   :  { %p3427_p13 = por %p3426_p12, %p3425_p11 }
  0x1d   :  { %p3428_p0 = pnand %p3427_p13, %p3421_p10 }
  0x1f   :  { %3431 = shalt.err (!%p3428_p0)
}
  0x20   :  { %47 = dma.hbm_to_vmem [thread:$0]  %s3936_s4, 32, %s45_s6, [#allocation5]  }
  0x21   :  { %3432 = dma.done.wait [#allocation3], 26624  }
  0x22   :  { %3433 = vsyncadd [#allocation3], 4294940672 }
  0x23   :  { %3434 = dma.done.wait [#allocation5], 64  }
  0x24   :  { %3435 = vsyncadd [#allocation5], 4294967232  ;;  %v3441_v0 = vmov 0   ;;  %v254_v1 = vld [vmem:[#allocation2 + $0x600] sm:$0x33]  ;;  %vm1314_vm0 = vcmask 1041408  }
  0x25   :  { %1443 = vmatprep.mubr.bf16.mxu0 %v3441_v0  ;;  %1484 = vmatprep.mubr.bf16.mxu1 %v3441_v0  ;;  %v255_v2 = vld [vmem:[#allocation2 + $0x608] sm:$0x33]  ;;  %v222_v3 = vld [vmem:[#allocation2 + $0x500] sm:$0xff]  ;;  %v3250_v4 = vcombine.high %v254_v1, %v254_v1  ;;  %v3249_v6 = vcombine.low %v254_v1, %v254_v1  ;;  %v256_v57 = vld [vmem:[#allocation2 + $0x610] sm:$0x33]  ;;  %vm1310_vm1 = vcmask 818176  }
  0x26   :  { %v3252_v5 = vcombine.high %v255_v2, %v255_v2  ;;  %v3251_v7 = vcombine.low %v255_v2, %v255_v2  ;;  %v238_v8 = vld [vmem:[#allocation2 + $0x580] sm:$0xff]  ;;  %v223_v9 = vld [vmem:[#allocation2 + $0x508] sm:$0xff]  ;;  %v257_v58 = vld [vmem:[#allocation2 + $0x618] sm:$0x33]  ;;  %v3254_v62 = vcombine.high %v256_v57, %v256_v57  ;;  %v3253_v1 = vcombine.low %v256_v57, %v256_v57 }
  0x27   :  { %v239_v10 = vld [vmem:[#allocation2 + $0x588] sm:$0xff]  ;;  %v3218_v11 = vcombine.high %v222_v3, %v238_v8  ;;  %v190_v13 = vld [vmem:[#allocation2 + $0x400] sm:$0xff]  ;;  %3281 = vmatprep.subr.msk.bf16.mxu0 %vm1314_vm0, %v3250_v4  ;;  %v1316_v16 = vsel %vm1314_vm0, %v3249_v6, 0  ;;  %v3217_v19 = vcombine.low %v222_v3, %v238_v8  ;;  %v3256_v63 = vcombine.high %v257_v58, %v257_v58  ;;  %v224_v3 = vld [vmem:[#allocation2 + $0x510] sm:$0xff] }
  0x28   :  { %v3220_v12 = vcombine.high %v223_v9, %v239_v10  ;;  %v206_v14 = vld [vmem:[#allocation2 + $0x480] sm:$0xff]  ;;  %v191_v15 = vld [vmem:[#allocation2 + $0x408] sm:$0xff]  ;;  %3283 = vmatprep.subr.msk.bf16.mxu1 %vm1314_vm0, %v3252_v5  ;;  %v1322_v17 = vsel %vm1314_vm0, %v3251_v7, 0  ;;  %1414 = vmatpush1.bf16.msra.mxu0 %v1316_v16  ;;  %v3219_v20 = vcombine.low %v223_v9, %v239_v10  ;;  %v3255_v2 = vcombine.low %v257_v58, %v257_v58  ;;  %v240_v4 = vld [vmem:[#allocation2 + $0x590] sm:$0xff] }
  0x29   :  { %v207_v18 = vld [vmem:[#allocation2 + $0x488] sm:$0xff]  ;;  %1455 = vmatpush1.bf16.msra.mxu1 %v1322_v17  ;;  %1415 = vmatprep.subr.bf16.mxu0 %v3218_v11  ;;  %v3186_v21 = vcombine.high %v190_v13, %v206_v14  ;;  %v158_v23 = vld [vmem:[#allocation2 + $0x300] sm:$0xff]  ;;  %v3185_v27 = vcombine.low %v190_v13, %v206_v14  ;;  %v225_v5 = vld [vmem:[#allocation2 + $0x518] sm:$0xff]  ;;  %v1328_v8 = vsel %vm1314_vm0, %v3253_v1, 0  ;;  %v3222_v10 = vcombine.high %v224_v3, %v240_v4 }
  0x2a   :  { %1456 = vmatprep.subr.bf16.mxu1 %v3220_v12  ;;  %v3188_v22 = vcombine.high %v191_v15, %v207_v18  ;;  %v174_v24 = vld [vmem:[#allocation2 + $0x380] sm:$0xff]  ;;  %v159_v25 = vld [vmem:[#allocation2 + $0x308] sm:$0xff]  ;;  %v3187_v28 = vcombine.low %v191_v15, %v207_v18  ;;  %v241_v6 = vld [vmem:[#allocation2 + $0x598] sm:$0xff]  ;;  %v1334_v9 = vsel %vm1314_vm0, %v3255_v2, 0  ;;  %v3221_v16 = vcombine.low %v224_v3, %v240_v4 }
  0x2b   :  { %v175_v26 = vld [vmem:[#allocation2 + $0x388] sm:$0xff]  ;;  %v3154_v29 = vcombine.high %v158_v23, %v174_v24  ;;  %v126_v31 = vld [vmem:[#allocation2 + $0x200] sm:$0xff]  ;;  %v3153_v35 = vcombine.low %v158_v23, %v174_v24  ;;  %v3224_v11 = vcombine.high %v225_v5, %v241_v6  ;;  %v192_v12 = vld [vmem:[#allocation2 + $0x410] sm:$0xff]  ;;  %v3223_v17 = vcombine.low %v225_v5, %v241_v6 }
  0x2c   :  { %1416 = vmatpush1.bf16.msra.mxu0 %v3217_v19  ;;  %v3156_v30 = vcombine.high %v159_v25, %v175_v26  ;;  %v142_v32 = vld [vmem:[#allocation2 + $0x280] sm:$0xff]  ;;  %v127_v33 = vld [vmem:[#allocation2 + $0x208] sm:$0xff]  ;;  %v3155_v36 = vcombine.low %v159_v25, %v175_v26  ;;  %v208_v13 = vld [vmem:[#allocation2 + $0x490] sm:$0xff] }
  0x2d   :  { %1457 = vmatpush1.bf16.msra.mxu1 %v3219_v20  ;;  %1417 = vmatprep.subr.bf16.mxu0 %v3186_v21  ;;  %v143_v34 = vld [vmem:[#allocation2 + $0x288] sm:$0xff]  ;;  %v3122_v37 = vcombine.high %v126_v31, %v142_v32  ;;  %v94_v39 = vld [vmem:[#allocation2 + $0x100] sm:$0xff]  ;;  %v3121_v43 = vcombine.low %v126_v31, %v142_v32  ;;  %v193_v14 = vld [vmem:[#allocation2 + $0x418] sm:$0xff]  ;;  %v3190_v18 = vcombine.high %v192_v12, %v208_v13 }
  0x2e   :  { %1458 = vmatprep.subr.bf16.mxu1 %v3188_v22  ;;  %v3124_v38 = vcombine.high %v127_v33, %v143_v34  ;;  %v110_v40 = vld [vmem:[#allocation2 + $0x180] sm:$0xff]  ;;  %v95_v41 = vld [vmem:[#allocation2 + $0x108] sm:$0xff]  ;;  %v3123_v44 = vcombine.low %v127_v33, %v143_v34  ;;  %v209_v15 = vld [vmem:[#allocation2 + $0x498] sm:$0xff]  ;;  %v3189_v24 = vcombine.low %v192_v12, %v208_v13 }
  0x2f   :  { %v111_v42 = vld [vmem:[#allocation2 + $0x188] sm:$0xff]  ;;  %v3090_v45 = vcombine.high %v94_v39, %v110_v40  ;;  %v62_v47 = vld [vmem:[#allocation2] sm:$0xff]  ;;  %v3089_v51 = vcombine.low %v94_v39, %v110_v40  ;;  %v3192_v19 = vcombine.high %v193_v14, %v209_v15  ;;  %v160_v20 = vld [vmem:[#allocation2 + $0x310] sm:$0xff]  ;;  %v3191_v25 = vcombine.low %v193_v14, %v209_v15 }
  0x30   :  { %1418 = vmatpush1.bf16.msra.mxu0 %v3185_v27  ;;  %v3092_v46 = vcombine.high %v95_v41, %v111_v42  ;;  %v78_v48 = vld [vmem:[#allocation2 + $0x80] sm:$0xff]  ;;  %v63_v49 = vld [vmem:[#allocation2 + $0x8] sm:$0xff]  ;;  %v3091_v52 = vcombine.low %v95_v41, %v111_v42  ;;  %v176_v21 = vld [vmem:[#allocation2 + $0x390] sm:$0xff] }
  0x31   :  { %1459 = vmatpush1.bf16.msra.mxu1 %v3187_v28  ;;  %1419 = vmatprep.subr.bf16.mxu0 %v3154_v29  ;;  %v79_v50 = vld [vmem:[#allocation2 + $0x88] sm:$0xff]  ;;  %v58_v53 = vld [vmem:[%s3932_s0] sm:$0x3]  ;;  %v3058_v55 = vcombine.high %v62_v47, %v78_v48  ;;  %v3057_v60 = vcombine.low %v62_v47, %v78_v48  ;;  %v161_v22 = vld [vmem:[#allocation2 + $0x318] sm:$0xff]  ;;  %v3158_v26 = vcombine.high %v160_v20, %v176_v21 }
  0x32   :  { %1460 = vmatprep.subr.bf16.mxu1 %v3156_v30  ;;  %v59_v54 = vld [vmem:[%s3933_s1] sm:$0x3]  ;;  %v3060_v56 = vcombine.high %v63_v49, %v79_v50  ;;  %v3059_v61 = vcombine.low %v63_v49, %v79_v50  ;;  %v177_v23 = vld [vmem:[#allocation2 + $0x398] sm:$0xff]  ;;  %v128_v28 = vld [vmem:[#allocation2 + $0x210] sm:$0xff]  ;;  %v3157_v32 = vcombine.low %v160_v20, %v176_v21 }
  0x33   :  { %v60_v59 = vmul.f32 %v59_v54, %v58_v53  ;;  %v3160_v27 = vcombine.high %v161_v22, %v177_v23  ;;  %v144_v29 = vld [vmem:[#allocation2 + $0x290] sm:$0xff]  ;;  %v129_v30 = vld [vmem:[#allocation2 + $0x218] sm:$0xff]  ;;  %v3159_v33 = vcombine.low %v161_v22, %v177_v23  ;;  %v259_v53 = vld [vmem:[#allocation2 + $0x628] sm:$0x33] }
  0x34   :  { %1420 = vmatpush1.bf16.msra.mxu0 %v3153_v35  ;;  %v145_v31 = vld [vmem:[#allocation2 + $0x298] sm:$0xff]  ;;  %v3126_v34 = vcombine.high %v128_v28, %v144_v29  ;;  %v3125_v40 = vcombine.low %v128_v28, %v144_v29  ;;  %v3260_v57 = vcombine.high %v259_v53, %v259_v53  ;;  %v194_v5 = vld [vmem:[#allocation2 + $0x420] sm:$0xff] }
  0x35   :  { %1461 = vmatpush1.bf16.msra.mxu1 %v3155_v36  ;;  %1421 = vmatprep.subr.bf16.mxu0 %v3122_v37  ;;  %v3494_v7 = vpack.c.bf16 %v60_v59, %v60_v59  ;;  %v3128_v35 = vcombine.high %v129_v30, %v145_v31  ;;  %v96_v36 = vld [vmem:[#allocation2 + $0x110] sm:$0xff]  ;;  %v113_v39 = vld [vmem:[#allocation2 + $0x198] sm:$0xff]  ;;  %v3127_v41 = vcombine.low %v129_v30, %v145_v31  ;;  %v210_v6 = vld [vmem:[#allocation2 + $0x4a0] sm:$0xff] }
  0x36   :  { %1462 = vmatprep.subr.bf16.mxu1 %v3124_v38  ;;  %v112_v37 = vld [vmem:[#allocation2 + $0x190] sm:$0xff]  ;;  %v97_v38 = vld [vmem:[#allocation2 + $0x118] sm:$0xff]  ;;  %v3259_v59 = vcombine.low %v259_v53, %v259_v53  ;;  %v3194_v12 = vcombine.high %v194_v5, %v210_v6  ;;  %v162_v14 = vld [vmem:[#allocation2 + $0x320] sm:$0xff] }
  0x37   :  { %v3094_v42 = vcombine.high %v96_v36, %v112_v37  ;;  %v81_v47 = vld [vmem:[#allocation2 + $0x98] sm:$0xff]  ;;  %v3093_v48 = vcombine.low %v96_v36, %v112_v37  ;;  %v3095_v49 = vcombine.low %v97_v38, %v113_v39  ;;  %v178_v15 = vld [vmem:[#allocation2 + $0x3a0] sm:$0xff] }
  0x38   :  { %1422 = vmatpush1.bf16.msra.mxu0 %v3121_v43  ;;  %v3096_v43 = vcombine.high %v97_v38, %v113_v39  ;;  %v1346_v2 = vsel %vm1314_vm0, %v3259_v59, 0  ;;  %v3162_v20 = vcombine.high %v162_v14, %v178_v15  ;;  %v130_v22 = vld [vmem:[#allocation2 + $0x220] sm:$0xff] }
  0x39   :  { %1463 = vmatpush1.bf16.msra.mxu1 %v3123_v44  ;;  %1423 = vmatprep.subr.bf16.mxu0 %v3090_v45  ;;  %v64_v44 = vld [vmem:[#allocation2 + $0x10] sm:$0xff]  ;;  %v146_v23 = vld [vmem:[#allocation2 + $0x2a0] sm:$0xff] }
  0x3a   :  { %1464 = vmatprep.subr.bf16.mxu1 %v3092_v46  ;;  %v80_v45 = vld [vmem:[#allocation2 + $0x90] sm:$0xff]  ;;  %v65_v46 = vld [vmem:[#allocation2 + $0x18] sm:$0xff]  ;;  %v3130_v28 = vcombine.high %v130_v22, %v146_v23  ;;  %v98_v30 = vld [vmem:[#allocation2 + $0x120] sm:$0xff] }
  0x3b   :  { %v3062_v50 = vcombine.high %v64_v44, %v80_v45  ;;  %v3061_v54 = vcombine.low %v64_v44, %v80_v45  ;;  %v114_v31 = vld [vmem:[#allocation2 + $0x1a0] sm:$0xff] }
  0x3c   :  { %1424 = vmatpush1.bf16.msra.mxu0 %v3089_v51  ;;  %v3064_v51 = vcombine.high %v65_v46, %v81_v47  ;;  %v3098_v36 = vcombine.high %v98_v30, %v114_v31  ;;  %v66_v38 = vld [vmem:[#allocation2 + $0x20] sm:$0xff] }
  0x3d   :  { %1465 = vmatpush1.bf16.msra.mxu1 %v3091_v52  ;;  %1425 = vmatprep.subr.bf16.mxu0 %v3058_v55  ;;  %v258_v52 = vld [vmem:[#allocation2 + $0x620] sm:$0x33]  ;;  %v3063_v55 = vcombine.low %v65_v46, %v81_v47  ;;  %v260_v46 = vld [vmem:[#allocation2 + $0x630] sm:$0x33]  ;;  %v261_v47 = vld [vmem:[#allocation2 + $0x638] sm:$0x33] }
  0x3e   :  { %1466 = vmatprep.subr.bf16.mxu1 %v3060_v56  ;;  %v3258_v56 = vcombine.high %v258_v52, %v258_v52  ;;  %v3257_v58 = vcombine.low %v258_v52, %v258_v52  ;;  %v82_v39 = vld [vmem:[#allocation2 + $0xa0] sm:$0xff]  ;;  %v3261_v52 = vcombine.low %v260_v46, %v260_v46  ;;  %v3263_v53 = vcombine.low %v261_v47, %v261_v47 }
  0x3f   :  { %v3066_v44 = vcombine.high %v66_v38, %v82_v39 }
  0x40   :  { %1426 = vmatpush1.bf16.msra.mxu0 %v3057_v60  ;;  %v226_v60 = vld [vmem:[#allocation2 + $0x520] sm:$0xff]  ;;  %v1340_v1 = vsel %vm1314_vm0, %v3257_v58, 0  ;;  %v1352_v58 = vsel %vm1314_vm0, %v3261_v52, 0  ;;  %v1358_v59 = vsel %vm1314_vm0, %v3263_v53, 0 }
  0x41   :  { %1467 = vmatpush1.bf16.msra.mxu1 %v3059_v61  ;;  %3285 = vmatprep.subr.msk.bf16.mxu0 %vm1314_vm0, %v3254_v62  ;;  %v242_v61 = vld [vmem:[#allocation2 + $0x5a0] sm:$0xff]  ;;  %v227_v62 = vld [vmem:[#allocation2 + $0x528] sm:$0xff] }
  0x42   :  { %3287 = vmatprep.subr.msk.bf16.mxu1 %vm1314_vm0, %v3256_v63  ;;  %v243_v63 = vld [vmem:[#allocation2 + $0x5a8] sm:$0xff]  ;;  %v3226_v3 = vcombine.high %v226_v60, %v242_v61 }
  0x43   :  { %3282 = vmatmul.mubr.msk.bf16.vlgmr.msra.gmra.mxu0 %vm1310_vm1, %v3494_v7  ;;  %v3228_v4 = vcombine.high %v227_v62, %v243_v63 }
  0x44   :  { %3284 = vmatmul.mubr.msk.bf16.vlgmr.msra.gmra.mxu1 %vm1310_vm1, %v3494_v7  ;;  %1496 = vmatpush1.bf16.msra.mxu0 %v1328_v8  ;;  %v195_v8 = vld [vmem:[#allocation2 + $0x428] sm:$0xff] }
  0x45   :  { %1537 = vmatpush1.bf16.msra.mxu1 %v1334_v9  ;;  %1497 = vmatprep.subr.bf16.mxu0 %v3222_v10  ;;  %v211_v9 = vld [vmem:[#allocation2 + $0x4a8] sm:$0xff]  ;;  %v3225_v10 = vcombine.low %v226_v60, %v242_v61 }
  0x46   :  { %1538 = vmatprep.subr.bf16.mxu1 %v3224_v11  ;;  %1525 = vmatprep.mubr.bf16.mxu0 %v3441_v0  ;;  %v3227_v11 = vcombine.low %v227_v62, %v243_v63  ;;  %v3196_v13 = vcombine.high %v195_v8, %v211_v9  ;;  %v196_v62 = vld [vmem:[#allocation2 + $0x430] sm:$0xff] }
  0x47   :  { %1566 = vmatprep.mubr.bf16.mxu1 %v3441_v0  ;;  %v212_v63 = vld [vmem:[#allocation2 + $0x4b0] sm:$0xff] }
  0x48   :  { %1498 = vmatpush1.bf16.msra.mxu0 %v3221_v16  ;;  %v163_v16 = vld [vmem:[#allocation2 + $0x328] sm:$0xff] }
  0x49   :  { %1539 = vmatpush1.bf16.msra.mxu1 %v3223_v17  ;;  %1499 = vmatprep.subr.bf16.mxu0 %v3190_v18  ;;  %v179_v17 = vld [vmem:[#allocation2 + $0x3a8] sm:$0xff]  ;;  %v3193_v18 = vcombine.low %v194_v5, %v210_v6  ;;  %v3198_v5 = vcombine.high %v196_v62, %v212_v63 }
  0x4a   :  { %1540 = vmatprep.subr.bf16.mxu1 %v3192_v19  ;;  %v3195_v19 = vcombine.low %v195_v8, %v211_v9  ;;  %v3164_v21 = vcombine.high %v163_v16, %v179_v17  ;;  %v164_v8 = vld [vmem:[#allocation2 + $0x330] sm:$0xff] }
  0x4b   :  { %v180_v9 = vld [vmem:[#allocation2 + $0x3b0] sm:$0xff] }
  0x4c   :  { %1500 = vmatpush1.bf16.msra.mxu0 %v3189_v24  ;;  %v131_v24 = vld [vmem:[#allocation2 + $0x228] sm:$0xff] }
  0x4d   :  { %1541 = vmatpush1.bf16.msra.mxu1 %v3191_v25  ;;  %1501 = vmatprep.subr.bf16.mxu0 %v3158_v26  ;;  %v147_v25 = vld [vmem:[#allocation2 + $0x2a8] sm:$0xff]  ;;  %v3161_v26 = vcombine.low %v162_v14, %v178_v15  ;;  %v3166_v14 = vcombine.high %v164_v8, %v180_v9 }
  0x4e   :  { %1542 = vmatprep.subr.bf16.mxu1 %v3160_v27  ;;  %v3163_v27 = vcombine.low %v163_v16, %v179_v17  ;;  %v3132_v29 = vcombine.high %v131_v24, %v147_v25  ;;  %v132_v16 = vld [vmem:[#allocation2 + $0x230] sm:$0xff] }
  0x4f   :  { %v148_v17 = vld [vmem:[#allocation2 + $0x2b0] sm:$0xff] }
  0x50   :  { %1502 = vmatpush1.bf16.msra.mxu0 %v3157_v32  ;;  %v99_v32 = vld [vmem:[#allocation2 + $0x128] sm:$0xff] }
  0x51   :  { %1543 = vmatpush1.bf16.msra.mxu1 %v3159_v33  ;;  %1503 = vmatprep.subr.bf16.mxu0 %v3126_v34  ;;  %v115_v33 = vld [vmem:[#allocation2 + $0x1a8] sm:$0xff]  ;;  %v3129_v34 = vcombine.low %v130_v22, %v146_v23  ;;  %v3134_v22 = vcombine.high %v132_v16, %v148_v17 }
  0x52   :  { %1544 = vmatprep.subr.bf16.mxu1 %v3128_v35  ;;  %v3131_v35 = vcombine.low %v131_v24, %v147_v25  ;;  %v3100_v37 = vcombine.high %v99_v32, %v115_v33  ;;  %v100_v24 = vld [vmem:[#allocation2 + $0x130] sm:$0xff] }
  0x53   :  { %v116_v25 = vld [vmem:[#allocation2 + $0x1b0] sm:$0xff] }
  0x54   :  { %1504 = vmatpush1.bf16.msra.mxu0 %v3125_v40  ;;  %v67_v40 = vld [vmem:[#allocation2 + $0x28] sm:$0xff] }
  0x55   :  { %1545 = vmatpush1.bf16.msra.mxu1 %v3127_v41  ;;  %1505 = vmatprep.subr.bf16.mxu0 %v3094_v42  ;;  %v83_v41 = vld [vmem:[#allocation2 + $0xa8] sm:$0xff]  ;;  %v3097_v42 = vcombine.low %v98_v30, %v114_v31  ;;  %v3102_v30 = vcombine.high %v100_v24, %v116_v25 }
  0x56   :  { %1546 = vmatprep.subr.bf16.mxu1 %v3096_v43  ;;  %v3099_v43 = vcombine.low %v99_v32, %v115_v33  ;;  %v3068_v45 = vcombine.high %v67_v40, %v83_v41  ;;  %v68_v32 = vld [vmem:[#allocation2 + $0x30] sm:$0xff] }
  0x57   :  { %v84_v33 = vld [vmem:[#allocation2 + $0xb0] sm:$0xff] }
  0x58   :  { %1506 = vmatpush1.bf16.msra.mxu0 %v3093_v48  ;;  %v3065_v48 = vcombine.low %v66_v38, %v82_v39  ;;  %v3070_v38 = vcombine.high %v68_v32, %v84_v33 }
  0x59   :  { %1547 = vmatpush1.bf16.msra.mxu1 %v3095_v49  ;;  %1507 = vmatprep.subr.bf16.mxu0 %v3062_v50  ;;  %v3067_v49 = vcombine.low %v67_v40, %v83_v41  ;;  %v3262_v50 = vcombine.high %v260_v46, %v260_v46  ;;  %v262_v40 = vld [vmem:[#allocation2 + $0x640] sm:$0x33]  ;;  %v263_v41 = vld [vmem:[#allocation2 + $0x648] sm:$0x33] }
  0x5a   :  { %1548 = vmatprep.subr.bf16.mxu1 %v3064_v51  ;;  %v3264_v51 = vcombine.high %v261_v47, %v261_v47  ;;  %v3265_v46 = vcombine.low %v262_v40, %v262_v40  ;;  %v3267_v47 = vcombine.low %v263_v41, %v263_v41 }
  0x5c   :  { %1508 = vmatpush1.bf16.msra.mxu0 %v3061_v54  ;;  %v228_v54 = vld [vmem:[#allocation2 + $0x530] sm:$0xff]  ;;  %v1364_v52 = vsel %vm1314_vm0, %v3265_v46, 0  ;;  %v1370_v53 = vsel %vm1314_vm0, %v3267_v47, 0 }
  0x5d   :  { %1549 = vmatpush1.bf16.msra.mxu1 %v3063_v55  ;;  %3289 = vmatprep.subr.msk.bf16.mxu0 %vm1314_vm0, %v3258_v56  ;;  %v244_v55 = vld [vmem:[#allocation2 + $0x5b0] sm:$0xff]  ;;  %v229_v56 = vld [vmem:[#allocation2 + $0x538] sm:$0xff] }
  0x5e   :  { %3291 = vmatprep.subr.msk.bf16.mxu1 %vm1314_vm0, %v3260_v57  ;;  %v245_v57 = vld [vmem:[#allocation2 + $0x5b8] sm:$0xff]  ;;  %v3230_v60 = vcombine.high %v228_v54, %v244_v55 }
  0x5f   :  { %3286 = vmatmul.mubr.msk.bf16.vlgmr.msra.gmra.mxu0 %vm1310_vm1, %v3494_v7  ;;  %v3232_v61 = vcombine.high %v229_v56, %v245_v57 }
  0x60   :  { %3288 = vmatmul.mubr.msk.bf16.vlgmr.msra.gmra.mxu1 %vm1310_vm1, %v3494_v7  ;;  %1578 = vmatpush1.bf16.msra.mxu0 %v1340_v1  ;;  %v197_v1 = vld [vmem:[#allocation2 + $0x438] sm:$0xff] }
  0x61   :  { %1619 = vmatpush1.bf16.msra.mxu1 %v1346_v2  ;;  %1579 = vmatprep.subr.bf16.mxu0 %v3226_v3  ;;  %v213_v2 = vld [vmem:[#allocation2 + $0x4b8] sm:$0xff]  ;;  %v3229_v3 = vcombine.low %v228_v54, %v244_v55 }
  0x62   :  { %1620 = vmatprep.subr.bf16.mxu1 %v3228_v4  ;;  %1607 = vmatprep.mubr.bf16.mxu0 %v3441_v0  ;;  %v3231_v4 = vcombine.low %v229_v56, %v245_v57  ;;  %v3200_v6 = vcombine.high %v197_v1, %v213_v2  ;;  %v198_v56 = vld [vmem:[#allocation2 + $0x440] sm:$0xff] }
  0x63   :  { %1648 = vmatprep.mubr.bf16.mxu1 %v3441_v0  ;;  %v214_v57 = vld [vmem:[#allocation2 + $0x4c0] sm:$0xff] }
  0x64   :  { %1580 = vmatpush1.bf16.msra.mxu0 %v3225_v10  ;;  %v165_v10 = vld [vmem:[#allocation2 + $0x338] sm:$0xff] }
  0x65   :  { %1621 = vmatpush1.bf16.msra.mxu1 %v3227_v11  ;;  %1581 = vmatprep.subr.bf16.mxu0 %v3194_v12  ;;  %v181_v11 = vld [vmem:[#allocation2 + $0x3b8] sm:$0xff]  ;;  %v3197_v12 = vcombine.low %v196_v62, %v212_v63  ;;  %v3202_v62 = vcombine.high %v198_v56, %v214_v57 }
  0x66   :  { %1622 = vmatprep.subr.bf16.mxu1 %v3196_v13  ;;  %v3199_v13 = vcombine.low %v197_v1, %v213_v2  ;;  %v3168_v15 = vcombine.high %v165_v10, %v181_v11  ;;  %v166_v1 = vld [vmem:[#allocation2 + $0x340] sm:$0xff] }
  0x67   :  { %v182_v2 = vld [vmem:[#allocation2 + $0x3c0] sm:$0xff] }
  0x68   :  { %1582 = vmatpush1.bf16.msra.mxu0 %v3193_v18  ;;  %v133_v18 = vld [vmem:[#allocation2 + $0x238] sm:$0xff] }
  0x69   :  { %1623 = vmatpush1.bf16.msra.mxu1 %v3195_v19  ;;  %1583 = vmatprep.subr.bf16.mxu0 %v3162_v20  ;;  %v149_v19 = vld [vmem:[#allocation2 + $0x2b8] sm:$0xff]  ;;  %v3165_v20 = vcombine.low %v164_v8, %v180_v9  ;;  %v3170_v8 = vcombine.high %v166_v1, %v182_v2 }
  0x6a   :  { %1624 = vmatprep.subr.bf16.mxu1 %v3164_v21  ;;  %v3167_v21 = vcombine.low %v165_v10, %v181_v11  ;;  %v3136_v23 = vcombine.high %v133_v18, %v149_v19  ;;  %v134_v10 = vld [vmem:[#allocation2 + $0x240] sm:$0xff] }
  0x6b   :  { %v150_v11 = vld [vmem:[#allocation2 + $0x2c0] sm:$0xff] }
  0x6c   :  { %1584 = vmatpush1.bf16.msra.mxu0 %v3161_v26  ;;  %v101_v26 = vld [vmem:[#allocation2 + $0x138] sm:$0xff] }
  0x6d   :  { %1625 = vmatpush1.bf16.msra.mxu1 %v3163_v27  ;;  %1585 = vmatprep.subr.bf16.mxu0 %v3130_v28  ;;  %v117_v27 = vld [vmem:[#allocation2 + $0x1b8] sm:$0xff]  ;;  %v3133_v28 = vcombine.low %v132_v16, %v148_v17  ;;  %v3138_v16 = vcombine.high %v134_v10, %v150_v11 }
  0x6e   :  { %1626 = vmatprep.subr.bf16.mxu1 %v3132_v29  ;;  %v3135_v29 = vcombine.low %v133_v18, %v149_v19  ;;  %v3104_v31 = vcombine.high %v101_v26, %v117_v27  ;;  %v102_v18 = vld [vmem:[#allocation2 + $0x140] sm:$0xff] }
  0x6f   :  { %v118_v19 = vld [vmem:[#allocation2 + $0x1c0] sm:$0xff] }
  0x70   :  { %1586 = vmatpush1.bf16.msra.mxu0 %v3129_v34  ;;  %v69_v34 = vld [vmem:[#allocation2 + $0x38] sm:$0xff] }
  0x71   :  { %1627 = vmatpush1.bf16.msra.mxu1 %v3131_v35  ;;  %1587 = vmatprep.subr.bf16.mxu0 %v3098_v36  ;;  %v85_v35 = vld [vmem:[#allocation2 + $0xb8] sm:$0xff]  ;;  %v3101_v36 = vcombine.low %v100_v24, %v116_v25  ;;  %v3106_v24 = vcombine.high %v102_v18, %v118_v19 }
  0x72   :  { %1628 = vmatprep.subr.bf16.mxu1 %v3100_v37  ;;  %v3103_v37 = vcombine.low %v101_v26, %v117_v27  ;;  %v3072_v39 = vcombine.high %v69_v34, %v85_v35  ;;  %v70_v26 = vld [vmem:[#allocation2 + $0x40] sm:$0xff] }
  0x73   :  { %v86_v27 = vld [vmem:[#allocation2 + $0xc0] sm:$0xff] }
  0x74   :  { %1588 = vmatpush1.bf16.msra.mxu0 %v3097_v42  ;;  %v3069_v42 = vcombine.low %v68_v32, %v84_v33  ;;  %v3074_v32 = vcombine.high %v70_v26, %v86_v27 }
  0x75   :  { %1629 = vmatpush1.bf16.msra.mxu1 %v3099_v43  ;;  %1589 = vmatprep.subr.bf16.mxu0 %v3066_v44  ;;  %v3071_v43 = vcombine.low %v69_v34, %v85_v35  ;;  %v3266_v44 = vcombine.high %v262_v40, %v262_v40  ;;  %v264_v34 = vld [vmem:[#allocation2 + $0x650] sm:$0x33]  ;;  %v265_v35 = vld [vmem:[#allocation2 + $0x658] sm:$0x33] }
  0x76   :  { %1630 = vmatprep.subr.bf16.mxu1 %v3068_v45  ;;  %v3268_v45 = vcombine.high %v263_v41, %v263_v41  ;;  %v3269_v40 = vcombine.low %v264_v34, %v264_v34  ;;  %v3271_v41 = vcombine.low %v265_v35, %v265_v35 }
  0x78   :  { %1590 = vmatpush1.bf16.msra.mxu0 %v3065_v48  ;;  %v230_v48 = vld [vmem:[#allocation2 + $0x540] sm:$0xff]  ;;  %v1376_v46 = vsel %vm1314_vm0, %v3269_v40, 0  ;;  %v1382_v47 = vsel %vm1314_vm0, %v3271_v41, 0 }
  0x79   :  { %1631 = vmatpush1.bf16.msra.mxu1 %v3067_v49  ;;  %3293 = vmatprep.subr.msk.bf16.mxu0 %vm1314_vm0, %v3262_v50  ;;  %v246_v49 = vld [vmem:[#allocation2 + $0x5c0] sm:$0xff]  ;;  %v231_v50 = vld [vmem:[#allocation2 + $0x548] sm:$0xff] }
  0x7a   :  { %3295 = vmatprep.subr.msk.bf16.mxu1 %vm1314_vm0, %v3264_v51  ;;  %v247_v51 = vld [vmem:[#allocation2 + $0x5c8] sm:$0xff]  ;;  %v3234_v54 = vcombine.high %v230_v48, %v246_v49 }
  0x7b   :  { %3290 = vmatmul.mubr.msk.bf16.vlgmr.msra.gmra.mxu0 %vm1310_vm1, %v3494_v7  ;;  %v3236_v55 = vcombine.high %v231_v50, %v247_v51 }
  0x7c   :  { %3292 = vmatmul.mubr.msk.bf16.vlgmr.msra.gmra.mxu1 %vm1310_vm1, %v3494_v7  ;;  %1660 = vmatpush1.bf16.msra.mxu0 %v1352_v58  ;;  %v199_v58 = vld [vmem:[#allocation2 + $0x448] sm:$0xff] }
  0x7d   :  { %1701 = vmatpush1.bf16.msra.mxu1 %v1358_v59  ;;  %1661 = vmatprep.subr.bf16.mxu0 %v3230_v60  ;;  %v215_v59 = vld [vmem:[#allocation2 + $0x4c8] sm:$0xff]  ;;  %v3233_v60 = vcombine.low %v230_v48, %v246_v49 }
  0x7e   :  { %1702 = vmatprep.subr.bf16.mxu1 %v3232_v61  ;;  %1689 = vmatprep.mubr.bf16.mxu0 %v3441_v0  ;;  %v3235_v61 = vcombine.low %v231_v50, %v247_v51  ;;  %v3204_v63 = vcombine.high %v199_v58, %v215_v59  ;;  %v200_v50 = vld [vmem:[#allocation2 + $0x450] sm:$0xff] }
  0x7f   :  { %1730 = vmatprep.mubr.bf16.mxu1 %v3441_v0  ;;  %v216_v51 = vld [vmem:[#allocation2 + $0x4d0] sm:$0xff] }
  0x80   :  { %1662 = vmatpush1.bf16.msra.mxu0 %v3229_v3  ;;  %v167_v3 = vld [vmem:[#allocation2 + $0x348] sm:$0xff] }
  0x81   :  { %1703 = vmatpush1.bf16.msra.mxu1 %v3231_v4  ;;  %1663 = vmatprep.subr.bf16.mxu0 %v3198_v5  ;;  %v183_v4 = vld [vmem:[#allocation2 + $0x3c8] sm:$0xff]  ;;  %v3201_v5 = vcombine.low %v198_v56, %v214_v57  ;;  %v3206_v56 = vcombine.high %v200_v50, %v216_v51 }
  0x82   :  { %1704 = vmatprep.subr.bf16.mxu1 %v3200_v6  ;;  %v3203_v6 = vcombine.low %v199_v58, %v215_v59  ;;  %v3172_v9 = vcombine.high %v167_v3, %v183_v4  ;;  %v168_v58 = vld [vmem:[#allocation2 + $0x350] sm:$0xff] }
  0x83   :  { %v184_v59 = vld [vmem:[#allocation2 + $0x3d0] sm:$0xff] }
  0x84   :  { %1664 = vmatpush1.bf16.msra.mxu0 %v3197_v12  ;;  %v135_v12 = vld [vmem:[#allocation2 + $0x248] sm:$0xff] }
  0x85   :  { %1705 = vmatpush1.bf16.msra.mxu1 %v3199_v13  ;;  %1665 = vmatprep.subr.bf16.mxu0 %v3166_v14  ;;  %v151_v13 = vld [vmem:[#allocation2 + $0x2c8] sm:$0xff]  ;;  %v3169_v14 = vcombine.low %v166_v1, %v182_v2  ;;  %v3174_v1 = vcombine.high %v168_v58, %v184_v59 }
  0x86   :  { %1706 = vmatprep.subr.bf16.mxu1 %v3168_v15  ;;  %v3171_v15 = vcombine.low %v167_v3, %v183_v4  ;;  %v3140_v17 = vcombine.high %v135_v12, %v151_v13  ;;  %v136_v3 = vld [vmem:[#allocation2 + $0x250] sm:$0xff] }
  0x87   :  { %v152_v4 = vld [vmem:[#allocation2 + $0x2d0] sm:$0xff] }
  0x88   :  { %1666 = vmatpush1.bf16.msra.mxu0 %v3165_v20  ;;  %v103_v20 = vld [vmem:[#allocation2 + $0x148] sm:$0xff] }
  0x89   :  { %1707 = vmatpush1.bf16.msra.mxu1 %v3167_v21  ;;  %1667 = vmatprep.subr.bf16.mxu0 %v3134_v22  ;;  %v119_v21 = vld [vmem:[#allocation2 + $0x1c8] sm:$0xff]  ;;  %v3137_v22 = vcombine.low %v134_v10, %v150_v11  ;;  %v3142_v10 = vcombine.high %v136_v3, %v152_v4 }
  0x8a   :  { %1708 = vmatprep.subr.bf16.mxu1 %v3136_v23  ;;  %v3139_v23 = vcombine.low %v135_v12, %v151_v13  ;;  %v3108_v25 = vcombine.high %v103_v20, %v119_v21  ;;  %v104_v12 = vld [vmem:[#allocation2 + $0x150] sm:$0xff] }
  0x8b   :  { %v120_v13 = vld [vmem:[#allocation2 + $0x1d0] sm:$0xff] }
  0x8c   :  { %1668 = vmatpush1.bf16.msra.mxu0 %v3133_v28  ;;  %v71_v28 = vld [vmem:[#allocation2 + $0x48] sm:$0xff] }
  0x8d   :  { %1709 = vmatpush1.bf16.msra.mxu1 %v3135_v29  ;;  %1669 = vmatprep.subr.bf16.mxu0 %v3102_v30  ;;  %v87_v29 = vld [vmem:[#allocation2 + $0xc8] sm:$0xff]  ;;  %v3105_v30 = vcombine.low %v102_v18, %v118_v19  ;;  %v3110_v18 = vcombine.high %v104_v12, %v120_v13 }
  0x8e   :  { %1710 = vmatprep.subr.bf16.mxu1 %v3104_v31  ;;  %v3107_v31 = vcombine.low %v103_v20, %v119_v21  ;;  %v3076_v33 = vcombine.high %v71_v28, %v87_v29  ;;  %v72_v20 = vld [vmem:[#allocation2 + $0x50] sm:$0xff] }
  0x8f   :  { %v88_v21 = vld [vmem:[#allocation2 + $0xd0] sm:$0xff] }
  0x90   :  { %1670 = vmatpush1.bf16.msra.mxu0 %v3101_v36  ;;  %v3073_v36 = vcombine.low %v70_v26, %v86_v27  ;;  %v3078_v26 = vcombine.high %v72_v20, %v88_v21 }
  0x91   :  { %1711 = vmatpush1.bf16.msra.mxu1 %v3103_v37  ;;  %1671 = vmatprep.subr.bf16.mxu0 %v3070_v38  ;;  %v3075_v37 = vcombine.low %v71_v28, %v87_v29  ;;  %v3270_v38 = vcombine.high %v264_v34, %v264_v34  ;;  %v266_v28 = vld [vmem:[#allocation2 + $0x660] sm:$0x33]  ;;  %v267_v29 = vld [vmem:[#allocation2 + $0x668] sm:$0x33] }
  0x92   :  { %1712 = vmatprep.subr.bf16.mxu1 %v3072_v39  ;;  %v3272_v39 = vcombine.high %v265_v35, %v265_v35  ;;  %v3273_v34 = vcombine.low %v266_v28, %v266_v28  ;;  %v3275_v35 = vcombine.low %v267_v29, %v267_v29 }
  0x94   :  { %1672 = vmatpush1.bf16.msra.mxu0 %v3069_v42  ;;  %v232_v42 = vld [vmem:[#allocation2 + $0x550] sm:$0xff]  ;;  %v1388_v40 = vsel %vm1314_vm0, %v3273_v34, 0  ;;  %v1394_v41 = vsel %vm1314_vm0, %v3275_v35, 0 }
  0x95   :  { %1713 = vmatpush1.bf16.msra.mxu1 %v3071_v43  ;;  %3297 = vmatprep.subr.msk.bf16.mxu0 %vm1314_vm0, %v3266_v44  ;;  %v248_v43 = vld [vmem:[#allocation2 + $0x5d0] sm:$0xff]  ;;  %v233_v44 = vld [vmem:[#allocation2 + $0x558] sm:$0xff] }
  0x96   :  { %3299 = vmatprep.subr.msk.bf16.mxu1 %vm1314_vm0, %v3268_v45  ;;  %v249_v45 = vld [vmem:[#allocation2 + $0x5d8] sm:$0xff]  ;;  %v3238_v48 = vcombine.high %v232_v42, %v248_v43 }
  0x97   :  { %3294 = vmatmul.mubr.msk.bf16.vlgmr.msra.gmra.mxu0 %vm1310_vm1, %v3494_v7  ;;  %v3240_v49 = vcombine.high %v233_v44, %v249_v45 }
  0x98   :  { %3296 = vmatmul.mubr.msk.bf16.vlgmr.msra.gmra.mxu1 %vm1310_vm1, %v3494_v7  ;;  %1742 = vmatpush1.bf16.msra.mxu0 %v1364_v52  ;;  %v201_v52 = vld [vmem:[#allocation2 + $0x458] sm:$0xff] }
  0x99   :  { %1783 = vmatpush1.bf16.msra.mxu1 %v1370_v53  ;;  %1743 = vmatprep.subr.bf16.mxu0 %v3234_v54  ;;  %v217_v53 = vld [vmem:[#allocation2 + $0x4d8] sm:$0xff]  ;;  %v3237_v54 = vcombine.low %v232_v42, %v248_v43 }
  0x9a   :  { %1784 = vmatprep.subr.bf16.mxu1 %v3236_v55  ;;  %1771 = vmatprep.mubr.bf16.mxu0 %v3441_v0  ;;  %v3239_v55 = vcombine.low %v233_v44, %v249_v45  ;;  %v3208_v57 = vcombine.high %v201_v52, %v217_v53  ;;  %v202_v44 = vld [vmem:[#allocation2 + $0x460] sm:$0xff] }
  0x9b   :  { %1812 = vmatprep.mubr.bf16.mxu1 %v3441_v0  ;;  %v218_v45 = vld [vmem:[#allocation2 + $0x4e0] sm:$0xff] }
  0x9c   :  { %1744 = vmatpush1.bf16.msra.mxu0 %v3233_v60  ;;  %v169_v60 = vld [vmem:[#allocation2 + $0x358] sm:$0xff] }
  0x9d   :  { %1785 = vmatpush1.bf16.msra.mxu1 %v3235_v61  ;;  %1745 = vmatprep.subr.bf16.mxu0 %v3202_v62  ;;  %v185_v61 = vld [vmem:[#allocation2 + $0x3d8] sm:$0xff]  ;;  %v3205_v62 = vcombine.low %v200_v50, %v216_v51  ;;  %v3210_v50 = vcombine.high %v202_v44, %v218_v45 }
  0x9e   :  { %1786 = vmatprep.subr.bf16.mxu1 %v3204_v63  ;;  %v3207_v63 = vcombine.low %v201_v52, %v217_v53  ;;  %v3176_v2 = vcombine.high %v169_v60, %v185_v61  ;;  %v170_v52 = vld [vmem:[#allocation2 + $0x360] sm:$0xff] }
  0x9f   :  { %v186_v53 = vld [vmem:[#allocation2 + $0x3e0] sm:$0xff] }
  0xa0   :  { %1746 = vmatpush1.bf16.msra.mxu0 %v3201_v5  ;;  %v137_v5 = vld [vmem:[#allocation2 + $0x258] sm:$0xff] }
  0xa1   :  { %1787 = vmatpush1.bf16.msra.mxu1 %v3203_v6  ;;  %1747 = vmatprep.subr.bf16.mxu0 %v3170_v8  ;;  %v153_v6 = vld [vmem:[#allocation2 + $0x2d8] sm:$0xff]  ;;  %v3173_v8 = vcombine.low %v168_v58, %v184_v59  ;;  %v3178_v58 = vcombine.high %v170_v52, %v186_v53 }
  0xa2   :  { %1788 = vmatprep.subr.bf16.mxu1 %v3172_v9  ;;  %v3175_v9 = vcombine.low %v169_v60, %v185_v61  ;;  %v3144_v11 = vcombine.high %v137_v5, %v153_v6  ;;  %v138_v60 = vld [vmem:[#allocation2 + $0x260] sm:$0xff] }
  0xa3   :  { %v154_v61 = vld [vmem:[#allocation2 + $0x2e0] sm:$0xff] }
  0xa4   :  { %1748 = vmatpush1.bf16.msra.mxu0 %v3169_v14  ;;  %v105_v14 = vld [vmem:[#allocation2 + $0x158] sm:$0xff] }
  0xa5   :  { %1789 = vmatpush1.bf16.msra.mxu1 %v3171_v15  ;;  %1749 = vmatprep.subr.bf16.mxu0 %v3138_v16  ;;  %v121_v15 = vld [vmem:[#allocation2 + $0x1d8] sm:$0xff]  ;;  %v3141_v16 = vcombine.low %v136_v3, %v152_v4  ;;  %v3146_v3 = vcombine.high %v138_v60, %v154_v61 }
  0xa6   :  { %1790 = vmatprep.subr.bf16.mxu1 %v3140_v17  ;;  %v3143_v17 = vcombine.low %v137_v5, %v153_v6  ;;  %v3112_v19 = vcombine.high %v105_v14, %v121_v15  ;;  %v106_v5 = vld [vmem:[#allocation2 + $0x160] sm:$0xff] }
  0xa7   :  { %v122_v6 = vld [vmem:[#allocation2 + $0x1e0] sm:$0xff] }
  0xa8   :  { %1750 = vmatpush1.bf16.msra.mxu0 %v3137_v22  ;;  %v73_v22 = vld [vmem:[#allocation2 + $0x58] sm:$0xff] }
  0xa9   :  { %1791 = vmatpush1.bf16.msra.mxu1 %v3139_v23  ;;  %1751 = vmatprep.subr.bf16.mxu0 %v3106_v24  ;;  %v89_v23 = vld [vmem:[#allocation2 + $0xd8] sm:$0xff]  ;;  %v3109_v24 = vcombine.low %v104_v12, %v120_v13  ;;  %v3114_v12 = vcombine.high %v106_v5, %v122_v6 }
  0xaa   :  { %1792 = vmatprep.subr.bf16.mxu1 %v3108_v25  ;;  %v3111_v25 = vcombine.low %v105_v14, %v121_v15  ;;  %v3080_v27 = vcombine.high %v73_v22, %v89_v23  ;;  %v74_v14 = vld [vmem:[#allocation2 + $0x60] sm:$0xff] }
  0xab   :  { %v90_v15 = vld [vmem:[#allocation2 + $0xe0] sm:$0xff] }
  0xac   :  { %1752 = vmatpush1.bf16.msra.mxu0 %v3105_v30  ;;  %v3077_v30 = vcombine.low %v72_v20, %v88_v21  ;;  %v3082_v20 = vcombine.high %v74_v14, %v90_v15 }
  0xad   :  { %1793 = vmatpush1.bf16.msra.mxu1 %v3107_v31  ;;  %1753 = vmatprep.subr.bf16.mxu0 %v3074_v32  ;;  %v3079_v31 = vcombine.low %v73_v22, %v89_v23  ;;  %v3274_v32 = vcombine.high %v266_v28, %v266_v28  ;;  %v268_v22 = vld [vmem:[#allocation2 + $0x670] sm:$0x33]  ;;  %v269_v23 = vld [vmem:[#allocation2 + $0x678] sm:$0x33] }
  0xae   :  { %1794 = vmatprep.subr.bf16.mxu1 %v3076_v33  ;;  %v3276_v33 = vcombine.high %v267_v29, %v267_v29  ;;  %v3277_v28 = vcombine.low %v268_v22, %v268_v22  ;;  %v3279_v29 = vcombine.low %v269_v23, %v269_v23 }
  0xb0   :  { %1754 = vmatpush1.bf16.msra.mxu0 %v3073_v36  ;;  %v234_v36 = vld [vmem:[#allocation2 + $0x560] sm:$0xff]  ;;  %v1400_v34 = vsel %vm1314_vm0, %v3277_v28, 0  ;;  %v1406_v35 = vsel %vm1314_vm0, %v3279_v29, 0 }
  0xb1   :  { %1795 = vmatpush1.bf16.msra.mxu1 %v3075_v37  ;;  %3301 = vmatprep.subr.msk.bf16.mxu0 %vm1314_vm0, %v3270_v38  ;;  %v250_v37 = vld [vmem:[#allocation2 + $0x5e0] sm:$0xff]  ;;  %v235_v38 = vld [vmem:[#allocation2 + $0x568] sm:$0xff] }
  0xb2   :  { %3303 = vmatprep.subr.msk.bf16.mxu1 %vm1314_vm0, %v3272_v39  ;;  %v251_v39 = vld [vmem:[#allocation2 + $0x5e8] sm:$0xff]  ;;  %v3242_v42 = vcombine.high %v234_v36, %v250_v37 }
  0xb3   :  { %3298 = vmatmul.mubr.msk.bf16.vlgmr.msra.gmra.mxu0 %vm1310_vm1, %v3494_v7  ;;  %v3244_v43 = vcombine.high %v235_v38, %v251_v39 }
  0xb4   :  { %3300 = vmatmul.mubr.msk.bf16.vlgmr.msra.gmra.mxu1 %vm1310_vm1, %v3494_v7  ;;  %1824 = vmatpush1.bf16.msra.mxu0 %v1376_v46  ;;  %v203_v46 = vld [vmem:[#allocation2 + $0x468] sm:$0xff] }
  0xb5   :  { %1865 = vmatpush1.bf16.msra.mxu1 %v1382_v47  ;;  %1825 = vmatprep.subr.bf16.mxu0 %v3238_v48  ;;  %v219_v47 = vld [vmem:[#allocation2 + $0x4e8] sm:$0xff]  ;;  %v3241_v48 = vcombine.low %v234_v36, %v250_v37 }
  0xb6   :  { %1866 = vmatprep.subr.bf16.mxu1 %v3240_v49  ;;  %1853 = vmatprep.mubr.bf16.mxu0 %v3441_v0  ;;  %v3243_v49 = vcombine.low %v235_v38, %v251_v39  ;;  %v3212_v51 = vcombine.high %v203_v46, %v219_v47  ;;  %v204_v38 = vld [vmem:[#allocation2 + $0x470] sm:$0xff] }
  0xb7   :  { %1894 = vmatprep.mubr.bf16.mxu1 %v3441_v0  ;;  %v220_v39 = vld [vmem:[#allocation2 + $0x4f0] sm:$0xff] }
  0xb8   :  { %1826 = vmatpush1.bf16.msra.mxu0 %v3237_v54  ;;  %v171_v54 = vld [vmem:[#allocation2 + $0x368] sm:$0xff] }
  0xb9   :  { %1867 = vmatpush1.bf16.msra.mxu1 %v3239_v55  ;;  %1827 = vmatprep.subr.bf16.mxu0 %v3206_v56  ;;  %v187_v55 = vld [vmem:[#allocation2 + $0x3e8] sm:$0xff]  ;;  %v3209_v56 = vcombine.low %v202_v44, %v218_v45  ;;  %v3214_v44 = vcombine.high %v204_v38, %v220_v39 }
  0xba   :  { %1868 = vmatprep.subr.bf16.mxu1 %v3208_v57  ;;  %v3211_v57 = vcombine.low %v203_v46, %v219_v47  ;;  %v3180_v59 = vcombine.high %v171_v54, %v187_v55  ;;  %v172_v46 = vld [vmem:[#allocation2 + $0x370] sm:$0xff] }
  0xbb   :  { %v188_v47 = vld [vmem:[#allocation2 + $0x3f0] sm:$0xff] }
  0xbc   :  { %1828 = vmatpush1.bf16.msra.mxu0 %v3205_v62  ;;  %v139_v62 = vld [vmem:[#allocation2 + $0x268] sm:$0xff] }
  0xbd   :  { %1869 = vmatpush1.bf16.msra.mxu1 %v3207_v63  ;;  %1829 = vmatprep.subr.bf16.mxu0 %v3174_v1  ;;  %v155_v63 = vld [vmem:[#allocation2 + $0x2e8] sm:$0xff]  ;;  %v3177_v1 = vcombine.low %v170_v52, %v186_v53  ;;  %v3182_v52 = vcombine.high %v172_v46, %v188_v47 }
  0xbe   :  { %1870 = vmatprep.subr.bf16.mxu1 %v3176_v2  ;;  %v3179_v2 = vcombine.low %v171_v54, %v187_v55  ;;  %v3148_v4 = vcombine.high %v139_v62, %v155_v63  ;;  %v140_v54 = vld [vmem:[#allocation2 + $0x270] sm:$0xff] }
  0xbf   :  { %v156_v55 = vld [vmem:[#allocation2 + $0x2f0] sm:$0xff] }
  0xc0   :  { %1830 = vmatpush1.bf16.msra.mxu0 %v3173_v8  ;;  %v107_v8 = vld [vmem:[#allocation2 + $0x168] sm:$0xff] }
  0xc1   :  { %1871 = vmatpush1.bf16.msra.mxu1 %v3175_v9  ;;  %1831 = vmatprep.subr.bf16.mxu0 %v3142_v10  ;;  %v123_v9 = vld [vmem:[#allocation2 + $0x1e8] sm:$0xff]  ;;  %v3145_v10 = vcombine.low %v138_v60, %v154_v61  ;;  %v3150_v60 = vcombine.high %v140_v54, %v156_v55  ;;  %v108_v61 = vld [vmem:[#allocation2 + $0x170] sm:$0xff] }
  0xc2   :  { %1872 = vmatprep.subr.bf16.mxu1 %v3144_v11  ;;  %v3147_v11 = vcombine.low %v139_v62, %v155_v63  ;;  %v3116_v13 = vcombine.high %v107_v8, %v123_v9  ;;  %v124_v62 = vld [vmem:[#allocation2 + $0x1f0] sm:$0xff]  ;;  %v109_v63 = vld [vmem:[#allocation2 + $0x178] sm:$0xff] }
  0xc4   :  { %1832 = vmatpush1.bf16.msra.mxu0 %v3141_v16  ;;  %v75_v16 = vld [vmem:[#allocation2 + $0x68] sm:$0xff] }
  0xc5   :  { %1873 = vmatpush1.bf16.msra.mxu1 %v3143_v17  ;;  %1833 = vmatprep.subr.bf16.mxu0 %v3110_v18  ;;  %v91_v17 = vld [vmem:[#allocation2 + $0xe8] sm:$0xff]  ;;  %v3113_v18 = vcombine.low %v106_v5, %v122_v6  ;;  %v76_v6 = vld [vmem:[#allocation2 + $0x70] sm:$0xff] }
  0xc6   :  { %1874 = vmatprep.subr.bf16.mxu1 %v3112_v19  ;;  %v3115_v19 = vcombine.low %v107_v8, %v123_v9  ;;  %v3084_v21 = vcombine.high %v75_v16, %v91_v17  ;;  %v92_v8 = vld [vmem:[#allocation2 + $0xf0] sm:$0xff]  ;;  %v77_v9 = vld [vmem:[#allocation2 + $0x78] sm:$0xff] }
  0xc8   :  { %1834 = vmatpush1.bf16.msra.mxu0 %v3109_v24  ;;  %v3081_v24 = vcombine.low %v74_v14, %v90_v15  ;;  %v3085_v15 = vcombine.low %v76_v6, %v92_v8 }
  0xc9   :  { %1875 = vmatpush1.bf16.msra.mxu1 %v3111_v25  ;;  %1835 = vmatprep.subr.bf16.mxu0 %v3078_v26  ;;  %v3083_v25 = vcombine.low %v75_v16, %v91_v17  ;;  %v3278_v26 = vcombine.high %v268_v22, %v268_v22 }
  0xca   :  { %1876 = vmatprep.subr.bf16.mxu1 %v3080_v27  ;;  %v3280_v27 = vcombine.high %v269_v23, %v269_v23 }
  0xcc   :  { %1836 = vmatpush1.bf16.msra.mxu0 %v3077_v30  ;;  %v236_v30 = vld [vmem:[#allocation2 + $0x570] sm:$0xff] }
  0xcd   :  { %1877 = vmatpush1.bf16.msra.mxu1 %v3079_v31  ;;  %3305 = vmatprep.subr.msk.bf16.mxu0 %vm1314_vm0, %v3274_v32  ;;  %v252_v31 = vld [vmem:[#allocation2 + $0x5f0] sm:$0xff]  ;;  %v237_v32 = vld [vmem:[#allocation2 + $0x578] sm:$0xff] }
  0xce   :  { %3307 = vmatprep.subr.msk.bf16.mxu1 %vm1314_vm0, %v3276_v33  ;;  %v253_v33 = vld [vmem:[#allocation2 + $0x5f8] sm:$0xff]  ;;  %v3246_v36 = vcombine.high %v236_v30, %v252_v31 }
  0xcf   :  { %3302 = vmatmul.mubr.msk.bf16.vlgmr.msra.gmra.mxu0 %vm1310_vm1, %v3494_v7  ;;  %v3248_v37 = vcombine.high %v237_v32, %v253_v33 }
  0xd0   :  { %3304 = vmatmul.mubr.msk.bf16.vlgmr.msra.gmra.mxu1 %vm1310_vm1, %v3494_v7  ;;  %1906 = vmatpush1.bf16.msra.mxu0 %v1388_v40  ;;  %v205_v40 = vld [vmem:[#allocation2 + $0x478] sm:$0xff] }
  0xd1   :  { %1947 = vmatpush1.bf16.msra.mxu1 %v1394_v41  ;;  %1907 = vmatprep.subr.bf16.mxu0 %v3242_v42  ;;  %v221_v41 = vld [vmem:[#allocation2 + $0x4f8] sm:$0xff]  ;;  %v3245_v42 = vcombine.low %v236_v30, %v252_v31 }
  0xd2   :  { %1948 = vmatprep.subr.bf16.mxu1 %v3244_v43  ;;  %1935 = vmatprep.mubr.bf16.mxu0 %v3441_v0  ;;  %v3247_v43 = vcombine.low %v237_v32, %v253_v33  ;;  %v3216_v45 = vcombine.high %v205_v40, %v221_v41 }
  0xd3   :  { %1976 = vmatprep.mubr.bf16.mxu1 %v3441_v0 }
  0xd4   :  { %1908 = vmatpush1.bf16.msra.mxu0 %v3241_v48  ;;  %v173_v48 = vld [vmem:[#allocation2 + $0x378] sm:$0xff] }
  0xd5   :  { %1949 = vmatpush1.bf16.msra.mxu1 %v3243_v49  ;;  %1909 = vmatprep.subr.bf16.mxu0 %v3210_v50  ;;  %v189_v49 = vld [vmem:[#allocation2 + $0x3f8] sm:$0xff]  ;;  %v3213_v50 = vcombine.low %v204_v38, %v220_v39 }
  0xd6   :  { %1950 = vmatprep.subr.bf16.mxu1 %v3212_v51  ;;  %v3215_v51 = vcombine.low %v205_v40, %v221_v41  ;;  %v3184_v53 = vcombine.high %v173_v48, %v189_v49 }
  0xd8   :  { %1910 = vmatpush1.bf16.msra.mxu0 %v3209_v56  ;;  %v141_v56 = vld [vmem:[#allocation2 + $0x278] sm:$0xff] }
  0xd9   :  { %1951 = vmatpush1.bf16.msra.mxu1 %v3211_v57  ;;  %1911 = vmatprep.subr.bf16.mxu0 %v3178_v58  ;;  %v157_v57 = vld [vmem:[#allocation2 + $0x2f8] sm:$0xff]  ;;  %v3181_v58 = vcombine.low %v172_v46, %v188_v47 }
  0xda   :  { %1952 = vmatprep.subr.bf16.mxu1 %v3180_v59  ;;  %v3183_v59 = vcombine.low %v173_v48, %v189_v49 }
  0xdc   :  { %1912 = vmatpush1.bf16.msra.mxu0 %v3177_v1  ;;  %v125_v1 = vld [vmem:[#allocation2 + $0x1f8] sm:$0xff] }
  0xdd   :  { %1953 = vmatpush1.bf16.msra.mxu1 %v3179_v2  ;;  %1913 = vmatprep.subr.bf16.mxu0 %v3146_v3  ;;  %v3149_v2 = vcombine.low %v140_v54, %v156_v55  ;;  %v3151_v3 = vcombine.low %v141_v56, %v157_v57  ;;  %v3120_v5 = vcombine.high %v109_v63, %v125_v1 }
  0xde   :  { %1954 = vmatprep.subr.bf16.mxu1 %v3148_v4  ;;  %v3118_v4 = vcombine.high %v108_v61, %v124_v62 }
  0xe0   :  { %1914 = vmatpush1.bf16.msra.mxu0 %v3145_v10  ;;  %v93_v10 = vld [vmem:[#allocation2 + $0xf8] sm:$0xff] }
  0xe1   :  { %1955 = vmatpush1.bf16.msra.mxu1 %v3147_v11  ;;  %1915 = vmatprep.subr.bf16.mxu0 %v3114_v12  ;;  %v3117_v11 = vcombine.low %v108_v61, %v124_v62  ;;  %v3119_v12 = vcombine.low %v109_v63, %v125_v1  ;;  %v3088_v14 = vcombine.high %v77_v9, %v93_v10 }
  0xe2   :  { %1956 = vmatprep.subr.bf16.mxu1 %v3116_v13  ;;  %v3086_v13 = vcombine.high %v76_v6, %v92_v8  ;;  %v3087_v16 = vcombine.low %v77_v9, %v93_v10 }
  0xe4   :  { %1916 = vmatpush1.bf16.msra.mxu0 %v3113_v18 }
  0xe5   :  { %1957 = vmatpush1.bf16.msra.mxu1 %v3115_v19  ;;  %1917 = vmatprep.subr.bf16.mxu0 %v3082_v20 }
  0xe6   :  { %1958 = vmatprep.subr.bf16.mxu1 %v3084_v21 }
  0xe8   :  { %1918 = vmatpush1.bf16.msra.mxu0 %v3081_v24 }
  0xe9   :  { %1959 = vmatpush1.bf16.msra.mxu1 %v3083_v25  ;;  %3309 = vmatprep.subr.msk.bf16.mxu0 %vm1314_vm0, %v3278_v26 }
  0xea   :  { %3311 = vmatprep.subr.msk.bf16.mxu1 %vm1314_vm0, %v3280_v27 }
  0xeb   :  { %3306 = vmatmul.mubr.msk.bf16.vlgmr.msra.gmra.mxu0 %vm1310_vm1, %v3494_v7 }
  0xec   :  { %3308 = vmatmul.mubr.msk.bf16.vlgmr.msra.gmra.mxu1 %vm1310_vm1, %v3494_v7  ;;  %1988 = vmatpush1.bf16.msra.mxu0 %v1400_v34 }
  0xed   :  { %2029 = vmatpush1.bf16.msra.mxu1 %v1406_v35  ;;  %1989 = vmatprep.subr.bf16.mxu0 %v3246_v36 }
  0xee   :  { %2030 = vmatprep.subr.bf16.mxu1 %v3248_v37  ;;  %2017 = vmatprep.mubr.bf16.mxu0 %v3441_v0 }
  0xef   :  { %2058 = vmatprep.mubr.bf16.mxu1 %v3441_v0  ;;  %v3152_v0 = vcombine.high %v141_v56, %v157_v57 }
  0xf0   :  { %1990 = vmatpush1.bf16.msra.mxu0 %v3245_v42 }
  0xf1   :  { %2031 = vmatpush1.bf16.msra.mxu1 %v3247_v43  ;;  %1991 = vmatprep.subr.bf16.mxu0 %v3214_v44 }
  0xf2   :  { %2032 = vmatprep.subr.bf16.mxu1 %v3216_v45 }
  0xf4   :  { %1992 = vmatpush1.bf16.msra.mxu0 %v3213_v50 }
  0xf5   :  { %2033 = vmatpush1.bf16.msra.mxu1 %v3215_v51  ;;  %1993 = vmatprep.subr.bf16.mxu0 %v3182_v52 }
  0xf6   :  { %2034 = vmatprep.subr.bf16.mxu1 %v3184_v53 }
  0xf8   :  { %1994 = vmatpush1.bf16.msra.mxu0 %v3181_v58 }
  0xf9   :  { %2035 = vmatpush1.bf16.msra.mxu1 %v3183_v59  ;;  %1995 = vmatprep.subr.bf16.mxu0 %v3150_v60 }
  0xfa   :  { %2036 = vmatprep.subr.bf16.mxu1 %v3152_v0 }
  0xfc   :  { %1996 = vmatpush1.bf16.msra.mxu0 %v3149_v2 }
  0xfd   :  { %2037 = vmatpush1.bf16.msra.mxu1 %v3151_v3  ;;  %1997 = vmatprep.subr.bf16.mxu0 %v3118_v4 }
  0xfe   :  { %2038 = vmatprep.subr.bf16.mxu1 %v3120_v5 }
 0x100   :  { %1998 = vmatpush1.bf16.msra.mxu0 %v3117_v11 }
 0x101   :  { %2039 = vmatpush1.bf16.msra.mxu1 %v3119_v12  ;;  %1999 = vmatprep.subr.bf16.mxu0 %v3086_v13 }
 0x102   :  { %2040 = vmatprep.subr.bf16.mxu1 %v3088_v14 }
 0x103   :  { %v3566_v17 = vpop.f32.mrf.mxu0 }
 0x104   :  { %v3568_v18 = vpop.f32.mrf.mxu1  ;;  %2000 = vmatpush1.bf16.msra.mxu0 %v3085_v15  ;;  %v2083_v40 = vmul.f32 %v3566_v17, %v3566_v17  ;;  %v2067_v42 = vsel %vm1314_vm0, %v3566_v17, 0.0 }
 0x105   :  { %2041 = vmatpush1.bf16.msra.mxu1 %v3087_v16  ;;  %v3570_v19 = vpop.f32.mrf.mxu0  ;;  %v2117_v41 = vmul.f32 %v3568_v18, %v3568_v18  ;;  %v2101_v44 = vsel %vm1314_vm0, %v3568_v18, 0.0  ;;  %v2068_v47 = vrot.slane %v2067_v42, 4 }
 0x106   :  { %v3572_v20 = vpop.f32.mrf.mxu1  ;;  %v2085_v43 = vsel %vm1314_vm0, %v2083_v40, 0.0  ;;  %v2084_v46 = vmul.f32 %v3570_v19, %v3570_v19  ;;  %v2102_v49 = vrot.slane %v2101_v44, 4  ;;  %v2074_v52 = vsel %vm1314_vm0, %v3570_v19, 0.0 }
 0x107   :  { %v1449_v21 = vpop.f32.mrf.mxu0  ;;  %3310 = vmatmul.mubr.msk.bf16.vlgmr.msra.gmra.mxu0 %vm1310_vm1, %v3494_v7  ;;  %v2119_v45 = vsel %vm1314_vm0, %v2117_v41, 0.0  ;;  %v2086_v48 = vrot.slane %v2085_v43, 4  ;;  %v2118_v50 = vmul.f32 %v3572_v20, %v3572_v20  ;;  %v2069_v54 = vadd.f32 %v2068_v47, %v2067_v42 }
 0x108   :  { %v1490_v22 = vpop.f32.mrf.mxu1  ;;  %3312 = vmatmul.mubr.msk.bf16.vlgmr.msra.gmra.mxu1 %vm1310_vm1, %v3494_v7  ;;  %v2120_v51 = vrot.slane %v2119_v45, 4  ;;  %v2092_v53 = vsel %vm1314_vm0, %v2084_v46, 0.0  ;;  %v2108_v55 = vsel %vm1314_vm0, %v3572_v20, 0.0  ;;  %v2103_v57 = vadd.f32 %v2102_v49, %v2101_v44 }
 0x109   :  { %v1450_v23 = vpop.f32.mrf.mxu0  ;;  %v2087_v56 = vadd.f32 %v2086_v48, %v2085_v43  ;;  %v2075_v58 = vrot.slane %v2074_v52, 4  ;;  %v2126_v59 = vsel %vm1314_vm0, %v2118_v50, 0.0  ;;  %v2093_v0 = vrot.slane %v2092_v53, 4 }
 0x10a   :  { %v1491_v24 = vpop.f32.mrf.mxu1  ;;  %v2121_v60 = vadd.f32 %v2120_v51, %v2119_v45  ;;  %v2109_v61 = vrot.slane %v2108_v55, 4  ;;  %v2070_v62 = vrot.slane %v2069_v54, 2  ;;  %v2127_v63 = vrot.slane %v2126_v59, 4 }
 0x10b   :  { %v2088_v1 = vrot.slane %v2087_v56, 2  ;;  %v2104_v2 = vrot.slane %v2103_v57, 2  ;;  %v2076_v3 = vadd.f32 %v2075_v58, %v2074_v52  ;;  %v2094_v5 = vadd.f32 %v2093_v0, %v2092_v53 }
 0x10c   :  { %v2122_v4 = vrot.slane %v2121_v60, 2  ;;  %v2110_v6 = vadd.f32 %v2109_v61, %v2108_v55  ;;  %v2071_v8 = vadd.f32 %v2070_v62, %v2069_v54  ;;  %v2128_v9 = vadd.f32 %v2127_v63, %v2126_v59 }
 0x10d   :  { %v2089_v12 = vadd.f32 %v2088_v1, %v2087_v56  ;;  %v2105_v13 = vadd.f32 %v2104_v2, %v2103_v57  ;;  %v2077_v14 = vrot.slane %v2076_v3, 2  ;;  %v2095_v16 = vrot.slane %v2094_v5, 2 }
 0x10e   :  { %v2123_v15 = vadd.f32 %v2122_v4, %v2121_v60  ;;  %v2111_v23 = vrot.slane %v2110_v6, 2 }
 0x10f   :  { %v2078_v40 = vadd.f32 %v2077_v14, %v2076_v3  ;;  %v2096_v47 = vadd.f32 %v2095_v16, %v2094_v5 }
 0x110   :  { %v2124_v41 = vrot.slane %v2123_v15, 1  ;;  %v2112_v48 = vadd.f32 %v2111_v23, %v2110_v6 }
 0x111   :  { %v2079_v54 = vrot.slane %v2078_v40, 1  ;;  %v2097_v62 = vrot.slane %v2096_v47, 1 }
 0x112   :  { %v2125_v61 = vadd.f32 %v2124_v41, %v2123_v15  ;;  %v2113_v63 = vrot.slane %v2112_v48, 1 }
 0x113   :  { %v2080_v16 = vadd.f32 %v2079_v54, %v2078_v40  ;;  %v2098_v23 = vadd.f32 %v2097_v62, %v2096_v47 }
 0x11f   :  { %v3578_v25 = vpop.f32.mrf.mxu0 }
 0x120   :  { %v3580_v26 = vpop.f32.mrf.mxu1  ;;  %v2135_v24 = vsel %vm1314_vm0, %v3578_v25, 0.0 }
 0x121   :  { %v3582_v27 = vpop.f32.mrf.mxu0  ;;  %v2136_v42 = vrot.slane %v2135_v24, 4  ;;  %v2169_v43 = vsel %vm1314_vm0, %v3580_v26, 0.0 }
 0x122   :  { %v3584_v28 = vpop.f32.mrf.mxu1  ;;  %v2152_v44 = vmul.f32 %v3582_v27, %v3582_v27  ;;  %v2170_v55 = vrot.slane %v2169_v43, 4  ;;  %v2142_v56 = vsel %vm1314_vm0, %v3582_v27, 0.0 }
 0x123   :  { %v1531_v29 = vpop.f32.mrf.mxu0  ;;  %v2137_v57 = vadd.f32 %v2136_v42, %v2135_v24  ;;  %v2143_v2 = vrot.slane %v2142_v56, 4  ;;  %v2186_v3 = vmul.f32 %v3584_v28, %v3584_v28  ;;  %v2176_v6 = vsel %vm1314_vm0, %v3584_v28, 0.0 }
 0x124   :  { %v1572_v30 = vpop.f32.mrf.mxu1  ;;  %v2151_v29 = vmul.f32 %v3578_v25, %v3578_v25  ;;  %v2160_v60 = vsel %vm1314_vm0, %v2152_v44, 0.0  ;;  %v2171_v4 = vadd.f32 %v2170_v55, %v2169_v43  ;;  %v2114_v24 = vadd.f32 %v2113_v63, %v2112_v48 }
 0x125   :  { %v1532_v31 = vpop.f32.mrf.mxu0  ;;  %v2185_v30 = vmul.f32 %v3580_v26, %v3580_v26  ;;  %v2161_v5 = vrot.slane %v2160_v60, 4 }
 0x126   :  { %v1573_v32 = vpop.f32.mrf.mxu1  ;;  %v2072_v31 = vrot.slane %v2071_v8, 1  ;;  %v2153_v49 = vsel %vm1314_vm0, %v2151_v29, 0.0  ;;  %v2144_v29 = vadd.f32 %v2143_v2, %v2142_v56 }
 0x127   :  { %v2129_v32 = vrot.slane %v2128_v9, 2  ;;  %v2187_v50 = vsel %vm1314_vm0, %v2185_v30, 0.0  ;;  %v2154_v58 = vrot.slane %v2153_v49, 4  ;;  %v2177_v30 = vrot.slane %v2176_v6, 4 }
 0x128   :  { %v2073_v51 = vadd.f32 %v2072_v31, %v2071_v8  ;;  %v2188_v59 = vrot.slane %v2187_v50, 4  ;;  %v2194_v31 = vsel %vm1314_vm0, %v2186_v3, 0.0  ;;  %v2145_v48 = vrot.slane %v2144_v29, 2 }
 0x129   :  { %v2130_v52 = vadd.f32 %v2129_v32, %v2128_v9  ;;  %v2195_v44 = vrot.slane %v2194_v31, 4 }
 0x12a   :  { %v2189_v14 = vadd.f32 %v2188_v59, %v2187_v50 }
 0x12b   :  { %v2131_v1 = vrot.slane %v2130_v52, 1 }
 0x12c   :  { %v2190_v43 = vrot.slane %v2189_v14, 2 }
 0x12e   :  { %v2191_v63 = vadd.f32 %v2190_v43, %v2189_v14 }
 0x130   :  { %v2192_v14 = vrot.slane %v2191_v63, 1 }
 0x13b   :  { %v3586_v33 = vpop.f32.mrf.mxu0 }
 0x13c   :  { %v3588_v34 = vpop.f32.mrf.mxu1  ;;  %v2219_v8 = vmul.f32 %v3586_v33, %v3586_v33  ;;  %v2203_v32 = vsel %vm1314_vm0, %v3586_v33, 0.0 }
 0x13d   :  { %3952 = vst [vmem:[#allocation9_spill] sm:$0xff] %v3588_v34  ;;  %v3590_v35 = vpop.f32.mrf.mxu0  ;;  %v2253_v47 = vmul.f32 %v3588_v34, %v3588_v34 }
 0x13e   :  { %3953 = vst [vmem:[#allocation10_spill] sm:$0xff] %v3590_v35  ;;  %v3592_v7 = vpop.f32.mrf.mxu1  ;;  %v2220_v40 = vmul.f32 %v3590_v35, %v3590_v35 }
 0x13f   :  { %3954 = vst [vmem:[#allocation11_spill] sm:$0xff] %v3592_v7  ;;  %v1613_v36 = vpop.f32.mrf.mxu0 }
 0x140   :  { %v1654_v37 = vpop.f32.mrf.mxu1  ;;  %v2228_v59 = vsel %vm1314_vm0, %v2220_v40, 0.0 }
 0x141   :  { %v1614_v38 = vpop.f32.mrf.mxu0 }
 0x142   :  { %v1655_v39 = vpop.f32.mrf.mxu1  ;;  %v2090_v38 = vrot.slane %v2089_v12, 1 }
 0x143   :  { %v2106_v39 = vrot.slane %v2105_v13, 1 }
 0x144   :  { %v2091_v0 = vadd.f32 %v2090_v38, %v2089_v12  ;;  %v2155_v12 = vadd.f32 %v2154_v58, %v2153_v49  ;;  %v2162_v38 = vadd.f32 %v2161_v5, %v2160_v60  ;;  %v2178_v49 = vadd.f32 %v2177_v30, %v2176_v6 }
 0x145   :  { %v2107_v53 = vadd.f32 %v2106_v39, %v2105_v13  ;;  %v2138_v13 = vrot.slane %v2137_v57, 2  ;;  %v2221_v39 = vsel %vm1314_vm0, %v2219_v8, 0.0  ;;  %v2196_v60 = vadd.f32 %v2195_v44, %v2194_v31 }
 0x146   :  { %v3645_v15 = vadd.f32 %v2125_v61, %v2091_v0  ;;  %v2156_v42 = vrot.slane %v2155_v12, 2  ;;  %v2222_v50 = vrot.slane %v2221_v39, 4  ;;  %v2163_v55 = vrot.slane %v2162_v38, 2 }
 0x147   :  { %v3643_v9 = vadd.f32 %v2107_v53, %v2073_v51  ;;  %v2139_v41 = vadd.f32 %v2138_v13, %v2137_v57  ;;  %v2210_v51 = vsel %vm1314_vm0, %v3590_v35, 0.0  ;;  %v2255_v61 = vsel %vm1314_vm0, %v2253_v47, 0.0 }
 0x148   :  { %v2157_v57 = vadd.f32 %v2156_v42, %v2155_v12  ;;  %v2211_v62 = vrot.slane %v2210_v51, 4  ;;  %v2179_v2 = vrot.slane %v2178_v49, 2  ;;  %v2223_v3 = vadd.f32 %v2222_v50, %v2221_v39 }
 0x149   :  { %v2140_v56 = vrot.slane %v2139_v41, 1  ;;  %v2164_v5 = vadd.f32 %v2163_v55, %v2162_v38  ;;  %v2229_v6 = vrot.slane %v2228_v59, 4  ;;  %v2254_v8 = vmul.f32 %v3592_v7, %v3592_v7 }
 0x14a   :  { %v2158_v12 = vrot.slane %v2157_v57, 1  ;;  %v2197_v30 = vrot.slane %v2196_v60, 2  ;;  %v2180_v43 = vadd.f32 %v2179_v2, %v2178_v49 }
 0x14b   :  { %v2141_v13 = vadd.f32 %v2140_v56, %v2139_v41  ;;  %v2165_v42 = vrot.slane %v2164_v5, 1  ;;  %v2230_v40 = vadd.f32 %v2229_v6, %v2228_v59  ;;  %v2262_v41 = vsel %vm1314_vm0, %v2254_v8, 0.0 }
 0x14c   :  { %v2198_v55 = vadd.f32 %v2197_v30, %v2196_v60  ;;  %v2263_v49 = vrot.slane %v2262_v41, 4 }
 0x14d   :  { %v2149_v44 = vadd.f32 %v2141_v13, %v3643_v9  ;;  %v2166_v8 = vadd.f32 %v2165_v42, %v2164_v5  ;;  %v2181_v9 = vrot.slane %v2180_v43, 1 }
 0x14e   :  { %v2199_v60 = vrot.slane %v2198_v55, 1  ;;  %v2264_v30 = vadd.f32 %v2263_v49, %v2262_v41 }
 0x157   :  { %v3614_v10 = vpop.f32.mrf.mxu0 }
 0x158   :  { %v3616_v11 = vpop.f32.mrf.mxu1 }
 0x159   :  { %3955 = vst [vmem:[#allocation12_spill] sm:$0xff] %v3616_v11  ;;  %v3618_v21 = vpop.f32.mrf.mxu0 }
 0x15a   :  { %3956 = vst [vmem:[#allocation13_spill] sm:$0xff] %v3618_v21  ;;  %v3620_v22 = vpop.f32.mrf.mxu1 }
 0x15b   :  { %3957 = vst [vmem:[#allocation14_spill] sm:$0xff] %v3620_v22  ;;  %v1695_v36 = vpop.f32.mrf.mxu0 }
 0x15c   :  { %v1736_v37 = vpop.f32.mrf.mxu1  ;;  %v2132_v36 = vadd.f32 %v2131_v1, %v2130_v52  ;;  %v3659_v52 = vadd.f32 %v2114_v24, %v2080_v16  ;;  %v2146_v1 = vadd.f32 %v2145_v48, %v2144_v29 }
 0x15d   :  { %v1696_v45 = vpop.f32.mrf.mxu0  ;;  %v2172_v37 = vrot.slane %v2171_v4, 2 }
 0x15e   :  { %v1737_v46 = vpop.f32.mrf.mxu1  ;;  %v2204_v45 = vrot.slane %v2203_v32, 4  ;;  %v3661_v53 = vadd.f32 %v2132_v36, %v2098_v23  ;;  %v2256_v23 = vrot.slane %v2255_v61, 4  ;;  %v2147_v29 = vrot.slane %v2146_v1, 1 }
 0x15f   :  { %v2237_v46 = vsel %vm1314_vm0, %v3588_v34, 0.0  ;;  %v2173_v54 = vadd.f32 %v2172_v37, %v2171_v4  ;;  %v2244_v4 = vsel %vm1314_vm0, %v3592_v7, 0.0  ;;  %v2224_v36 = vrot.slane %v2223_v3, 2 }
 0x160   :  { %v2238_v58 = vrot.slane %v2237_v46, 4  ;;  %v2205_v0 = vadd.f32 %v2204_v45, %v2203_v32  ;;  %v2212_v32 = vadd.f32 %v2211_v62, %v2210_v51  ;;  %v2245_v37 = vrot.slane %v2244_v4, 4 }
 0x161   :  { %v2174_v24 = vrot.slane %v2173_v54, 1  ;;  %v2159_v45 = vadd.f32 %v2158_v12, %v2157_v57  ;;  %v2257_v47 = vadd.f32 %v2256_v23, %v2255_v61  ;;  %v2193_v62 = vadd.f32 %v2192_v14, %v2191_v63 }
 0x162   :  { %v2239_v16 = vadd.f32 %v2238_v58, %v2237_v46  ;;  %v2206_v31 = vrot.slane %v2205_v0, 2  ;;  %v2213_v58 = vrot.slane %v2212_v32, 2  ;;  %v2225_v7 = vadd.f32 %v2224_v36, %v2223_v3 }
 0x163   :  { %v2175_v51 = vadd.f32 %v2174_v24, %v2173_v54  ;;  %v2246_v34 = vadd.f32 %v2245_v37, %v2244_v4  ;;  %v2148_v6 = vadd.f32 %v2147_v29, %v2146_v1  ;;  %v2231_v57 = vrot.slane %v2230_v40, 2 }
 0x164   :  { %v2240_v46 = vrot.slane %v2239_v16, 2  ;;  %v2207_v56 = vadd.f32 %v2206_v31, %v2205_v0  ;;  %v2167_v61 = vadd.f32 %v2159_v45, %v3645_v15  ;;  %v2258_v23 = vrot.slane %v2257_v47, 2 }
 0x165   :  { %v2183_v13 = vadd.f32 %v2175_v51, %v2149_v44  ;;  %v2214_v24 = vadd.f32 %v2213_v58, %v2212_v32  ;;  %v2271_v63 = vsel %vm1314_vm0, %v3614_v10, 0.0  ;;  %v2226_v3 = vrot.slane %v2225_v7, 1 }
 0x166   :  { %v2241_v12 = vadd.f32 %v2240_v46, %v2239_v16  ;;  %v2208_v0 = vrot.slane %v2207_v56, 1  ;;  %v2247_v4 = vrot.slane %v2246_v34, 2  ;;  %v2287_v1 = vmul.f32 %v3614_v10, %v3614_v10 }
 0x167   :  { %v2150_v5 = vadd.f32 %v2148_v6, %v3659_v52  ;;  %v2168_v15 = vadd.f32 %v2166_v8, %v3661_v53  ;;  %v2182_v16 = vadd.f32 %v2181_v9, %v2180_v43  ;;  %v2232_v31 = vadd.f32 %v2231_v57, %v2230_v40 }
 0x168   :  { %v2242_v14 = vrot.slane %v2241_v12, 1  ;;  %v2259_v29 = vadd.f32 %v2258_v23, %v2257_v47  ;;  %v2272_v36 = vrot.slane %v2271_v63, 4  ;;  %v2200_v32 = vadd.f32 %v2199_v60, %v2198_v55 }
 0x169   :  { %v2209_v37 = vadd.f32 %v2208_v0, %v2207_v56  ;;  %v2215_v42 = vrot.slane %v2214_v24, 1  ;;  %v2321_v44 = vmul.f32 %v3616_v11, %v3616_v11  ;;  %v2227_v41 = vadd.f32 %v2226_v3, %v2225_v7 }
 0x16a   :  { %v2248_v45 = vadd.f32 %v2247_v4, %v2246_v34  ;;  %v2265_v46 = vrot.slane %v2264_v30, 2  ;;  %v2289_v51 = vsel %vm1314_vm0, %v2287_v1, 0.0  ;;  %v2184_v52 = vadd.f32 %v2182_v16, %v2150_v5 }
 0x16b   :  { %v2202_v58 = vadd.f32 %v2200_v32, %v2168_v15  ;;  %v2233_v53 = vrot.slane %v2232_v31, 1  ;;  %v2288_v43 = vmul.f32 %v3618_v21, %v3618_v21  ;;  %v2243_v40 = vadd.f32 %v2242_v14, %v2241_v12 }
 0x16c   :  { %v2260_v47 = vrot.slane %v2259_v29, 1  ;;  %v2278_v55 = vsel %vm1314_vm0, %v3618_v21, 0.0  ;;  %v2217_v56 = vadd.f32 %v2209_v37, %v2183_v13  ;;  %v2290_v49 = vrot.slane %v2289_v51, 4 }
 0x16d   :  { %v2305_v34 = vsel %vm1314_vm0, %v3616_v11, 0.0  ;;  %v2323_v7 = vsel %vm1314_vm0, %v2321_v44, 0.0  ;;  %v2249_v6 = vrot.slane %v2248_v45, 1  ;;  %v2266_v8 = vadd.f32 %v2265_v46, %v2264_v30 }
 0x16e   :  { %v2234_v9 = vadd.f32 %v2233_v53, %v2232_v31  ;;  %v2279_v57 = vrot.slane %v2278_v55, 4  ;;  %v2322_v12 = vmul.f32 %v3620_v22, %v3620_v22  ;;  %v2324_v13 = vrot.slane %v2323_v7, 4 }
 0x16f   :  { %v2312_v60 = vsel %vm1314_vm0, %v3620_v22, 0.0  ;;  %v3701_v0 = vadd.f32 %v2243_v40, %v2217_v56  ;;  %v2291_v3 = vadd.f32 %v2290_v49, %v2289_v51  ;;  %v2250_v30 = vadd.f32 %v2249_v6, %v2248_v45 }
 0x170   :  { %v2267_v1 = vrot.slane %v2266_v8, 1  ;;  %v2280_v16 = vadd.f32 %v2279_v57, %v2278_v55  ;;  %v2313_v31 = vrot.slane %v2312_v60, 4  ;;  %v2236_v14 = vadd.f32 %v2234_v9, %v2202_v58 }
 0x171   :  { %v2325_v37 = vadd.f32 %v2324_v13, %v2323_v7 }
 0x172   :  { %v2268_v45 = vadd.f32 %v2267_v1, %v2266_v8  ;;  %v2281_v58 = vrot.slane %v2280_v16, 2 }
 0x173   :  { %v3669_v38 = vpop.f32.mrf.mxu0 }
 0x174   :  { %3958 = vst [vmem:[#allocation15_spill] sm:$0xff] %v3669_v38  ;;  %v3671_v39 = vpop.f32.mrf.mxu1 }
 0x175   :  { %3959 = vst [vmem:[#allocation16_spill] sm:$0xff] %v3671_v39  ;;  %v3675_v48 = vpop.f32.mrf.mxu0  ;;  %v2389_v40 = vmul.f32 %v3671_v39, %v3671_v39 }
 0x176   :  { %3960 = vst [vmem:[#allocation17_spill] sm:$0xff] %v3675_v48  ;;  %v3677_v50 = vpop.f32.mrf.mxu1 }
 0x177   :  { %3961 = vst [vmem:[#allocation18_spill] sm:$0xff] %v3677_v50  ;;  %v1777_v59 = vpop.f32.mrf.mxu0  ;;  %v2390_v9 = vmul.f32 %v3677_v50, %v3677_v50  ;;  %v2391_v13 = vsel %vm1314_vm0, %v2389_v40, 0.0 }
 0x178   :  { %v1818_v2 = vpop.f32.mrf.mxu1 }
 0x179   :  { %v1778_v35 = vpop.f32.mrf.mxu0  ;;  %v2216_v2 = vadd.f32 %v2215_v42, %v2214_v24  ;;  %v2355_v24 = vmul.f32 %v3669_v38, %v3669_v38  ;;  %v2292_v42 = vrot.slane %v2291_v3, 2 }
 0x17a   :  { %v1819_v54 = vpop.f32.mrf.mxu1  ;;  %v2201_v35 = vadd.f32 %v2193_v62, %v2167_v61  ;;  %v2273_v62 = vadd.f32 %v2272_v36, %v2271_v63  ;;  %v2296_v61 = vsel %vm1314_vm0, %v2288_v43, 0.0  ;;  %v2261_v63 = vadd.f32 %v2260_v47, %v2259_v29 }
 0x17b   :  { %v2306_v54 = vrot.slane %v2305_v34, 4  ;;  %v2218_v4 = vadd.f32 %v2216_v2, %v2184_v52  ;;  %v2297_v5 = vrot.slane %v2296_v61, 4  ;;  %v2339_v29 = vsel %vm1314_vm0, %v3669_v38, 0.0 }
 0x17c   :  { %v2235_v59 = vadd.f32 %v2227_v41, %v2201_v35  ;;  %v2274_v23 = vrot.slane %v2273_v62, 2  ;;  %v2330_v35 = vsel %vm1314_vm0, %v2322_v12, 0.0  ;;  %v2357_v44 = vsel %vm1314_vm0, %v2355_v24, 0.0 }
 0x17d   :  { %v2307_v32 = vadd.f32 %v2306_v54, %v2305_v34  ;;  %v2346_v41 = vsel %vm1314_vm0, %v3675_v48, 0.0  ;;  %v2298_v46 = vadd.f32 %v2297_v5, %v2296_v61  ;;  %v2331_v51 = vrot.slane %v2330_v35, 4 }
 0x17e   :  { %v3705_v15 = vadd.f32 %v2261_v63, %v2235_v59  ;;  %v2275_v36 = vadd.f32 %v2274_v23, %v2273_v62  ;;  %v2356_v52 = vmul.f32 %v3675_v48, %v3675_v48  ;;  %v3715_v53 = vadd.f32 %v2250_v30, %v2218_v4 }
 0x17f   :  { %v2314_v43 = vadd.f32 %v2313_v31, %v2312_v60  ;;  %v3719_v47 = vadd.f32 %v2268_v45, %v2236_v14  ;;  %v2340_v62 = vrot.slane %v2339_v29, 4  ;;  %v2358_v55 = vrot.slane %v2357_v44, 4 }
 0x180   :  { %v2347_v56 = vrot.slane %v2346_v41, 4  ;;  %v2276_v49 = vrot.slane %v2275_v36, 1  ;;  %v2293_v34 = vadd.f32 %v2292_v42, %v2291_v3  ;;  %v2308_v7 = vrot.slane %v2307_v32, 2 }
 0x181   :  { %v2326_v59 = vrot.slane %v2325_v37, 2  ;;  %v2299_v2 = vrot.slane %v2298_v46, 2  ;;  %v2332_v6 = vadd.f32 %v2331_v51, %v2330_v35  ;;  %v2364_v8 = vsel %vm1314_vm0, %v2356_v52, 0.0 }
 0x182   :  { %v2282_v12 = vadd.f32 %v2281_v58, %v2280_v16  ;;  %v2315_v23 = vrot.slane %v2314_v43, 2  ;;  %v2373_v54 = vsel %vm1314_vm0, %v3671_v39, 0.0  ;;  %v2341_v60 = vadd.f32 %v2340_v62, %v2339_v29 }
 0x183   :  { %v2359_v63 = vadd.f32 %v2358_v55, %v2357_v44  ;;  %v2348_v3 = vadd.f32 %v2347_v56, %v2346_v41  ;;  %v2380_v24 = vsel %vm1314_vm0, %v3677_v50, 0.0  ;;  %v2294_v1 = vrot.slane %v2293_v34, 1 }
 0x184   :  { %v2309_v5 = vadd.f32 %v2308_v7, %v2307_v32  ;;  %v2327_v31 = vadd.f32 %v2326_v59, %v2325_v37  ;;  %v2365_v16 = vrot.slane %v2364_v8, 4  ;;  %v2300_v35 = vadd.f32 %v2299_v2, %v2298_v46 }
 0x185   :  { %v2333_v14 = vrot.slane %v2332_v6, 2  ;;  %v2374_v42 = vrot.slane %v2373_v54, 4  ;;  %v2398_v45 = vsel %vm1314_vm0, %v2390_v9, 0.0  ;;  %v2277_v44 = vadd.f32 %v2276_v49, %v2275_v36 }
 0x186   :  { %v2283_v41 = vrot.slane %v2282_v12, 1  ;;  %v2392_v52 = vrot.slane %v2391_v13, 4  ;;  %v2381_v58 = vrot.slane %v2380_v24, 4  ;;  %v2316_v40 = vadd.f32 %v2315_v23, %v2314_v43 }
 0x187   :  { %v2342_v62 = vrot.slane %v2341_v60, 2  ;;  %v2360_v55 = vrot.slane %v2359_v63, 2  ;;  %v2349_v56 = vrot.slane %v2348_v3, 2  ;;  %v2310_v32 = vrot.slane %v2309_v5, 1 }
 0x188   :  { %v2328_v37 = vrot.slane %v2327_v31, 1  ;;  %v2366_v7 = vadd.f32 %v2365_v16, %v2364_v8  ;;  %v2399_v46 = vrot.slane %v2398_v45, 4  ;;  %v2295_v59 = vadd.f32 %v2294_v1, %v2293_v34 }
 0x189   :  { %v2301_v2 = vrot.slane %v2300_v35, 1  ;;  %v2334_v48 = vadd.f32 %v2333_v14, %v2332_v6  ;;  %v2375_v9 = vadd.f32 %v2374_v42, %v2373_v54  ;;  %v2284_v36 = vadd.f32 %v2283_v41, %v2282_v12 }
 0x18a   :  { %v2393_v49 = vadd.f32 %v2392_v52, %v2391_v13  ;;  %v2317_v38 = vrot.slane %v2316_v40, 1  ;;  %v2343_v43 = vadd.f32 %v2342_v62, %v2341_v60  ;;  %v2361_v23 = vadd.f32 %v2360_v55, %v2359_v63 }
 0x18b   :  { %v2350_v22 = vadd.f32 %v2349_v56, %v2348_v3  ;;  %v2311_v11 = vadd.f32 %v2310_v32, %v2309_v5  ;;  %v2400_v21 = vadd.f32 %v2399_v46, %v2398_v45  ;;  %v2303_v8 = vadd.f32 %v2295_v59, %v3705_v15 }
 0x18c   :  { %v2302_v16 = vadd.f32 %v2301_v2, %v2300_v35  ;;  %v2335_v34 = vrot.slane %v2334_v48, 1  ;;  %v2376_v1 = vrot.slane %v2375_v9, 2  ;;  %v2286_v54 = vadd.f32 %v2284_v36, %v3715_v53 }
 0x18d   :  { %v2318_v13 = vadd.f32 %v2317_v38, %v2316_v40  ;;  %v2362_v14 = vrot.slane %v2361_v23, 1  ;;  %v2351_v60 = vrot.slane %v2350_v22, 1  ;;  %v2401_v3 = vrot.slane %v2400_v21, 2 }
 0x18e   :  { %v2304_v35 = vadd.f32 %v2302_v16, %v3719_v47  ;;  %v2377_v42 = vadd.f32 %v2376_v1, %v2375_v9 }
 0x18f   :  { %v3724_v57 = vpop.f32.mrf.mxu0  ;;  %v2363_v52 = vadd.f32 %v2362_v14, %v2361_v23  ;;  %v2402_v55 = vadd.f32 %v2401_v3, %v2400_v21  ;;  %v2320_v47 = vadd.f32 %v2318_v13, %v2286_v54 }
 0x190   :  { %v3726_v61 = vpop.f32.mrf.mxu1  ;;  %v2407_v5 = vsel %vm1314_vm0, %v3724_v57, 0.0  ;;  %v2423_v15 = vmul.f32 %v3724_v57, %v3724_v57 }
 0x191   :  { %v3733_v4 = vpop.f32.mrf.mxu0  ;;  %v2441_v38 = vsel %vm1314_vm0, %v3726_v61, 0.0  ;;  %v2408_v40 = vrot.slane %v2407_v5, 4 }
 0x192   :  { %v3735_v30 = vpop.f32.mrf.mxu1  ;;  %v2425_v56 = vsel %vm1314_vm0, %v2423_v15, 0.0  ;;  %v2414_v9 = vsel %vm1314_vm0, %v3733_v4, 0.0 }
 0x193   :  { %v1859_v51 = vpop.f32.mrf.mxu0  ;;  %v2409_v36 = vadd.f32 %v2408_v40, %v2407_v5  ;;  %v2426_v21 = vrot.slane %v2425_v56, 4  ;;  %v2415_v16 = vrot.slane %v2414_v9, 4  ;;  %v2448_v54 = vsel %vm1314_vm0, %v3735_v30, 0.0 }
 0x194   :  { %v1900_v29 = vpop.f32.mrf.mxu1  ;;  %v2285_v51 = vadd.f32 %v2277_v44, %v3701_v0  ;;  %v2394_v0 = vrot.slane %v2393_v49, 2  ;;  %v2457_v44 = vmul.f32 %v3726_v61, %v3726_v61 }
 0x195   :  { %v1860_v50 = vpop.f32.mrf.mxu0  ;;  %v2382_v29 = vadd.f32 %v2381_v58, %v2380_v24  ;;  %v2344_v24 = vrot.slane %v2343_v43, 1  ;;  %v2352_v58 = vadd.f32 %v2351_v60, %v2350_v22  ;;  %v2427_v13 = vadd.f32 %v2426_v21, %v2425_v56 }
 0x196   :  { %v1901_v39 = vpop.f32.mrf.mxu1  ;;  %v2329_v50 = vadd.f32 %v2328_v37, %v2327_v31  ;;  %v2319_v6 = vadd.f32 %v2311_v11, %v2285_v51  ;;  %v2336_v11 = vadd.f32 %v2335_v34, %v2334_v48  ;;  %v2395_v53 = vadd.f32 %v2394_v0, %v2393_v49 }
 0x197   :  { %v2367_v39 = vrot.slane %v2366_v7, 2  ;;  %v2383_v12 = vrot.slane %v2382_v29, 2  ;;  %v2345_v41 = vadd.f32 %v2344_v24, %v2343_v43  ;;  %v2424_v48 = vmul.f32 %v3733_v4, %v3733_v4 }
 0x198   :  { %v2337_v31 = vadd.f32 %v2329_v50, %v2303_v8  ;;  %v2338_v32 = vadd.f32 %v2336_v11, %v2304_v35  ;;  %v2378_v37 = vrot.slane %v2377_v42, 1  ;;  %v2396_v46 = vrot.slane %v2395_v53, 1 }
 0x199   :  { %v2368_v63 = vadd.f32 %v2367_v39, %v2366_v7  ;;  %v2384_v45 = vadd.f32 %v2383_v12, %v2382_v29  ;;  %v2442_v7 = vrot.slane %v2441_v38, 4  ;;  %v2459_v2 = vsel %vm1314_vm0, %v2457_v44, 0.0 }
 0x19a   :  { %v2353_v22 = vadd.f32 %v2345_v41, %v2319_v6  ;;  %v2371_v51 = vadd.f32 %v2363_v52, %v2337_v31  ;;  %v2354_v49 = vadd.f32 %v2352_v58, %v2320_v47  ;;  %v2403_v43 = vrot.slane %v2402_v55, 1 }
 0x19b   :  { %v2369_v62 = vrot.slane %v2368_v63, 1  ;;  %v2385_v59 = vrot.slane %v2384_v45, 1  ;;  %v2432_v23 = vsel %vm1314_vm0, %v2424_v48, 0.0  ;;  %v2379_v50 = vadd.f32 %v2378_v37, %v2377_v42 }
 0x19c   :  { %v2443_v39 = vadd.f32 %v2442_v7, %v2441_v38  ;;  %v2460_v8 = vrot.slane %v2459_v2, 4  ;;  %v2397_v34 = vadd.f32 %v2396_v46, %v2395_v53  ;;  %v2458_v6 = vmul.f32 %v3735_v30, %v3735_v30 }
 0x19d   :  { %v2370_v29 = vadd.f32 %v2369_v62, %v2368_v63  ;;  %v2386_v1 = vadd.f32 %v2385_v59, %v2384_v45  ;;  %v3761_v0 = vadd.f32 %v2379_v50, %v2353_v22  ;;  %v2410_v12 = vrot.slane %v2409_v36, 2 }
 0x19e   :  { %v2433_v24 = vrot.slane %v2432_v23, 4  ;;  %v3763_v14 = vadd.f32 %v2397_v34, %v2371_v51  ;;  %v3769_v3 = vadd.f32 %v2403_v43, %v2402_v55  ;;  %v2444_v5 = vrot.slane %v2443_v39, 2 }
 0x19f   :  { %v3765_v60 = vadd.f32 %v2370_v29, %v2338_v32  ;;  %v3767_v63 = vadd.f32 %v2386_v1, %v2354_v49  ;;  %v2461_v15 = vadd.f32 %v2460_v8, %v2459_v2  ;;  %v2416_v31 = vadd.f32 %v2415_v16, %v2414_v9 }
 0x1a0   :  { %v2449_v35 = vrot.slane %v2448_v54, 4  ;;  %v2466_v53 = vsel %vm1314_vm0, %v2458_v6, 0.0  ;;  %v2411_v41 = vadd.f32 %v2410_v12, %v2409_v36  ;;  %v2428_v52 = vrot.slane %v2427_v13, 2 }
 0x1a1   :  { %v2434_v58 = vadd.f32 %v2433_v24, %v2432_v23  ;;  %v2467_v37 = vrot.slane %v2466_v53, 4  ;;  %v2417_v49 = vrot.slane %v2416_v31, 2  ;;  %v2445_v12 = vadd.f32 %v2444_v5, %v2443_v39 }
 0x1a2   :  { %v2450_v29 = vadd.f32 %v2449_v35, %v2448_v54  ;;  %v2429_v16 = vadd.f32 %v2428_v52, %v2427_v13 }
 0x1a3   :  { %v2435_v34 = vrot.slane %v2434_v58, 2 }
 0x1ab   :  { %v3771_v11 = vpop.f32.mrf.mxu0 }
 0x1ac   :  { %3962 = vst [vmem:[#allocation19_spill] sm:$0xff] %v3771_v11  ;;  %v3773_v42 = vpop.f32.mrf.mxu1  ;;  %v2475_v45 = vsel %vm1314_vm0, %v3771_v11, 0.0  ;;  %v2491_v38 = vmul.f32 %v3771_v11, %v3771_v11 }
 0x1ad   :  { %3963 = vst [vmem:[#allocation20_spill] sm:$0xff] %v3773_v42  ;;  %v2525_v44 = vmul.f32 %v3773_v42, %v3773_v42  ;;  %v2476_v40 = vrot.slane %v2475_v45, 4  ;;  %v3782_v62 = vpop.f32.mrf.mxu0  ;;  %v2509_v48 = vsel %vm1314_vm0, %v3773_v42, 0.0 }
 0x1ae   :  { %3964 = vst [vmem:[#allocation21_spill] sm:$0xff] %v3782_v62  ;;  %v3784_v55 = vpop.f32.mrf.mxu1  ;;  %v2493_v56 = vsel %vm1314_vm0, %v2491_v38, 0.0  ;;  %v2482_v47 = vsel %vm1314_vm0, %v3782_v62, 0.0  ;;  %v2492_v32 = vmul.f32 %v3782_v62, %v3782_v62  ;;  %v2510_v23 = vrot.slane %v2509_v48, 4 }
 0x1af   :  { %3965 = vst [vmem:[#allocation22_spill] sm:$0xff] %v3784_v55  ;;  %v2477_v7 = vadd.f32 %v2476_v40, %v2475_v45  ;;  %v2494_v46 = vrot.slane %v2493_v56, 4  ;;  %v2527_v59 = vsel %vm1314_vm0, %v2525_v44, 0.0  ;;  %v1941_v2 = vpop.f32.mrf.mxu0  ;;  %v2483_v22 = vrot.slane %v2482_v47, 4 }
 0x1b0   :  { %v1982_v9 = vpop.f32.mrf.mxu1  ;;  %v2500_v51 = vsel %vm1314_vm0, %v2492_v32, 0.0  ;;  %v2516_v36 = vsel %vm1314_vm0, %v3784_v55, 0.0  ;;  %v2526_v21 = vmul.f32 %v3784_v55, %v3784_v55  ;;  %v2528_v1 = vrot.slane %v2527_v59, 4 }
 0x1b1   :  { %v2495_v43 = vadd.f32 %v2494_v46, %v2493_v56  ;;  %v1942_v50 = vpop.f32.mrf.mxu0  ;;  %v2501_v6 = vrot.slane %v2500_v51, 4  ;;  %v2478_v24 = vrot.slane %v2477_v7, 2  ;;  %v2484_v45 = vadd.f32 %v2483_v22, %v2482_v47 }
 0x1b2   :  { %v1983_v8 = vpop.f32.mrf.mxu1  ;;  %v2517_v38 = vrot.slane %v2516_v36, 4  ;;  %v2412_v44 = vrot.slane %v2411_v41, 1  ;;  %v2462_v40 = vrot.slane %v2461_v15, 2  ;;  %v2468_v32 = vadd.f32 %v2467_v37, %v2466_v53 }
 0x1b3   :  { %v2534_v2 = vsel %vm1314_vm0, %v2526_v21, 0.0  ;;  %v2418_v9 = vadd.f32 %v2417_v49, %v2416_v31  ;;  %v2496_v55 = vrot.slane %v2495_v43, 2  ;;  %v2511_v54 = vadd.f32 %v2510_v23, %v2509_v48 }
 0x1b4   :  { %v2502_v35 = vadd.f32 %v2501_v6, %v2500_v51  ;;  %v2430_v56 = vrot.slane %v2429_v16, 1  ;;  %v2436_v46 = vadd.f32 %v2435_v34, %v2434_v58  ;;  %v2451_v50 = vrot.slane %v2450_v29, 2 }
 0x1b5   :  { %v2529_v13 = vadd.f32 %v2528_v1, %v2527_v59  ;;  %v2479_v52 = vadd.f32 %v2478_v24, %v2477_v7  ;;  %v2485_v8 = vrot.slane %v2484_v45, 2  ;;  %v2518_v42 = vadd.f32 %v2517_v38, %v2516_v36 }
 0x1b6   :  { %v2535_v39 = vrot.slane %v2534_v2, 4  ;;  %v2413_v5 = vadd.f32 %v2412_v44, %v2411_v41  ;;  %v2446_v47 = vrot.slane %v2445_v12, 1  ;;  %v2463_v22 = vadd.f32 %v2462_v40, %v2461_v15 }
 0x1b7   :  { %v2469_v62 = vrot.slane %v2468_v32, 2  ;;  %v2419_v11 = vrot.slane %v2418_v9, 1  ;;  %v2497_v53 = vadd.f32 %v2496_v55, %v2495_v43  ;;  %v2512_v37 = vrot.slane %v2511_v54, 2 }
 0x1b8   :  { %v2503_v21 = vrot.slane %v2502_v35, 2  ;;  %v2431_v31 = vadd.f32 %v2430_v56, %v2429_v16  ;;  %v2437_v49 = vrot.slane %v2436_v46, 1  ;;  %v2452_v48 = vadd.f32 %v2451_v50, %v2450_v29 }
 0x1b9   :  { %v2530_v51 = vrot.slane %v2529_v13, 2  ;;  %v2480_v23 = vrot.slane %v2479_v52, 1  ;;  %v2486_v58 = vadd.f32 %v2485_v8, %v2484_v45  ;;  %v2519_v34 = vrot.slane %v2518_v42, 2 }
 0x1ba   :  { %v2536_v59 = vadd.f32 %v2535_v39, %v2534_v2  ;;  %v2421_v7 = vadd.f32 %v2413_v5, %v3761_v0  ;;  %v2447_v36 = vadd.f32 %v2446_v47, %v2445_v12  ;;  %v2464_v1 = vrot.slane %v2463_v22, 1 }
 0x1bb   :  { %v2470_v41 = vadd.f32 %v2469_v62, %v2468_v32  ;;  %v2420_v6 = vadd.f32 %v2419_v11, %v2418_v9  ;;  %v2498_v15 = vrot.slane %v2497_v53, 1  ;;  %v2513_v24 = vadd.f32 %v2512_v37, %v2511_v54 }
 0x1bc   :  { %v2504_v38 = vadd.f32 %v2503_v21, %v2502_v35  ;;  %v2439_v55 = vadd.f32 %v2431_v31, %v3763_v14  ;;  %v2438_v43 = vadd.f32 %v2437_v49, %v2436_v46  ;;  %v2453_v16 = vrot.slane %v2452_v48, 1 }
 0x1bd   :  { %v2531_v44 = vadd.f32 %v2530_v51, %v2529_v13  ;;  %v2481_v29 = vadd.f32 %v2480_v23, %v2479_v52  ;;  %v2487_v40 = vrot.slane %v2486_v58, 1  ;;  %v2520_v56 = vadd.f32 %v2519_v34, %v2518_v42 }
 0x1be   :  { %v2537_v45 = vrot.slane %v2536_v59, 2  ;;  %v2406_v2 = vadd.f32 %v3769_v3, %v3765_v60  ;;  %v2455_v0 = vadd.f32 %v2447_v36, %v2421_v7  ;;  %v2465_v12 = vadd.f32 %v2464_v1, %v2463_v22 }
 0x1bf   :  { %v2471_v50 = vrot.slane %v2470_v41, 1  ;;  %v2422_v11 = vadd.f32 %v2420_v6, %v3767_v63  ;;  %v2499_v62 = vadd.f32 %v2498_v15, %v2497_v53  ;;  %v2514_v32 = vrot.slane %v2513_v24, 1 }
 0x1c0   :  { %v2505_v9 = vrot.slane %v2504_v38, 1  ;;  %v2473_v54 = vadd.f32 %v2465_v12, %v2439_v55  ;;  %v2440_v14 = vadd.f32 %v2438_v43, %v2406_v2  ;;  %v2454_v35 = vadd.f32 %v2453_v16, %v2452_v48 }
 0x1c1   :  { %v2532_v46 = vrot.slane %v2531_v44, 1  ;;  %v2489_v13 = vadd.f32 %v2481_v29, %v2455_v0  ;;  %v2488_v52 = vadd.f32 %v2487_v40, %v2486_v58  ;;  %v2521_v8 = vrot.slane %v2520_v56, 1 }
 0x1c2   :  { %v3805_v42 = vadd.f32 %v2537_v45, %v2536_v59  ;;  %v2472_v39 = vadd.f32 %v2471_v50, %v2470_v41  ;;  %v2456_v5 = vadd.f32 %v2454_v35, %v2422_v11  ;;  %v2507_v60 = vadd.f32 %v2499_v62, %v2473_v54 }
 0x1c3   :  { %v2515_v3 = vadd.f32 %v2514_v32, %v2513_v24  ;;  %v2506_v47 = vadd.f32 %v2505_v9, %v2504_v38  ;;  %v2533_v37 = vadd.f32 %v2532_v46, %v2531_v44  ;;  %v2522_v21 = vadd.f32 %v2521_v8, %v2520_v56 }
 0x1c4   :  { %v2474_v22 = vadd.f32 %v2472_v39, %v2440_v14  ;;  %v2490_v53 = vadd.f32 %v2488_v52, %v2456_v5  ;;  %v2539_v31 = vrot.slane %v3805_v42, 1 }
 0x1c5   :  { %v3807_v63 = vadd.f32 %v2515_v3, %v2489_v13  ;;  %v3822_v59 = vadd.f32 %v2533_v37, %v2507_v60 }
 0x1c6   :  { %v2508_v7 = vadd.f32 %v2506_v47, %v2474_v22 }
 0x1c7   :  { %v3810_v49 = vpop.f32.mrf.mxu0 }
 0x1c8   :  { %v3812_v48 = vpop.f32.mrf.mxu1  ;;  %v2543_v51 = vsel %vm1314_vm0, %v3810_v49, 0.0  ;;  %v2559_v23 = vmul.f32 %v3810_v49, %v3810_v49 }
 0x1c9   :  { %v2577_v58 = vsel %vm1314_vm0, %v3812_v48, 0.0  ;;  %v2593_v34 = vmul.f32 %v3812_v48, %v3812_v48  ;;  %v2544_v36 = vrot.slane %v2543_v51, 4  ;;  %v3824_v41 = vpop.f32.mrf.mxu0 }
 0x1ca   :  { %v2578_v1 = vrot.slane %v2577_v58, 4  ;;  %v3826_v6 = vpop.f32.mrf.mxu1  ;;  %v2561_v15 = vsel %vm1314_vm0, %v2559_v23, 0.0  ;;  %v2550_v38 = vsel %vm1314_vm0, %v3824_v41, 0.0  ;;  %v2560_v55 = vmul.f32 %v3824_v41, %v3824_v41 }
 0x1cb   :  { %v2595_v24 = vsel %vm1314_vm0, %v2593_v34, 0.0  ;;  %v2545_v43 = vadd.f32 %v2544_v36, %v2543_v51  ;;  %v2562_v16 = vrot.slane %v2561_v15, 4  ;;  %v2023_v40 = vpop.f32.mrf.mxu0  ;;  %v2551_v45 = vrot.slane %v2550_v38, 4 }
 0x1cc   :  { %v2579_v44 = vadd.f32 %v2578_v1, %v2577_v58  ;;  %v2596_v29 = vrot.slane %v2595_v24, 4  ;;  %v2064_v56 = vpop.f32.mrf.mxu1  ;;  %v2568_v2 = vsel %vm1314_vm0, %v2560_v55, 0.0  ;;  %v2584_v0 = vsel %vm1314_vm0, %v3826_v6, 0.0 }
 0x1cd   :  { %v2594_v12 = vmul.f32 %v3826_v6, %v3826_v6  ;;  %v2546_v50 = vrot.slane %v2545_v43, 2  ;;  %v2563_v11 = vadd.f32 %v2562_v16, %v2561_v15  ;;  %v2024_v9 = vpop.f32.mrf.mxu0  ;;  %v2552_v14 = vadd.f32 %v2551_v45, %v2550_v38 }
 0x1ce   :  { %v2580_v62 = vrot.slane %v2579_v44, 2  ;;  %v2597_v32 = vadd.f32 %v2596_v29, %v2595_v24  ;;  %v2065_v54 = vpop.f32.mrf.mxu1  ;;  %v2569_v35 = vrot.slane %v2568_v2, 4  ;;  %v2585_v46 = vrot.slane %v2584_v0, 4 }
 0x1cf   :  { %v2602_v13 = vsel %vm1314_vm0, %v2594_v12, 0.0  ;;  %v2547_v52 = vadd.f32 %v2546_v50, %v2545_v43  ;;  %v2564_v8 = vrot.slane %v2563_v11, 2  ;;  %v2553_v60 = vrot.slane %v2552_v14, 2 }
 0x1d0   :  { %v2581_v39 = vadd.f32 %v2580_v62, %v2579_v44  ;;  %v2598_v5 = vrot.slane %v2597_v32, 2  ;;  %v2570_v3 = vadd.f32 %v2569_v35, %v2568_v2  ;;  %v2586_v47 = vadd.f32 %v2585_v46, %v2584_v0 }
 0x1d1   :  { %v2603_v22 = vrot.slane %v2602_v13, 4  ;;  %v2548_v37 = vrot.slane %v2547_v52, 1  ;;  %v2565_v51 = vadd.f32 %v2564_v8, %v2563_v11  ;;  %v2554_v34 = vadd.f32 %v2553_v60, %v2552_v14 }
 0x1d2   :  { %v2582_v23 = vrot.slane %v2581_v39, 1  ;;  %v2599_v58 = vadd.f32 %v2598_v5, %v2597_v32  ;;  %v2571_v36 = vrot.slane %v2570_v3, 2  ;;  %v2587_v1 = vrot.slane %v2586_v47, 2 }
 0x1d3   :  { %v2604_v15 = vadd.f32 %v2603_v22, %v2602_v13  ;;  %v2524_v24 = vadd.f32 %v2522_v21, %v2490_v53  ;;  %v2549_v38 = vadd.f32 %v2548_v37, %v2547_v52  ;;  %v2566_v55 = vrot.slane %v2565_v51, 1 }
 0x1d4   :  { %v2600_v16 = vrot.slane %v2599_v58, 1  ;;  %v2555_v43 = vrot.slane %v2554_v34, 1  ;;  %v2572_v29 = vadd.f32 %v2571_v36, %v2570_v3  ;;  %v2588_v44 = vadd.f32 %v2587_v1, %v2586_v47 }
 0x1d5   :  { %v2605_v40 = vrot.slane %v2604_v15, 2  ;;  %v2540_v56 = vadd.f32 %v2539_v31, %v3805_v42  ;;  %v2557_v45 = vadd.f32 %v2549_v38, %v3807_v63  ;;  %v2567_v2 = vadd.f32 %v2566_v55, %v2565_v51 }
 0x1d6   :  { %v2583_v0 = vadd.f32 %v2582_v23, %v2581_v39  ;;  %v2556_v12 = vadd.f32 %v2555_v43, %v2554_v34  ;;  %v2573_v50 = vrot.slane %v2572_v29, 1  ;;  %v2589_v11 = vrot.slane %v2588_v44, 1 }
 0x1d7   :  { %v2606_v62 = vadd.f32 %v2605_v40, %v2604_v15  ;;  %v2542_v32 = vadd.f32 %v2540_v56, %v2508_v7  ;;  %v2575_v53 = vadd.f32 %v2567_v2, %v3822_v59  ;;  %v2601_v9 = vadd.f32 %v2600_v16, %v2599_v58  ;;  %v2619_v16 = vld [vmem:[#allocation4] sm:$0x3] }
 0x1d8   :  { %v2591_v21 = vadd.f32 %v2583_v0, %v2557_v45  ;;  %v2558_v54 = vadd.f32 %v2556_v12, %v2524_v24  ;;  %v2574_v14 = vadd.f32 %v2573_v50, %v2572_v29  ;;  %v2590_v35 = vadd.f32 %v2589_v11, %v2588_v44 }
 0x1d9   :  { %v2607_v46 = vrot.slane %v2606_v62, 1  ;;  %v2609_v13 = vadd.f32 %v2601_v9, %v2575_v53  ;;  %v3442_v51 = vmov 1966171168   ;;  %v2630_v58 = vlaneseq }
 0x1da   :  { %v2611_v52 = vmul.f32 0.03125, %v2591_v21  ;;  %v2576_v42 = vadd.f32 %v2574_v14, %v2542_v32  ;;  %v2592_v31 = vadd.f32 %v2590_v35, %v2558_v54  ;;  %v2628_v23 = vunpack.c.l.s4 %v3442_v51  ;;  %v2643_v35 = vld [vmem:[#allocation6] sm:$0x3] }
 0x1db   :  { %v2608_v63 = vadd.f32 %v2607_v46, %v2606_v62  ;;  %v2613_v8 = vmul.f32 0.03125, %v2609_v13  ;;  %v2631_v36 = vshrl.u32 %v2630_v58, 7  ;;  %v3976_v58 = vld [vmem:[#allocation19_spill] sm:$0xff] }
 0x1dc   :  { %v2615_v39 = vmul.f32 %v2611_v52, %v2611_v52  ;;  %v2612_v60 = vmul.f32 0.03125, %v2592_v31  ;;  %v2629_v34 = vunpack.c.0.s8 %v2628_v23  ;;  %v3969_v31 = vld [vmem:[#allocation13_spill] sm:$0xff] }
 0x1dd   :  { %v2610_v5 = vadd.f32 %v2608_v63, %v2576_v42  ;;  %v2647_v29 = vsub.s32 0, %v2631_v36  ;;  %v2651_v44 = vsub.s32 1, %v2631_v36 }
 0x1de   :  { %v2617_v3 = vsub.f32 %v2613_v8, %v2615_v39  ;;  %v2616_v7 = vmul.f32 %v2612_v60, %v2612_v60  ;;  %v3843_v15 = vsub.s32 %v2629_v34, %v2631_v36  ;;  %v3977_v36 = vld [vmem:[#allocation21_spill] sm:$0xff] }
 0x1df   :  { %v2614_v47 = vmul.f32 0.03125, %v2610_v5 }
 0x1e0   :  { %v2620_v22 = vadd.f32 1e-05, %v2617_v3  ;;  %v3974_v3 = vld [vmem:[#allocation16_spill] sm:$0xff] }
 0x1e1   :  { %v2618_v59 = vsub.f32 %v2614_v47, %v2616_v7 }
 0x1e2   :  { %3368 = vrsqrt.f32 %v2620_v22  ;;  %v3975_v22 = vld [vmem:[#allocation18_spill] sm:$0xff] }
 0x1e3   :  { %v2621_v37 = vadd.f32 1e-05, %v2618_v59 }
 0x1e5   :  { %3370 = vrsqrt.f32 %v2621_v37 }
 0x1ef   :  { %v3369_v1 = vpop.eup %3368 }
 0x1f2   :  { %v3371_v24 = vpop.eup %3370 }
 0x1f3   :  { %v2626_v38 = vcombine.low %v3369_v1, %v3371_v24 }
 0x1f5   :  { %v2633_v55 = vrot.slane %v2626_v38, %v3843_v15 }
 0x1f7   :  { %v2640_v43 = vrot.slane %v2633_v55, %v3843_v15  ;;  %v3978_v55 = vld [vmem:[#allocation20_spill] sm:$0xff] }
 0x1f9   :  { %v2642_v40 = vmul.f32 %v2640_v43, %v2619_v16  ;;  %v3979_v43 = vld [vmem:[#allocation22_spill] sm:$0xff] }
 0x1fb   :  { %v2648_v56 = vrot.slane %v2642_v40, %v2647_v29  ;;  %v2652_v45 = vrot.slane %v2642_v40, %v2651_v44 }
 0x1fd   :  { %v2655_v2 = vmul.f32 %v2648_v56, %v2611_v52  ;;  %v2656_v0 = vmul.f32 %v2652_v45, %v2612_v60  ;;  %v2676_v50 = vmul.f32 %v2648_v56, %v3566_v17  ;;  %v2677_v11 = vmul.f32 %v2652_v45, %v3570_v19  ;;  %v3966_v17 = vld [vmem:[#allocation10_spill] sm:$0xff]  ;;  %v3967_v19 = vld [vmem:[#allocation9_spill] sm:$0xff] }
 0x1fe   :  { %v2693_v62 = vmul.f32 %v2648_v56, %v3568_v18  ;;  %v2694_v32 = vmul.f32 %v2652_v45, %v3572_v20  ;;  %v2699_v53 = vmul.f32 %v2648_v56, %v3578_v25  ;;  %v2700_v9 = vmul.f32 %v2652_v45, %v3582_v27  ;;  %v3968_v18 = vld [vmem:[#allocation11_spill] sm:$0xff]  ;;  %v3970_v27 = vld [vmem:[#allocation12_spill] sm:$0xff]  ;;  %v3973_v60 = vld [vmem:[#allocation17_spill] sm:$0xff] }
 0x1ff   :  { %v2659_v12 = vcombine.low %v2655_v2, %v2656_v0  ;;  %v2705_v54 = vmul.f32 %v2648_v56, %v3580_v26  ;;  %v2706_v14 = vmul.f32 %v2652_v45, %v3584_v28  ;;  %v2711_v46 = vmul.f32 %v2648_v56, %v3586_v33  ;;  %v3971_v26 = vld [vmem:[#allocation14_spill] sm:$0xff]  ;;  %v3972_v28 = vld [vmem:[#allocation15_spill] sm:$0xff] }
 0x200   :  { %v2712_v13 = vmul.f32 %v2652_v45, %v3966_v17  ;;  %v2717_v52 = vmul.f32 %v2648_v56, %v3967_v19  ;;  %v2718_v42 = vmul.f32 %v2652_v45, %v3968_v18  ;;  %v2723_v25 = vmul.f32 %v2648_v56, %v3614_v10 }
 0x201   :  { %v2666_v21 = vrot.slane %v2659_v12, %v3843_v15  ;;  %v2724_v63 = vmul.f32 %v2652_v45, %v3969_v31  ;;  %v2729_v8 = vmul.f32 %v2648_v56, %v3970_v27  ;;  %v2730_v39 = vmul.f32 %v2652_v45, %v3971_v26 }
 0x202   :  { %v2735_v5 = vmul.f32 %v2648_v56, %v3972_v28  ;;  %v2736_v33 = vmul.f32 %v2652_v45, %v3973_v60  ;;  %v2741_v47 = vmul.f32 %v2648_v56, %v3974_v3  ;;  %v2742_v59 = vmul.f32 %v2652_v45, %v3975_v22 }
 0x203   :  { %v2673_v20 = vrot.slane %v2666_v21, %v3843_v15  ;;  %v2747_v37 = vmul.f32 %v2648_v56, %v3724_v57  ;;  %v2748_v51 = vmul.f32 %v2652_v45, %v3733_v4  ;;  %v2753_v10 = vmul.f32 %v2648_v56, %v3726_v61 }
 0x204   :  { %v2754_v23 = vmul.f32 %v2652_v45, %v3735_v30  ;;  %v2759_v34 = vmul.f32 %v2648_v56, %v3976_v58  ;;  %v2760_v1 = vmul.f32 %v2652_v45, %v3977_v36  ;;  %v2765_v16 = vmul.f32 %v2648_v56, %v3978_v55 }
 0x205   :  { %v2675_v7 = vsub.f32 %v2643_v35, %v2673_v20  ;;  %v2766_v40 = vmul.f32 %v2652_v45, %v3979_v43  ;;  %v2771_v2 = vmul.f32 %v2648_v56, %v3810_v49  ;;  %v2772_v57 = vmul.f32 %v2652_v45, %v3824_v41 }
 0x206   :  { %v2777_v4 = vmul.f32 %v2648_v56, %v3812_v48  ;;  %v2778_v61 = vmul.f32 %v2652_v45, %v3826_v6 }
 0x207   :  { %v2682_v24 = vrot.slane %v2675_v7, %v2647_v29  ;;  %v2686_v38 = vrot.slane %v2675_v7, %v2651_v44 }
 0x209   :  { %v3881_v0 = vadd.f32 %v2682_v24, %v2676_v50  ;;  %v3883_v30 = vadd.f32 %v2686_v38, %v2677_v11  ;;  %v3885_v12 = vadd.f32 %v2693_v62, %v2682_v24  ;;  %v3887_v29 = vadd.f32 %v2694_v32, %v2686_v38 }
 0x20a   :  { %v3889_v44 = vadd.f32 %v2699_v53, %v2682_v24  ;;  %v2702_v21 = vadd.f32 %v2700_v9, %v2686_v38  ;;  %v2707_v35 = vadd.f32 %v2705_v54, %v2682_v24  ;;  %v2708_v17 = vadd.f32 %v2706_v14, %v2686_v38 }
 0x20b   :  { %v2691_v49 = vmax.f32 %v3881_v0, 0.0  ;;  %v2692_v41 = vmax.f32 %v3883_v30, 0.0  ;;  %v2697_v48 = vmax.f32 %v3885_v12, 0.0  ;;  %v2698_v6 = vmax.f32 %v3887_v29, 0.0 }
 0x20c   :  { %v2703_v56 = vmax.f32 %v3889_v44, 0.0  ;;  %v2704_v45 = vmax.f32 %v2702_v21, 0.0  ;;  %v2709_v50 = vmax.f32 %v2707_v35, 0.0  ;;  %v2710_v11 = vmax.f32 %v2708_v17, 0.0 }
 0x20d   :  { %v2713_v62 = vadd.f32 %v2711_v46, %v2682_v24  ;;  %v2714_v32 = vadd.f32 %v2712_v13, %v2686_v38  ;;  %v2719_v53 = vadd.f32 %v2717_v52, %v2682_v24  ;;  %v2720_v19 = vadd.f32 %v2718_v42, %v2686_v38 }
 0x20e   :  { %v2725_v9 = vadd.f32 %v2723_v25, %v2682_v24  ;;  %v2726_v54 = vadd.f32 %v2724_v63, %v2686_v38  ;;  %v2731_v14 = vadd.f32 %v2729_v8, %v2682_v24  ;;  %v2732_v18 = vadd.f32 %v2730_v39, %v2686_v38 }
 0x20f   :  { %v2715_v20 = vmax.f32 %v2713_v62, 0.0  ;;  %v2716_v31 = vmax.f32 %v2714_v32, 0.0  ;;  %v2721_v27 = vmax.f32 %v2719_v53, 0.0  ;;  %v2722_v26 = vmax.f32 %v2720_v19, 0.0 }
 0x210   :  { %v2727_v28 = vmax.f32 %v2725_v9, 0.0  ;;  %v2728_v60 = vmax.f32 %v2726_v54, 0.0  ;;  %v2733_v3 = vmax.f32 %v2731_v14, 0.0  ;;  %v2734_v7 = vmax.f32 %v2732_v18, 0.0 }
 0x211   :  { %v2737_v22 = vadd.f32 %v2735_v5, %v2682_v24  ;;  %v2738_v58 = vadd.f32 %v2736_v33, %v2686_v38  ;;  %v2743_v36 = vadd.f32 %v2741_v47, %v2682_v24  ;;  %v2744_v55 = vadd.f32 %v2742_v59, %v2686_v38 }
 0x212   :  { %v2749_v46 = vadd.f32 %v2747_v37, %v2682_v24  ;;  %v2750_v13 = vadd.f32 %v2748_v51, %v2686_v38  ;;  %v2755_v52 = vadd.f32 %v2753_v10, %v2682_v24  ;;  %v2756_v42 = vadd.f32 %v2754_v23, %v2686_v38 }
 0x213   :  { %v2739_v25 = vmax.f32 %v2737_v22, 0.0  ;;  %v2740_v63 = vmax.f32 %v2738_v58, 0.0  ;;  %v2745_v8 = vmax.f32 %v2743_v36, 0.0  ;;  %v2746_v39 = vmax.f32 %v2744_v55, 0.0 }
 0x214   :  { %v2751_v43 = vmax.f32 %v2749_v46, 0.0  ;;  %v2752_v0 = vmax.f32 %v2750_v13, 0.0  ;;  %v2757_v30 = vmax.f32 %v2755_v52, 0.0  ;;  %v2758_v12 = vmax.f32 %v2756_v42, 0.0 }
 0x215   :  { %v2761_v29 = vadd.f32 %v2759_v34, %v2682_v24  ;;  %v2762_v44 = vadd.f32 %v2760_v1, %v2686_v38  ;;  %v2767_v21 = vadd.f32 %v2765_v16, %v2682_v24  ;;  %v2768_v35 = vadd.f32 %v2766_v40, %v2686_v38 }
 0x216   :  { %v2773_v5 = vadd.f32 %v2771_v2, %v2682_v24  ;;  %v2774_v33 = vadd.f32 %v2772_v57, %v2686_v38  ;;  %v2779_v47 = vadd.f32 %v2777_v4, %v2682_v24  ;;  %v2780_v59 = vadd.f32 %v2778_v61, %v2686_v38 }
 0x217   :  { %v2763_v37 = vmax.f32 %v2761_v29, 0.0  ;;  %v2764_v51 = vmax.f32 %v2762_v44, 0.0  ;;  %v2769_v10 = vmax.f32 %v2767_v21, 0.0  ;;  %v2770_v23 = vmax.f32 %v2768_v35, 0.0 }
 0x218   :  { %v2775_v17 = vmax.f32 %v2773_v5, 0.0  ;;  %v2776_v62 = vmax.f32 %v2774_v33, 0.0  ;;  %v2781_v32 = vmax.f32 %v2779_v47, 0.0  ;;  %v2782_v53 = vmax.f32 %v2780_v59, 0.0 }
 0x219   :  { %v3313_v19 = vpack.c.bf16 %v2692_v41, %v2691_v49  ;;  %v3314_v9 = vpack.c.bf16 %v2698_v6, %v2697_v48  ;;  %v3315_v54 = vpack.c.bf16 %v2704_v45, %v2703_v56  ;;  %v3316_v14 = vpack.c.bf16 %v2710_v11, %v2709_v50 }
 0x21a   :  { %v3317_v34 = vpack.c.bf16 %v2716_v31, %v2715_v20  ;;  %v3318_v1 = vpack.c.bf16 %v2722_v26, %v2721_v27  ;;  %v3319_v16 = vpack.c.bf16 %v2728_v60, %v2727_v28  ;;  %v3320_v40 = vpack.c.bf16 %v2734_v7, %v2733_v3 }
 0x21b   :  { %v2857_v2 = vrot.slane %v3313_v19, %v3843_v15  ;;  %v2864_v24 = vrot.slane %v3314_v9, %v3843_v15  ;;  %v2871_v38 = vrot.slane %v3315_v54, %v3843_v15  ;;  %v2878_v57 = vrot.slane %v3316_v14, %v3843_v15 }
 0x21c   :  { %v2906_v4 = vrot.slane %v3317_v34, %v3843_v15  ;;  %v2913_v61 = vrot.slane %v3318_v1, %v3843_v15  ;;  %v2920_v49 = vrot.slane %v3319_v16, %v3843_v15  ;;  %v2927_v41 = vrot.slane %v3320_v40, %v3843_v15 }
 0x21d   :  { %v2879_v48 = vcombine.low %v2857_v2, %v2864_v24  ;;  %v2880_v6 = vcombine.low %v2871_v38, %v2878_v57  ;;  %v3321_v56 = vpack.c.bf16 %v2740_v63, %v2739_v25  ;;  %v3322_v45 = vpack.c.bf16 %v2746_v39, %v2745_v8 }
 0x21e   :  { %v2928_v50 = vcombine.low %v2906_v4, %v2913_v61  ;;  %v2929_v11 = vcombine.low %v2920_v49, %v2927_v41  ;;  %v3323_v18 = vpack.c.bf16 %v2752_v0, %v2751_v43  ;;  %v3324_v20 = vpack.c.bf16 %v2758_v12, %v2757_v30 }
 0x21f   :  { %v2887_v31 = vrot.slane %v2879_v48, %v3843_v15  ;;  %v2894_v27 = vrot.slane %v2880_v6, %v3843_v15  ;;  %v2955_v26 = vrot.slane %v3321_v56, %v3843_v15  ;;  %v2962_v28 = vrot.slane %v3322_v45, %v3843_v15 }
 0x220   :  { %v2936_v60 = vrot.slane %v2928_v50, %v3843_v15  ;;  %v2943_v3 = vrot.slane %v2929_v11, %v3843_v15  ;;  %v2969_v7 = vrot.slane %v3323_v18, %v3843_v15  ;;  %v2976_v22 = vrot.slane %v3324_v20, %v3843_v15 }
 0x221   :  { %v2895_v58 = vcombine.low %v2887_v31, %v2894_v27  ;;  %v2977_v36 = vcombine.low %v2955_v26, %v2962_v28  ;;  %v3325_v55 = vpack.c.bf16 %v2764_v51, %v2763_v37  ;;  %v3326_v46 = vpack.c.bf16 %v2770_v23, %v2769_v10 }
 0x222   :  { %v2944_v13 = vcombine.low %v2936_v60, %v2943_v3  ;;  %v2978_v52 = vcombine.low %v2969_v7, %v2976_v22  ;;  %v3327_v42 = vpack.c.bf16 %v2776_v62, %v2775_v17  ;;  %v3328_v25 = vpack.c.bf16 %v2782_v53, %v2781_v32 }
 0x223   :  { %v2985_v63 = vrot.slane %v2977_v36, %v3843_v15  ;;  %v3004_v8 = vrot.slane %v3325_v55, %v3843_v15  ;;  %v3011_v39 = vrot.slane %v3326_v46, %v3843_v15  ;;  %3047 = vst [vmem:[%s3937_s5] sm:$0xff] %v2895_v58 }
 0x224   :  { %v2992_v43 = vrot.slane %v2978_v52, %v3843_v15  ;;  %v3018_v0 = vrot.slane %v3327_v42, %v3843_v15  ;;  %v3025_v30 = vrot.slane %v3328_v25, %v3843_v15  ;;  %3048 = vst [vmem:[%s3937_s5 + $0x8] sm:$0xff] %v2944_v13 }
 0x225   :  { %v3026_v12 = vcombine.low %v3004_v8, %v3011_v39 }
 0x226   :  { %v2993_v29 = vcombine.low %v2985_v63, %v2992_v43  ;;  %v3027_v44 = vcombine.low %v3018_v0, %v3025_v30 }
 0x227   :  { %v3034_v21 = vrot.slane %v3026_v12, %v3843_v15 }
 0x228   :  { %v3041_v35 = vrot.slane %v3027_v44, %v3843_v15  ;;  %3049 = vst [vmem:[%s3937_s5 + $0x10] sm:$0xff] %v2993_v29 }
 0x22a   :  { %v3042_v5 = vcombine.low %v3034_v21, %v3041_v35 }
 0x22c   :  { %3050 = vst [vmem:[%s3937_s5 + $0x18] sm:$0xff] %v3042_v5 }
 0x22d   :  { %3055 = vsyncpa [#allocation3], 1 }
 0x22e   :  { %3056 = vsyncpa [#allocation5], 1 }

// kernel: generator_forward.5
= control target key start
LH: loop header
LB: loop body
LE: loop exit
PB: predicated region body
PF: predicated region fallthrough
CT: control target
= control target key end

     0   :  { %s6215_s1 = inlined_call_operand.vmem [shape: bf16[4,1024,128], index: 1, kind: input, shape index: {}]   ;;  %s6216_s0 = inlined_call_operand.vmem [shape: bf16[4,32,1024], index: 0, kind: input, shape index: {}]   ;;  %s6217_s2 = inlined_call_operand.vmem [shape: f32[1,128], index: 2, kind: input, shape index: {}]   ;;  %s6218_s3 = inlined_call_operand.vmem [shape: f32[1,128], index: 3, kind: input, shape index: {}]   ;;  %s6219_s4 = inlined_call_operand.vmem [shape: bf16[4,32,128], index: 4, kind: output, shape index: {}]  }
   0x1   :  { %v4820_v0 = vld [vmem:[%s6215_s1 + $0x78] sm:$0xff]   ;;  %v4824_v4 = vld [vmem:[%s6215_s1 + $0x70] sm:$0xff]   ;;  %v4828_v8 = vld [vmem:[%s6215_s1 + $0x68] sm:$0xff]  }
   0x2   :  { %v4821_v1 = vld [vmem:[%s6215_s1 + $0xf8] sm:$0xff]   ;;  %4372 = vmatprep.subr.bf16.mxu0 %v4820_v0  ;;  %v4825_v5 = vld [vmem:[%s6215_s1 + $0xf0] sm:$0xff]   ;;  %v4829_v9 = vld [vmem:[%s6215_s1 + $0xe8] sm:$0xff]  }
   0x3   :  { %v4822_v2 = vld [vmem:[%s6215_s1 + $0x38] sm:$0xff]   ;;  %4400 = vmatprep.subr.bf16.mxu1 %v4821_v1  ;;  %v4826_v6 = vld [vmem:[%s6215_s1 + $0x30] sm:$0xff]   ;;  %v4830_v10 = vld [vmem:[%s6215_s1 + $0x28] sm:$0xff]  }
   0x4   :  { %v4823_v3 = vld [vmem:[%s6215_s1 + $0xb8] sm:$0xff]   ;;  %4373 = vmatpush3.bf16.msra.mxu0 %v4822_v2  ;;  %v4827_v7 = vld [vmem:[%s6215_s1 + $0xb0] sm:$0xff]   ;;  %v4831_v11 = vld [vmem:[%s6215_s1 + $0xa8] sm:$0xff]  }
   0x5   :  { %4401 = vmatpush3.bf16.msra.mxu1 %v4823_v3  ;;  %4374 = vmatprep.subr.bf16.mxu0 %v4824_v4  ;;  %v4832_v12 = vld [vmem:[%s6215_s1 + $0x60] sm:$0xff]   ;;  %v4836_v16 = vld [vmem:[%s6215_s1 + $0x58] sm:$0xff]   ;;  %v4840_v20 = vld [vmem:[%s6215_s1 + $0x50] sm:$0xff]  }
   0x6   :  { %4402 = vmatprep.subr.bf16.mxu1 %v4825_v5  ;;  %v4833_v13 = vld [vmem:[%s6215_s1 + $0xe0] sm:$0xff]   ;;  %v4837_v17 = vld [vmem:[%s6215_s1 + $0xd8] sm:$0xff]   ;;  %v4841_v21 = vld [vmem:[%s6215_s1 + $0xd0] sm:$0xff]  }
   0x7   :  { %v4834_v14 = vld [vmem:[%s6215_s1 + $0x20] sm:$0xff]   ;;  %v4838_v18 = vld [vmem:[%s6215_s1 + $0x18] sm:$0xff]   ;;  %v4842_v22 = vld [vmem:[%s6215_s1 + $0x10] sm:$0xff]  }
   0x8   :  { %4375 = vmatpush3.bf16.msra.mxu0 %v4826_v6  ;;  %v4835_v15 = vld [vmem:[%s6215_s1 + $0xa0] sm:$0xff]   ;;  %v4839_v19 = vld [vmem:[%s6215_s1 + $0x98] sm:$0xff]   ;;  %v4843_v23 = vld [vmem:[%s6215_s1 + $0x90] sm:$0xff]  }
   0x9   :  { %4403 = vmatpush3.bf16.msra.mxu1 %v4827_v7  ;;  %4376 = vmatprep.subr.bf16.mxu0 %v4828_v8  ;;  %v4844_v24 = vld [vmem:[%s6215_s1 + $0x48] sm:$0xff]   ;;  %v4848_v28 = vld [vmem:[%s6215_s1 + $0x40] sm:$0xff]   ;;  %v4852_v40 = vld [vmem:[%s6215_s1 + $0x178] sm:$0xff]  }
   0xa   :  { %4404 = vmatprep.subr.bf16.mxu1 %v4829_v9  ;;  %v4845_v25 = vld [vmem:[%s6215_s1 + $0xc8] sm:$0xff]   ;;  %v4849_v29 = vld [vmem:[%s6215_s1 + $0xc0] sm:$0xff]   ;;  %v4853_v41 = vld [vmem:[%s6215_s1 + $0x1f8] sm:$0xff]  }
   0xb   :  { %v4846_v26 = vld [vmem:[%s6215_s1 + $0x8] sm:$0xff]   ;;  %v4850_v30 = vld [vmem:[%s6215_s1] sm:$0xff]   ;;  %v4854_v42 = vld [vmem:[%s6215_s1 + $0x138] sm:$0xff]  }
   0xc   :  { %4377 = vmatpush3.bf16.msra.mxu0 %v4830_v10  ;;  %v4847_v27 = vld [vmem:[%s6215_s1 + $0x88] sm:$0xff]   ;;  %v4851_v31 = vld [vmem:[%s6215_s1 + $0x80] sm:$0xff]   ;;  %v4855_v43 = vld [vmem:[%s6215_s1 + $0x1b8] sm:$0xff]  }
   0xd   :  { %4405 = vmatpush3.bf16.msra.mxu1 %v4831_v11  ;;  %4378 = vmatprep.subr.bf16.mxu0 %v4832_v12  ;;  %v18_v32 = vld [vmem:[%s6216_s0] sm:$0xff]  ;;  %v19_v34 = vld [vmem:[%s6216_s0 + $0x8] sm:$0xff]  ;;  %v4856_v44 = vld [vmem:[%s6215_s1 + $0x170] sm:$0xff]  }
   0xe   :  { %4406 = vmatprep.subr.bf16.mxu1 %v4833_v13  ;;  %v22_v33 = vld [vmem:[%s6216_s0 + $0x20] sm:$0xff]  ;;  %v23_v37 = vld [vmem:[%s6216_s0 + $0x28] sm:$0xff]  ;;  %v4857_v45 = vld [vmem:[%s6215_s1 + $0x1f0] sm:$0xff]  }
   0xf   :  { %v3529_v35 = vcombine.low %v18_v32, %v22_v33  ;;  %v3530_v36 = vcombine.high %v18_v32, %v22_v33  ;;  %v3531_v38 = vcombine.low %v19_v34, %v23_v37  ;;  %v3532_v39 = vcombine.high %v19_v34, %v23_v37  ;;  %v4858_v46 = vld [vmem:[%s6215_s1 + $0x130] sm:$0xff]   ;;  %v4860_v48 = vld [vmem:[%s6215_s1 + $0x168] sm:$0xff]   ;;  %v4864_v52 = vld [vmem:[%s6215_s1 + $0x160] sm:$0xff]  }
  0x10   :  { %4379 = vmatpush3.bf16.msra.mxu0 %v4834_v14  ;;  %v4859_v47 = vld [vmem:[%s6215_s1 + $0x1b0] sm:$0xff]   ;;  %v4861_v49 = vld [vmem:[%s6215_s1 + $0x1e8] sm:$0xff]   ;;  %v4865_v53 = vld [vmem:[%s6215_s1 + $0x1e0] sm:$0xff]  }
  0x11   :  { %4407 = vmatpush3.bf16.msra.mxu1 %v4835_v15  ;;  %4380 = vmatprep.subr.bf16.mxu0 %v4836_v16  ;;  %v4862_v50 = vld [vmem:[%s6215_s1 + $0x128] sm:$0xff]   ;;  %v4866_v54 = vld [vmem:[%s6215_s1 + $0x120] sm:$0xff]   ;;  %v4868_v56 = vld [vmem:[%s6215_s1 + $0x158] sm:$0xff]  }
  0x12   :  { %4408 = vmatprep.subr.bf16.mxu1 %v4837_v17  ;;  %658 = vmatprep.mubr.bf16.mxu0 %v3530_v36  ;;  %v4863_v51 = vld [vmem:[%s6215_s1 + $0x1a8] sm:$0xff]   ;;  %v4867_v55 = vld [vmem:[%s6215_s1 + $0x1a0] sm:$0xff]   ;;  %v4869_v57 = vld [vmem:[%s6215_s1 + $0x1d8] sm:$0xff]  }
  0x13   :  { %707 = vmatprep.mubr.bf16.mxu1 %v3532_v39  ;;  %v4870_v58 = vld [vmem:[%s6215_s1 + $0x118] sm:$0xff]   ;;  %v26_v60 = vld [vmem:[%s6216_s0 + $0x40] sm:$0xff]  ;;  %v27_v63 = vld [vmem:[%s6216_s0 + $0x48] sm:$0xff] }
  0x14   :  { %4381 = vmatpush3.bf16.msra.mxu0 %v4838_v18  ;;  %v4871_v59 = vld [vmem:[%s6215_s1 + $0x198] sm:$0xff]   ;;  %v30_v61 = vld [vmem:[%s6216_s0 + $0x60] sm:$0xff]  ;;  %v31_v0 = vld [vmem:[%s6216_s0 + $0x68] sm:$0xff] }
  0x15   :  { %4409 = vmatpush3.bf16.msra.mxu1 %v4839_v19  ;;  %4382 = vmatprep.subr.bf16.mxu0 %v4840_v20  ;;  %v3538_v62 = vcombine.high %v26_v60, %v30_v61  ;;  %v3537_v1 = vcombine.low %v26_v60, %v30_v61  ;;  %v3540_v2 = vcombine.high %v27_v63, %v31_v0  ;;  %v4872_v4 = vld [vmem:[%s6215_s1 + $0x150] sm:$0xff]   ;;  %v4876_v8 = vld [vmem:[%s6215_s1 + $0x148] sm:$0xff]   ;;  %v4880_v12 = vld [vmem:[%s6215_s1 + $0x140] sm:$0xff]  }
  0x16   :  { %4410 = vmatprep.subr.bf16.mxu1 %v4841_v21  ;;  %v3539_v3 = vcombine.low %v27_v63, %v31_v0  ;;  %v4873_v5 = vld [vmem:[%s6215_s1 + $0x1d0] sm:$0xff]   ;;  %v4877_v9 = vld [vmem:[%s6215_s1 + $0x1c8] sm:$0xff]   ;;  %v4881_v13 = vld [vmem:[%s6215_s1 + $0x1c0] sm:$0xff]  }
  0x17   :  { %v4874_v6 = vld [vmem:[%s6215_s1 + $0x110] sm:$0xff]   ;;  %v4878_v10 = vld [vmem:[%s6215_s1 + $0x108] sm:$0xff]   ;;  %v4882_v14 = vld [vmem:[%s6215_s1 + $0x100] sm:$0xff]  }
  0x18   :  { %4383 = vmatpush3.bf16.msra.mxu0 %v4842_v22  ;;  %v4875_v7 = vld [vmem:[%s6215_s1 + $0x190] sm:$0xff]   ;;  %v4879_v11 = vld [vmem:[%s6215_s1 + $0x188] sm:$0xff]   ;;  %v4883_v15 = vld [vmem:[%s6215_s1 + $0x180] sm:$0xff]  }
  0x19   :  { %4411 = vmatpush3.bf16.msra.mxu1 %v4843_v23  ;;  %4384 = vmatprep.subr.bf16.mxu0 %v4844_v24  ;;  %v20_v16 = vld [vmem:[%s6216_s0 + $0x10] sm:$0xff]  ;;  %v21_v18 = vld [vmem:[%s6216_s0 + $0x18] sm:$0xff]  ;;  %v4892_v36 = vld [vmem:[%s6215_s1 + $0x268] sm:$0xff]  }
  0x1a   :  { %4412 = vmatprep.subr.bf16.mxu1 %v4845_v25  ;;  %v24_v17 = vld [vmem:[%s6216_s0 + $0x30] sm:$0xff]  ;;  %v25_v19 = vld [vmem:[%s6216_s0 + $0x38] sm:$0xff]  ;;  %v4893_v37 = vld [vmem:[%s6215_s1 + $0x2e8] sm:$0xff]  }
  0x1b   :  { %v3533_v20 = vcombine.low %v20_v16, %v24_v17  ;;  %v3534_v21 = vcombine.high %v20_v16, %v24_v17  ;;  %v3535_v22 = vcombine.low %v21_v18, %v25_v19  ;;  %v3536_v23 = vcombine.high %v21_v18, %v25_v19  ;;  %v4884_v24 = vld [vmem:[%s6215_s1 + $0x278] sm:$0xff]   ;;  %v28_v32 = vld [vmem:[%s6216_s0 + $0x50] sm:$0xff]  ;;  %v4912_v60 = vld [vmem:[%s6215_s1 + $0x240] sm:$0xff]  }
  0x1c   :  { %4385 = vmatpush3.bf16.msra.mxu0 %v4846_v26  ;;  %v4885_v25 = vld [vmem:[%s6215_s1 + $0x2f8] sm:$0xff]   ;;  %v32_v33 = vld [vmem:[%s6216_s0 + $0x70] sm:$0xff]  ;;  %v4913_v61 = vld [vmem:[%s6215_s1 + $0x2c0] sm:$0xff]  }
  0x1d   :  { %4413 = vmatpush3.bf16.msra.mxu1 %v4847_v27  ;;  %4386 = vmatprep.subr.bf16.mxu0 %v4848_v28  ;;  %v4886_v26 = vld [vmem:[%s6215_s1 + $0x238] sm:$0xff]   ;;  %v4888_v28 = vld [vmem:[%s6215_s1 + $0x270] sm:$0xff]   ;;  %v3542_v34 = vcombine.high %v28_v32, %v32_v33  ;;  %v4915_v63 = vld [vmem:[%s6215_s1 + $0x280] sm:$0xff]  }
  0x1e   :  { %4414 = vmatprep.subr.bf16.mxu1 %v4849_v29  ;;  %v4887_v27 = vld [vmem:[%s6215_s1 + $0x2b8] sm:$0xff]   ;;  %v4889_v29 = vld [vmem:[%s6215_s1 + $0x2f0] sm:$0xff]   ;;  %v3609_v0 = vld [vmem:[%s6216_s0 + $0x80] sm:$0xff] }
  0x1f   :  { %v33_v39 = vld [vmem:[%s6216_s0 + $0x78] sm:$0xff]  ;;  %v4924_v16 = vld [vmem:[%s6215_s1 + $0x368] sm:$0xff]  }
  0x20   :  { %4387 = vmatpush3.bf16.msra.mxu0 %v4850_v30  ;;  %v4890_v30 = vld [vmem:[%s6215_s1 + $0x230] sm:$0xff]   ;;  %v4925_v17 = vld [vmem:[%s6215_s1 + $0x3e8] sm:$0xff]  }
  0x21   :  { %4415 = vmatpush3.bf16.msra.mxu1 %v4851_v31  ;;  %4428 = vmatprep.subr.bf16.mxu0 %v4852_v40  ;;  %v4891_v31 = vld [vmem:[%s6215_s1 + $0x2b0] sm:$0xff]   ;;  %v4926_v18 = vld [vmem:[%s6215_s1 + $0x328] sm:$0xff]  }
  0x22   :  { %4456 = vmatprep.subr.bf16.mxu1 %v4853_v41  ;;  %v4894_v41 = vld [vmem:[%s6215_s1 + $0x228] sm:$0xff]  }
  0x23   :  { %659 = vmatmul.mubr.bf16.vlgmr.msra.gmra.mxu0 %v3529_v35  ;;  %v3541_v35 = vcombine.low %v28_v32, %v32_v33  ;;  %v4927_v19 = vld [vmem:[%s6215_s1 + $0x3a8] sm:$0xff]  }
  0x24   :  { %708 = vmatmul.mubr.bf16.vlgmr.msra.gmra.mxu1 %v3531_v38  ;;  %4429 = vmatpush3.bf16.msra.mxu0 %v4854_v42  ;;  %v29_v38 = vld [vmem:[%s6216_s0 + $0x58] sm:$0xff] }
  0x25   :  { %4457 = vmatpush3.bf16.msra.mxu1 %v4855_v43  ;;  %4430 = vmatprep.subr.bf16.mxu0 %v4856_v44  ;;  %v3544_v40 = vcombine.high %v29_v38, %v33_v39  ;;  %v3543_v42 = vcombine.low %v29_v38, %v33_v39  ;;  %v4895_v43 = vld [vmem:[%s6215_s1 + $0x2a8] sm:$0xff]   ;;  %v4896_v44 = vld [vmem:[%s6215_s1 + $0x260] sm:$0xff]   ;;  %v4938_v38 = vld [vmem:[%s6215_s1 + $0x310] sm:$0xff]  }
  0x26   :  { %4458 = vmatprep.subr.bf16.mxu1 %v4857_v45  ;;  %666 = vmatprep.mubr.bf16.mxu0 %v3538_v62  ;;  %v4897_v45 = vld [vmem:[%s6215_s1 + $0x2e0] sm:$0xff]   ;;  %v4939_v39 = vld [vmem:[%s6215_s1 + $0x390] sm:$0xff]  }
  0x27   :  { %715 = vmatprep.mubr.bf16.mxu1 %v3540_v2  ;;  %v4914_v62 = vld [vmem:[%s6215_s1 + $0x200] sm:$0xff]  }
  0x28   :  { %4431 = vmatpush3.bf16.msra.mxu0 %v4858_v46  ;;  %v4898_v46 = vld [vmem:[%s6215_s1 + $0x220] sm:$0xff]  }
  0x29   :  { %4459 = vmatpush3.bf16.msra.mxu1 %v4859_v47  ;;  %4432 = vmatprep.subr.bf16.mxu0 %v4860_v48  ;;  %v4899_v47 = vld [vmem:[%s6215_s1 + $0x2a0] sm:$0xff]   ;;  %v4900_v48 = vld [vmem:[%s6215_s1 + $0x258] sm:$0xff]  }
  0x2a   :  { %4460 = vmatprep.subr.bf16.mxu1 %v4861_v49  ;;  %v4901_v49 = vld [vmem:[%s6215_s1 + $0x2d8] sm:$0xff]  }
  0x2b   :  { %667 = vmatmul.mubr.bf16.gmra.mxu0 %v3537_v1  ;;  %v3613_v1 = vld [vmem:[%s6216_s0 + $0xa0] sm:$0xff] }
  0x2c   :  { %4433 = vmatpush3.bf16.msra.mxu0 %v4862_v50  ;;  %716 = vmatmul.mubr.bf16.gmra.mxu1 %v3539_v3  ;;  %v4902_v50 = vld [vmem:[%s6215_s1 + $0x218] sm:$0xff]   ;;  %v3753_v2 = vcombine.low %v3609_v0, %v3613_v1  ;;  %v3754_v3 = vcombine.high %v3609_v0, %v3613_v1  ;;  %v3619_v0 = vld [vmem:[%s6216_s0 + $0xd0] sm:$0xff] }
  0x2d   :  { %4461 = vmatpush3.bf16.msra.mxu1 %v4863_v51  ;;  %4434 = vmatprep.subr.bf16.mxu0 %v4864_v52  ;;  %v4903_v51 = vld [vmem:[%s6215_s1 + $0x298] sm:$0xff]   ;;  %v4904_v52 = vld [vmem:[%s6215_s1 + $0x250] sm:$0xff]  }
  0x2e   :  { %4462 = vmatprep.subr.bf16.mxu1 %v4865_v53  ;;  %756 = vmatprep.mubr.bf16.mxu0 %v3534_v21  ;;  %v4905_v53 = vld [vmem:[%s6215_s1 + $0x2d0] sm:$0xff]   ;;  %v4929_v21 = vld [vmem:[%s6215_s1 + $0x3e0] sm:$0xff]  }
  0x2f   :  { %805 = vmatprep.mubr.bf16.mxu1 %v3536_v23  ;;  %v4931_v23 = vld [vmem:[%s6215_s1 + $0x3a0] sm:$0xff]   ;;  %v3623_v1 = vld [vmem:[%s6216_s0 + $0xf0] sm:$0xff] }
  0x30   :  { %4435 = vmatpush3.bf16.msra.mxu0 %v4866_v54  ;;  %v4906_v54 = vld [vmem:[%s6215_s1 + $0x210] sm:$0xff]  }
  0x31   :  { %4463 = vmatpush3.bf16.msra.mxu1 %v4867_v55  ;;  %4436 = vmatprep.subr.bf16.mxu0 %v4868_v56  ;;  %v4907_v55 = vld [vmem:[%s6215_s1 + $0x290] sm:$0xff]   ;;  %v4908_v56 = vld [vmem:[%s6215_s1 + $0x248] sm:$0xff]  }
  0x32   :  { %4464 = vmatprep.subr.bf16.mxu1 %v4869_v57  ;;  %v4909_v57 = vld [vmem:[%s6215_s1 + $0x2c8] sm:$0xff]  }
  0x34   :  { %4437 = vmatpush3.bf16.msra.mxu0 %v4870_v58  ;;  %v4910_v58 = vld [vmem:[%s6215_s1 + $0x208] sm:$0xff]  }
  0x35   :  { %4465 = vmatpush3.bf16.msra.mxu1 %v4871_v59  ;;  %4438 = vmatprep.subr.bf16.mxu0 %v4872_v4  ;;  %v4911_v59 = vld [vmem:[%s6215_s1 + $0x288] sm:$0xff]  }
  0x36   :  { %4466 = vmatprep.subr.bf16.mxu1 %v4873_v5  ;;  %v3610_v4 = vld [vmem:[%s6216_s0 + $0x88] sm:$0xff] }
  0x37   :  { %v3614_v5 = vld [vmem:[%s6216_s0 + $0xa8] sm:$0xff] }
  0x38   :  { %4439 = vmatpush3.bf16.msra.mxu0 %v4874_v6  ;;  %v3755_v6 = vcombine.low %v3610_v4, %v3614_v5 }
  0x39   :  { %4467 = vmatpush3.bf16.msra.mxu1 %v4875_v7  ;;  %4440 = vmatprep.subr.bf16.mxu0 %v4876_v8  ;;  %v3756_v7 = vcombine.high %v3610_v4, %v3614_v5  ;;  %v4916_v8 = vld [vmem:[%s6215_s1 + $0x378] sm:$0xff]   ;;  %v4956_v4 = vld [vmem:[%s6215_s1 + $0x468] sm:$0xff]  }
  0x3a   :  { %4468 = vmatprep.subr.bf16.mxu1 %v4877_v9  ;;  %v4917_v9 = vld [vmem:[%s6215_s1 + $0x3f8] sm:$0xff]   ;;  %v4957_v5 = vld [vmem:[%s6215_s1 + $0x4e8] sm:$0xff]  }
  0x3c   :  { %4441 = vmatpush3.bf16.msra.mxu0 %v4878_v10  ;;  %v4918_v10 = vld [vmem:[%s6215_s1 + $0x338] sm:$0xff]  }
  0x3d   :  { %4469 = vmatpush3.bf16.msra.mxu1 %v4879_v11  ;;  %4442 = vmatprep.subr.bf16.mxu0 %v4880_v12  ;;  %v4919_v11 = vld [vmem:[%s6215_s1 + $0x3b8] sm:$0xff]   ;;  %v4920_v12 = vld [vmem:[%s6215_s1 + $0x370] sm:$0xff]  }
  0x3e   :  { %4470 = vmatprep.subr.bf16.mxu1 %v4881_v13  ;;  %v4921_v13 = vld [vmem:[%s6215_s1 + $0x3f0] sm:$0xff]  }
  0x40   :  { %4443 = vmatpush3.bf16.msra.mxu0 %v4882_v14  ;;  %v4922_v14 = vld [vmem:[%s6215_s1 + $0x330] sm:$0xff]  }
  0x41   :  { %4471 = vmatpush3.bf16.msra.mxu1 %v4883_v15  ;;  %4484 = vmatprep.subr.bf16.mxu0 %v4884_v24  ;;  %v4923_v15 = vld [vmem:[%s6215_s1 + $0x3b0] sm:$0xff]   ;;  %v4932_v24 = vld [vmem:[%s6215_s1 + $0x358] sm:$0xff]  }
  0x42   :  { %4512 = vmatprep.subr.bf16.mxu1 %v4885_v25  ;;  %v4933_v25 = vld [vmem:[%s6215_s1 + $0x3d8] sm:$0xff]  }
  0x43   :  { %757 = vmatmul.mubr.bf16.vlgmr.msra.gmra.mxu0 %v3533_v20  ;;  %v4928_v20 = vld [vmem:[%s6215_s1 + $0x360] sm:$0xff]  }
  0x44   :  { %806 = vmatmul.mubr.bf16.vlgmr.msra.gmra.mxu1 %v3535_v22  ;;  %4485 = vmatpush3.bf16.msra.mxu0 %v4886_v26  ;;  %v4930_v22 = vld [vmem:[%s6215_s1 + $0x320] sm:$0xff]   ;;  %v4934_v26 = vld [vmem:[%s6215_s1 + $0x318] sm:$0xff]  }
  0x45   :  { %4513 = vmatpush3.bf16.msra.mxu1 %v4887_v27  ;;  %4486 = vmatprep.subr.bf16.mxu0 %v4888_v28  ;;  %v4935_v27 = vld [vmem:[%s6215_s1 + $0x398] sm:$0xff]   ;;  %v3617_v28 = vld [vmem:[%s6216_s0 + $0xc0] sm:$0xff] }
  0x46   :  { %4514 = vmatprep.subr.bf16.mxu1 %v4889_v29  ;;  %764 = vmatprep.mubr.bf16.mxu0 %v3542_v34  ;;  %v3621_v29 = vld [vmem:[%s6216_s0 + $0xe0] sm:$0xff] }
  0x47   :  { %813 = vmatprep.mubr.bf16.mxu1 %v3544_v40  ;;  %v3762_v32 = vcombine.high %v3617_v28, %v3621_v29  ;;  %v3761_v34 = vcombine.low %v3617_v28, %v3621_v29  ;;  %v4940_v40 = vld [vmem:[%s6215_s1 + $0x348] sm:$0xff]   ;;  %v4976_v28 = vld [vmem:[%s6215_s1 + $0x440] sm:$0xff]  }
  0x48   :  { %4487 = vmatpush3.bf16.msra.mxu0 %v4890_v30  ;;  %v3618_v30 = vld [vmem:[%s6216_s0 + $0xc8] sm:$0xff]  ;;  %v4977_v29 = vld [vmem:[%s6215_s1 + $0x4c0] sm:$0xff]  }
  0x49   :  { %4515 = vmatpush3.bf16.msra.mxu1 %v4891_v31  ;;  %4488 = vmatprep.subr.bf16.mxu0 %v4892_v36  ;;  %v3622_v31 = vld [vmem:[%s6216_s0 + $0xe8] sm:$0xff]  ;;  %v4936_v36 = vld [vmem:[%s6215_s1 + $0x350] sm:$0xff]  }
  0x4a   :  { %4516 = vmatprep.subr.bf16.mxu1 %v4893_v37  ;;  %v3764_v33 = vcombine.high %v3618_v30, %v3622_v31  ;;  %v4937_v37 = vld [vmem:[%s6215_s1 + $0x3d0] sm:$0xff]  }
  0x4b   :  { %765 = vmatmul.mubr.bf16.gmra.mxu0 %v3541_v35  ;;  %v3763_v35 = vcombine.low %v3618_v30, %v3622_v31  ;;  %v4978_v30 = vld [vmem:[%s6215_s1 + $0x400] sm:$0xff]  }
  0x4c   :  { %4489 = vmatpush3.bf16.msra.mxu0 %v4894_v41  ;;  %814 = vmatmul.mubr.bf16.gmra.mxu1 %v3543_v42  ;;  %v4941_v41 = vld [vmem:[%s6215_s1 + $0x3c8] sm:$0xff]   ;;  %v4979_v31 = vld [vmem:[%s6215_s1 + $0x480] sm:$0xff]  }
  0x4d   :  { %4517 = vmatpush3.bf16.msra.mxu1 %v4895_v43  ;;  %4490 = vmatprep.subr.bf16.mxu0 %v4896_v44  ;;  %v4942_v42 = vld [vmem:[%s6215_s1 + $0x308] sm:$0xff]   ;;  %v4944_v44 = vld [vmem:[%s6215_s1 + $0x340] sm:$0xff]  }
  0x4e   :  { %4518 = vmatprep.subr.bf16.mxu1 %v4897_v45  ;;  %1492 = vmatprep.mubr.bf16.mxu0 %v3754_v3  ;;  %v4943_v43 = vld [vmem:[%s6215_s1 + $0x388] sm:$0xff]   ;;  %v4945_v45 = vld [vmem:[%s6215_s1 + $0x3c0] sm:$0xff]   ;;  %v3765_v3 = vcombine.low %v3619_v0, %v3623_v1 }
  0x4f   :  { %1541 = vmatprep.mubr.bf16.mxu1 %v3756_v7  ;;  %v3624_v7 = vld [vmem:[%s6216_s0 + $0xf8] sm:$0xff] }
  0x50   :  { %4491 = vmatpush3.bf16.msra.mxu0 %v4898_v46  ;;  %v4946_v46 = vld [vmem:[%s6215_s1 + $0x300] sm:$0xff]  }
  0x51   :  { %4519 = vmatpush3.bf16.msra.mxu1 %v4899_v47  ;;  %4492 = vmatprep.subr.bf16.mxu0 %v4900_v48  ;;  %v4947_v47 = vld [vmem:[%s6215_s1 + $0x380] sm:$0xff]   ;;  %v3611_v48 = vld [vmem:[%s6216_s0 + $0x90] sm:$0xff] }
  0x52   :  { %4520 = vmatprep.subr.bf16.mxu1 %v4901_v49  ;;  %v3615_v49 = vld [vmem:[%s6216_s0 + $0xb0] sm:$0xff] }
  0x54   :  { %4493 = vmatpush3.bf16.msra.mxu0 %v4902_v50  ;;  %v3612_v50 = vld [vmem:[%s6216_s0 + $0x98] sm:$0xff] }
  0x55   :  { %4521 = vmatpush3.bf16.msra.mxu1 %v4903_v51  ;;  %4494 = vmatprep.subr.bf16.mxu0 %v4904_v52  ;;  %v3757_v51 = vcombine.low %v3611_v48, %v3615_v49  ;;  %v3758_v52 = vcombine.high %v3611_v48, %v3615_v49  ;;  %v4988_v48 = vld [vmem:[%s6215_s1 + $0x568] sm:$0xff]  }
  0x56   :  { %4522 = vmatprep.subr.bf16.mxu1 %v4905_v53  ;;  %v3616_v53 = vld [vmem:[%s6216_s0 + $0xb8] sm:$0xff]  ;;  %v4989_v49 = vld [vmem:[%s6215_s1 + $0x5e8] sm:$0xff]  }
  0x58   :  { %4495 = vmatpush3.bf16.msra.mxu0 %v4906_v54  ;;  %v3759_v54 = vcombine.low %v3612_v50, %v3616_v53 }
  0x59   :  { %4523 = vmatpush3.bf16.msra.mxu1 %v4907_v55  ;;  %4496 = vmatprep.subr.bf16.mxu0 %v4908_v56  ;;  %v3760_v55 = vcombine.high %v3612_v50, %v3616_v53  ;;  %v4948_v56 = vld [vmem:[%s6215_s1 + $0x478] sm:$0xff]   ;;  %v4990_v50 = vld [vmem:[%s6215_s1 + $0x528] sm:$0xff]   ;;  %v4993_v53 = vld [vmem:[%s6215_s1 + $0x5e0] sm:$0xff]  }
  0x5a   :  { %4524 = vmatprep.subr.bf16.mxu1 %v4909_v57  ;;  %v4949_v57 = vld [vmem:[%s6215_s1 + $0x4f8] sm:$0xff]  }
  0x5c   :  { %4497 = vmatpush3.bf16.msra.mxu0 %v4910_v58  ;;  %v4950_v58 = vld [vmem:[%s6215_s1 + $0x438] sm:$0xff]  }
  0x5d   :  { %4525 = vmatpush3.bf16.msra.mxu1 %v4911_v59  ;;  %4498 = vmatprep.subr.bf16.mxu0 %v4912_v60  ;;  %v4951_v59 = vld [vmem:[%s6215_s1 + $0x4b8] sm:$0xff]   ;;  %v4952_v60 = vld [vmem:[%s6215_s1 + $0x470] sm:$0xff]  }
  0x5e   :  { %4526 = vmatprep.subr.bf16.mxu1 %v4913_v61  ;;  %v4953_v61 = vld [vmem:[%s6215_s1 + $0x4f0] sm:$0xff]  }
  0x60   :  { %4499 = vmatpush3.bf16.msra.mxu0 %v4914_v62  ;;  %v4954_v62 = vld [vmem:[%s6215_s1 + $0x430] sm:$0xff]  }
  0x61   :  { %4527 = vmatpush3.bf16.msra.mxu1 %v4915_v63  ;;  %4540 = vmatprep.subr.bf16.mxu0 %v4916_v8  ;;  %v4955_v63 = vld [vmem:[%s6215_s1 + $0x4b0] sm:$0xff]  }
  0x62   :  { %4568 = vmatprep.subr.bf16.mxu1 %v4917_v9  ;;  %v4958_v9 = vld [vmem:[%s6215_s1 + $0x428] sm:$0xff]  }
  0x63   :  { %1493 = vmatmul.mubr.bf16.vlgmr.msra.gmra.mxu0 %v3753_v2  ;;  %v3766_v2 = vcombine.high %v3619_v0, %v3623_v1  ;;  %v3846_v0 = vld [vmem:[%s6216_s0 + $0x168] sm:$0xff] }
  0x64   :  { %1542 = vmatmul.mubr.bf16.vlgmr.msra.gmra.mxu1 %v3755_v6  ;;  %4541 = vmatpush3.bf16.msra.mxu0 %v4918_v10  ;;  %v3620_v6 = vld [vmem:[%s6216_s0 + $0xd8] sm:$0xff] }
  0x65   :  { %4569 = vmatpush3.bf16.msra.mxu1 %v4919_v11  ;;  %4542 = vmatprep.subr.bf16.mxu0 %v4920_v12  ;;  %v3768_v8 = vcombine.high %v3620_v6, %v3624_v7  ;;  %v3767_v10 = vcombine.low %v3620_v6, %v3624_v7  ;;  %v4959_v11 = vld [vmem:[%s6215_s1 + $0x4a8] sm:$0xff]   ;;  %v4960_v12 = vld [vmem:[%s6215_s1 + $0x460] sm:$0xff]   ;;  %v5002_v6 = vld [vmem:[%s6215_s1 + $0x510] sm:$0xff]  }
  0x66   :  { %4570 = vmatprep.subr.bf16.mxu1 %v4921_v13  ;;  %1500 = vmatprep.mubr.bf16.mxu0 %v3762_v32  ;;  %v4961_v13 = vld [vmem:[%s6215_s1 + $0x4e0] sm:$0xff]   ;;  %v5003_v7 = vld [vmem:[%s6215_s1 + $0x590] sm:$0xff]  }
  0x67   :  { %1549 = vmatprep.mubr.bf16.mxu1 %v3764_v33  ;;  %v3833_v32 = vld [vmem:[%s6216_s0 + $0x100] sm:$0xff] }
  0x68   :  { %4543 = vmatpush3.bf16.msra.mxu0 %v4922_v14  ;;  %v4962_v14 = vld [vmem:[%s6215_s1 + $0x420] sm:$0xff]  }
  0x69   :  { %4571 = vmatpush3.bf16.msra.mxu1 %v4923_v15  ;;  %4544 = vmatprep.subr.bf16.mxu0 %v4924_v16  ;;  %v4963_v15 = vld [vmem:[%s6215_s1 + $0x4a0] sm:$0xff]   ;;  %v4964_v16 = vld [vmem:[%s6215_s1 + $0x458] sm:$0xff]  }
  0x6a   :  { %4572 = vmatprep.subr.bf16.mxu1 %v4925_v17  ;;  %v4965_v17 = vld [vmem:[%s6215_s1 + $0x4d8] sm:$0xff]   ;;  %v3837_v33 = vld [vmem:[%s6216_s0 + $0x120] sm:$0xff] }
  0x6b   :  { %1501 = vmatmul.mubr.bf16.gmra.mxu0 %v3761_v34  ;;  %v3834_v34 = vld [vmem:[%s6216_s0 + $0x108] sm:$0xff] }
  0x6c   :  { %4545 = vmatpush3.bf16.msra.mxu0 %v4926_v18  ;;  %1550 = vmatmul.mubr.bf16.gmra.mxu1 %v3763_v35  ;;  %v4966_v18 = vld [vmem:[%s6215_s1 + $0x418] sm:$0xff]   ;;  %v3838_v35 = vld [vmem:[%s6216_s0 + $0x128] sm:$0xff] }
  0x6d   :  { %4573 = vmatpush3.bf16.msra.mxu1 %v4927_v19  ;;  %4546 = vmatprep.subr.bf16.mxu0 %v4928_v20  ;;  %v4967_v19 = vld [vmem:[%s6215_s1 + $0x498] sm:$0xff]   ;;  %v4968_v20 = vld [vmem:[%s6215_s1 + $0x450] sm:$0xff]  }
  0x6e   :  { %4574 = vmatprep.subr.bf16.mxu1 %v4929_v21  ;;  %1590 = vmatprep.mubr.bf16.mxu0 %v3758_v52  ;;  %v4969_v21 = vld [vmem:[%s6215_s1 + $0x4d0] sm:$0xff]   ;;  %v4992_v52 = vld [vmem:[%s6215_s1 + $0x560] sm:$0xff]  }
  0x6f   :  { %1639 = vmatprep.mubr.bf16.mxu1 %v3760_v55  ;;  %v4995_v55 = vld [vmem:[%s6215_s1 + $0x5a0] sm:$0xff]  }
  0x70   :  { %4547 = vmatpush3.bf16.msra.mxu0 %v4930_v22  ;;  %v4970_v22 = vld [vmem:[%s6215_s1 + $0x410] sm:$0xff]  }
  0x71   :  { %4575 = vmatpush3.bf16.msra.mxu1 %v4931_v23  ;;  %4548 = vmatprep.subr.bf16.mxu0 %v4932_v24  ;;  %v4971_v23 = vld [vmem:[%s6215_s1 + $0x490] sm:$0xff]   ;;  %v4972_v24 = vld [vmem:[%s6215_s1 + $0x448] sm:$0xff]  }
  0x72   :  { %4576 = vmatprep.subr.bf16.mxu1 %v4933_v25  ;;  %v4973_v25 = vld [vmem:[%s6215_s1 + $0x4c8] sm:$0xff]  }
  0x74   :  { %4549 = vmatpush3.bf16.msra.mxu0 %v4934_v26  ;;  %v4974_v26 = vld [vmem:[%s6215_s1 + $0x408] sm:$0xff]  }
  0x75   :  { %4577 = vmatpush3.bf16.msra.mxu1 %v4935_v27  ;;  %4550 = vmatprep.subr.bf16.mxu0 %v4936_v36  ;;  %v4975_v27 = vld [vmem:[%s6215_s1 + $0x488] sm:$0xff]   ;;  %v3977_v36 = vcombine.low %v3833_v32, %v3837_v33 }
  0x76   :  { %4578 = vmatprep.subr.bf16.mxu1 %v4937_v37  ;;  %v3978_v37 = vcombine.high %v3833_v32, %v3837_v33  ;;  %v3843_v32 = vld [vmem:[%s6216_s0 + $0x150] sm:$0xff] }
  0x77   :  { %v3847_v33 = vld [vmem:[%s6216_s0 + $0x170] sm:$0xff] }
  0x78   :  { %4551 = vmatpush3.bf16.msra.mxu0 %v4938_v38  ;;  %v3979_v38 = vcombine.low %v3834_v34, %v3838_v35 }
  0x79   :  { %4579 = vmatpush3.bf16.msra.mxu1 %v4939_v39  ;;  %4552 = vmatprep.subr.bf16.mxu0 %v4940_v40  ;;  %v3980_v39 = vcombine.high %v3834_v34, %v3838_v35  ;;  %v4980_v40 = vld [vmem:[%s6215_s1 + $0x578] sm:$0xff]   ;;  %v3990_v34 = vcombine.high %v3843_v32, %v3847_v33  ;;  %v3989_v35 = vcombine.low %v3843_v32, %v3847_v33  ;;  %v5053_v33 = vld [vmem:[%s6215_s1 + $0x7e8] sm:$0xff]  }
  0x7a   :  { %4580 = vmatprep.subr.bf16.mxu1 %v4941_v41  ;;  %v4981_v41 = vld [vmem:[%s6215_s1 + $0x5f8] sm:$0xff]  }
  0x7c   :  { %4553 = vmatpush3.bf16.msra.mxu0 %v4942_v42  ;;  %v4982_v42 = vld [vmem:[%s6215_s1 + $0x538] sm:$0xff]  }
  0x7d   :  { %4581 = vmatpush3.bf16.msra.mxu1 %v4943_v43  ;;  %4554 = vmatprep.subr.bf16.mxu0 %v4944_v44  ;;  %v4983_v43 = vld [vmem:[%s6215_s1 + $0x5b8] sm:$0xff]   ;;  %v4984_v44 = vld [vmem:[%s6215_s1 + $0x570] sm:$0xff]  }
  0x7e   :  { %4582 = vmatprep.subr.bf16.mxu1 %v4945_v45  ;;  %v4985_v45 = vld [vmem:[%s6215_s1 + $0x5f0] sm:$0xff]  }
  0x80   :  { %4555 = vmatpush3.bf16.msra.mxu0 %v4946_v46  ;;  %v4986_v46 = vld [vmem:[%s6215_s1 + $0x530] sm:$0xff]  }
  0x81   :  { %4583 = vmatpush3.bf16.msra.mxu1 %v4947_v47  ;;  %4596 = vmatprep.subr.bf16.mxu0 %v4948_v56  ;;  %v4987_v47 = vld [vmem:[%s6215_s1 + $0x5b0] sm:$0xff]   ;;  %v4996_v56 = vld [vmem:[%s6215_s1 + $0x558] sm:$0xff]  }
  0x82   :  { %4624 = vmatprep.subr.bf16.mxu1 %v4949_v57  ;;  %v4997_v57 = vld [vmem:[%s6215_s1 + $0x5d8] sm:$0xff]  }
  0x83   :  { %1591 = vmatmul.mubr.bf16.vlgmr.msra.gmra.mxu0 %v3757_v51  ;;  %v4991_v51 = vld [vmem:[%s6215_s1 + $0x5a8] sm:$0xff]  }
  0x84   :  { %1640 = vmatmul.mubr.bf16.vlgmr.msra.gmra.mxu1 %v3759_v54  ;;  %4597 = vmatpush3.bf16.msra.mxu0 %v4950_v58  ;;  %v4994_v54 = vld [vmem:[%s6215_s1 + $0x520] sm:$0xff]   ;;  %v4998_v58 = vld [vmem:[%s6215_s1 + $0x518] sm:$0xff]  }
  0x85   :  { %4625 = vmatpush3.bf16.msra.mxu1 %v4951_v59  ;;  %4598 = vmatprep.subr.bf16.mxu0 %v4952_v60  ;;  %v4999_v59 = vld [vmem:[%s6215_s1 + $0x598] sm:$0xff]   ;;  %v3841_v60 = vld [vmem:[%s6216_s0 + $0x140] sm:$0xff] }
  0x86   :  { %4626 = vmatprep.subr.bf16.mxu1 %v4953_v61  ;;  %1598 = vmatprep.mubr.bf16.mxu0 %v3766_v2  ;;  %v3845_v61 = vld [vmem:[%s6216_s0 + $0x160] sm:$0xff] }
  0x87   :  { %1647 = vmatprep.mubr.bf16.mxu1 %v3768_v8  ;;  %v3985_v1 = vcombine.low %v3841_v60, %v3845_v61  ;;  %v5004_v8 = vld [vmem:[%s6215_s1 + $0x548] sm:$0xff]  }
  0x88   :  { %4599 = vmatpush3.bf16.msra.mxu0 %v4954_v62  ;;  %v3842_v62 = vld [vmem:[%s6216_s0 + $0x148] sm:$0xff] }
  0x89   :  { %4627 = vmatpush3.bf16.msra.mxu1 %v4955_v63  ;;  %4600 = vmatprep.subr.bf16.mxu0 %v4956_v4  ;;  %v3986_v63 = vcombine.high %v3841_v60, %v3845_v61  ;;  %v3988_v2 = vcombine.high %v3842_v62, %v3846_v0  ;;  %v5000_v4 = vld [vmem:[%s6215_s1 + $0x550] sm:$0xff]   ;;  %v5036_v61 = vld [vmem:[%s6215_s1 + $0x648] sm:$0xff]  }
  0x8a   :  { %4628 = vmatprep.subr.bf16.mxu1 %v4957_v5  ;;  %v5001_v5 = vld [vmem:[%s6215_s1 + $0x5d0] sm:$0xff]  }
  0x8b   :  { %1599 = vmatmul.mubr.bf16.gmra.mxu0 %v3765_v3  ;;  %v3987_v3 = vcombine.low %v3842_v62, %v3846_v0  ;;  %v5037_v0 = vld [vmem:[%s6215_s1 + $0x6c8] sm:$0xff]  }
  0x8c   :  { %4601 = vmatpush3.bf16.msra.mxu0 %v4958_v9  ;;  %1648 = vmatmul.mubr.bf16.gmra.mxu1 %v3767_v10  ;;  %v5005_v9 = vld [vmem:[%s6215_s1 + $0x5c8] sm:$0xff]  }
  0x8d   :  { %4629 = vmatpush3.bf16.msra.mxu1 %v4959_v11  ;;  %4602 = vmatprep.subr.bf16.mxu0 %v4960_v12  ;;  %v5006_v10 = vld [vmem:[%s6215_s1 + $0x508] sm:$0xff]   ;;  %v5008_v12 = vld [vmem:[%s6215_s1 + $0x540] sm:$0xff]  }
  0x8e   :  { %4630 = vmatprep.subr.bf16.mxu1 %v4961_v13  ;;  %2327 = vmatprep.mubr.bf16.mxu0 %v3978_v37  ;;  %v5007_v11 = vld [vmem:[%s6215_s1 + $0x588] sm:$0xff]   ;;  %v5009_v13 = vld [vmem:[%s6215_s1 + $0x5c0] sm:$0xff]  }
  0x8f   :  { %2376 = vmatprep.mubr.bf16.mxu1 %v3980_v39  ;;  %v5021_v37 = vld [vmem:[%s6215_s1 + $0x6e8] sm:$0xff]   ;;  %v3848_v39 = vld [vmem:[%s6216_s0 + $0x178] sm:$0xff] }
  0x90   :  { %4603 = vmatpush3.bf16.msra.mxu0 %v4962_v14  ;;  %v5010_v14 = vld [vmem:[%s6215_s1 + $0x500] sm:$0xff]  }
  0x91   :  { %4631 = vmatpush3.bf16.msra.mxu1 %v4963_v15  ;;  %4604 = vmatprep.subr.bf16.mxu0 %v4964_v16  ;;  %v5011_v15 = vld [vmem:[%s6215_s1 + $0x580] sm:$0xff]   ;;  %v3835_v16 = vld [vmem:[%s6216_s0 + $0x110] sm:$0xff] }
  0x92   :  { %4632 = vmatprep.subr.bf16.mxu1 %v4965_v17  ;;  %v3839_v17 = vld [vmem:[%s6216_s0 + $0x130] sm:$0xff] }
  0x94   :  { %4605 = vmatpush3.bf16.msra.mxu0 %v4966_v18  ;;  %v3981_v18 = vcombine.low %v3835_v16, %v3839_v17 }
  0x95   :  { %4633 = vmatpush3.bf16.msra.mxu1 %v4967_v19  ;;  %4606 = vmatprep.subr.bf16.mxu0 %v4968_v20  ;;  %v3982_v19 = vcombine.high %v3835_v16, %v3839_v17  ;;  %v3836_v20 = vld [vmem:[%s6216_s0 + $0x118] sm:$0xff]  ;;  %v4058_v16 = vld [vmem:[%s6216_s0 + $0x188] sm:$0xff] }
  0x96   :  { %4634 = vmatprep.subr.bf16.mxu1 %v4969_v21  ;;  %v3840_v21 = vld [vmem:[%s6216_s0 + $0x138] sm:$0xff] }
  0x98   :  { %4607 = vmatpush3.bf16.msra.mxu0 %v4970_v22  ;;  %v3983_v22 = vcombine.low %v3836_v20, %v3840_v21 }
  0x99   :  { %4635 = vmatpush3.bf16.msra.mxu1 %v4971_v23  ;;  %4608 = vmatprep.subr.bf16.mxu0 %v4972_v24  ;;  %v3984_v23 = vcombine.high %v3836_v20, %v3840_v21  ;;  %v5012_v24 = vld [vmem:[%s6215_s1 + $0x678] sm:$0xff]  }
  0x9a   :  { %4636 = vmatprep.subr.bf16.mxu1 %v4973_v25  ;;  %v5013_v25 = vld [vmem:[%s6215_s1 + $0x6f8] sm:$0xff]  }
  0x9c   :  { %4609 = vmatpush3.bf16.msra.mxu0 %v4974_v26  ;;  %v5014_v26 = vld [vmem:[%s6215_s1 + $0x638] sm:$0xff]  }
  0x9d   :  { %4637 = vmatpush3.bf16.msra.mxu1 %v4975_v27  ;;  %4610 = vmatprep.subr.bf16.mxu0 %v4976_v28  ;;  %v5015_v27 = vld [vmem:[%s6215_s1 + $0x6b8] sm:$0xff]   ;;  %v5016_v28 = vld [vmem:[%s6215_s1 + $0x670] sm:$0xff]  }
  0x9e   :  { %4638 = vmatprep.subr.bf16.mxu1 %v4977_v29  ;;  %v5017_v29 = vld [vmem:[%s6215_s1 + $0x6f0] sm:$0xff]  }
  0xa0   :  { %4611 = vmatpush3.bf16.msra.mxu0 %v4978_v30  ;;  %v5018_v30 = vld [vmem:[%s6215_s1 + $0x630] sm:$0xff]  }
  0xa1   :  { %4639 = vmatpush3.bf16.msra.mxu1 %v4979_v31  ;;  %4652 = vmatprep.subr.bf16.mxu0 %v4980_v40  ;;  %v5019_v31 = vld [vmem:[%s6215_s1 + $0x6b0] sm:$0xff]  }
  0xa2   :  { %4680 = vmatprep.subr.bf16.mxu1 %v4981_v41  ;;  %v5022_v41 = vld [vmem:[%s6215_s1 + $0x628] sm:$0xff]  }
  0xa3   :  { %2328 = vmatmul.mubr.bf16.vlgmr.msra.gmra.mxu0 %v3977_v36  ;;  %v5020_v36 = vld [vmem:[%s6215_s1 + $0x668] sm:$0xff]  }
  0xa4   :  { %2377 = vmatmul.mubr.bf16.vlgmr.msra.gmra.mxu1 %v3979_v38  ;;  %4653 = vmatpush3.bf16.msra.mxu0 %v4982_v42  ;;  %v3844_v38 = vld [vmem:[%s6216_s0 + $0x158] sm:$0xff] }
  0xa5   :  { %4681 = vmatpush3.bf16.msra.mxu1 %v4983_v43  ;;  %4654 = vmatprep.subr.bf16.mxu0 %v4984_v44  ;;  %v3992_v40 = vcombine.high %v3844_v38, %v3848_v39  ;;  %v3991_v42 = vcombine.low %v3844_v38, %v3848_v39  ;;  %v5023_v43 = vld [vmem:[%s6215_s1 + $0x6a8] sm:$0xff]   ;;  %v5024_v44 = vld [vmem:[%s6215_s1 + $0x660] sm:$0xff]  }
  0xa6   :  { %4682 = vmatprep.subr.bf16.mxu1 %v4985_v45  ;;  %2335 = vmatprep.mubr.bf16.mxu0 %v3986_v63  ;;  %v5025_v45 = vld [vmem:[%s6215_s1 + $0x6e0] sm:$0xff]   ;;  %v5055_v38 = vld [vmem:[%s6215_s1 + $0x7a8] sm:$0xff]  }
  0xa7   :  { %2384 = vmatprep.mubr.bf16.mxu1 %v3988_v2  ;;  %v5038_v2 = vld [vmem:[%s6215_s1 + $0x608] sm:$0xff]  }
  0xa8   :  { %4655 = vmatpush3.bf16.msra.mxu0 %v4986_v46  ;;  %v5026_v46 = vld [vmem:[%s6215_s1 + $0x620] sm:$0xff]  }
  0xa9   :  { %4683 = vmatpush3.bf16.msra.mxu1 %v4987_v47  ;;  %4656 = vmatprep.subr.bf16.mxu0 %v4988_v48  ;;  %v5027_v47 = vld [vmem:[%s6215_s1 + $0x6a0] sm:$0xff]   ;;  %v5028_v48 = vld [vmem:[%s6215_s1 + $0x658] sm:$0xff]  }
  0xaa   :  { %4684 = vmatprep.subr.bf16.mxu1 %v4989_v49  ;;  %v5029_v49 = vld [vmem:[%s6215_s1 + $0x6d8] sm:$0xff]  }
  0xab   :  { %2336 = vmatmul.mubr.bf16.gmra.mxu0 %v3985_v1 }
  0xac   :  { %4657 = vmatpush3.bf16.msra.mxu0 %v4990_v50  ;;  %2385 = vmatmul.mubr.bf16.gmra.mxu1 %v3987_v3  ;;  %v5030_v50 = vld [vmem:[%s6215_s1 + $0x618] sm:$0xff]  }
  0xad   :  { %4685 = vmatpush3.bf16.msra.mxu1 %v4991_v51  ;;  %4658 = vmatprep.subr.bf16.mxu0 %v4992_v52  ;;  %v5031_v51 = vld [vmem:[%s6215_s1 + $0x698] sm:$0xff]   ;;  %v5032_v52 = vld [vmem:[%s6215_s1 + $0x650] sm:$0xff]  }
  0xae   :  { %4686 = vmatprep.subr.bf16.mxu1 %v4993_v53  ;;  %2425 = vmatprep.mubr.bf16.mxu0 %v3982_v19  ;;  %v4062_v19 = vld [vmem:[%s6216_s0 + $0x1a8] sm:$0xff] }
  0xaf   :  { %2474 = vmatprep.mubr.bf16.mxu1 %v3984_v23  ;;  %v4203_v20 = vcombine.low %v4058_v16, %v4062_v19  ;;  %v4204_v21 = vcombine.high %v4058_v16, %v4062_v19  ;;  %v5045_v23 = vld [vmem:[%s6215_s1 + $0x7f8] sm:$0xff]  }
  0xb0   :  { %4659 = vmatpush3.bf16.msra.mxu0 %v4994_v54  ;;  %v5033_v54 = vld [vmem:[%s6215_s1 + $0x6d0] sm:$0xff]  }
  0xb1   :  { %4687 = vmatpush3.bf16.msra.mxu1 %v4995_v55  ;;  %4660 = vmatprep.subr.bf16.mxu0 %v4996_v56  ;;  %v5034_v56 = vld [vmem:[%s6215_s1 + $0x610] sm:$0xff]  }
  0xb2   :  { %4688 = vmatprep.subr.bf16.mxu1 %v4997_v57 }
  0xb4   :  { %4661 = vmatpush3.bf16.msra.mxu0 %v4998_v58  ;;  %v5035_v58 = vld [vmem:[%s6215_s1 + $0x690] sm:$0xff]  }
  0xb5   :  { %4689 = vmatpush3.bf16.msra.mxu1 %v4999_v59  ;;  %4662 = vmatprep.subr.bf16.mxu0 %v5000_v4 }
  0xb6   :  { %4690 = vmatprep.subr.bf16.mxu1 %v5001_v5  ;;  %v5039_v5 = vld [vmem:[%s6215_s1 + $0x688] sm:$0xff]  }
  0xb8   :  { %4663 = vmatpush3.bf16.msra.mxu0 %v5002_v6 }
  0xb9   :  { %4691 = vmatpush3.bf16.msra.mxu1 %v5003_v7  ;;  %4664 = vmatprep.subr.bf16.mxu0 %v5004_v8  ;;  %v5040_v8 = vld [vmem:[%s6215_s1 + $0x640] sm:$0xff]  }
  0xba   :  { %4692 = vmatprep.subr.bf16.mxu1 %v5005_v9 }
  0xbc   :  { %4665 = vmatpush3.bf16.msra.mxu0 %v5006_v10  ;;  %v5041_v10 = vld [vmem:[%s6215_s1 + $0x6c0] sm:$0xff]  }
  0xbd   :  { %4693 = vmatpush3.bf16.msra.mxu1 %v5007_v11  ;;  %4666 = vmatprep.subr.bf16.mxu0 %v5008_v12  ;;  %v5042_v11 = vld [vmem:[%s6215_s1 + $0x600] sm:$0xff]  }
  0xbe   :  { %4694 = vmatprep.subr.bf16.mxu1 %v5009_v13  ;;  %v5043_v13 = vld [vmem:[%s6215_s1 + $0x680] sm:$0xff]  }
  0xc0   :  { %4667 = vmatpush3.bf16.msra.mxu0 %v5010_v14  ;;  %v4057_v14 = vld [vmem:[%s6216_s0 + $0x180] sm:$0xff] }
  0xc1   :  { %4695 = vmatpush3.bf16.msra.mxu1 %v5011_v15  ;;  %4708 = vmatprep.subr.bf16.mxu0 %v5012_v24  ;;  %v4061_v15 = vld [vmem:[%s6216_s0 + $0x1a0] sm:$0xff]  ;;  %v5046_v24 = vld [vmem:[%s6215_s1 + $0x738] sm:$0xff]  }
  0xc2   :  { %4736 = vmatprep.subr.bf16.mxu1 %v5013_v25  ;;  %v4201_v17 = vcombine.low %v4057_v14, %v4061_v15  ;;  %v5047_v25 = vld [vmem:[%s6215_s1 + $0x7b8] sm:$0xff]  }
  0xc3   :  { %2426 = vmatmul.mubr.bf16.vlgmr.msra.gmra.mxu0 %v3981_v18  ;;  %v4202_v18 = vcombine.high %v4057_v14, %v4061_v15  ;;  %v5069_v15 = vld [vmem:[%s6215_s1 + $0x7c8] sm:$0xff]  }
  0xc4   :  { %2475 = vmatmul.mubr.bf16.vlgmr.msra.gmra.mxu1 %v3983_v22  ;;  %4709 = vmatpush3.bf16.msra.mxu0 %v5014_v26  ;;  %v5044_v22 = vld [vmem:[%s6215_s1 + $0x778] sm:$0xff]   ;;  %v5048_v26 = vld [vmem:[%s6215_s1 + $0x770] sm:$0xff]  }
  0xc5   :  { %4737 = vmatpush3.bf16.msra.mxu1 %v5015_v27  ;;  %4710 = vmatprep.subr.bf16.mxu0 %v5016_v28  ;;  %v5049_v27 = vld [vmem:[%s6215_s1 + $0x7f0] sm:$0xff]  }
  0xc6   :  { %4738 = vmatprep.subr.bf16.mxu1 %v5017_v29  ;;  %2433 = vmatprep.mubr.bf16.mxu0 %v3990_v34  ;;  %v5050_v28 = vld [vmem:[%s6215_s1 + $0x730] sm:$0xff]  }
  0xc7   :  { %2482 = vmatprep.mubr.bf16.mxu1 %v3992_v40  ;;  %v5051_v29 = vld [vmem:[%s6215_s1 + $0x7b0] sm:$0xff]  }
  0xc8   :  { %4711 = vmatpush3.bf16.msra.mxu0 %v5018_v30 }
  0xc9   :  { %4739 = vmatpush3.bf16.msra.mxu1 %v5019_v31  ;;  %4712 = vmatprep.subr.bf16.mxu0 %v5020_v36  ;;  %v5052_v31 = vld [vmem:[%s6215_s1 + $0x768] sm:$0xff]  }
  0xca   :  { %4740 = vmatprep.subr.bf16.mxu1 %v5021_v37 }
  0xcb   :  { %2434 = vmatmul.mubr.bf16.gmra.mxu0 %v3989_v35  ;;  %v5054_v35 = vld [vmem:[%s6215_s1 + $0x728] sm:$0xff]  }
  0xcc   :  { %4713 = vmatpush3.bf16.msra.mxu0 %v5022_v41  ;;  %2483 = vmatmul.mubr.bf16.gmra.mxu1 %v3991_v42  ;;  %v5056_v41 = vld [vmem:[%s6215_s1 + $0x760] sm:$0xff]  }
  0xcd   :  { %4741 = vmatpush3.bf16.msra.mxu1 %v5023_v43  ;;  %4714 = vmatprep.subr.bf16.mxu0 %v5024_v44  ;;  %v5057_v43 = vld [vmem:[%s6215_s1 + $0x7e0] sm:$0xff]  }
  0xce   :  { %4742 = vmatprep.subr.bf16.mxu1 %v5025_v45  ;;  %3162 = vmatprep.mubr.bf16.mxu0 %v4202_v18 }
  0xcf   :  { %3211 = vmatprep.mubr.bf16.mxu1 %v4204_v21 }
  0xd0   :  { %4715 = vmatpush3.bf16.msra.mxu0 %v5026_v46  ;;  %v5058_v46 = vld [vmem:[%s6215_s1 + $0x720] sm:$0xff]  }
  0xd1   :  { %4743 = vmatpush3.bf16.msra.mxu1 %v5027_v47  ;;  %4716 = vmatprep.subr.bf16.mxu0 %v5028_v48 }
  0xd2   :  { %4744 = vmatprep.subr.bf16.mxu1 %v5029_v49  ;;  %v5059_v49 = vld [vmem:[%s6215_s1 + $0x7a0] sm:$0xff]  }
  0xd4   :  { %4717 = vmatpush3.bf16.msra.mxu0 %v5030_v50 }
  0xd5   :  { %4745 = vmatpush3.bf16.msra.mxu1 %v5031_v51  ;;  %4718 = vmatprep.subr.bf16.mxu0 %v5032_v52  ;;  %v5060_v51 = vld [vmem:[%s6215_s1 + $0x758] sm:$0xff]  }
  0xd6   :  { %4746 = vmatprep.subr.bf16.mxu1 %v5033_v54  ;;  %v5061_v52 = vld [vmem:[%s6215_s1 + $0x7d8] sm:$0xff]   ;;  %v4069_v54 = vld [vmem:[%s6216_s0 + $0x1e0] sm:$0xff] }
  0xd8   :  { %4719 = vmatpush3.bf16.msra.mxu0 %v5034_v56 }
  0xd9   :  { %4747 = vmatpush3.bf16.msra.mxu1 %v5035_v58  ;;  %4720 = vmatprep.subr.bf16.mxu0 %v5036_v61  ;;  %v4070_v58 = vld [vmem:[%s6216_s0 + $0x1e8] sm:$0xff]  ;;  %v5062_v61 = vld [vmem:[%s6215_s1 + $0x718] sm:$0xff]  }
  0xda   :  { %4748 = vmatprep.subr.bf16.mxu1 %v5037_v0  ;;  %v5064_v0 = vld [vmem:[%s6215_s1 + $0x750] sm:$0xff]  }
  0xdc   :  { %4721 = vmatpush3.bf16.msra.mxu0 %v5038_v2 }
  0xdd   :  { %4749 = vmatpush3.bf16.msra.mxu1 %v5039_v5  ;;  %4722 = vmatprep.subr.bf16.mxu0 %v5040_v8  ;;  %v5066_v5 = vld [vmem:[%s6215_s1 + $0x710] sm:$0xff]  }
  0xde   :  { %4750 = vmatprep.subr.bf16.mxu1 %v5041_v10  ;;  %v5067_v8 = vld [vmem:[%s6215_s1 + $0x790] sm:$0xff]  }
  0xe0   :  { %4723 = vmatpush3.bf16.msra.mxu0 %v5042_v11  ;;  %v5068_v11 = vld [vmem:[%s6215_s1 + $0x748] sm:$0xff]  }
  0xe1   :  { %4751 = vmatpush3.bf16.msra.mxu1 %v5043_v13  ;;  %4764 = vmatprep.subr.bf16.mxu0 %v5044_v22 }
  0xe2   :  { %4792 = vmatprep.subr.bf16.mxu1 %v5045_v23 }
  0xe3   :  { %v4388_v53 = vpop.f32.mrf.mxu0  ;;  %3163 = vmatmul.mubr.bf16.vlgmr.msra.gmra.mxu0 %v4201_v17  ;;  %v5070_v17 = vld [vmem:[%s6215_s1 + $0x708] sm:$0xff]  }
  0xe4   :  { %v4416_v55 = vpop.f32.mrf.mxu1  ;;  %3212 = vmatmul.mubr.bf16.vlgmr.msra.gmra.mxu1 %v4203_v20  ;;  %4765 = vmatpush3.bf16.msra.mxu0 %v5046_v24  ;;  %v5071_v20 = vld [vmem:[%s6215_s1 + $0x788] sm:$0xff]   ;;  %v5073_v24 = vld [vmem:[%s6215_s1 + $0x7c0] sm:$0xff]  }
  0xe5   :  { %v4389_v57 = vpop.f32.mrf.mxu0  ;;  %4793 = vmatpush3.bf16.msra.mxu1 %v5047_v25  ;;  %4766 = vmatprep.subr.bf16.mxu0 %v5048_v26 }
  0xe6   :  { %v4390_v59 = vadd.f32 %v4389_v57, %v4388_v53  ;;  %v4417_v60 = vpop.f32.mrf.mxu1  ;;  %4794 = vmatprep.subr.bf16.mxu1 %v5049_v27  ;;  %v4065_v53 = vld [vmem:[%s6216_s0 + $0x1c0] sm:$0xff]  ;;  %v4066_v57 = vld [vmem:[%s6216_s0 + $0x1c8] sm:$0xff] }
  0xe7   :  { %v4418_v62 = vadd.f32 %v4417_v60, %v4416_v55  ;;  %v4391_v63 = vpop.f32.mrf.mxu0  ;;  %v4210_v56 = vcombine.high %v4065_v53, %v4069_v54  ;;  %v4212_v60 = vcombine.high %v4066_v57, %v4070_v58  ;;  %v5074_v27 = vld [vmem:[%s6215_s1 + $0x700] sm:$0xff]  }
  0xe8   :  { %v4419_v1 = vpop.f32.mrf.mxu1  ;;  %4767 = vmatpush3.bf16.msra.mxu0 %v5050_v28  ;;  %v5075_v28 = vld [vmem:[%s6215_s1 + $0x780] sm:$0xff]  }
  0xe9   :  { %v5904_v3 = vadd.f32 %v4418_v62, %v4390_v59  ;;  %v4392_v4 = vpop.f32.mrf.mxu0  ;;  %4795 = vmatpush3.bf16.msra.mxu1 %v5051_v29  ;;  %4768 = vmatprep.subr.bf16.mxu0 %v5052_v31  ;;  %v4209_v59 = vcombine.low %v4065_v53, %v4069_v54  ;;  %v4211_v62 = vcombine.low %v4066_v57, %v4070_v58  ;;  %v4059_v29 = vld [vmem:[%s6216_s0 + $0x190] sm:$0xff] }
  0xea   :  { %v4393_v6 = vadd.f32 %v4392_v4, %v4391_v63  ;;  %v4420_v7 = vpop.f32.mrf.mxu1  ;;  %4796 = vmatprep.subr.bf16.mxu1 %v5053_v33  ;;  %3170 = vmatprep.mubr.bf16.mxu0 %v4210_v56  ;;  %v5063_v63 = vld [vmem:[%s6215_s1 + $0x798] sm:$0xff]   ;;  %v5065_v4 = vld [vmem:[%s6215_s1 + $0x7d0] sm:$0xff]  }
  0xeb   :  { %v4421_v9 = vadd.f32 %v4420_v7, %v4419_v1  ;;  %v4394_v30 = vpop.f32.mrf.mxu0  ;;  %3219 = vmatprep.mubr.bf16.mxu1 %v4212_v60  ;;  %3171 = vmatmul.mubr.bf16.gmra.mxu0 %v4209_v59  ;;  %v4064_v33 = vld [vmem:[%s6216_s0 + $0x1b8] sm:$0xff] }
  0xec   :  { %v4422_v32 = vpop.f32.mrf.mxu1  ;;  %4769 = vmatpush3.bf16.msra.mxu0 %v5054_v35  ;;  %3220 = vmatmul.mubr.bf16.gmra.mxu1 %v4211_v62 }
  0xed   :  { %v5918_v12 = vadd.f32 %v4421_v9, %v4393_v6  ;;  %v4395_v34 = vpop.f32.mrf.mxu0  ;;  %4797 = vmatpush3.bf16.msra.mxu1 %v5055_v38  ;;  %4770 = vmatprep.subr.bf16.mxu0 %v5056_v41  ;;  %v4068_v41 = vld [vmem:[%s6216_s0 + $0x1d8] sm:$0xff] }
  0xee   :  { %v4396_v36 = vadd.f32 %v4395_v34, %v4394_v30  ;;  %v4423_v37 = vpop.f32.mrf.mxu1  ;;  %4798 = vmatprep.subr.bf16.mxu1 %v5057_v43 }
  0xef   :  { %v4424_v39 = vadd.f32 %v4423_v37, %v4422_v32  ;;  %v4397_v40 = vpop.f32.mrf.mxu0  ;;  %v4060_v32 = vld [vmem:[%s6216_s0 + $0x198] sm:$0xff] }
  0xf0   :  { %v4425_v42 = vpop.f32.mrf.mxu1  ;;  %4771 = vmatpush3.bf16.msra.mxu0 %v5058_v46  ;;  %v4207_v37 = vcombine.low %v4060_v32, %v4064_v33  ;;  %v4208_v38 = vcombine.high %v4060_v32, %v4064_v33 }
  0xf1   :  { %v5977_v44 = vadd.f32 %v4424_v39, %v4396_v36  ;;  %v4398_v45 = vpop.f32.mrf.mxu0  ;;  %4799 = vmatpush3.bf16.msra.mxu1 %v5059_v49  ;;  %4772 = vmatprep.subr.bf16.mxu0 %v5060_v51  ;;  %v4067_v39 = vld [vmem:[%s6216_s0 + $0x1d0] sm:$0xff]  ;;  %v4072_v49 = vld [vmem:[%s6216_s0 + $0x1f8] sm:$0xff] }
  0xf2   :  { %v4399_v47 = vadd.f32 %v4398_v45, %v4397_v40  ;;  %v4426_v48 = vpop.f32.mrf.mxu1  ;;  %4800 = vmatprep.subr.bf16.mxu1 %v5061_v52  ;;  %v4071_v40 = vld [vmem:[%s6216_s0 + $0x1f0] sm:$0xff]  ;;  %3309 = vmatprep.mubr.bf16.mxu1 %v4208_v38 }
  0xf3   :  { %v4427_v50 = vadd.f32 %v4426_v48, %v4425_v42  ;;  %v4214_v48 = vcombine.high %v4067_v39, %v4071_v40 }
  0xf4   :  { %4773 = vmatpush3.bf16.msra.mxu0 %v5062_v61  ;;  %v4213_v61 = vcombine.low %v4067_v39, %v4071_v40 }
  0xf5   :  { %v5997_v55 = vadd.f32 %v4427_v50, %v4399_v47  ;;  %4801 = vmatpush3.bf16.msra.mxu1 %v5063_v63  ;;  %4774 = vmatprep.subr.bf16.mxu0 %v5064_v0  ;;  %v4216_v50 = vcombine.high %v4068_v41, %v4072_v49  ;;  %v4215_v63 = vcombine.low %v4068_v41, %v4072_v49 }
  0xf6   :  { %4802 = vmatprep.subr.bf16.mxu1 %v5065_v4 }
  0xf8   :  { %4775 = vmatpush3.bf16.msra.mxu0 %v5066_v5 }
  0xf9   :  { %4803 = vmatpush3.bf16.msra.mxu1 %v5067_v8  ;;  %4776 = vmatprep.subr.bf16.mxu0 %v5068_v11 }
  0xfa   :  { %4804 = vmatprep.subr.bf16.mxu1 %v5069_v15 }
  0xfc   :  { %4777 = vmatpush3.bf16.msra.mxu0 %v5070_v17 }
  0xfd   :  { %4805 = vmatpush3.bf16.msra.mxu1 %v5071_v20 }
  0xfe   :  { %4806 = vmatprep.subr.bf16.mxu1 %v5073_v24 }
 0x101   :  { %4807 = vmatpush3.bf16.msra.mxu1 %v5075_v28 }
 0x103   :  { %v4444_v1 = vpop.f32.mrf.mxu0 }
 0x104   :  { %v4472_v2 = vpop.f32.mrf.mxu1  ;;  %3310 = vmatmul.mubr.bf16.vlgmr.msra.gmra.mxu1 %v4207_v37 }
 0x105   :  { %v4445_v6 = vpop.f32.mrf.mxu0  ;;  %3317 = vmatprep.mubr.bf16.mxu1 %v4216_v50 }
 0x106   :  { %v4473_v7 = vpop.f32.mrf.mxu1  ;;  %v4446_v9 = vadd.f32 %v4445_v6, %v4444_v1 }
 0x107   :  { %v4474_v10 = vadd.f32 %v4473_v7, %v4472_v2  ;;  %v4447_v13 = vpop.f32.mrf.mxu0 }
 0x108   :  { %v4475_v14 = vpop.f32.mrf.mxu1  ;;  %v759_v16 = vadd.f32 %v4446_v9, %v5904_v3  ;;  %v5072_v3 = vld [vmem:[%s6215_s1 + $0x740] sm:$0xff]  }
 0x109   :  { %v4448_v18 = vpop.f32.mrf.mxu0  ;;  %4778 = vmatprep.subr.bf16.mxu0 %v5072_v3 }
 0x10a   :  { %v4476_v19 = vpop.f32.mrf.mxu1  ;;  %v6036_v21 = vadd.f32 %v4474_v10, %v759_v16  ;;  %v4449_v22 = vadd.f32 %v4448_v18, %v4447_v13  ;;  %4779 = vmatpush3.bf16.msra.mxu0 %v5074_v27 }
 0x10b   :  { %v4477_v23 = vadd.f32 %v4476_v19, %v4475_v14  ;;  %v4450_v26 = vpop.f32.mrf.mxu0 }
 0x10c   :  { %v762_v25 = vadd.f32 %v4449_v22, %v5918_v12  ;;  %v4063_v12 = vld [vmem:[%s6216_s0 + $0x1b0] sm:$0xff]  ;;  %v4478_v42 = vpop.f32.mrf.mxu1  ;;  %v836_v45 = vmul.f32 %v6036_v21, %v6036_v21  ;;  %3318 = vmatmul.mubr.bf16.gmra.mxu1 %v4215_v63 }
 0x10d   :  { %v4451_v31 = vpop.f32.mrf.mxu0  ;;  %v4205_v35 = vcombine.low %v4059_v29, %v4063_v12  ;;  %v4206_v36 = vcombine.high %v4059_v29, %v4063_v12 }
 0x10e   :  { %v6054_v30 = vadd.f32 %v4477_v23, %v762_v25  ;;  %v4452_v34 = vadd.f32 %v4451_v31, %v4450_v26  ;;  %v4479_v52 = vpop.f32.mrf.mxu1 }
 0x10f   :  { %v4453_v43 = vpop.f32.mrf.mxu0  ;;  %3260 = vmatprep.mubr.bf16.mxu0 %v4206_v36  ;;  %v4480_v56 = vadd.f32 %v4479_v52, %v4478_v42 }
 0x110   :  { %v826_v46 = vadd.f32 %v6054_v30, %v6036_v21  ;;  %v837_v47 = vmul.f32 %v6054_v30, %v6054_v30  ;;  %v767_v51 = vadd.f32 %v4452_v34, %v5977_v44  ;;  %3261 = vmatmul.mubr.bf16.vlgmr.msra.gmra.mxu0 %v4205_v35  ;;  %v4481_v58 = vpop.f32.mrf.mxu1 }
 0x111   :  { %v4454_v53 = vpop.f32.mrf.mxu0  ;;  %3268 = vmatprep.mubr.bf16.mxu0 %v4214_v48 }
 0x112   :  { %v840_v54 = vadd.f32 %v837_v47, %v836_v45  ;;  %v4455_v57 = vadd.f32 %v4454_v53, %v4453_v43  ;;  %v6084_v59 = vadd.f32 %v4480_v56, %v767_v51  ;;  %v4482_v62 = vpop.f32.mrf.mxu1 }
 0x113   :  { %v4483_v1 = vadd.f32 %v4482_v62, %v4481_v58 }
 0x114   :  { %v770_v60 = vadd.f32 %v4455_v57, %v5997_v55  ;;  %v827_v0 = vadd.f32 %v826_v46, %v6084_v59  ;;  %v838_v44 = vmul.f32 %v6084_v59, %v6084_v59 }
 0x116   :  { %v841_v2 = vadd.f32 %v840_v54, %v838_v44  ;;  %v6090_v4 = vadd.f32 %v4483_v1, %v770_v60 }
 0x118   :  { %3269 = vmatmul.mubr.bf16.gmra.mxu0 %v4213_v61  ;;  %v6093_v5 = vadd.f32 %v827_v0, %v6090_v4  ;;  %v839_v55 = vmul.f32 %v6090_v4, %v6090_v4 }
 0x11a   :  { %v6097_v6 = vadd.f32 %v841_v2, %v839_v55  ;;  %v829_v2 = vrot.slane %v6093_v5, 4 }
 0x123   :  { %v4500_v7 = vpop.f32.mrf.mxu0 }
 0x124   :  { %v4528_v8 = vpop.f32.mrf.mxu1 }
 0x125   :  { %v4501_v9 = vpop.f32.mrf.mxu0 }
 0x126   :  { %v4502_v10 = vadd.f32 %v4501_v9, %v4500_v7  ;;  %v4529_v11 = vpop.f32.mrf.mxu1  ;;  %v843_v9 = vrot.slane %v6097_v6, 4 }
 0x127   :  { %v4530_v13 = vadd.f32 %v4529_v11, %v4528_v8  ;;  %v4503_v14 = vpop.f32.mrf.mxu0 }
 0x128   :  { %v4531_v15 = vpop.f32.mrf.mxu1 }
 0x129   :  { %v1544_v16 = vadd.f32 %v4530_v13, %v4502_v10  ;;  %v4504_v17 = vpop.f32.mrf.mxu0 }
 0x12a   :  { %v4505_v18 = vadd.f32 %v4504_v17, %v4503_v14  ;;  %v4532_v19 = vpop.f32.mrf.mxu1  ;;  %v830_v14 = vadd.f32 %v829_v2, %v6093_v5 }
 0x12b   :  { %v4533_v20 = vadd.f32 %v4532_v19, %v4531_v15  ;;  %v4506_v23 = vpop.f32.mrf.mxu0 }
 0x12c   :  { %v4534_v3 = vpop.f32.mrf.mxu1 }
 0x12d   :  { %v1547_v22 = vadd.f32 %v4533_v20, %v4505_v18  ;;  %v4507_v24 = vpop.f32.mrf.mxu0  ;;  %v844_v18 = vadd.f32 %v843_v9, %v6097_v6 }
 0x12e   :  { %v4535_v25 = vpop.f32.mrf.mxu1  ;;  %v4508_v26 = vadd.f32 %v4507_v24, %v4506_v23 }
 0x12f   :  { %v4536_v27 = vadd.f32 %v4535_v25, %v4534_v3  ;;  %v4509_v28 = vpop.f32.mrf.mxu0  ;;  %v845_v24 = vrot.slane %v844_v18, 2 }
 0x130   :  { %v4537_v29 = vpop.f32.mrf.mxu1 }
 0x131   :  { %v1552_v31 = vadd.f32 %v4536_v27, %v4508_v26  ;;  %v4510_v12 = vpop.f32.mrf.mxu0 }
 0x132   :  { %v4538_v32 = vpop.f32.mrf.mxu1  ;;  %v4511_v33 = vadd.f32 %v4510_v12, %v4509_v28 }
 0x133   :  { %v4539_v34 = vadd.f32 %v4538_v32, %v4537_v29  ;;  %v846_v29 = vadd.f32 %v845_v24, %v844_v18 }
 0x135   :  { %v1555_v35 = vadd.f32 %v4539_v34, %v4511_v33  ;;  %v847_v34 = vrot.slane %v846_v29, 1 }
 0x143   :  { %v4556_v36 = vpop.f32.mrf.mxu0 }
 0x144   :  { %v4584_v37 = vpop.f32.mrf.mxu1 }
 0x145   :  { %v4557_v38 = vpop.f32.mrf.mxu0 }
 0x146   :  { %v4558_v39 = vadd.f32 %v4557_v38, %v4556_v36  ;;  %v4585_v40 = vpop.f32.mrf.mxu1 }
 0x147   :  { %v4586_v41 = vadd.f32 %v4585_v40, %v4584_v37  ;;  %v4559_v42 = vpop.f32.mrf.mxu0  ;;  %v848_v40 = vadd.f32 %v847_v34, %v846_v29 }
 0x148   :  { %v1593_v43 = vadd.f32 %v4558_v39, %v1544_v16  ;;  %v4587_v45 = vpop.f32.mrf.mxu1 }
 0x149   :  { %v4560_v46 = vpop.f32.mrf.mxu0 }
 0x14a   :  { %v6099_v47 = vadd.f32 %v4586_v41, %v1593_v43  ;;  %v4561_v48 = vadd.f32 %v4560_v46, %v4559_v42  ;;  %v4588_v49 = vpop.f32.mrf.mxu1 }
 0x14b   :  { %v4589_v50 = vadd.f32 %v4588_v49, %v4587_v45  ;;  %v4562_v52 = vpop.f32.mrf.mxu0 }
 0x14c   :  { %6224 = vst [vmem:[#allocation3_spill] sm:$0xff] %v6099_v47  ;;  %v1596_v51 = vadd.f32 %v4561_v48, %v1547_v22  ;;  %v1671_v57 = vmul.f32 %v6099_v47, %v6099_v47  ;;  %v4590_v61 = vpop.f32.mrf.mxu1  ;;  %v831_v22 = vrot.slane %v830_v14, 2 }
 0x14d   :  { %v4563_v54 = vpop.f32.mrf.mxu0 }
 0x14e   :  { %v6101_v53 = vadd.f32 %v4589_v50, %v1596_v51  ;;  %v4564_v56 = vadd.f32 %v4563_v54, %v4562_v52  ;;  %v4591_v44 = vpop.f32.mrf.mxu1  ;;  %v832_v26 = vadd.f32 %v831_v22, %v830_v14 }
 0x14f   :  { %v4565_v62 = vpop.f32.mrf.mxu0  ;;  %v4592_v55 = vadd.f32 %v4591_v44, %v4590_v61 }
 0x150   :  { %6225 = vst [vmem:[#allocation4_spill] sm:$0xff] %v6101_v53  ;;  %v1661_v58 = vadd.f32 %v6101_v53, %v6099_v47  ;;  %v1672_v60 = vmul.f32 %v6101_v53, %v6101_v53  ;;  %v1601_v63 = vadd.f32 %v4564_v56, %v1552_v31  ;;  %v4593_v8 = vpop.f32.mrf.mxu1  ;;  %v833_v32 = vrot.slane %v832_v26, 1 }
 0x151   :  { %v4566_v1 = vpop.f32.mrf.mxu0 }
 0x152   :  { %v1675_v0 = vadd.f32 %v1672_v60, %v1671_v57  ;;  %v4567_v7 = vadd.f32 %v4566_v1, %v4565_v62  ;;  %v6111_v10 = vadd.f32 %v4592_v55, %v1601_v63  ;;  %v4594_v13 = vpop.f32.mrf.mxu1  ;;  %v834_v37 = vadd.f32 %v833_v32, %v832_v26 }
 0x153   :  { %v4595_v17 = vadd.f32 %v4594_v13, %v4593_v8 }
 0x154   :  { %6226 = vst [vmem:[#allocation5_spill] sm:$0xff] %v6111_v10  ;;  %v1604_v11 = vadd.f32 %v4567_v7, %v1555_v35  ;;  %v1662_v15 = vadd.f32 %v1661_v58, %v6111_v10  ;;  %v1673_v16 = vmul.f32 %v6111_v10, %v6111_v10 }
 0x156   :  { %v1676_v19 = vadd.f32 %v1675_v0, %v1673_v16  ;;  %v6118_v20 = vadd.f32 %v4595_v17, %v1604_v11 }
 0x158   :  { %6227 = vst [vmem:[#allocation6_spill] sm:$0xff] %v6118_v20  ;;  %v1663_v23 = vadd.f32 %v1662_v15, %v6118_v20  ;;  %v1674_v3 = vmul.f32 %v6118_v20, %v6118_v20 }
 0x15a   :  { %v1664_v25 = vrot.slane %v1663_v23, 4  ;;  %v1677_v5 = vadd.f32 %v1676_v19, %v1674_v3 }
 0x15c   :  { %v1665_v27 = vadd.f32 %v1664_v25, %v1663_v23  ;;  %v1678_v28 = vrot.slane %v1677_v5, 4 }
 0x15e   :  { %v1666_v31 = vrot.slane %v1665_v27, 2  ;;  %v1679_v12 = vadd.f32 %v1678_v28, %v1677_v5 }
 0x160   :  { %v1667_v6 = vadd.f32 %v1666_v31, %v1665_v27  ;;  %v1680_v33 = vrot.slane %v1679_v12, 2 }
 0x162   :  { %v1668_v35 = vrot.slane %v1667_v6, 1  ;;  %v1681_v36 = vadd.f32 %v1680_v33, %v1679_v12 }
 0x163   :  { %v4612_v45 = vpop.f32.mrf.mxu0 }
 0x164   :  { %v1669_v38 = vadd.f32 %v1668_v35, %v1667_v6  ;;  %v1682_v39 = vrot.slane %v1681_v36, 1  ;;  %v4640_v46 = vpop.f32.mrf.mxu1 }
 0x165   :  { %v4613_v48 = vpop.f32.mrf.mxu0 }
 0x166   :  { %v6123_v41 = vadd.f32 %v1669_v38, %v834_v37  ;;  %v1683_v42 = vadd.f32 %v1682_v39, %v1681_v36  ;;  %v4641_v49 = vpop.f32.mrf.mxu1  ;;  %v4614_v12 = vadd.f32 %v4613_v48, %v4612_v45 }
 0x167   :  { %v4615_v50 = vpop.f32.mrf.mxu0  ;;  %v4642_v32 = vadd.f32 %v4641_v49, %v4640_v46 }
 0x168   :  { %v6125_v43 = vadd.f32 %v1683_v42, %v848_v40  ;;  %v4643_v51 = vpop.f32.mrf.mxu1 }
 0x169   :  { %v4616_v52 = vpop.f32.mrf.mxu0  ;;  %v2379_v20 = vadd.f32 %v4642_v32, %v4614_v12 }
 0x16a   :  { %v4644_v54 = vpop.f32.mrf.mxu1  ;;  %v4617_v27 = vadd.f32 %v4616_v52, %v4615_v50 }
 0x16b   :  { %v4618_v56 = vpop.f32.mrf.mxu0  ;;  %v4645_v28 = vadd.f32 %v4644_v54, %v4643_v51 }
 0x16c   :  { %v4646_v57 = vpop.f32.mrf.mxu1 }
 0x16d   :  { %v4619_v58 = vpop.f32.mrf.mxu0  ;;  %v2382_v37 = vadd.f32 %v4645_v28, %v4617_v27 }
 0x16e   :  { %v4647_v60 = vpop.f32.mrf.mxu1  ;;  %v4620_v33 = vadd.f32 %v4619_v58, %v4618_v56 }
 0x16f   :  { %v4621_v61 = vpop.f32.mrf.mxu0  ;;  %v4648_v34 = vadd.f32 %v4647_v60, %v4646_v57 }
 0x170   :  { %v4649_v62 = vpop.f32.mrf.mxu1 }
 0x171   :  { %v4622_v63 = vpop.f32.mrf.mxu0  ;;  %v2387_v53 = vadd.f32 %v4648_v34, %v4620_v33 }
 0x172   :  { %v4650_v0 = vpop.f32.mrf.mxu1  ;;  %v4623_v39 = vadd.f32 %v4622_v63, %v4621_v61 }
 0x173   :  { %v4651_v40 = vadd.f32 %v4650_v0, %v4649_v62 }
 0x175   :  { %v2390_v46 = vadd.f32 %v4651_v40, %v4623_v39 }
 0x183   :  { %v4668_v44 = vpop.f32.mrf.mxu0 }
 0x184   :  { %v4696_v1 = vpop.f32.mrf.mxu1 }
 0x185   :  { %v4669_v2 = vpop.f32.mrf.mxu0 }
 0x186   :  { %v4697_v55 = vpop.f32.mrf.mxu1  ;;  %v4670_v38 = vadd.f32 %v4669_v2, %v4668_v44 }
 0x187   :  { %v4671_v7 = vpop.f32.mrf.mxu0  ;;  %v4698_v54 = vadd.f32 %v4697_v55, %v4696_v1 }
 0x188   :  { %v4699_v8 = vpop.f32.mrf.mxu1  ;;  %v2428_v52 = vadd.f32 %v4670_v38, %v2379_v20 }
 0x189   :  { %v4672_v9 = vpop.f32.mrf.mxu0 }
 0x18a   :  { %v4700_v11 = vpop.f32.mrf.mxu1  ;;  %v4673_v6 = vadd.f32 %v4672_v9, %v4671_v7  ;;  %v6129_v62 = vadd.f32 %v4698_v54, %v2428_v52 }
 0x18b   :  { %v4674_v13 = vpop.f32.mrf.mxu0  ;;  %v4701_v45 = vadd.f32 %v4700_v11, %v4699_v8 }
 0x18c   :  { %v4702_v14 = vpop.f32.mrf.mxu1  ;;  %v2431_v10 = vadd.f32 %v4673_v6, %v2382_v37 }
 0x18d   :  { %v4675_v15 = vpop.f32.mrf.mxu0 }
 0x18e   :  { %v4703_v16 = vpop.f32.mrf.mxu1  ;;  %v4676_v42 = vadd.f32 %v4675_v15, %v4674_v13  ;;  %v6127_v56 = vadd.f32 %v4701_v45, %v2431_v10 }
 0x18f   :  { %v4677_v17 = vpop.f32.mrf.mxu0  ;;  %v4704_v49 = vadd.f32 %v4703_v16, %v4702_v14 }
 0x190   :  { %v4705_v18 = vpop.f32.mrf.mxu1  ;;  %v2436_v48 = vadd.f32 %v4676_v42, %v2387_v53  ;;  %v2507_v0 = vmul.f32 %v6127_v56, %v6127_v56  ;;  %v2506_v53 = vmul.f32 %v6129_v62, %v6129_v62 }
 0x191   :  { %v4678_v19 = vpop.f32.mrf.mxu0 }
 0x192   :  { %v4706_v22 = vpop.f32.mrf.mxu1  ;;  %v4679_v47 = vadd.f32 %v4678_v19, %v4677_v17  ;;  %v6131_v63 = vadd.f32 %v4704_v49, %v2436_v48  ;;  %v2510_v7 = vadd.f32 %v2507_v0, %v2506_v53 }
 0x193   :  { %v4707_v58 = vadd.f32 %v4706_v22, %v4705_v18 }
 0x194   :  { %v2439_v57 = vadd.f32 %v4679_v47, %v2390_v46  ;;  %v2496_v47 = vadd.f32 %v6127_v56, %v6129_v62  ;;  %v2508_v10 = vmul.f32 %v6131_v63, %v6131_v63 }
 0x196   :  { %v6135_v44 = vadd.f32 %v4707_v58, %v2439_v57  ;;  %v2497_v8 = vadd.f32 %v2496_v47, %v6131_v63  ;;  %v2511_v18 = vadd.f32 %v2510_v7, %v2508_v10 }
 0x198   :  { %v2509_v9 = vmul.f32 %v6135_v44, %v6135_v44  ;;  %v2498_v19 = vadd.f32 %v2497_v8, %v6135_v44 }
 0x19a   :  { %v2512_v12 = vadd.f32 %v2511_v18, %v2509_v9 }
 0x1a3   :  { %v4724_v23 = vpop.f32.mrf.mxu0 }
 0x1a4   :  { %v4752_v3 = vpop.f32.mrf.mxu1 }
 0x1a5   :  { %v4725_v24 = vpop.f32.mrf.mxu0 }
 0x1a6   :  { %v4753_v25 = vpop.f32.mrf.mxu1  ;;  %v4726_v11 = vadd.f32 %v4725_v24, %v4724_v23  ;;  %v2499_v23 = vrot.slane %v2498_v19, 4 }
 0x1a7   :  { %v4727_v5 = vpop.f32.mrf.mxu0  ;;  %v4754_v13 = vadd.f32 %v4753_v25, %v4752_v3 }
 0x1a8   :  { %v4755_v26 = vpop.f32.mrf.mxu1 }
 0x1a9   :  { %v4728_v29 = vpop.f32.mrf.mxu0  ;;  %v3214_v32 = vadd.f32 %v4754_v13, %v4726_v11 }
 0x1aa   :  { %v4756_v31 = vpop.f32.mrf.mxu1  ;;  %v4729_v16 = vadd.f32 %v4728_v29, %v4727_v5  ;;  %v2513_v29 = vrot.slane %v2512_v12, 4 }
 0x1ab   :  { %v4730_v35 = vpop.f32.mrf.mxu0  ;;  %v4757_v17 = vadd.f32 %v4756_v31, %v4755_v26 }
 0x1ac   :  { %v4758_v36 = vpop.f32.mrf.mxu1  ;;  %v2514_v58 = vadd.f32 %v2513_v29, %v2512_v12 }
 0x1ad   :  { %v4731_v50 = vpop.f32.mrf.mxu0  ;;  %v3217_v38 = vadd.f32 %v4757_v17, %v4729_v16 }
 0x1ae   :  { %v4759_v51 = vpop.f32.mrf.mxu1  ;;  %v4732_v6 = vadd.f32 %v4731_v50, %v4730_v35  ;;  %v2515_v9 = vrot.slane %v2514_v58, 2 }
 0x1af   :  { %v4733_v60 = vpop.f32.mrf.mxu0  ;;  %v4760_v33 = vadd.f32 %v4759_v51, %v4758_v36  ;;  %v2500_v36 = vadd.f32 %v2499_v23, %v2498_v19 }
 0x1b0   :  { %v4761_v61 = vpop.f32.mrf.mxu1  ;;  %v2516_v19 = vadd.f32 %v2515_v9, %v2514_v58  ;;  %v6230_v9 = vld [vmem:[#allocation5_spill] sm:$0xff] }
 0x1b1   :  { %v4734_v20 = vpop.f32.mrf.mxu0  ;;  %v3222_v31 = vadd.f32 %v4760_v33, %v4732_v6 }
 0x1b2   :  { %v4762_v1 = vpop.f32.mrf.mxu1  ;;  %v4735_v54 = vadd.f32 %v4734_v20, %v4733_v60  ;;  %v2517_v6 = vrot.slane %v2516_v19, 1 }
 0x1b3   :  { %v4763_v45 = vadd.f32 %v4762_v1, %v4761_v61  ;;  %v2501_v61 = vrot.slane %v2500_v36, 2 }
 0x1b4   :  { %v2518_v23 = vadd.f32 %v2517_v6, %v2516_v19 }
 0x1b5   :  { %v3225_v47 = vadd.f32 %v4763_v45, %v4735_v54 }
 0x1b6   :  { %v2519_v29 = vadd.f32 %v2518_v23, %v6125_v43  ;;  %v3363_v43 = vld [vmem:[%s6218_s3] sm:$0x1] }
 0x1c4   :  { %v4808_v55 = vpop.f32.mrf.mxu1 }
 0x1c6   :  { %v4809_v15 = vpop.f32.mrf.mxu1 }
 0x1c7   :  { %v4810_v40 = vadd.f32 %v4809_v15, %v4808_v55  ;;  %v2502_v15 = vadd.f32 %v2501_v61, %v2500_v36 }
 0x1c8   :  { %v4811_v28 = vpop.f32.mrf.mxu1 }
 0x1ca   :  { %v4812_v37 = vpop.f32.mrf.mxu1 }
 0x1cb   :  { %v4813_v26 = vadd.f32 %v4812_v37, %v4811_v28  ;;  %v2503_v28 = vrot.slane %v2502_v15, 1 }
 0x1cc   :  { %v4814_v25 = vpop.f32.mrf.mxu1 }
 0x1cd   :  { %v2504_v37 = vadd.f32 %v2503_v28, %v2502_v15  ;;  %v6231_v15 = vld [vmem:[#allocation6_spill] sm:$0xff] }
 0x1ce   :  { %v4815_v52 = vpop.f32.mrf.mxu1 }
 0x1cf   :  { %v4816_v57 = vadd.f32 %v4815_v52, %v4814_v25  ;;  %v2505_v25 = vadd.f32 %v2504_v37, %v6123_v41 }
 0x1d0   :  { %v4780_v2 = vpop.f32.mrf.mxu0  ;;  %v4817_v48 = vpop.f32.mrf.mxu1 }
 0x1d2   :  { %v4781_v14 = vpop.f32.mrf.mxu0  ;;  %v4818_v53 = vpop.f32.mrf.mxu1 }
 0x1d3   :  { %v4782_v22 = vadd.f32 %v4781_v14, %v4780_v2  ;;  %v4819_v8 = vadd.f32 %v4818_v53, %v4817_v48 }
 0x1d4   :  { %v4783_v27 = vpop.f32.mrf.mxu0 }
 0x1d5   :  { %v3263_v3 = vadd.f32 %v4782_v22, %v3214_v32 }
 0x1d6   :  { %v4784_v34 = vpop.f32.mrf.mxu0 }
 0x1d7   :  { %v4785_v39 = vadd.f32 %v4784_v34, %v4783_v27  ;;  %v6149_v50 = vadd.f32 %v4810_v40, %v3263_v3 }
 0x1d8   :  { %v4786_v24 = vpop.f32.mrf.mxu0 }
 0x1d9   :  { %v3266_v5 = vadd.f32 %v4785_v39, %v3217_v38  ;;  %v3341_v20 = vmul.f32 %v6149_v50, %v6149_v50 }
 0x1da   :  { %v4787_v42 = vpop.f32.mrf.mxu0 }
 0x1db   :  { %v6147_v46 = vadd.f32 %v4813_v26, %v3266_v5  ;;  %v4788_v35 = vadd.f32 %v4787_v42, %v4786_v24 }
 0x1dc   :  { %v4789_v51 = vpop.f32.mrf.mxu0 }
 0x1dd   :  { %v3271_v49 = vadd.f32 %v4788_v35, %v3222_v31  ;;  %v3342_v10 = vmul.f32 %v6147_v46, %v6147_v46  ;;  %v3331_v1 = vadd.f32 %v6147_v46, %v6149_v50 }
 0x1de   :  { %v4790_v0 = vpop.f32.mrf.mxu0 }
 0x1df   :  { %v6153_v2 = vadd.f32 %v4816_v57, %v3271_v49  ;;  %v4791_v60 = vadd.f32 %v4790_v0, %v4789_v51  ;;  %v3345_v11 = vadd.f32 %v3342_v10, %v3341_v20  ;;  %v3371_v51 = vlaneseq  ;;  %v3359_v49 = vld [vmem:[%s6217_s2] sm:$0x1] }
 0x1e1   :  { %v3343_v55 = vmul.f32 %v6153_v2, %v6153_v2  ;;  %v3274_v7 = vadd.f32 %v4791_v60, %v3225_v47  ;;  %v3332_v13 = vadd.f32 %v3331_v1, %v6153_v2  ;;  %v3372_v48 = vshrl.u32 %v3371_v51, 7  ;;  %v6228_v1 = vld [vmem:[#allocation3_spill] sm:$0xff] }
 0x1e3   :  { %v6162_v14 = vadd.f32 %v4819_v8, %v3274_v7  ;;  %v3346_v16 = vadd.f32 %v3345_v11, %v3343_v55  ;;  %v3373_v41 = vsub.s32 0, %v3372_v48  ;;  %v6229_v7 = vld [vmem:[#allocation4_spill] sm:$0xff] }
 0x1e5   :  { %v3333_v17 = vadd.f32 %v3332_v13, %v6162_v14  ;;  %v3344_v18 = vmul.f32 %v6162_v14, %v6162_v14 }
 0x1e7   :  { %v3334_v22 = vrot.slane %v3333_v17, 4  ;;  %v3347_v27 = vadd.f32 %v3346_v16, %v3344_v18 }
 0x1e9   :  { %v3335_v12 = vadd.f32 %v3334_v22, %v3333_v17  ;;  %v3348_v32 = vrot.slane %v3347_v27, 4 }
 0x1eb   :  { %v3336_v33 = vrot.slane %v3335_v12, 2  ;;  %v3349_v34 = vadd.f32 %v3348_v32, %v3347_v27 }
 0x1ed   :  { %v3337_v38 = vadd.f32 %v3336_v33, %v3335_v12  ;;  %v3350_v39 = vrot.slane %v3349_v34, 2 }
 0x1ef   :  { %v3338_v3 = vrot.slane %v3337_v38, 1  ;;  %v3351_v24 = vadd.f32 %v3350_v39, %v3349_v34 }
 0x1f1   :  { %v3339_v5 = vadd.f32 %v3338_v3, %v3337_v38  ;;  %v3352_v26 = vrot.slane %v3351_v24, 1 }
 0x1f3   :  { %v3340_v31 = vadd.f32 %v3339_v5, %v2505_v25  ;;  %v3353_v40 = vadd.f32 %v3352_v26, %v3351_v24 }
 0x1f5   :  { %v3354_v42 = vadd.f32 %v3353_v40, %v2519_v29  ;;  %v3355_v52 = vmul.f32 0.0078125, %v3340_v31 }
 0x1f7   :  { %v3356_v54 = vmul.f32 0.0078125, %v3354_v42  ;;  %v3357_v45 = vmul.f32 %v3355_v52, %v3355_v52 }
 0x1f9   :  { %v3358_v35 = vsub.f32 %v3356_v54, %v3357_v45 }
 0x1fb   :  { %v3360_v36 = vadd.f32 1e-05, %v3358_v35 }
 0x1fd   :  { %5076 = vrsqrt.f32 %v3360_v36 }
 0x20a   :  { %v5077_v57 = vpop.eup %5076 }
 0x20b   :  { %v3362_v58 = vmul.f32 %v5077_v57, %v3359_v49 }
 0x20d   :  { %v3364_v0 = vmul.f32 %v3362_v58, %v3355_v52  ;;  %v3374_v53 = vrot.slane %v3362_v58, %v3373_v41 }
 0x20f   :  { %v3365_v47 = vsub.f32 %v3363_v43, %v3364_v0  ;;  %v3376_v10 = vmul.f32 %v3374_v53, %v6036_v21  ;;  %v3377_v60 = vmul.f32 %v3374_v53, %v6054_v30  ;;  %v3378_v61 = vmul.f32 %v3374_v53, %v6084_v59 }
 0x210   :  { %v3379_v20 = vmul.f32 %v3374_v53, %v6090_v4  ;;  %v3418_v55 = vmul.f32 %v3374_v53, %v6228_v1  ;;  %v3419_v8 = vmul.f32 %v3374_v53, %v6229_v7  ;;  %v3420_v11 = vmul.f32 %v3374_v53, %v6230_v9 }
 0x211   :  { %v3384_v13 = vrot.slane %v3365_v47, %v3373_v41  ;;  %v3421_v16 = vmul.f32 %v3374_v53, %v6231_v15  ;;  %v3455_v17 = vmul.f32 %v3374_v53, %v6129_v62  ;;  %v3456_v18 = vmul.f32 %v3374_v53, %v6127_v56 }
 0x212   :  { %v3457_v21 = vmul.f32 %v3374_v53, %v6131_v63  ;;  %v3458_v30 = vmul.f32 %v3374_v53, %v6135_v44  ;;  %v3492_v59 = vmul.f32 %v3374_v53, %v6149_v50  ;;  %v3493_v4 = vmul.f32 %v3374_v53, %v6147_v46 }
 0x213   :  { %v3386_v19 = vadd.f32 %v3384_v13, %v3376_v10  ;;  %v3387_v22 = vadd.f32 %v3384_v13, %v3377_v60  ;;  %v3388_v27 = vadd.f32 %v3384_v13, %v3378_v61  ;;  %v3389_v28 = vadd.f32 %v3384_v13, %v3379_v20 }
 0x214   :  { %v3422_v12 = vadd.f32 %v3418_v55, %v3384_v13  ;;  %v3423_v32 = vadd.f32 %v3419_v8, %v3384_v13  ;;  %v3424_v6 = vadd.f32 %v3420_v11, %v3384_v13  ;;  %v3425_v33 = vadd.f32 %v3421_v16, %v3384_v13 }
 0x215   :  { %v3390_v34 = vmax.f32 %v3386_v19, 0.0  ;;  %v3391_v62 = vmax.f32 %v3387_v22, 0.0  ;;  %v3392_v37 = vmax.f32 %v3388_v27, 0.0  ;;  %v3393_v56 = vmax.f32 %v3389_v28, 0.0 }
 0x216   :  { %v3426_v38 = vmax.f32 %v3422_v12, 0.0  ;;  %v3427_v63 = vmax.f32 %v3423_v32, 0.0  ;;  %v3428_v39 = vmax.f32 %v3424_v6, 0.0  ;;  %v3429_v44 = vmax.f32 %v3425_v33, 0.0 }
 0x217   :  { %v4328_v23 = vpack.c.bf16 %v3391_v62, %v3390_v34  ;;  %v4333_v50 = vpack.c.bf16 %v3393_v56, %v3392_v37  ;;  %v3459_v3 = vadd.f32 %v3455_v17, %v3384_v13  ;;  %v3460_v46 = vadd.f32 %v3456_v18, %v3384_v13 }
 0x218   :  { %v4338_v24 = vpack.c.bf16 %v3427_v63, %v3426_v38  ;;  %v4343_v25 = vpack.c.bf16 %v3429_v44, %v3428_v39  ;;  %v3461_v5 = vadd.f32 %v3457_v21, %v3384_v13  ;;  %v3462_v26 = vadd.f32 %v3458_v30, %v3384_v13 }
 0x219   :  { %4329 = vst [vmem:[%s6219_s4] sm:$0xff] %v4328_v23   ;;  %4365 = vst [vmem:[%s6219_s4 + $0x8] sm:$0xff] %v4333_v50   ;;  %v3463_v29 = vmax.f32 %v3459_v3, 0.0  ;;  %v3464_v31 = vmax.f32 %v3460_v46, 0.0  ;;  %v3494_v40 = vmul.f32 %v3374_v53, %v6153_v2  ;;  %v3495_v42 = vmul.f32 %v3374_v53, %v6162_v14 }
 0x21a   :  { %4366 = vst [vmem:[%s6219_s4 + $0x10] sm:$0xff] %v4338_v24   ;;  %4367 = vst [vmem:[%s6219_s4 + $0x18] sm:$0xff] %v4343_v25   ;;  %v3465_v52 = vmax.f32 %v3461_v5, 0.0  ;;  %v3466_v54 = vmax.f32 %v3462_v26, 0.0  ;;  %v3496_v45 = vadd.f32 %v3492_v59, %v3384_v13  ;;  %v3497_v35 = vadd.f32 %v3493_v4, %v3384_v13 }
 0x21b   :  { %v4348_v36 = vpack.c.bf16 %v3464_v31, %v3463_v29  ;;  %v3498_v51 = vadd.f32 %v3494_v40, %v3384_v13  ;;  %v3499_v48 = vadd.f32 %v3495_v42, %v3384_v13 }
 0x21c   :  { %v4353_v49 = vpack.c.bf16 %v3466_v54, %v3465_v52  ;;  %v3500_v41 = vmax.f32 %v3496_v45, 0.0  ;;  %v3501_v2 = vmax.f32 %v3497_v35, 0.0 }
 0x21d   :  { %4368 = vst [vmem:[%s6219_s4 + $0x20] sm:$0xff] %v4348_v36   ;;  %v3502_v14 = vmax.f32 %v3498_v51, 0.0  ;;  %v3503_v57 = vmax.f32 %v3499_v48, 0.0 }
 0x21e   :  { %4369 = vst [vmem:[%s6219_s4 + $0x28] sm:$0xff] %v4353_v49   ;;  %v4358_v58 = vpack.c.bf16 %v3501_v2, %v3500_v41 }
 0x21f   :  { %v4363_v43 = vpack.c.bf16 %v3503_v57, %v3502_v14 }
 0x220   :  { %4370 = vst [vmem:[%s6219_s4 + $0x30] sm:$0xff] %v4358_v58  }
 0x221   :  { %4371 = vst [vmem:[%s6219_s4 + $0x38] sm:$0xff] %v4363_v43  }

// kernel: generator_forward.6
= control target key start
LH: loop header
LB: loop body
LE: loop exit
PB: predicated region body
PF: predicated region fallthrough
CT: control target
= control target key end

     0   :  { %s6693_s1 = inlined_call_operand.vmem [shape: bf16[4,512,128], index: 1, kind: input, shape index: {}]   ;;  %s6694_s0 = inlined_call_operand.vmem [shape: bf16[4,128,512], index: 0, kind: input, shape index: {}]   ;;  %s6695_s2 = inlined_call_operand.vmem [shape: f32[1,128], index: 2, kind: input, shape index: {}]   ;;  %s6696_s3 = inlined_call_operand.vmem [shape: f32[1,128], index: 3, kind: input, shape index: {}]   ;;  %s6697_s4 = inlined_call_operand.vmem [shape: bf16[4,128,128], index: 4, kind: output, shape index: {}]  }
   0x1   :  { %v4928_v0 = vld [vmem:[%s6693_s1 + $0x78] sm:$0xff]   ;;  %v4932_v4 = vld [vmem:[%s6693_s1 + $0x70] sm:$0xff]   ;;  %v4936_v8 = vld [vmem:[%s6693_s1 + $0x68] sm:$0xff]  }
   0x2   :  { %v4929_v1 = vld [vmem:[%s6693_s1 + $0xf8] sm:$0xff]   ;;  %4416 = vmatprep.subr.bf16.mxu0 %v4928_v0  ;;  %v4933_v5 = vld [vmem:[%s6693_s1 + $0xf0] sm:$0xff]   ;;  %v4937_v9 = vld [vmem:[%s6693_s1 + $0xe8] sm:$0xff]  }
   0x3   :  { %v4930_v2 = vld [vmem:[%s6693_s1 + $0x38] sm:$0xff]   ;;  %4480 = vmatprep.subr.bf16.mxu1 %v4929_v1  ;;  %v4934_v6 = vld [vmem:[%s6693_s1 + $0x30] sm:$0xff]   ;;  %v4938_v10 = vld [vmem:[%s6693_s1 + $0x28] sm:$0xff]  }
   0x4   :  { %v4931_v3 = vld [vmem:[%s6693_s1 + $0xb8] sm:$0xff]   ;;  %4417 = vmatpush3.bf16.msra.mxu0 %v4930_v2  ;;  %v4935_v7 = vld [vmem:[%s6693_s1 + $0xb0] sm:$0xff]   ;;  %v4939_v11 = vld [vmem:[%s6693_s1 + $0xa8] sm:$0xff]  }
   0x5   :  { %4481 = vmatpush3.bf16.msra.mxu1 %v4931_v3  ;;  %4418 = vmatprep.subr.bf16.mxu0 %v4932_v4  ;;  %v4940_v12 = vld [vmem:[%s6693_s1 + $0x60] sm:$0xff]   ;;  %v4944_v16 = vld [vmem:[%s6693_s1 + $0x58] sm:$0xff]   ;;  %v4948_v20 = vld [vmem:[%s6693_s1 + $0x50] sm:$0xff]  }
   0x6   :  { %4482 = vmatprep.subr.bf16.mxu1 %v4933_v5  ;;  %v4941_v13 = vld [vmem:[%s6693_s1 + $0xe0] sm:$0xff]   ;;  %v4945_v17 = vld [vmem:[%s6693_s1 + $0xd8] sm:$0xff]   ;;  %v4949_v21 = vld [vmem:[%s6693_s1 + $0xd0] sm:$0xff]  }
   0x7   :  { %v4942_v14 = vld [vmem:[%s6693_s1 + $0x20] sm:$0xff]   ;;  %v4946_v18 = vld [vmem:[%s6693_s1 + $0x18] sm:$0xff]   ;;  %v4950_v22 = vld [vmem:[%s6693_s1 + $0x10] sm:$0xff]  }
   0x8   :  { %4419 = vmatpush3.bf16.msra.mxu0 %v4934_v6  ;;  %v4943_v15 = vld [vmem:[%s6693_s1 + $0xa0] sm:$0xff]   ;;  %v4947_v19 = vld [vmem:[%s6693_s1 + $0x98] sm:$0xff]   ;;  %v4951_v23 = vld [vmem:[%s6693_s1 + $0x90] sm:$0xff]  }
   0x9   :  { %4483 = vmatpush3.bf16.msra.mxu1 %v4935_v7  ;;  %4420 = vmatprep.subr.bf16.mxu0 %v4936_v8  ;;  %v4952_v24 = vld [vmem:[%s6693_s1 + $0x48] sm:$0xff]   ;;  %v4956_v28 = vld [vmem:[%s6693_s1 + $0x40] sm:$0xff]   ;;  %v4966_v36 = vld [vmem:[%s6693_s1 + $0x178] sm:$0xff]  }
   0xa   :  { %4484 = vmatprep.subr.bf16.mxu1 %v4937_v9  ;;  %v4953_v25 = vld [vmem:[%s6693_s1 + $0xc8] sm:$0xff]   ;;  %v4957_v29 = vld [vmem:[%s6693_s1 + $0xc0] sm:$0xff]   ;;  %v4967_v37 = vld [vmem:[%s6693_s1 + $0x1f8] sm:$0xff]  }
   0xb   :  { %v4954_v26 = vld [vmem:[%s6693_s1 + $0x8] sm:$0xff]   ;;  %v4958_v30 = vld [vmem:[%s6693_s1] sm:$0xff]   ;;  %v4968_v38 = vld [vmem:[%s6693_s1 + $0x138] sm:$0xff]  }
   0xc   :  { %4421 = vmatpush3.bf16.msra.mxu0 %v4938_v10  ;;  %v4955_v27 = vld [vmem:[%s6693_s1 + $0x88] sm:$0xff]   ;;  %v4959_v31 = vld [vmem:[%s6693_s1 + $0x80] sm:$0xff]   ;;  %v4969_v39 = vld [vmem:[%s6693_s1 + $0x1b8] sm:$0xff]  }
   0xd   :  { %4485 = vmatpush3.bf16.msra.mxu1 %v4939_v11  ;;  %4422 = vmatprep.subr.bf16.mxu0 %v4940_v12  ;;  %v4960_v32 = vld [vmem:[%s6694_s0] ss:$16 sps:$4 sm:$0xff]   ;;  %v4962_v33 = vld [vmem:[%s6694_s0 + $0x4] ss:$16 sps:$4 sm:$0xff]   ;;  %v4963_v34 = vld [vmem:[%s6694_s0 + $0x8] ss:$16 sps:$4 sm:$0xff]  }
   0xe   :  { %4486 = vmatprep.subr.bf16.mxu1 %v4941_v13  ;;  %v4965_v35 = vld [vmem:[%s6694_s0 + $0xc] ss:$16 sps:$4 sm:$0xff]   ;;  %498 = vmatprep.mubr.bf16.mxu0 %v4962_v33  ;;  %v4970_v40 = vld [vmem:[%s6694_s0 + $0x24] ss:$16 sps:$4 sm:$0xff]   ;;  %v4974_v42 = vld [vmem:[%s6694_s0 + $0x20] ss:$16 sps:$4 sm:$0xff]  }
   0xf   :  { %595 = vmatprep.mubr.bf16.mxu1 %v4965_v35  ;;  %v4972_v41 = vld [vmem:[%s6694_s0 + $0x2c] ss:$16 sps:$4 sm:$0xff]   ;;  %v4975_v43 = vld [vmem:[%s6694_s0 + $0x28] ss:$16 sps:$4 sm:$0xff]   ;;  %v4976_v44 = vld [vmem:[%s6693_s1 + $0x170] sm:$0xff]  }
  0x10   :  { %4423 = vmatpush3.bf16.msra.mxu0 %v4942_v14  ;;  %v4977_v45 = vld [vmem:[%s6693_s1 + $0x1f0] sm:$0xff]   ;;  %v4982_v49 = vld [vmem:[%s6694_s0 + $0x4c] ss:$16 sps:$4 sm:$0xff]   ;;  %v4985_v51 = vld [vmem:[%s6694_s0 + $0x48] ss:$16 sps:$4 sm:$0xff]  }
  0x11   :  { %4487 = vmatpush3.bf16.msra.mxu1 %v4943_v15  ;;  %4424 = vmatprep.subr.bf16.mxu0 %v4944_v16  ;;  %v4978_v46 = vld [vmem:[%s6693_s1 + $0x130] sm:$0xff]   ;;  %v4986_v52 = vld [vmem:[%s6693_s1 + $0x168] sm:$0xff]   ;;  %v4996_v60 = vld [vmem:[%s6693_s1 + $0x160] sm:$0xff]  }
  0x12   :  { %4488 = vmatprep.subr.bf16.mxu1 %v4945_v17  ;;  %v4979_v47 = vld [vmem:[%s6693_s1 + $0x1b0] sm:$0xff]   ;;  %v4987_v53 = vld [vmem:[%s6693_s1 + $0x1e8] sm:$0xff]   ;;  %v4997_v61 = vld [vmem:[%s6693_s1 + $0x1e0] sm:$0xff]  }
  0x13   :  { %v4980_v48 = vld [vmem:[%s6694_s0 + $0x44] ss:$16 sps:$4 sm:$0xff]   ;;  %v4984_v50 = vld [vmem:[%s6694_s0 + $0x40] ss:$16 sps:$4 sm:$0xff]   ;;  %v4988_v54 = vld [vmem:[%s6693_s1 + $0x128] sm:$0xff]  }
  0x14   :  { %4425 = vmatpush3.bf16.msra.mxu0 %v4946_v18  ;;  %v4989_v55 = vld [vmem:[%s6693_s1 + $0x1a8] sm:$0xff]   ;;  %v4990_v56 = vld [vmem:[%s6694_s0 + $0x64] ss:$16 sps:$4 sm:$0xff]   ;;  %v4994_v58 = vld [vmem:[%s6694_s0 + $0x60] ss:$16 sps:$4 sm:$0xff]  }
  0x15   :  { %4489 = vmatpush3.bf16.msra.mxu1 %v4947_v19  ;;  %4426 = vmatprep.subr.bf16.mxu0 %v4948_v20  ;;  %v4992_v57 = vld [vmem:[%s6694_s0 + $0x6c] ss:$16 sps:$4 sm:$0xff]   ;;  %v4995_v59 = vld [vmem:[%s6694_s0 + $0x68] ss:$16 sps:$4 sm:$0xff]   ;;  %v4998_v62 = vld [vmem:[%s6693_s1 + $0x120] sm:$0xff]  }
  0x16   :  { %4490 = vmatprep.subr.bf16.mxu1 %v4949_v21  ;;  %v4999_v63 = vld [vmem:[%s6693_s1 + $0x1a0] sm:$0xff]   ;;  %v5002_v1 = vld [vmem:[%s6694_s0 + $0x8c] ss:$16 sps:$4 sm:$0xff]   ;;  %v5005_v4 = vld [vmem:[%s6694_s0 + $0x88] ss:$16 sps:$4 sm:$0xff]  }
  0x17   :  { %v5000_v0 = vld [vmem:[%s6694_s0 + $0x84] ss:$16 sps:$4 sm:$0xff]   ;;  %v5004_v2 = vld [vmem:[%s6694_s0 + $0x80] ss:$16 sps:$4 sm:$0xff]   ;;  %v5006_v3 = vld [vmem:[%s6693_s1 + $0x158] sm:$0xff]  }
  0x18   :  { %4427 = vmatpush3.bf16.msra.mxu0 %v4950_v22  ;;  %v5007_v5 = vld [vmem:[%s6693_s1 + $0x1d8] sm:$0xff]   ;;  %v5010_v8 = vld [vmem:[%s6694_s0 + $0xa4] ss:$16 sps:$4 sm:$0xff]   ;;  %v5014_v12 = vld [vmem:[%s6694_s0 + $0xa0] ss:$16 sps:$4 sm:$0xff]  }
  0x19   :  { %4491 = vmatpush3.bf16.msra.mxu1 %v4951_v23  ;;  %4428 = vmatprep.subr.bf16.mxu0 %v4952_v24  ;;  %v5008_v6 = vld [vmem:[%s6693_s1 + $0x118] sm:$0xff]   ;;  %v5016_v10 = vld [vmem:[%s6693_s1 + $0x150] sm:$0xff]   ;;  %v5026_v18 = vld [vmem:[%s6693_s1 + $0x148] sm:$0xff]  }
  0x1a   :  { %4492 = vmatprep.subr.bf16.mxu1 %v4953_v25  ;;  %v5009_v7 = vld [vmem:[%s6693_s1 + $0x198] sm:$0xff]   ;;  %v5017_v11 = vld [vmem:[%s6693_s1 + $0x1d0] sm:$0xff]   ;;  %v5027_v19 = vld [vmem:[%s6693_s1 + $0x1c8] sm:$0xff]  }
  0x1b   :  { %v5012_v9 = vld [vmem:[%s6694_s0 + $0xac] ss:$16 sps:$4 sm:$0xff]   ;;  %v5018_v13 = vld [vmem:[%s6693_s1 + $0x110] sm:$0xff]   ;;  %v5015_v15 = vld [vmem:[%s6694_s0 + $0xa8] ss:$16 sps:$4 sm:$0xff]  }
  0x1c   :  { %4429 = vmatpush3.bf16.msra.mxu0 %v4954_v26  ;;  %v5019_v14 = vld [vmem:[%s6693_s1 + $0x190] sm:$0xff]   ;;  %v5022_v17 = vld [vmem:[%s6694_s0 + $0xcc] ss:$16 sps:$4 sm:$0xff]   ;;  %v5025_v23 = vld [vmem:[%s6694_s0 + $0xc8] ss:$16 sps:$4 sm:$0xff]  }
  0x1d   :  { %4493 = vmatpush3.bf16.msra.mxu1 %v4955_v27  ;;  %4430 = vmatprep.subr.bf16.mxu0 %v4956_v28  ;;  %v5020_v16 = vld [vmem:[%s6694_s0 + $0xc4] ss:$16 sps:$4 sm:$0xff]   ;;  %v5028_v20 = vld [vmem:[%s6693_s1 + $0x108] sm:$0xff]   ;;  %v5024_v22 = vld [vmem:[%s6694_s0 + $0xc0] ss:$16 sps:$4 sm:$0xff]  }
  0x1e   :  { %4494 = vmatprep.subr.bf16.mxu1 %v4957_v29  ;;  %v5029_v21 = vld [vmem:[%s6693_s1 + $0x188] sm:$0xff]   ;;  %v5030_v24 = vld [vmem:[%s6694_s0 + $0xe4] ss:$16 sps:$4 sm:$0xff]   ;;  %v5046_v33 = vld [vmem:[%s6693_s1 + $0x278] sm:$0xff]  }
  0x1f   :  { %v5032_v25 = vld [vmem:[%s6694_s0 + $0xec] ss:$16 sps:$4 sm:$0xff]   ;;  %v5036_v26 = vld [vmem:[%s6693_s1 + $0x140] sm:$0xff]  }
  0x20   :  { %4431 = vmatpush3.bf16.msra.mxu0 %v4958_v30  ;;  %v5037_v27 = vld [vmem:[%s6693_s1 + $0x1c0] sm:$0xff]   ;;  %v5045_v35 = vld [vmem:[%s6694_s0 + $0x10c] ss:$16 sps:$4 sm:$0xff]  }
  0x21   :  { %4495 = vmatpush3.bf16.msra.mxu1 %v4959_v31  ;;  %4544 = vmatprep.subr.bf16.mxu0 %v4966_v36  ;;  %v5038_v28 = vld [vmem:[%s6693_s1 + $0x100] sm:$0xff]   ;;  %v5035_v31 = vld [vmem:[%s6694_s0 + $0xe8] ss:$16 sps:$4 sm:$0xff]  }
  0x22   :  { %4608 = vmatprep.subr.bf16.mxu1 %v4967_v37  ;;  %v5039_v29 = vld [vmem:[%s6693_s1 + $0x180] sm:$0xff]   ;;  %v5043_v37 = vld [vmem:[%s6694_s0 + $0x108] ss:$16 sps:$4 sm:$0xff]  }
  0x23   :  { %499 = vmatmul.mubr.bf16.vlgmr.msra.gmra.mxu0 %v4960_v32  ;;  %v5034_v30 = vld [vmem:[%s6694_s0 + $0xe0] ss:$16 sps:$4 sm:$0xff]   ;;  %v5042_v32 = vld [vmem:[%s6694_s0 + $0x104] ss:$16 sps:$4 sm:$0xff]  }
  0x24   :  { %596 = vmatmul.mubr.bf16.vlgmr.msra.gmra.mxu1 %v4963_v34  ;;  %4545 = vmatpush3.bf16.msra.mxu0 %v4968_v38  ;;  %v5047_v34 = vld [vmem:[%s6693_s1 + $0x2f8] sm:$0xff]   ;;  %v5040_v36 = vld [vmem:[%s6694_s0 + $0x100] ss:$16 sps:$4 sm:$0xff]  }
  0x25   :  { %4609 = vmatpush3.bf16.msra.mxu1 %v4969_v39  ;;  %506 = vmatprep.mubr.bf16.mxu0 %v4970_v40  ;;  %v5048_v38 = vld [vmem:[%s6693_s1 + $0x238] sm:$0xff]   ;;  %v5050_v40 = vld [vmem:[%s6694_s0 + $0x124] ss:$16 sps:$4 sm:$0xff]  }
  0x26   :  { %603 = vmatprep.mubr.bf16.mxu1 %v4972_v41  ;;  %4546 = vmatprep.subr.bf16.mxu0 %v4976_v44  ;;  %v5049_v39 = vld [vmem:[%s6693_s1 + $0x2b8] sm:$0xff]   ;;  %v5058_v44 = vld [vmem:[%s6693_s1 + $0x230] sm:$0xff]  }
  0x27   :  { %4610 = vmatprep.subr.bf16.mxu1 %v4977_v45  ;;  %v5052_v41 = vld [vmem:[%s6694_s0 + $0x12c] ss:$16 sps:$4 sm:$0xff]   ;;  %v5059_v45 = vld [vmem:[%s6693_s1 + $0x2b0] sm:$0xff]  }
  0x28   :  { %4547 = vmatpush3.bf16.msra.mxu0 %v4978_v46  ;;  %v5054_v46 = vld [vmem:[%s6694_s0 + $0x120] ss:$16 sps:$4 sm:$0xff]  }
  0x29   :  { %4611 = vmatpush3.bf16.msra.mxu1 %v4979_v47  ;;  %4548 = vmatprep.subr.bf16.mxu0 %v4986_v52  ;;  %v5066_v47 = vld [vmem:[%s6693_s1 + $0x268] sm:$0xff]  }
  0x2a   :  { %4612 = vmatprep.subr.bf16.mxu1 %v4987_v53  ;;  %v5068_v52 = vld [vmem:[%s6693_s1 + $0x228] sm:$0xff]  }
  0x2b   :  { %507 = vmatmul.mubr.bf16.gmra.mxu0 %v4974_v42  ;;  %v5056_v42 = vld [vmem:[%s6693_s1 + $0x270] sm:$0xff]   ;;  %v5069_v53 = vld [vmem:[%s6693_s1 + $0x2a8] sm:$0xff]  }
  0x2c   :  { %604 = vmatmul.mubr.bf16.gmra.mxu1 %v4975_v43  ;;  %514 = vmatprep.mubr.bf16.mxu0 %v4980_v48  ;;  %v5057_v43 = vld [vmem:[%s6693_s1 + $0x2f0] sm:$0xff]   ;;  %v5055_v48 = vld [vmem:[%s6694_s0 + $0x128] ss:$16 sps:$4 sm:$0xff]  }
  0x2d   :  { %611 = vmatprep.mubr.bf16.mxu1 %v4982_v49  ;;  %4549 = vmatpush3.bf16.msra.mxu0 %v4988_v54  ;;  %v5067_v49 = vld [vmem:[%s6693_s1 + $0x2e8] sm:$0xff]   ;;  %v5076_v54 = vld [vmem:[%s6693_s1 + $0x260] sm:$0xff]  }
  0x2e   :  { %4613 = vmatpush3.bf16.msra.mxu1 %v4989_v55  ;;  %4550 = vmatprep.subr.bf16.mxu0 %v4996_v60  ;;  %v5077_v55 = vld [vmem:[%s6693_s1 + $0x2e0] sm:$0xff]  }
  0x2f   :  { %4614 = vmatprep.subr.bf16.mxu1 %v4997_v61  ;;  %v5070_v60 = vld [vmem:[%s6694_s0 + $0x164] ss:$16 sps:$4 sm:$0xff]   ;;  %v5072_v61 = vld [vmem:[%s6694_s0 + $0x16c] ss:$16 sps:$4 sm:$0xff]  }
  0x31   :  { %4551 = vmatpush3.bf16.msra.mxu0 %v4998_v62  ;;  %v5086_v62 = vld [vmem:[%s6693_s1 + $0x258] sm:$0xff]  }
  0x32   :  { %4615 = vmatpush3.bf16.msra.mxu1 %v4999_v63  ;;  %4552 = vmatprep.subr.bf16.mxu0 %v5006_v3  ;;  %v5087_v63 = vld [vmem:[%s6693_s1 + $0x2d8] sm:$0xff]  }
  0x33   :  { %515 = vmatmul.mubr.bf16.gmra.mxu0 %v4984_v50  ;;  %4616 = vmatprep.subr.bf16.mxu1 %v5007_v5  ;;  %v5060_v50 = vld [vmem:[%s6694_s0 + $0x144] ss:$16 sps:$4 sm:$0xff]   ;;  %v5075_v3 = vld [vmem:[%s6694_s0 + $0x168] ss:$16 sps:$4 sm:$0xff]   ;;  %v5082_v5 = vld [vmem:[%s6694_s0 + $0x18c] ss:$16 sps:$4 sm:$0xff]  }
  0x34   :  { %612 = vmatmul.mubr.bf16.gmra.mxu1 %v4985_v51  ;;  %522 = vmatprep.mubr.bf16.mxu0 %v4990_v56  ;;  %v5062_v51 = vld [vmem:[%s6694_s0 + $0x14c] ss:$16 sps:$4 sm:$0xff]   ;;  %v5064_v56 = vld [vmem:[%s6694_s0 + $0x140] ss:$16 sps:$4 sm:$0xff]  }
  0x35   :  { %619 = vmatprep.mubr.bf16.mxu1 %v4992_v57  ;;  %4553 = vmatpush3.bf16.msra.mxu0 %v5008_v6  ;;  %v5078_v57 = vld [vmem:[%s6693_s1 + $0x220] sm:$0xff]   ;;  %v5096_v6 = vld [vmem:[%s6693_s1 + $0x250] sm:$0xff]  }
  0x36   :  { %4617 = vmatpush3.bf16.msra.mxu1 %v5009_v7  ;;  %4554 = vmatprep.subr.bf16.mxu0 %v5016_v10  ;;  %v5097_v7 = vld [vmem:[%s6693_s1 + $0x2d0] sm:$0xff]  }
  0x37   :  { %4618 = vmatprep.subr.bf16.mxu1 %v5017_v11  ;;  %v5084_v10 = vld [vmem:[%s6694_s0 + $0x180] ss:$16 sps:$4 sm:$0xff]   ;;  %v5085_v11 = vld [vmem:[%s6694_s0 + $0x188] ss:$16 sps:$4 sm:$0xff]  }
  0x39   :  { %4555 = vmatpush3.bf16.msra.mxu0 %v5018_v13  ;;  %v5092_v13 = vld [vmem:[%s6694_s0 + $0x1ac] ss:$16 sps:$4 sm:$0xff]  }
  0x3a   :  { %4619 = vmatpush3.bf16.msra.mxu1 %v5019_v14  ;;  %4556 = vmatprep.subr.bf16.mxu0 %v5026_v18  ;;  %v5106_v14 = vld [vmem:[%s6693_s1 + $0x248] sm:$0xff]   ;;  %v5094_v18 = vld [vmem:[%s6694_s0 + $0x1a0] ss:$16 sps:$4 sm:$0xff]  }
  0x3b   :  { %523 = vmatmul.mubr.bf16.gmra.mxu0 %v4994_v58  ;;  %4620 = vmatprep.subr.bf16.mxu1 %v5027_v19  ;;  %v5079_v58 = vld [vmem:[%s6693_s1 + $0x2a0] sm:$0xff]   ;;  %v5095_v19 = vld [vmem:[%s6694_s0 + $0x1a8] ss:$16 sps:$4 sm:$0xff]  }
  0x3c   :  { %620 = vmatmul.mubr.bf16.gmra.mxu1 %v4995_v59  ;;  %530 = vmatprep.mubr.bf16.mxu0 %v5000_v0  ;;  %v5065_v59 = vld [vmem:[%s6694_s0 + $0x148] ss:$16 sps:$4 sm:$0xff]  }
  0x3d   :  { %627 = vmatprep.mubr.bf16.mxu1 %v5002_v1  ;;  %4557 = vmatpush3.bf16.msra.mxu0 %v5028_v20  ;;  %v5088_v0 = vld [vmem:[%s6693_s1 + $0x218] sm:$0xff]   ;;  %v5100_v20 = vld [vmem:[%s6694_s0 + $0x1c4] ss:$16 sps:$4 sm:$0xff]  }
  0x3e   :  { %4621 = vmatpush3.bf16.msra.mxu1 %v5029_v21  ;;  %4558 = vmatprep.subr.bf16.mxu0 %v5036_v26  ;;  %v5089_v1 = vld [vmem:[%s6693_s1 + $0x298] sm:$0xff]   ;;  %v5116_v21 = vld [vmem:[%s6693_s1 + $0x240] sm:$0xff]  }
  0x3f   :  { %4622 = vmatprep.subr.bf16.mxu1 %v5037_v27  ;;  %v5104_v26 = vld [vmem:[%s6694_s0 + $0x1c0] ss:$16 sps:$4 sm:$0xff]   ;;  %v5126_v27 = vld [vmem:[%s6693_s1 + $0x378] sm:$0xff]  }
  0x41   :  { %4559 = vmatpush3.bf16.msra.mxu0 %v5038_v28  ;;  %v5127_v28 = vld [vmem:[%s6693_s1 + $0x3f8] sm:$0xff]  }
  0x42   :  { %4623 = vmatpush3.bf16.msra.mxu1 %v5039_v29  ;;  %4672 = vmatprep.subr.bf16.mxu0 %v5046_v33  ;;  %v5105_v29 = vld [vmem:[%s6694_s0 + $0x1c8] ss:$16 sps:$4 sm:$0xff]  }
  0x43   :  { %531 = vmatmul.mubr.bf16.gmra.mxu0 %v5004_v2  ;;  %4736 = vmatprep.subr.bf16.mxu1 %v5047_v34  ;;  %v5074_v2 = vld [vmem:[%s6694_s0 + $0x160] ss:$16 sps:$4 sm:$0xff]   ;;  %v5115_v33 = vld [vmem:[%s6694_s0 + $0x1e8] ss:$16 sps:$4 sm:$0xff]   ;;  %v5122_v34 = vld [vmem:[%s6694_s0 + $0x204] ss:$16 sps:$4 sm:$0xff]  }
  0x44   :  { %628 = vmatmul.mubr.bf16.gmra.mxu1 %v5005_v4  ;;  %538 = vmatprep.mubr.bf16.mxu0 %v5010_v8  ;;  %v5080_v4 = vld [vmem:[%s6694_s0 + $0x184] ss:$16 sps:$4 sm:$0xff]  }
  0x45   :  { %635 = vmatprep.mubr.bf16.mxu1 %v5012_v9  ;;  %v5098_v8 = vld [vmem:[%s6693_s1 + $0x210] sm:$0xff]  }
  0x46   :  { %v5099_v9 = vld [vmem:[%s6693_s1 + $0x290] sm:$0xff]  }
  0x4b   :  { %539 = vmatmul.mubr.bf16.gmra.mxu0 %v5014_v12  ;;  %v5090_v12 = vld [vmem:[%s6694_s0 + $0x1a4] ss:$16 sps:$4 sm:$0xff]  }
  0x4c   :  { %636 = vmatmul.mubr.bf16.gmra.mxu1 %v5015_v15  ;;  %546 = vmatprep.mubr.bf16.mxu0 %v5020_v16  ;;  %v5107_v15 = vld [vmem:[%s6693_s1 + $0x2c8] sm:$0xff]  }
  0x4d   :  { %643 = vmatprep.mubr.bf16.mxu1 %v5022_v17  ;;  %v5108_v16 = vld [vmem:[%s6693_s1 + $0x208] sm:$0xff]  }
  0x4e   :  { %v5109_v17 = vld [vmem:[%s6693_s1 + $0x288] sm:$0xff]  }
  0x53   :  { %547 = vmatmul.mubr.bf16.gmra.mxu0 %v5024_v22  ;;  %v5102_v22 = vld [vmem:[%s6694_s0 + $0x1cc] ss:$16 sps:$4 sm:$0xff]  }
  0x54   :  { %644 = vmatmul.mubr.bf16.gmra.mxu1 %v5025_v23  ;;  %554 = vmatprep.mubr.bf16.mxu0 %v5030_v24  ;;  %v5117_v23 = vld [vmem:[%s6693_s1 + $0x2c0] sm:$0xff]  }
  0x55   :  { %651 = vmatprep.mubr.bf16.mxu1 %v5032_v25  ;;  %v5118_v24 = vld [vmem:[%s6693_s1 + $0x200] sm:$0xff]  }
  0x56   :  { %v5119_v25 = vld [vmem:[%s6693_s1 + $0x280] sm:$0xff]  }
  0x5b   :  { %555 = vmatmul.mubr.bf16.gmra.mxu0 %v5034_v30  ;;  %v5110_v30 = vld [vmem:[%s6694_s0 + $0x1e4] ss:$16 sps:$4 sm:$0xff]  }
  0x5c   :  { %652 = vmatmul.mubr.bf16.gmra.mxu1 %v5035_v31  ;;  %1218 = vmatprep.mubr.bf16.mxu0 %v5042_v32  ;;  %v5112_v31 = vld [vmem:[%s6694_s0 + $0x1ec] ss:$16 sps:$4 sm:$0xff]   ;;  %v5114_v32 = vld [vmem:[%s6694_s0 + $0x1e0] ss:$16 sps:$4 sm:$0xff]  }
  0x5d   :  { %1315 = vmatprep.mubr.bf16.mxu1 %v5045_v35  ;;  %v5125_v35 = vld [vmem:[%s6694_s0 + $0x20c] ss:$16 sps:$4 sm:$0xff]  }
  0x63   :  { %1219 = vmatmul.mubr.bf16.vlgmr.msra.gmra.mxu0 %v5040_v36  ;;  %v5120_v36 = vld [vmem:[%s6694_s0 + $0x200] ss:$16 sps:$4 sm:$0xff]  }
  0x64   :  { %1316 = vmatmul.mubr.bf16.vlgmr.msra.gmra.mxu1 %v5043_v37  ;;  %4673 = vmatpush3.bf16.msra.mxu0 %v5048_v38  ;;  %v5123_v37 = vld [vmem:[%s6694_s0 + $0x208] ss:$16 sps:$4 sm:$0xff]  }
  0x65   :  { %4737 = vmatpush3.bf16.msra.mxu1 %v5049_v39  ;;  %1226 = vmatprep.mubr.bf16.mxu0 %v5050_v40  ;;  %v5128_v38 = vld [vmem:[%s6693_s1 + $0x338] sm:$0xff]   ;;  %v5130_v40 = vld [vmem:[%s6694_s0 + $0x224] ss:$16 sps:$4 sm:$0xff]  }
  0x66   :  { %1323 = vmatprep.mubr.bf16.mxu1 %v5052_v41  ;;  %4674 = vmatprep.subr.bf16.mxu0 %v5056_v42  ;;  %v5129_v39 = vld [vmem:[%s6693_s1 + $0x3b8] sm:$0xff]   ;;  %v5136_v42 = vld [vmem:[%s6693_s1 + $0x370] sm:$0xff]  }
  0x67   :  { %4738 = vmatprep.subr.bf16.mxu1 %v5057_v43  ;;  %v5132_v41 = vld [vmem:[%s6694_s0 + $0x22c] ss:$16 sps:$4 sm:$0xff]   ;;  %v5137_v43 = vld [vmem:[%s6693_s1 + $0x3f0] sm:$0xff]  }
  0x68   :  { %4675 = vmatpush3.bf16.msra.mxu0 %v5058_v44  ;;  %v5138_v44 = vld [vmem:[%s6693_s1 + $0x330] sm:$0xff]  }
  0x69   :  { %4739 = vmatpush3.bf16.msra.mxu1 %v5059_v45  ;;  %4676 = vmatprep.subr.bf16.mxu0 %v5066_v47  ;;  %v5139_v45 = vld [vmem:[%s6693_s1 + $0x3b0] sm:$0xff]   ;;  %v5146_v47 = vld [vmem:[%s6693_s1 + $0x368] sm:$0xff]  }
  0x6a   :  { %4740 = vmatprep.subr.bf16.mxu1 %v5067_v49  ;;  %v5140_v49 = vld [vmem:[%s6694_s0 + $0x244] ss:$16 sps:$4 sm:$0xff]  }
  0x6b   :  { %1227 = vmatmul.mubr.bf16.gmra.mxu0 %v5054_v46  ;;  %v5134_v46 = vld [vmem:[%s6694_s0 + $0x220] ss:$16 sps:$4 sm:$0xff]  }
  0x6c   :  { %1324 = vmatmul.mubr.bf16.gmra.mxu1 %v5055_v48  ;;  %1234 = vmatprep.mubr.bf16.mxu0 %v5060_v50  ;;  %v5135_v48 = vld [vmem:[%s6694_s0 + $0x228] ss:$16 sps:$4 sm:$0xff]  }
  0x6d   :  { %1331 = vmatprep.mubr.bf16.mxu1 %v5062_v51  ;;  %4677 = vmatpush3.bf16.msra.mxu0 %v5068_v52  ;;  %v5147_v50 = vld [vmem:[%s6693_s1 + $0x3e8] sm:$0xff]  }
  0x6e   :  { %4741 = vmatpush3.bf16.msra.mxu1 %v5069_v53  ;;  %4678 = vmatprep.subr.bf16.mxu0 %v5076_v54  ;;  %v5142_v51 = vld [vmem:[%s6694_s0 + $0x24c] ss:$16 sps:$4 sm:$0xff]   ;;  %v5156_v54 = vld [vmem:[%s6693_s1 + $0x360] sm:$0xff]  }
  0x6f   :  { %4742 = vmatprep.subr.bf16.mxu1 %v5077_v55  ;;  %v5148_v52 = vld [vmem:[%s6693_s1 + $0x328] sm:$0xff]   ;;  %v5157_v55 = vld [vmem:[%s6693_s1 + $0x3e0] sm:$0xff]  }
  0x70   :  { %v5149_v53 = vld [vmem:[%s6693_s1 + $0x3a8] sm:$0xff]  }
  0x71   :  { %4679 = vmatpush3.bf16.msra.mxu0 %v5078_v57  ;;  %v5158_v57 = vld [vmem:[%s6693_s1 + $0x320] sm:$0xff]  }
  0x72   :  { %4743 = vmatpush3.bf16.msra.mxu1 %v5079_v58  ;;  %4680 = vmatprep.subr.bf16.mxu0 %v5086_v62  ;;  %v5159_v58 = vld [vmem:[%s6693_s1 + $0x3a0] sm:$0xff]   ;;  %v5152_v62 = vld [vmem:[%s6694_s0 + $0x26c] ss:$16 sps:$4 sm:$0xff]  }
  0x73   :  { %1235 = vmatmul.mubr.bf16.gmra.mxu0 %v5064_v56  ;;  %4744 = vmatprep.subr.bf16.mxu1 %v5087_v63  ;;  %v5144_v56 = vld [vmem:[%s6694_s0 + $0x240] ss:$16 sps:$4 sm:$0xff]   ;;  %v5167_v63 = vld [vmem:[%s6693_s1 + $0x3d8] sm:$0xff]  }
  0x74   :  { %1332 = vmatmul.mubr.bf16.gmra.mxu1 %v5065_v59  ;;  %1242 = vmatprep.mubr.bf16.mxu0 %v5070_v60  ;;  %v5145_v59 = vld [vmem:[%s6694_s0 + $0x248] ss:$16 sps:$4 sm:$0xff]   ;;  %v5150_v60 = vld [vmem:[%s6694_s0 + $0x264] ss:$16 sps:$4 sm:$0xff]  }
  0x75   :  { %1339 = vmatprep.mubr.bf16.mxu1 %v5072_v61  ;;  %4681 = vmatpush3.bf16.msra.mxu0 %v5088_v0  ;;  %v5166_v61 = vld [vmem:[%s6693_s1 + $0x358] sm:$0xff]  }
  0x76   :  { %4745 = vmatpush3.bf16.msra.mxu1 %v5089_v1  ;;  %4682 = vmatprep.subr.bf16.mxu0 %v5096_v6  ;;  %v5168_v0 = vld [vmem:[%s6693_s1 + $0x318] sm:$0xff]   ;;  %v5179_v6 = vld [vmem:[%s6693_s1 + $0x390] sm:$0xff]  }
  0x77   :  { %4746 = vmatprep.subr.bf16.mxu1 %v5097_v7  ;;  %v5169_v1 = vld [vmem:[%s6693_s1 + $0x398] sm:$0xff]  }
  0x78   :  { %v5155_v7 = vld [vmem:[%s6694_s0 + $0x268] ss:$16 sps:$4 sm:$0xff]  }
  0x79   :  { %4683 = vmatpush3.bf16.msra.mxu0 %v5098_v8  ;;  %v5160_v8 = vld [vmem:[%s6694_s0 + $0x284] ss:$16 sps:$4 sm:$0xff]  }
  0x7a   :  { %4747 = vmatpush3.bf16.msra.mxu1 %v5099_v9  ;;  %4684 = vmatprep.subr.bf16.mxu0 %v5106_v14  ;;  %v5186_v9 = vld [vmem:[%s6693_s1 + $0x348] sm:$0xff]   ;;  %v5196_v14 = vld [vmem:[%s6693_s1 + $0x340] sm:$0xff]  }
  0x7b   :  { %1243 = vmatmul.mubr.bf16.gmra.mxu0 %v5074_v2  ;;  %4748 = vmatprep.subr.bf16.mxu1 %v5107_v15  ;;  %v5176_v2 = vld [vmem:[%s6693_s1 + $0x350] sm:$0xff]   ;;  %v5197_v15 = vld [vmem:[%s6693_s1 + $0x3c0] sm:$0xff]  }
  0x7c   :  { %1340 = vmatmul.mubr.bf16.gmra.mxu1 %v5075_v3  ;;  %1250 = vmatprep.mubr.bf16.mxu0 %v5080_v4  ;;  %v5177_v3 = vld [vmem:[%s6693_s1 + $0x3d0] sm:$0xff]  }
  0x7d   :  { %1347 = vmatprep.mubr.bf16.mxu1 %v5082_v5  ;;  %4685 = vmatpush3.bf16.msra.mxu0 %v5108_v16  ;;  %v5178_v4 = vld [vmem:[%s6693_s1 + $0x310] sm:$0xff]  }
  0x7e   :  { %4749 = vmatpush3.bf16.msra.mxu1 %v5109_v17  ;;  %4686 = vmatprep.subr.bf16.mxu0 %v5116_v21  ;;  %v5154_v5 = vld [vmem:[%s6694_s0 + $0x260] ss:$16 sps:$4 sm:$0xff]   ;;  %v5172_v21 = vld [vmem:[%s6694_s0 + $0x2ac] ss:$16 sps:$4 sm:$0xff]  }
  0x7f   :  { %4750 = vmatprep.subr.bf16.mxu1 %v5117_v23  ;;  %v5164_v16 = vld [vmem:[%s6694_s0 + $0x280] ss:$16 sps:$4 sm:$0xff]   ;;  %v5175_v23 = vld [vmem:[%s6694_s0 + $0x2a8] ss:$16 sps:$4 sm:$0xff]  }
  0x80   :  { %v5198_v17 = vld [vmem:[%s6693_s1 + $0x300] sm:$0xff]  }
  0x81   :  { %4687 = vmatpush3.bf16.msra.mxu0 %v5118_v24  ;;  %v5180_v24 = vld [vmem:[%s6694_s0 + $0x2c4] ss:$16 sps:$4 sm:$0xff]  }
  0x82   :  { %4751 = vmatpush3.bf16.msra.mxu1 %v5119_v25  ;;  %4800 = vmatprep.subr.bf16.mxu0 %v5126_v27  ;;  %v5182_v25 = vld [vmem:[%s6694_s0 + $0x2cc] ss:$16 sps:$4 sm:$0xff]   ;;  %v5185_v27 = vld [vmem:[%s6694_s0 + $0x2c8] ss:$16 sps:$4 sm:$0xff]  }
  0x83   :  { %1251 = vmatmul.mubr.bf16.gmra.mxu0 %v5084_v10  ;;  %4864 = vmatprep.subr.bf16.mxu1 %v5127_v28  ;;  %v5187_v10 = vld [vmem:[%s6693_s1 + $0x3c8] sm:$0xff]   ;;  %v5190_v28 = vld [vmem:[%s6694_s0 + $0x2e4] ss:$16 sps:$4 sm:$0xff]  }
  0x84   :  { %1348 = vmatmul.mubr.bf16.gmra.mxu1 %v5085_v11  ;;  %1258 = vmatprep.mubr.bf16.mxu0 %v5090_v12  ;;  %v5162_v11 = vld [vmem:[%s6694_s0 + $0x28c] ss:$16 sps:$4 sm:$0xff]  }
  0x85   :  { %1355 = vmatprep.mubr.bf16.mxu1 %v5092_v13  ;;  %v5188_v12 = vld [vmem:[%s6693_s1 + $0x308] sm:$0xff]  }
  0x86   :  { %v5189_v13 = vld [vmem:[%s6693_s1 + $0x388] sm:$0xff]  }
  0x8b   :  { %1259 = vmatmul.mubr.bf16.gmra.mxu0 %v5094_v18  ;;  %v5199_v18 = vld [vmem:[%s6693_s1 + $0x380] sm:$0xff]  }
  0x8c   :  { %1356 = vmatmul.mubr.bf16.gmra.mxu1 %v5095_v19  ;;  %1266 = vmatprep.mubr.bf16.mxu0 %v5100_v20  ;;  %v5165_v19 = vld [vmem:[%s6694_s0 + $0x288] ss:$16 sps:$4 sm:$0xff]   ;;  %v5170_v20 = vld [vmem:[%s6694_s0 + $0x2a4] ss:$16 sps:$4 sm:$0xff]  }
  0x8d   :  { %1363 = vmatprep.mubr.bf16.mxu1 %v5102_v22  ;;  %v5174_v22 = vld [vmem:[%s6694_s0 + $0x2a0] ss:$16 sps:$4 sm:$0xff]  }
  0x93   :  { %1267 = vmatmul.mubr.bf16.gmra.mxu0 %v5104_v26  ;;  %v5184_v26 = vld [vmem:[%s6694_s0 + $0x2c0] ss:$16 sps:$4 sm:$0xff]  }
  0x94   :  { %1364 = vmatmul.mubr.bf16.gmra.mxu1 %v5105_v29  ;;  %1274 = vmatprep.mubr.bf16.mxu0 %v5110_v30  ;;  %v5192_v29 = vld [vmem:[%s6694_s0 + $0x2ec] ss:$16 sps:$4 sm:$0xff]   ;;  %v5194_v30 = vld [vmem:[%s6694_s0 + $0x2e0] ss:$16 sps:$4 sm:$0xff]  }
  0x95   :  { %1371 = vmatprep.mubr.bf16.mxu1 %v5112_v31  ;;  %v5195_v31 = vld [vmem:[%s6694_s0 + $0x2e8] ss:$16 sps:$4 sm:$0xff]  }
  0x9b   :  { %1275 = vmatmul.mubr.bf16.gmra.mxu0 %v5114_v32  ;;  %v5202_v32 = vld [vmem:[%s6694_s0 + $0x304] ss:$16 sps:$4 sm:$0xff]  }
  0x9c   :  { %1372 = vmatmul.mubr.bf16.gmra.mxu1 %v5115_v33  ;;  %1939 = vmatprep.mubr.bf16.mxu0 %v5122_v34  ;;  %v5205_v33 = vld [vmem:[%s6694_s0 + $0x30c] ss:$16 sps:$4 sm:$0xff]   ;;  %v5200_v34 = vld [vmem:[%s6694_s0 + $0x300] ss:$16 sps:$4 sm:$0xff]  }
  0x9d   :  { %2036 = vmatprep.mubr.bf16.mxu1 %v5125_v35  ;;  %v5203_v35 = vld [vmem:[%s6694_s0 + $0x308] ss:$16 sps:$4 sm:$0xff]  }
  0xa3   :  { %1940 = vmatmul.mubr.bf16.vlgmr.msra.gmra.mxu0 %v5120_v36  ;;  %v5206_v36 = vld [vmem:[%s6694_s0 + $0x324] ss:$16 sps:$4 sm:$0xff]  }
  0xa4   :  { %2037 = vmatmul.mubr.bf16.vlgmr.msra.gmra.mxu1 %v5123_v37  ;;  %4801 = vmatpush3.bf16.msra.mxu0 %v5128_v38  ;;  %v5208_v37 = vld [vmem:[%s6694_s0 + $0x32c] ss:$16 sps:$4 sm:$0xff]  }
  0xa5   :  { %4865 = vmatpush3.bf16.msra.mxu1 %v5129_v39  ;;  %1947 = vmatprep.mubr.bf16.mxu0 %v5130_v40 }
  0xa6   :  { %2044 = vmatprep.mubr.bf16.mxu1 %v5132_v41  ;;  %4802 = vmatprep.subr.bf16.mxu0 %v5136_v42 }
  0xa7   :  { %4866 = vmatprep.subr.bf16.mxu1 %v5137_v43 }
  0xa8   :  { %4803 = vmatpush3.bf16.msra.mxu0 %v5138_v44 }
  0xa9   :  { %4867 = vmatpush3.bf16.msra.mxu1 %v5139_v45  ;;  %4804 = vmatprep.subr.bf16.mxu0 %v5146_v47  ;;  %v5210_v45 = vld [vmem:[%s6694_s0 + $0x320] ss:$16 sps:$4 sm:$0xff]   ;;  %v5211_v47 = vld [vmem:[%s6694_s0 + $0x328] ss:$16 sps:$4 sm:$0xff]  }
  0xaa   :  { %4868 = vmatprep.subr.bf16.mxu1 %v5147_v50 }
  0xab   :  { %1948 = vmatmul.mubr.bf16.gmra.mxu0 %v5134_v46 }
  0xac   :  { %2045 = vmatmul.mubr.bf16.gmra.mxu1 %v5135_v48  ;;  %1955 = vmatprep.mubr.bf16.mxu0 %v5140_v49  ;;  %v5212_v48 = vld [vmem:[%s6694_s0 + $0x344] ss:$16 sps:$4 sm:$0xff]  }
  0xad   :  { %2052 = vmatprep.mubr.bf16.mxu1 %v5142_v51  ;;  %4805 = vmatpush3.bf16.msra.mxu0 %v5148_v52  ;;  %v5214_v51 = vld [vmem:[%s6694_s0 + $0x34c] ss:$16 sps:$4 sm:$0xff]  }
  0xae   :  { %4869 = vmatpush3.bf16.msra.mxu1 %v5149_v53  ;;  %4806 = vmatprep.subr.bf16.mxu0 %v5156_v54 }
  0xaf   :  { %4870 = vmatprep.subr.bf16.mxu1 %v5157_v55 }
  0xb1   :  { %4807 = vmatpush3.bf16.msra.mxu0 %v5158_v57 }
  0xb2   :  { %4871 = vmatpush3.bf16.msra.mxu1 %v5159_v58  ;;  %4808 = vmatprep.subr.bf16.mxu0 %v5166_v61 }
  0xb3   :  { %1956 = vmatmul.mubr.bf16.gmra.mxu0 %v5144_v56  ;;  %4872 = vmatprep.subr.bf16.mxu1 %v5167_v63  ;;  %v5216_v63 = vld [vmem:[%s6694_s0 + $0x340] ss:$16 sps:$4 sm:$0xff]  }
  0xb4   :  { %2053 = vmatmul.mubr.bf16.gmra.mxu1 %v5145_v59  ;;  %1963 = vmatprep.mubr.bf16.mxu0 %v5150_v60 }
  0xb5   :  { %2060 = vmatprep.mubr.bf16.mxu1 %v5152_v62  ;;  %4809 = vmatpush3.bf16.msra.mxu0 %v5168_v0 }
  0xb6   :  { %4873 = vmatpush3.bf16.msra.mxu1 %v5169_v1  ;;  %4810 = vmatprep.subr.bf16.mxu0 %v5176_v2  ;;  %v5217_v1 = vld [vmem:[%s6694_s0 + $0x348] ss:$16 sps:$4 sm:$0xff]   ;;  %v5218_v2 = vld [vmem:[%s6694_s0 + $0x364] ss:$16 sps:$4 sm:$0xff]  }
  0xb7   :  { %4874 = vmatprep.subr.bf16.mxu1 %v5177_v3 }
  0xb9   :  { %4811 = vmatpush3.bf16.msra.mxu0 %v5178_v4 }
  0xba   :  { %4875 = vmatpush3.bf16.msra.mxu1 %v5179_v6  ;;  %4812 = vmatprep.subr.bf16.mxu0 %v5186_v9 }
  0xbb   :  { %1964 = vmatmul.mubr.bf16.gmra.mxu0 %v5154_v5  ;;  %4876 = vmatprep.subr.bf16.mxu1 %v5187_v10  ;;  %v5220_v5 = vld [vmem:[%s6694_s0 + $0x36c] ss:$16 sps:$4 sm:$0xff]  }
  0xbc   :  { %2061 = vmatmul.mubr.bf16.gmra.mxu1 %v5155_v7  ;;  %1971 = vmatprep.mubr.bf16.mxu0 %v5160_v8 }
  0xbd   :  { %2068 = vmatprep.mubr.bf16.mxu1 %v5162_v11  ;;  %4813 = vmatpush3.bf16.msra.mxu0 %v5188_v12 }
  0xbe   :  { %4877 = vmatpush3.bf16.msra.mxu1 %v5189_v13  ;;  %4814 = vmatprep.subr.bf16.mxu0 %v5196_v14 }
  0xbf   :  { %4878 = vmatprep.subr.bf16.mxu1 %v5197_v15 }
  0xc1   :  { %4815 = vmatpush3.bf16.msra.mxu0 %v5198_v17  ;;  %v5222_v17 = vld [vmem:[%s6694_s0 + $0x360] ss:$16 sps:$4 sm:$0xff]  }
  0xc2   :  { %4879 = vmatpush3.bf16.msra.mxu1 %v5199_v18 }
  0xc3   :  { %1972 = vmatmul.mubr.bf16.gmra.mxu0 %v5164_v16 }
  0xc4   :  { %2069 = vmatmul.mubr.bf16.gmra.mxu1 %v5165_v19  ;;  %1979 = vmatprep.mubr.bf16.mxu0 %v5170_v20  ;;  %v5223_v19 = vld [vmem:[%s6694_s0 + $0x368] ss:$16 sps:$4 sm:$0xff]   ;;  %v5226_v20 = vld [vmem:[%s6694_s0 + $0x384] ss:$16 sps:$4 sm:$0xff]  }
  0xc5   :  { %2076 = vmatprep.mubr.bf16.mxu1 %v5172_v21 }
  0xcb   :  { %1980 = vmatmul.mubr.bf16.gmra.mxu0 %v5174_v22 }
  0xcc   :  { %2077 = vmatmul.mubr.bf16.gmra.mxu1 %v5175_v23  ;;  %1987 = vmatprep.mubr.bf16.mxu0 %v5180_v24  ;;  %v5229_v23 = vld [vmem:[%s6694_s0 + $0x38c] ss:$16 sps:$4 sm:$0xff]  }
  0xcd   :  { %2084 = vmatprep.mubr.bf16.mxu1 %v5182_v25 }
  0xd3   :  { %1988 = vmatmul.mubr.bf16.gmra.mxu0 %v5184_v26 }
  0xd4   :  { %2085 = vmatmul.mubr.bf16.gmra.mxu1 %v5185_v27  ;;  %1995 = vmatprep.mubr.bf16.mxu0 %v5190_v28 }
  0xd5   :  { %2092 = vmatprep.mubr.bf16.mxu1 %v5192_v29 }
  0xdb   :  { %1996 = vmatmul.mubr.bf16.gmra.mxu0 %v5194_v30 }
  0xdc   :  { %2093 = vmatmul.mubr.bf16.gmra.mxu1 %v5195_v31  ;;  %2660 = vmatprep.mubr.bf16.mxu0 %v5202_v32 }
  0xdd   :  { %2757 = vmatprep.mubr.bf16.mxu1 %v5205_v33 }
  0xe3   :  { %v4432_v38 = vpop.f32.mrf.mxu0  ;;  %2661 = vmatmul.mubr.bf16.vlgmr.msra.gmra.mxu0 %v5200_v34 }
  0xe4   :  { %v4496_v39 = vpop.f32.mrf.mxu1  ;;  %2758 = vmatmul.mubr.bf16.vlgmr.msra.gmra.mxu1 %v5203_v35  ;;  %2668 = vmatprep.mubr.bf16.mxu0 %v5206_v36 }
  0xe5   :  { %v4433_v40 = vpop.f32.mrf.mxu0  ;;  %2765 = vmatprep.mubr.bf16.mxu1 %v5208_v37 }
  0xe6   :  { %v4434_v41 = vadd.f32 %v4433_v40, %v4432_v38  ;;  %v4497_v42 = vpop.f32.mrf.mxu1 }
  0xe7   :  { %v4498_v43 = vadd.f32 %v4497_v42, %v4496_v39  ;;  %v4435_v44 = vpop.f32.mrf.mxu0  ;;  %v5224_v42 = vld [vmem:[%s6694_s0 + $0x380] ss:$16 sps:$4 sm:$0xff]  }
  0xe8   :  { %v4499_v46 = vpop.f32.mrf.mxu1 }
  0xe9   :  { %v5974_v49 = vadd.f32 %v4498_v43, %v4434_v41  ;;  %v4436_v50 = vpop.f32.mrf.mxu0 }
  0xea   :  { %v4437_v52 = vadd.f32 %v4436_v50, %v4435_v44  ;;  %v4500_v53 = vpop.f32.mrf.mxu1  ;;  %v5227_v44 = vld [vmem:[%s6694_s0 + $0x388] ss:$16 sps:$4 sm:$0xff]  }
  0xeb   :  { %v4501_v54 = vadd.f32 %v4500_v53, %v4499_v46  ;;  %v4438_v55 = vpop.f32.mrf.mxu0  ;;  %2669 = vmatmul.mubr.bf16.gmra.mxu0 %v5210_v45  ;;  %v698_v30 = vmul.f32 %v5974_v49, %v5974_v49  ;;  %v5232_v45 = vld [vmem:[%s6694_s0 + $0x3a4] ss:$16 sps:$4 sm:$0xff]  }
  0xec   :  { %v4502_v56 = vpop.f32.mrf.mxu1  ;;  %2766 = vmatmul.mubr.bf16.gmra.mxu1 %v5211_v47  ;;  %2676 = vmatprep.mubr.bf16.mxu0 %v5212_v48 }
  0xed   :  { %v5979_v57 = vadd.f32 %v4501_v54, %v4437_v52  ;;  %v4439_v58 = vpop.f32.mrf.mxu0  ;;  %2773 = vmatprep.mubr.bf16.mxu1 %v5214_v51  ;;  %v5235_v52 = vld [vmem:[%s6694_s0 + $0x3ac] ss:$16 sps:$4 sm:$0xff]  }
  0xee   :  { %v4440_v59 = vadd.f32 %v4439_v58, %v4438_v55  ;;  %v4503_v60 = vpop.f32.mrf.mxu1 }
  0xef   :  { %v4504_v61 = vadd.f32 %v4503_v60, %v4502_v56  ;;  %v4441_v62 = vpop.f32.mrf.mxu0  ;;  %v699_v26 = vmul.f32 %v5979_v57, %v5979_v57  ;;  %v676_v31 = vadd.f32 %v5979_v57, %v5974_v49 }
  0xf0   :  { %v4505_v0 = vpop.f32.mrf.mxu1 }
  0xf1   :  { %v5990_v3 = vadd.f32 %v4504_v61, %v4440_v59  ;;  %v4442_v4 = vpop.f32.mrf.mxu0  ;;  %v714_v37 = vadd.f32 %v699_v26, %v698_v30 }
  0xf2   :  { %v4443_v6 = vadd.f32 %v4442_v4, %v4441_v62  ;;  %v4506_v7 = vpop.f32.mrf.mxu1 }
  0xf3   :  { %v4507_v8 = vadd.f32 %v4506_v7, %v4505_v0  ;;  %v4444_v9 = vpop.f32.mrf.mxu0  ;;  %2677 = vmatmul.mubr.bf16.gmra.mxu0 %v5216_v63  ;;  %v700_v32 = vmul.f32 %v5990_v3, %v5990_v3  ;;  %v677_v38 = vadd.f32 %v676_v31, %v5990_v3 }
  0xf4   :  { %v4508_v10 = vpop.f32.mrf.mxu1  ;;  %2774 = vmatmul.mubr.bf16.gmra.mxu1 %v5217_v1  ;;  %2684 = vmatprep.mubr.bf16.mxu0 %v5218_v2 }
  0xf5   :  { %v5995_v11 = vadd.f32 %v4507_v8, %v4443_v6  ;;  %v4445_v12 = vpop.f32.mrf.mxu0  ;;  %2781 = vmatprep.mubr.bf16.mxu1 %v5220_v5  ;;  %v715_v46 = vadd.f32 %v714_v37, %v700_v32 }
  0xf6   :  { %v4446_v13 = vadd.f32 %v4445_v12, %v4444_v9  ;;  %v4509_v14 = vpop.f32.mrf.mxu1  ;;  %v5230_v12 = vld [vmem:[%s6694_s0 + $0x3a0] ss:$16 sps:$4 sm:$0xff]  }
  0xf7   :  { %v4510_v15 = vadd.f32 %v4509_v14, %v4508_v10  ;;  %v4447_v16 = vpop.f32.mrf.mxu0  ;;  %v701_v39 = vmul.f32 %v5995_v11, %v5995_v11  ;;  %v678_v47 = vadd.f32 %v677_v38, %v5995_v11  ;;  %v5233_v14 = vld [vmem:[%s6694_s0 + $0x3a8] ss:$16 sps:$4 sm:$0xff]  }
  0xf8   :  { %v4511_v18 = vpop.f32.mrf.mxu1 }
  0xf9   :  { %v6006_v21 = vadd.f32 %v4510_v15, %v4446_v13  ;;  %v4448_v22 = vpop.f32.mrf.mxu0  ;;  %v716_v55 = vadd.f32 %v715_v46, %v701_v39  ;;  %v5238_v15 = vld [vmem:[%s6694_s0 + $0x3c4] ss:$16 sps:$4 sm:$0xff]  }
  0xfa   :  { %v4449_v24 = vadd.f32 %v4448_v22, %v4447_v16  ;;  %v4512_v25 = vpop.f32.mrf.mxu1 }
  0xfb   :  { %6738 = vst [vmem:[#allocation3_spill] sm:$0xff] %v6006_v21  ;;  %v4513_v27 = vadd.f32 %v4512_v25, %v4511_v18  ;;  %v4450_v28 = vpop.f32.mrf.mxu0  ;;  %2685 = vmatmul.mubr.bf16.gmra.mxu0 %v5222_v17  ;;  %v702_v48 = vmul.f32 %v6006_v21, %v6006_v21  ;;  %v679_v56 = vadd.f32 %v678_v47, %v6006_v21  ;;  %v5247_v47 = vld [vmem:[%s6694_s0 + $0x3ec] ss:$16 sps:$4 sm:$0xff]  }
  0xfc   :  { %v4514_v29 = vpop.f32.mrf.mxu1  ;;  %2782 = vmatmul.mubr.bf16.gmra.mxu1 %v5223_v19  ;;  %2692 = vmatprep.mubr.bf16.mxu0 %v5226_v20  ;;  %v5241_v20 = vld [vmem:[%s6694_s0 + $0x3cc] ss:$16 sps:$4 sm:$0xff]  }
  0xfd   :  { %v6019_v33 = vadd.f32 %v4513_v27, %v4449_v24  ;;  %v4451_v34 = vpop.f32.mrf.mxu0  ;;  %2789 = vmatprep.mubr.bf16.mxu1 %v5229_v23  ;;  %v717_v62 = vadd.f32 %v716_v55, %v702_v48 }
  0xfe   :  { %v4452_v35 = vadd.f32 %v4451_v34, %v4450_v28  ;;  %v4515_v36 = vpop.f32.mrf.mxu1 }
  0xff   :  { %6739 = vst [vmem:[#allocation4_spill] sm:$0xff] %v6019_v33  ;;  %v4516_v40 = vadd.f32 %v4515_v36, %v4514_v29  ;;  %v4453_v41 = vpop.f32.mrf.mxu0  ;;  %v703_v58 = vmul.f32 %v6019_v33, %v6019_v33  ;;  %v680_v63 = vadd.f32 %v679_v56, %v6019_v33 }
 0x100   :  { %v4517_v43 = vpop.f32.mrf.mxu1 }
 0x101   :  { %v6036_v50 = vadd.f32 %v4516_v40, %v4452_v35  ;;  %v4454_v51 = vpop.f32.mrf.mxu0  ;;  %v718_v6 = vadd.f32 %v717_v62, %v703_v58  ;;  %v5236_v40 = vld [vmem:[%s6694_s0 + $0x3c0] ss:$16 sps:$4 sm:$0xff]  }
 0x102   :  { %v4455_v53 = vadd.f32 %v4454_v51, %v4453_v41  ;;  %v4518_v54 = vpop.f32.mrf.mxu1 }
 0x103   :  { %6740 = vst [vmem:[#allocation5_spill] sm:$0xff] %v6036_v50  ;;  %v4519_v59 = vadd.f32 %v4518_v54, %v4517_v43  ;;  %v4456_v60 = vpop.f32.mrf.mxu0  ;;  %2693 = vmatmul.mubr.bf16.gmra.mxu0 %v5224_v42  ;;  %v704_v0 = vmul.f32 %v6036_v50, %v6036_v50  ;;  %v681_v7 = vadd.f32 %v680_v63, %v6036_v50  ;;  %v5239_v42 = vld [vmem:[%s6694_s0 + $0x3c8] ss:$16 sps:$4 sm:$0xff]   ;;  %v5244_v43 = vld [vmem:[%s6694_s0 + $0x3e4] ss:$16 sps:$4 sm:$0xff]  }
 0x104   :  { %v4520_v61 = vpop.f32.mrf.mxu1  ;;  %2790 = vmatmul.mubr.bf16.gmra.mxu1 %v5227_v44  ;;  %2700 = vmatprep.mubr.bf16.mxu0 %v5232_v45 }
 0x105   :  { %v6047_v1 = vadd.f32 %v4519_v59, %v4455_v53  ;;  %v4457_v2 = vpop.f32.mrf.mxu0  ;;  %2797 = vmatprep.mubr.bf16.mxu1 %v5235_v52  ;;  %v719_v16 = vadd.f32 %v718_v6, %v704_v0 }
 0x106   :  { %v4458_v4 = vadd.f32 %v4457_v2, %v4456_v60  ;;  %v4521_v5 = vpop.f32.mrf.mxu1 }
 0x107   :  { %6741 = vst [vmem:[#allocation6_spill] sm:$0xff] %v6047_v1  ;;  %v705_v8 = vmul.f32 %v6047_v1, %v6047_v1  ;;  %v4522_v9 = vadd.f32 %v4521_v5, %v4520_v61  ;;  %v4459_v10 = vpop.f32.mrf.mxu0  ;;  %v682_v17 = vadd.f32 %v681_v7, %v6047_v1  ;;  %v5242_v5 = vld [vmem:[%s6694_s0 + $0x3e0] ss:$16 sps:$4 sm:$0xff]   ;;  %v5245_v7 = vld [vmem:[%s6694_s0 + $0x3e8] ss:$16 sps:$4 sm:$0xff]  }
 0x108   :  { %v4523_v13 = vpop.f32.mrf.mxu1 }
 0x109   :  { %v6062_v18 = vadd.f32 %v4522_v9, %v4458_v4  ;;  %v4460_v19 = vpop.f32.mrf.mxu0  ;;  %v720_v24 = vadd.f32 %v719_v16, %v705_v8 }
 0x10a   :  { %v4461_v22 = vadd.f32 %v4460_v19, %v4459_v10  ;;  %v4524_v23 = vpop.f32.mrf.mxu1 }
 0x10b   :  { %6742 = vst [vmem:[#allocation7_spill] sm:$0xff] %v6062_v18  ;;  %v683_v25 = vadd.f32 %v682_v17, %v6062_v18  ;;  %v706_v26 = vmul.f32 %v6062_v18, %v6062_v18  ;;  %v4525_v27 = vadd.f32 %v4524_v23, %v4523_v13  ;;  %v4462_v28 = vpop.f32.mrf.mxu0  ;;  %2701 = vmatmul.mubr.bf16.gmra.mxu0 %v5230_v12 }
 0x10c   :  { %v4526_v29 = vpop.f32.mrf.mxu1  ;;  %2798 = vmatmul.mubr.bf16.gmra.mxu1 %v5233_v14  ;;  %2708 = vmatprep.mubr.bf16.mxu0 %v5238_v15 }
 0x10d   :  { %v721_v30 = vadd.f32 %v720_v24, %v706_v26  ;;  %v6070_v31 = vadd.f32 %v4525_v27, %v4461_v22  ;;  %v4463_v32 = vpop.f32.mrf.mxu0  ;;  %2805 = vmatprep.mubr.bf16.mxu1 %v5241_v20 }
 0x10e   :  { %v4464_v34 = vadd.f32 %v4463_v32, %v4462_v28  ;;  %v4527_v35 = vpop.f32.mrf.mxu1 }
 0x10f   :  { %6743 = vst [vmem:[#allocation8_spill] sm:$0xff] %v6070_v31  ;;  %v684_v36 = vadd.f32 %v683_v25, %v6070_v31  ;;  %v707_v37 = vmul.f32 %v6070_v31, %v6070_v31  ;;  %v4528_v38 = vadd.f32 %v4527_v35, %v4526_v29  ;;  %v4465_v39 = vpop.f32.mrf.mxu0 }
 0x110   :  { %v4529_v41 = vpop.f32.mrf.mxu1 }
 0x111   :  { %v722_v44 = vadd.f32 %v721_v30, %v707_v37  ;;  %v6084_v45 = vadd.f32 %v4528_v38, %v4464_v34  ;;  %v4466_v46 = vpop.f32.mrf.mxu0 }
 0x112   :  { %v4467_v48 = vadd.f32 %v4466_v46, %v4465_v39  ;;  %v4530_v51 = vpop.f32.mrf.mxu1 }
 0x113   :  { %6744 = vst [vmem:[#allocation9_spill] sm:$0xff] %v6084_v45  ;;  %v685_v52 = vadd.f32 %v684_v36, %v6084_v45  ;;  %v708_v53 = vmul.f32 %v6084_v45, %v6084_v45  ;;  %v4531_v54 = vadd.f32 %v4530_v51, %v4529_v41  ;;  %v4468_v55 = vpop.f32.mrf.mxu0  ;;  %2709 = vmatmul.mubr.bf16.gmra.mxu0 %v5236_v40 }
 0x114   :  { %v4532_v56 = vpop.f32.mrf.mxu1  ;;  %2806 = vmatmul.mubr.bf16.gmra.mxu1 %v5239_v42  ;;  %2716 = vmatprep.mubr.bf16.mxu0 %v5244_v43 }
 0x115   :  { %v723_v58 = vadd.f32 %v722_v44, %v708_v53  ;;  %v6092_v59 = vadd.f32 %v4531_v54, %v4467_v48  ;;  %v4469_v60 = vpop.f32.mrf.mxu0  ;;  %2813 = vmatprep.mubr.bf16.mxu1 %v5247_v47 }
 0x116   :  { %v4470_v61 = vadd.f32 %v4469_v60, %v4468_v55  ;;  %v4533_v62 = vpop.f32.mrf.mxu1 }
 0x117   :  { %6745 = vst [vmem:[#allocation10_spill] sm:$0xff] %v6092_v59  ;;  %v686_v63 = vadd.f32 %v685_v52, %v6092_v59  ;;  %v709_v0 = vmul.f32 %v6092_v59, %v6092_v59  ;;  %v4534_v2 = vadd.f32 %v4533_v62, %v4532_v56  ;;  %v4471_v4 = vpop.f32.mrf.mxu0 }
 0x118   :  { %v4535_v6 = vpop.f32.mrf.mxu1 }
 0x119   :  { %v724_v8 = vadd.f32 %v723_v58, %v709_v0  ;;  %v6103_v9 = vadd.f32 %v4534_v2, %v4470_v61  ;;  %v4472_v10 = vpop.f32.mrf.mxu0 }
 0x11a   :  { %v4473_v12 = vadd.f32 %v4472_v10, %v4471_v4  ;;  %v4536_v13 = vpop.f32.mrf.mxu1 }
 0x11b   :  { %6746 = vst [vmem:[#allocation11_spill] sm:$0xff] %v6103_v9  ;;  %v687_v14 = vadd.f32 %v686_v63, %v6103_v9  ;;  %v710_v15 = vmul.f32 %v6103_v9, %v6103_v9  ;;  %v4537_v16 = vadd.f32 %v4536_v13, %v4535_v6  ;;  %v4474_v17 = vpop.f32.mrf.mxu0  ;;  %2717 = vmatmul.mubr.bf16.gmra.mxu0 %v5242_v5 }
 0x11c   :  { %v4538_v19 = vpop.f32.mrf.mxu1  ;;  %2814 = vmatmul.mubr.bf16.gmra.mxu1 %v5245_v7 }
 0x11d   :  { %v725_v20 = vadd.f32 %v724_v8, %v710_v15  ;;  %v6108_v22 = vadd.f32 %v4537_v16, %v4473_v12  ;;  %v4475_v23 = vpop.f32.mrf.mxu0 }
 0x11e   :  { %v4476_v24 = vadd.f32 %v4475_v23, %v4474_v17  ;;  %v4539_v25 = vpop.f32.mrf.mxu1 }
 0x11f   :  { %6747 = vst [vmem:[#allocation12_spill] sm:$0xff] %v6108_v22  ;;  %v688_v26 = vadd.f32 %v687_v14, %v6108_v22  ;;  %v711_v27 = vmul.f32 %v6108_v22, %v6108_v22  ;;  %v4540_v28 = vadd.f32 %v4539_v25, %v4538_v19  ;;  %v4477_v29 = vpop.f32.mrf.mxu0 }
 0x120   :  { %v4541_v30 = vpop.f32.mrf.mxu1 }
 0x121   :  { %v726_v32 = vadd.f32 %v725_v20, %v711_v27  ;;  %v6113_v34 = vadd.f32 %v4540_v28, %v4476_v24  ;;  %v4478_v35 = vpop.f32.mrf.mxu0 }
 0x122   :  { %v4479_v36 = vadd.f32 %v4478_v35, %v4477_v29  ;;  %v4542_v37 = vpop.f32.mrf.mxu1 }
 0x123   :  { %6748 = vst [vmem:[#allocation13_spill] sm:$0xff] %v6113_v34  ;;  %v689_v38 = vadd.f32 %v688_v26, %v6113_v34  ;;  %v712_v39 = vmul.f32 %v6113_v34, %v6113_v34  ;;  %v4543_v40 = vadd.f32 %v4542_v37, %v4541_v30  ;;  %v4560_v41 = vpop.f32.mrf.mxu0 }
 0x124   :  { %v4624_v42 = vpop.f32.mrf.mxu1 }
 0x125   :  { %v727_v43 = vadd.f32 %v726_v32, %v712_v39  ;;  %v6118_v44 = vadd.f32 %v4543_v40, %v4479_v36  ;;  %v4561_v46 = vpop.f32.mrf.mxu0 }
 0x126   :  { %v4562_v47 = vadd.f32 %v4561_v46, %v4560_v41  ;;  %v4625_v48 = vpop.f32.mrf.mxu1 }
 0x127   :  { %6749 = vst [vmem:[#allocation14_spill] sm:$0xff] %v6118_v44  ;;  %v6121_v51 = vadd.f32 %v689_v38, %v6118_v44  ;;  %v713_v52 = vmul.f32 %v6118_v44, %v6118_v44  ;;  %v4626_v53 = vadd.f32 %v4625_v48, %v4624_v42  ;;  %v4563_v54 = vpop.f32.mrf.mxu0 }
 0x128   :  { %v4627_v55 = vpop.f32.mrf.mxu1 }
 0x129   :  { %v6125_v56 = vadd.f32 %v727_v43, %v713_v52  ;;  %v6127_v58 = vadd.f32 %v4626_v53, %v4562_v47  ;;  %v4564_v60 = vpop.f32.mrf.mxu0 }
 0x12a   :  { %v4565_v61 = vadd.f32 %v4564_v60, %v4563_v54  ;;  %v4628_v62 = vpop.f32.mrf.mxu1 }
 0x12b   :  { %6750 = vst [vmem:[#allocation15_spill] sm:$0xff] %v6127_v58  ;;  %v4629_v63 = vadd.f32 %v4628_v62, %v4627_v55  ;;  %v4566_v0 = vpop.f32.mrf.mxu0 }
 0x12c   :  { %v4630_v2 = vpop.f32.mrf.mxu1 }
 0x12d   :  { %v6129_v4 = vadd.f32 %v4629_v63, %v4565_v61  ;;  %v4567_v5 = vpop.f32.mrf.mxu0 }
 0x12e   :  { %v4568_v6 = vadd.f32 %v4567_v5, %v4566_v0  ;;  %v4631_v7 = vpop.f32.mrf.mxu1 }
 0x12f   :  { %6751 = vst [vmem:[#allocation16_spill] sm:$0xff] %v6129_v4  ;;  %v4569_v8 = vpop.f32.mrf.mxu0  ;;  %v4632_v10 = vadd.f32 %v4631_v7, %v4630_v2 }
 0x130   :  { %v4633_v12 = vpop.f32.mrf.mxu1 }
 0x131   :  { %v4570_v13 = vpop.f32.mrf.mxu0  ;;  %v6131_v14 = vadd.f32 %v4632_v10, %v4568_v6  ;;  %v1420_v10 = vmul.f32 %v6129_v4, %v6129_v4 }
 0x132   :  { %v4571_v15 = vadd.f32 %v4570_v13, %v4569_v8  ;;  %v4634_v16 = vpop.f32.mrf.mxu1 }
 0x133   :  { %6752 = vst [vmem:[#allocation17_spill] sm:$0xff] %v6131_v14  ;;  %v4635_v17 = vadd.f32 %v4634_v16, %v4633_v12  ;;  %v4572_v19 = vpop.f32.mrf.mxu0 }
 0x134   :  { %v4636_v20 = vpop.f32.mrf.mxu1 }
 0x135   :  { %v6133_v23 = vadd.f32 %v4635_v17, %v4571_v15  ;;  %v4573_v24 = vpop.f32.mrf.mxu0  ;;  %v1419_v17 = vmul.f32 %v6127_v58, %v6127_v58 }
 0x136   :  { %v4574_v25 = vadd.f32 %v4573_v24, %v4572_v19  ;;  %v4637_v26 = vpop.f32.mrf.mxu1  ;;  %v1397_v19 = vadd.f32 %v6129_v4, %v6127_v58 }
 0x137   :  { %6753 = vst [vmem:[#allocation18_spill] sm:$0xff] %v6133_v23  ;;  %v4638_v27 = vadd.f32 %v4637_v26, %v4636_v20  ;;  %v4575_v28 = vpop.f32.mrf.mxu0  ;;  %v1421_v20 = vmul.f32 %v6131_v14, %v6131_v14 }
 0x138   :  { %v4639_v29 = vpop.f32.mrf.mxu1 }
 0x139   :  { %v6135_v30 = vadd.f32 %v4638_v27, %v4574_v25  ;;  %v4576_v32 = vpop.f32.mrf.mxu0  ;;  %v1435_v27 = vadd.f32 %v1420_v10, %v1419_v17 }
 0x13a   :  { %v4577_v35 = vadd.f32 %v4576_v32, %v4575_v28  ;;  %v4640_v36 = vpop.f32.mrf.mxu1  ;;  %v1398_v28 = vadd.f32 %v1397_v19, %v6131_v14 }
 0x13b   :  { %6754 = vst [vmem:[#allocation19_spill] sm:$0xff] %v6135_v30  ;;  %v4641_v37 = vadd.f32 %v4640_v36, %v4639_v29  ;;  %v4578_v38 = vpop.f32.mrf.mxu0  ;;  %v1422_v29 = vmul.f32 %v6133_v23, %v6133_v23 }
 0x13c   :  { %v4642_v39 = vpop.f32.mrf.mxu1 }
 0x13d   :  { %v6137_v40 = vadd.f32 %v4641_v37, %v4577_v35  ;;  %v4579_v41 = vpop.f32.mrf.mxu0 }
 0x13e   :  { %v4580_v42 = vadd.f32 %v4579_v41, %v4578_v38  ;;  %v4643_v43 = vpop.f32.mrf.mxu1  ;;  %v1436_v38 = vadd.f32 %v1435_v27, %v1421_v20  ;;  %v1423_v41 = vmul.f32 %v6135_v30, %v6135_v30 }
 0x13f   :  { %6755 = vst [vmem:[#allocation20_spill] sm:$0xff] %v6137_v40  ;;  %v4644_v46 = vadd.f32 %v4643_v43, %v4642_v39  ;;  %v4581_v47 = vpop.f32.mrf.mxu0  ;;  %v1399_v39 = vadd.f32 %v1398_v28, %v6133_v23 }
 0x140   :  { %v4645_v48 = vpop.f32.mrf.mxu1 }
 0x141   :  { %v6139_v52 = vadd.f32 %v4644_v46, %v4580_v42  ;;  %v4582_v53 = vpop.f32.mrf.mxu0 }
 0x142   :  { %v4583_v54 = vadd.f32 %v4582_v53, %v4581_v47  ;;  %v4646_v55 = vpop.f32.mrf.mxu1  ;;  %v1437_v47 = vadd.f32 %v1436_v38, %v1422_v29  ;;  %v1424_v53 = vmul.f32 %v6137_v40, %v6137_v40 }
 0x143   :  { %6756 = vst [vmem:[#allocation21_spill] sm:$0xff] %v6139_v52  ;;  %v4647_v60 = vadd.f32 %v4646_v55, %v4645_v48  ;;  %v4584_v61 = vpop.f32.mrf.mxu0  ;;  %v1400_v48 = vadd.f32 %v1399_v39, %v6135_v30 }
 0x144   :  { %v4648_v62 = vpop.f32.mrf.mxu1 }
 0x145   :  { %v6141_v63 = vadd.f32 %v4647_v60, %v4583_v54  ;;  %v4585_v0 = vpop.f32.mrf.mxu0 }
 0x146   :  { %v4586_v2 = vadd.f32 %v4585_v0, %v4584_v61  ;;  %v4649_v5 = vpop.f32.mrf.mxu1  ;;  %v1401_v0 = vadd.f32 %v1400_v48, %v6137_v40 }
 0x147   :  { %6757 = vst [vmem:[#allocation22_spill] sm:$0xff] %v6141_v63  ;;  %v4650_v6 = vadd.f32 %v4649_v5, %v4648_v62  ;;  %v4587_v7 = vpop.f32.mrf.mxu0  ;;  %v1438_v62 = vadd.f32 %v1437_v47, %v1423_v41 }
 0x148   :  { %v4651_v8 = vpop.f32.mrf.mxu1  ;;  %v1402_v10 = vadd.f32 %v1401_v0, %v6139_v52 }
 0x149   :  { %v6145_v12 = vadd.f32 %v4650_v6, %v4586_v2  ;;  %v4588_v13 = vpop.f32.mrf.mxu0  ;;  %v1425_v2 = vmul.f32 %v6139_v52, %v6139_v52 }
 0x14a   :  { %v4589_v15 = vadd.f32 %v4588_v13, %v4587_v7  ;;  %v4652_v16 = vpop.f32.mrf.mxu1  ;;  %v1426_v13 = vmul.f32 %v6141_v63, %v6141_v63 }
 0x14b   :  { %6758 = vst [vmem:[#allocation23_spill] sm:$0xff] %v6145_v12  ;;  %v4653_v24 = vadd.f32 %v4652_v16, %v4651_v8  ;;  %v4590_v25 = vpop.f32.mrf.mxu0  ;;  %v1439_v8 = vadd.f32 %v1438_v62, %v1424_v53 }
 0x14c   :  { %v4654_v26 = vpop.f32.mrf.mxu1 }
 0x14d   :  { %v6156_v32 = vadd.f32 %v4653_v24, %v4589_v15  ;;  %v4591_v35 = vpop.f32.mrf.mxu0  ;;  %v1440_v20 = vadd.f32 %v1439_v8, %v1425_v2  ;;  %v1403_v24 = vadd.f32 %v1402_v10, %v6141_v63  ;;  %v691_v2 = vrot.slane %v6121_v51, 4 }
 0x14e   :  { %v4592_v36 = vadd.f32 %v4591_v35, %v4590_v25  ;;  %v4655_v37 = vpop.f32.mrf.mxu1  ;;  %v1427_v25 = vmul.f32 %v6145_v12, %v6145_v12 }
 0x14f   :  { %6759 = vst [vmem:[#allocation24_spill] sm:$0xff] %v6156_v32  ;;  %v4656_v42 = vadd.f32 %v4655_v37, %v4654_v26  ;;  %v4593_v43 = vpop.f32.mrf.mxu0  ;;  %v1441_v29 = vadd.f32 %v1440_v20, %v1426_v13  ;;  %v1404_v35 = vadd.f32 %v1403_v24, %v6145_v12 }
 0x150   :  { %v4657_v46 = vpop.f32.mrf.mxu1 }
 0x151   :  { %v6164_v54 = vadd.f32 %v4656_v42, %v4592_v36  ;;  %v4594_v55 = vpop.f32.mrf.mxu0  ;;  %v1428_v36 = vmul.f32 %v6156_v32, %v6156_v32  ;;  %v1442_v42 = vadd.f32 %v1441_v29, %v1427_v25 }
 0x152   :  { %v4595_v60 = vadd.f32 %v4594_v55, %v4593_v43  ;;  %v4658_v61 = vpop.f32.mrf.mxu1  ;;  %v1405_v43 = vadd.f32 %v1404_v35, %v6156_v32 }
 0x153   :  { %6760 = vst [vmem:[#allocation25_spill] sm:$0xff] %v6164_v54  ;;  %v4659_v5 = vadd.f32 %v4658_v61, %v4657_v46  ;;  %v4596_v6 = vpop.f32.mrf.mxu0  ;;  %v1429_v46 = vmul.f32 %v6164_v54, %v6164_v54  ;;  %v1443_v55 = vadd.f32 %v1442_v42, %v1428_v36 }
 0x154   :  { %v4660_v7 = vpop.f32.mrf.mxu1 }
 0x155   :  { %v6172_v15 = vadd.f32 %v4659_v5, %v4595_v60  ;;  %v4597_v16 = vpop.f32.mrf.mxu0  ;;  %v1406_v60 = vadd.f32 %v1405_v43, %v6164_v54 }
 0x156   :  { %v4598_v17 = vadd.f32 %v4597_v16, %v4596_v6  ;;  %v4661_v19 = vpop.f32.mrf.mxu1 }
 0x157   :  { %6761 = vst [vmem:[#allocation26_spill] sm:$0xff] %v6172_v15  ;;  %v4662_v26 = vadd.f32 %v4661_v19, %v4660_v7  ;;  %v4599_v27 = vpop.f32.mrf.mxu0  ;;  %v1430_v61 = vmul.f32 %v6172_v15, %v6172_v15  ;;  %v1444_v7 = vadd.f32 %v1443_v55, %v1429_v46  ;;  %v1407_v8 = vadd.f32 %v1406_v60, %v6172_v15 }
 0x158   :  { %v4663_v28 = vpop.f32.mrf.mxu1 }
 0x159   :  { %v6180_v37 = vadd.f32 %v4662_v26, %v4598_v17  ;;  %v4600_v38 = vpop.f32.mrf.mxu0  ;;  %v729_v17 = vrot.slane %v6125_v56, 4  ;;  %v1445_v20 = vadd.f32 %v1444_v7, %v1430_v61 }
 0x15a   :  { %v4601_v39 = vadd.f32 %v4600_v38, %v4599_v27  ;;  %v4664_v41 = vpop.f32.mrf.mxu1 }
 0x15b   :  { %6762 = vst [vmem:[#allocation27_spill] sm:$0xff] %v6180_v37  ;;  %v4665_v47 = vadd.f32 %v4664_v41, %v4663_v28  ;;  %v4602_v48 = vpop.f32.mrf.mxu0  ;;  %v1431_v10 = vmul.f32 %v6180_v37, %v6180_v37  ;;  %v1408_v24 = vadd.f32 %v1407_v8, %v6180_v37  ;;  %v692_v28 = vadd.f32 %v691_v2, %v6121_v51 }
 0x15c   :  { %v4666_v53 = vpop.f32.mrf.mxu1  ;;  %v730_v46 = vadd.f32 %v729_v17, %v6125_v56 }
 0x15d   :  { %v6188_v62 = vadd.f32 %v4665_v47, %v4601_v39  ;;  %v4603_v0 = vpop.f32.mrf.mxu0  ;;  %v1446_v36 = vadd.f32 %v1445_v20, %v1431_v10  ;;  %v693_v51 = vrot.slane %v692_v28, 2 }
 0x15e   :  { %v4604_v5 = vadd.f32 %v4603_v0, %v4602_v48  ;;  %v4667_v6 = vpop.f32.mrf.mxu1  ;;  %v731_v10 = vrot.slane %v730_v46, 2 }
 0x15f   :  { %6763 = vst [vmem:[#allocation28_spill] sm:$0xff] %v6188_v62  ;;  %v4668_v13 = vadd.f32 %v4667_v6, %v4666_v53  ;;  %v4605_v16 = vpop.f32.mrf.mxu0  ;;  %v1432_v25 = vmul.f32 %v6188_v62, %v6188_v62  ;;  %v1409_v38 = vadd.f32 %v1408_v24, %v6188_v62  ;;  %v694_v24 = vadd.f32 %v693_v51, %v692_v28 }
 0x160   :  { %v4669_v19 = vpop.f32.mrf.mxu1 }
 0x161   :  { %v6198_v26 = vadd.f32 %v4668_v13, %v4604_v5  ;;  %v4606_v27 = vpop.f32.mrf.mxu0  ;;  %v1447_v47 = vadd.f32 %v1446_v36, %v1432_v25 }
 0x162   :  { %v4607_v29 = vadd.f32 %v4606_v27, %v4605_v16  ;;  %v4670_v35 = vpop.f32.mrf.mxu1 }
 0x163   :  { %6764 = vst [vmem:[#allocation29_spill] sm:$0xff] %v6198_v26  ;;  %v1433_v39 = vmul.f32 %v6198_v26, %v6198_v26  ;;  %v4671_v41 = vadd.f32 %v4670_v35, %v4669_v19  ;;  %v4688_v42 = vpop.f32.mrf.mxu0  ;;  %v1410_v48 = vadd.f32 %v1409_v38, %v6198_v26  ;;  %v732_v38 = vadd.f32 %v731_v10, %v730_v46 }
 0x164   :  { %v4752_v43 = vpop.f32.mrf.mxu1 }
 0x165   :  { %v6206_v53 = vadd.f32 %v4671_v41, %v4607_v29  ;;  %v4689_v55 = vpop.f32.mrf.mxu0  ;;  %v1448_v0 = vadd.f32 %v1447_v47, %v1433_v39  ;;  %v733_v28 = vrot.slane %v732_v38, 1 }
 0x166   :  { %v4690_v60 = vadd.f32 %v4689_v55, %v4688_v42  ;;  %v4753_v61 = vpop.f32.mrf.mxu1  ;;  %v695_v55 = vrot.slane %v694_v24, 1 }
 0x167   :  { %6765 = vst [vmem:[#allocation30_spill] sm:$0xff] %v6206_v53  ;;  %v1411_v2 = vadd.f32 %v1410_v48, %v6206_v53  ;;  %v1434_v5 = vmul.f32 %v6206_v53, %v6206_v53  ;;  %v4754_v6 = vadd.f32 %v4753_v61, %v4752_v43  ;;  %v4691_v7 = vpop.f32.mrf.mxu0 }
 0x168   :  { %v4755_v8 = vpop.f32.mrf.mxu1 }
 0x169   :  { %v1412_v56 = vrot.slane %v1411_v2, 4  ;;  %v1449_v13 = vadd.f32 %v1448_v0, %v1434_v5  ;;  %v6211_v16 = vadd.f32 %v4754_v6, %v4690_v60  ;;  %v4692_v17 = vpop.f32.mrf.mxu0 }
 0x16a   :  { %v4693_v19 = vadd.f32 %v4692_v17, %v4691_v7  ;;  %v4756_v20 = vpop.f32.mrf.mxu1 }
 0x16b   :  { %6766 = vst [vmem:[#allocation31_spill] sm:$0xff] %v6211_v16  ;;  %v1413_v25 = vadd.f32 %v1412_v56, %v1411_v2  ;;  %v1450_v27 = vrot.slane %v1449_v13, 4  ;;  %v4757_v29 = vadd.f32 %v4756_v20, %v4755_v8  ;;  %v4694_v35 = vpop.f32.mrf.mxu0  ;;  %v696_v56 = vadd.f32 %v695_v55, %v694_v24 }
 0x16c   :  { %v4758_v36 = vpop.f32.mrf.mxu1 }
 0x16d   :  { %v1414_v39 = vrot.slane %v1413_v25, 2  ;;  %v1451_v41 = vadd.f32 %v1450_v27, %v1449_v13  ;;  %v6213_v42 = vadd.f32 %v4757_v29, %v4693_v19  ;;  %v4695_v43 = vpop.f32.mrf.mxu0  ;;  %v734_v29 = vadd.f32 %v733_v28, %v732_v38 }
 0x16e   :  { %v4696_v47 = vadd.f32 %v4695_v43, %v4694_v35  ;;  %v4759_v48 = vpop.f32.mrf.mxu1 }
 0x16f   :  { %6767 = vst [vmem:[#allocation32_spill] sm:$0xff] %v6213_v42  ;;  %v1415_v60 = vadd.f32 %v1414_v39, %v1413_v25  ;;  %v1452_v61 = vrot.slane %v1451_v41, 2  ;;  %v4697_v0 = vpop.f32.mrf.mxu0  ;;  %v4760_v5 = vadd.f32 %v4759_v48, %v4758_v36  ;;  %v2118_v40 = vadd.f32 %v6213_v42, %v6211_v16 }
 0x170   :  { %v4761_v6 = vpop.f32.mrf.mxu1 }
 0x171   :  { %v1416_v51 = vrot.slane %v1415_v60, 1  ;;  %v1453_v2 = vadd.f32 %v1452_v61, %v1451_v41  ;;  %v4698_v7 = vpop.f32.mrf.mxu0  ;;  %v6215_v8 = vadd.f32 %v4760_v5, %v4696_v47 }
 0x172   :  { %v4699_v46 = vadd.f32 %v4698_v7, %v4697_v0  ;;  %v4762_v10 = vpop.f32.mrf.mxu1 }
 0x173   :  { %6768 = vst [vmem:[#allocation33_spill] sm:$0xff] %v6215_v8  ;;  %v1417_v13 = vadd.f32 %v1416_v51, %v1415_v60  ;;  %v1454_v17 = vrot.slane %v1453_v2, 1  ;;  %v4763_v19 = vadd.f32 %v4762_v10, %v4761_v6  ;;  %v4700_v20 = vpop.f32.mrf.mxu0  ;;  %v2142_v12 = vmul.f32 %v6215_v8, %v6215_v8 }
 0x174   :  { %v4764_v27 = vpop.f32.mrf.mxu1  ;;  %v2119_v58 = vadd.f32 %v2118_v40, %v6215_v8 }
 0x175   :  { %v6217_v25 = vadd.f32 %v1417_v13, %v696_v56  ;;  %v1455_v35 = vadd.f32 %v1454_v17, %v1453_v2  ;;  %v6219_v36 = vadd.f32 %v4763_v19, %v4699_v46  ;;  %v4701_v39 = vpop.f32.mrf.mxu0 }
 0x176   :  { %v4702_v43 = vadd.f32 %v4701_v39, %v4700_v20  ;;  %v4765_v41 = vpop.f32.mrf.mxu1 }
 0x177   :  { %6769 = vst [vmem:[#allocation34_spill] sm:$0xff] %v6219_v36  ;;  %v6221_v48 = vadd.f32 %v1455_v35, %v734_v29  ;;  %v4766_v47 = vadd.f32 %v4765_v41, %v4764_v27  ;;  %v4703_v61 = vpop.f32.mrf.mxu0  ;;  %v2143_v23 = vmul.f32 %v6219_v36, %v6219_v36  ;;  %v2120_v59 = vadd.f32 %v2119_v58, %v6219_v36 }
 0x178   :  { %v4767_v0 = vpop.f32.mrf.mxu1 }
 0x179   :  { %v6223_v24 = vadd.f32 %v4766_v47, %v4702_v43  ;;  %v4704_v55 = vpop.f32.mrf.mxu0 }
 0x17a   :  { %v4705_v60 = vadd.f32 %v4704_v55, %v4703_v61  ;;  %v4768_v5 = vpop.f32.mrf.mxu1 }
 0x17b   :  { %6770 = vst [vmem:[#allocation35_spill] sm:$0xff] %v6223_v24  ;;  %v4769_v6 = vadd.f32 %v4768_v5, %v4767_v0  ;;  %v4706_v38 = vpop.f32.mrf.mxu0  ;;  %v2144_v34 = vmul.f32 %v6223_v24, %v6223_v24 }
 0x17c   :  { %v4770_v28 = vpop.f32.mrf.mxu1 }
 0x17d   :  { %v6225_v51 = vadd.f32 %v4769_v6, %v4705_v60  ;;  %v4707_v2 = vpop.f32.mrf.mxu0 }
 0x17e   :  { %v4708_v7 = vadd.f32 %v4707_v2, %v4706_v38  ;;  %v4771_v46 = vpop.f32.mrf.mxu1 }
 0x17f   :  { %v4772_v10 = vadd.f32 %v4771_v46, %v4770_v28  ;;  %v4709_v56 = vpop.f32.mrf.mxu0 }
 0x180   :  { %v4773_v13 = vpop.f32.mrf.mxu1 }
 0x181   :  { %v6227_v17 = vadd.f32 %v4772_v10, %v4708_v7  ;;  %v4710_v19 = vpop.f32.mrf.mxu0 }
 0x182   :  { %v4711_v20 = vadd.f32 %v4710_v19, %v4709_v56  ;;  %v4774_v27 = vpop.f32.mrf.mxu1 }
 0x183   :  { %v4775_v29 = vadd.f32 %v4774_v27, %v4773_v13  ;;  %v4712_v35 = vpop.f32.mrf.mxu0 }
 0x184   :  { %v4776_v39 = vpop.f32.mrf.mxu1 }
 0x185   :  { %v6229_v43 = vadd.f32 %v4775_v29, %v4711_v20  ;;  %v4713_v41 = vpop.f32.mrf.mxu0 }
 0x186   :  { %v4714_v47 = vadd.f32 %v4713_v41, %v4712_v35  ;;  %v4777_v61 = vpop.f32.mrf.mxu1 }
 0x187   :  { %v4778_v0 = vadd.f32 %v4777_v61, %v4776_v39  ;;  %v4715_v55 = vpop.f32.mrf.mxu0 }
 0x188   :  { %v4779_v60 = vpop.f32.mrf.mxu1 }
 0x189   :  { %v6231_v5 = vadd.f32 %v4778_v0, %v4714_v47  ;;  %v4716_v6 = vpop.f32.mrf.mxu0 }
 0x18a   :  { %v4717_v38 = vadd.f32 %v4716_v6, %v4715_v55  ;;  %v4780_v28 = vpop.f32.mrf.mxu1 }
 0x18b   :  { %v4781_v2 = vadd.f32 %v4780_v28, %v4779_v60  ;;  %v4718_v7 = vpop.f32.mrf.mxu0 }
 0x18c   :  { %v4782_v46 = vpop.f32.mrf.mxu1 }
 0x18d   :  { %v6233_v10 = vadd.f32 %v4781_v2, %v4717_v38  ;;  %v4719_v56 = vpop.f32.mrf.mxu0 }
 0x18e   :  { %v4720_v13 = vadd.f32 %v4719_v56, %v4718_v7  ;;  %v4783_v19 = vpop.f32.mrf.mxu1 }
 0x18f   :  { %v4784_v20 = vadd.f32 %v4783_v19, %v4782_v46  ;;  %v4721_v27 = vpop.f32.mrf.mxu0 }
 0x190   :  { %v4785_v29 = vpop.f32.mrf.mxu1 }
 0x191   :  { %v6235_v35 = vadd.f32 %v4784_v20, %v4720_v13  ;;  %v4722_v39 = vpop.f32.mrf.mxu0 }
 0x192   :  { %v4723_v41 = vadd.f32 %v4722_v39, %v4721_v27  ;;  %v4786_v47 = vpop.f32.mrf.mxu1 }
 0x193   :  { %v4787_v61 = vadd.f32 %v4786_v47, %v4785_v29  ;;  %v4724_v0 = vpop.f32.mrf.mxu0 }
 0x194   :  { %v4788_v55 = vpop.f32.mrf.mxu1 }
 0x195   :  { %v6237_v6 = vadd.f32 %v4787_v61, %v4723_v41  ;;  %v4725_v60 = vpop.f32.mrf.mxu0 }
 0x196   :  { %v4726_v28 = vadd.f32 %v4725_v60, %v4724_v0  ;;  %v4789_v38 = vpop.f32.mrf.mxu1 }
 0x197   :  { %v4790_v2 = vadd.f32 %v4789_v38, %v4788_v55  ;;  %v4727_v53 = vpop.f32.mrf.mxu0 }
 0x198   :  { %v4791_v7 = vpop.f32.mrf.mxu1 }
 0x199   :  { %v6239_v56 = vadd.f32 %v4790_v2, %v4726_v28  ;;  %v4728_v46 = vpop.f32.mrf.mxu0 }
 0x19a   :  { %v4729_v19 = vadd.f32 %v4728_v46, %v4727_v53  ;;  %v4792_v13 = vpop.f32.mrf.mxu1 }
 0x19b   :  { %v4793_v20 = vadd.f32 %v4792_v13, %v4791_v7  ;;  %v4730_v26 = vpop.f32.mrf.mxu0 }
 0x19c   :  { %v4794_v27 = vpop.f32.mrf.mxu1 }
 0x19d   :  { %v6241_v39 = vadd.f32 %v4793_v20, %v4729_v19  ;;  %v4731_v29 = vpop.f32.mrf.mxu0 }
 0x19e   :  { %v4732_v47 = vadd.f32 %v4731_v29, %v4730_v26  ;;  %v4795_v41 = vpop.f32.mrf.mxu1 }
 0x19f   :  { %v4796_v61 = vadd.f32 %v4795_v41, %v4794_v27  ;;  %v4733_v62 = vpop.f32.mrf.mxu0 }
 0x1a0   :  { %v4797_v0 = vpop.f32.mrf.mxu1 }
 0x1a1   :  { %v6243_v60 = vadd.f32 %v4796_v61, %v4732_v47  ;;  %v4734_v55 = vpop.f32.mrf.mxu0 }
 0x1a2   :  { %v4735_v38 = vadd.f32 %v4734_v55, %v4733_v62  ;;  %v4798_v28 = vpop.f32.mrf.mxu1 }
 0x1a3   :  { %v4799_v2 = vadd.f32 %v4798_v28, %v4797_v0  ;;  %v4816_v37 = vpop.f32.mrf.mxu0  ;;  %v2141_v0 = vmul.f32 %v6213_v42, %v6213_v42  ;;  %v2145_v42 = vmul.f32 %v6225_v51, %v6225_v51 }
 0x1a4   :  { %v4880_v53 = vpop.f32.mrf.mxu1 }
 0x1a5   :  { %v6245_v46 = vadd.f32 %v4799_v2, %v4735_v38  ;;  %v4817_v7 = vpop.f32.mrf.mxu0  ;;  %v2140_v2 = vmul.f32 %v6211_v16, %v6211_v16  ;;  %v2121_v16 = vadd.f32 %v2120_v59, %v6223_v24 }
 0x1a6   :  { %v4881_v13 = vpop.f32.mrf.mxu1 }
 0x1a7   :  { %v4819_v19 = vpop.f32.mrf.mxu0  ;;  %v2156_v30 = vadd.f32 %v2141_v0, %v2140_v2  ;;  %v2122_v1 = vadd.f32 %v2121_v16, %v6225_v51  ;;  %v4882_v36 = vadd.f32 %v4881_v13, %v4880_v53 }
 0x1a8   :  { %v4883_v20 = vpop.f32.mrf.mxu1 }
 0x1a9   :  { %v4820_v15 = vpop.f32.mrf.mxu0  ;;  %v2157_v44 = vadd.f32 %v2156_v30, %v2142_v12  ;;  %v2146_v30 = vmul.f32 %v6227_v17, %v6227_v17 }
 0x1aa   :  { %v4884_v26 = vpop.f32.mrf.mxu1  ;;  %v4821_v40 = vadd.f32 %v4820_v15, %v4819_v19  ;;  %v2148_v15 = vmul.f32 %v6231_v5, %v6231_v5 }
 0x1ab   :  { %v4822_v29 = vpop.f32.mrf.mxu0  ;;  %v2158_v45 = vadd.f32 %v2157_v44, %v2143_v23  ;;  %v4885_v12 = vadd.f32 %v4884_v26, %v4883_v20  ;;  %v2147_v44 = vmul.f32 %v6229_v43, %v6229_v43  ;;  %v4818_v23 = vadd.f32 %v4817_v7, %v4816_v37 }
 0x1ac   :  { %v4886_v27 = vpop.f32.mrf.mxu1 }
 0x1ad   :  { %v4823_v41 = vpop.f32.mrf.mxu0  ;;  %v2159_v31 = vadd.f32 %v2158_v45, %v2144_v34  ;;  %v2123_v45 = vadd.f32 %v2122_v1, %v6227_v17  ;;  %v6272_v19 = vadd.f32 %v4885_v12, %v4821_v40  ;;  %v6277_v53 = vadd.f32 %v4882_v36, %v4818_v23 }
 0x1ae   :  { %v4887_v54 = vpop.f32.mrf.mxu1  ;;  %v4824_v33 = vadd.f32 %v4823_v41, %v4822_v29 }
 0x1af   :  { %v4825_v47 = vpop.f32.mrf.mxu0  ;;  %v2160_v50 = vadd.f32 %v2159_v31, %v2145_v42  ;;  %v4888_v21 = vadd.f32 %v4887_v54, %v4886_v27  ;;  %v2124_v31 = vadd.f32 %v2123_v45, %v6229_v43  ;;  %v2149_v54 = vmul.f32 %v6233_v10, %v6233_v10 }
 0x1b0   :  { %v4889_v61 = vpop.f32.mrf.mxu1 }
 0x1b1   :  { %v4826_v32 = vpop.f32.mrf.mxu0  ;;  %v2161_v24 = vadd.f32 %v2160_v50, %v2146_v30  ;;  %v6279_v1 = vadd.f32 %v4888_v21, %v4824_v33  ;;  %v2125_v7 = vadd.f32 %v2124_v31, %v6231_v5 }
 0x1b2   :  { %v4890_v62 = vpop.f32.mrf.mxu1  ;;  %v4827_v42 = vadd.f32 %v4826_v32, %v4825_v47  ;;  %v2150_v32 = vmul.f32 %v6235_v35, %v6235_v35 }
 0x1b3   :  { %v4828_v55 = vpop.f32.mrf.mxu0  ;;  %v4891_v20 = vadd.f32 %v4890_v62, %v4889_v61  ;;  %v2162_v37 = vadd.f32 %v2161_v24, %v2147_v44  ;;  %v2862_v24 = vmul.f32 %v6272_v19, %v6272_v19  ;;  %v2126_v61 = vadd.f32 %v2125_v7, %v6233_v10 }
 0x1b4   :  { %v4892_v38 = vpop.f32.mrf.mxu1 }
 0x1b5   :  { %v4829_v28 = vpop.f32.mrf.mxu0  ;;  %v2163_v41 = vadd.f32 %v2162_v37, %v2148_v15  ;;  %v6287_v36 = vadd.f32 %v4891_v20, %v4827_v42  ;;  %v2127_v40 = vadd.f32 %v2126_v61, %v6235_v35 }
 0x1b6   :  { %v4893_v63 = vpop.f32.mrf.mxu1  ;;  %v4830_v13 = vadd.f32 %v4829_v28, %v4828_v55  ;;  %v2861_v55 = vmul.f32 %v6277_v53, %v6277_v53 }
 0x1b7   :  { %v4831_v52 = vpop.f32.mrf.mxu0  ;;  %v4894_v29 = vadd.f32 %v4893_v63, %v4892_v38  ;;  %v2164_v30 = vadd.f32 %v2163_v41, %v2149_v54  ;;  %v2151_v63 = vmul.f32 %v6237_v6, %v6237_v6  ;;  %v2863_v38 = vmul.f32 %v6279_v1, %v6279_v1 }
 0x1b8   :  { %v4895_v14 = vpop.f32.mrf.mxu1  ;;  %v2877_v45 = vadd.f32 %v2862_v24, %v2861_v55  ;;  %v2864_v31 = vmul.f32 %v6287_v36, %v6287_v36 }
 0x1b9   :  { %v4832_v4 = vpop.f32.mrf.mxu0  ;;  %v6296_v12 = vadd.f32 %v4894_v29, %v4830_v13 }
 0x1ba   :  { %v4896_v22 = vpop.f32.mrf.mxu1  ;;  %v4833_v21 = vadd.f32 %v4832_v4, %v4831_v52  ;;  %v2839_v52 = vadd.f32 %v6272_v19, %v6277_v53 }
 0x1bb   :  { %v4834_v9 = vpop.f32.mrf.mxu0  ;;  %v4897_v33 = vadd.f32 %v4896_v22, %v4895_v14  ;;  %v2165_v22 = vadd.f32 %v2164_v30, %v2150_v32  ;;  %v2152_v14 = vmul.f32 %v6239_v56, %v6239_v56  ;;  %v2865_v13 = vmul.f32 %v6296_v12, %v6296_v12 }
 0x1bc   :  { %v4898_v0 = vpop.f32.mrf.mxu1 }
 0x1bd   :  { %v4835_v2 = vpop.f32.mrf.mxu0  ;;  %v6304_v42 = vadd.f32 %v4897_v33, %v4833_v21 }
 0x1be   :  { %v4899_v18 = vpop.f32.mrf.mxu1  ;;  %v4836_v44 = vadd.f32 %v4835_v2, %v4834_v9  ;;  %v2166_v9 = vadd.f32 %v2165_v22, %v2151_v63  ;;  %v2878_v2 = vadd.f32 %v2877_v45, %v2863_v38  ;;  %v2154_v38 = vmul.f32 %v6243_v60, %v6243_v60 }
 0x1bf   :  { %v4837_v8 = vpop.f32.mrf.mxu0  ;;  %v4900_v23 = vadd.f32 %v4899_v18, %v4898_v0  ;;  %v2128_v18 = vadd.f32 %v2127_v40, %v6237_v6  ;;  %v2840_v0 = vadd.f32 %v2839_v52, %v6279_v1  ;;  %v2866_v33 = vmul.f32 %v6304_v42, %v6304_v42 }
 0x1c0   :  { %v4901_v58 = vpop.f32.mrf.mxu1  ;;  %v2879_v21 = vadd.f32 %v2878_v2, %v2864_v31 }
 0x1c1   :  { %v4838_v59 = vpop.f32.mrf.mxu0  ;;  %v6310_v29 = vadd.f32 %v4900_v23, %v4836_v44  ;;  %v2129_v61 = vadd.f32 %v2128_v18, %v6239_v56 }
 0x1c2   :  { %v4902_v34 = vpop.f32.mrf.mxu1  ;;  %v4839_v20 = vadd.f32 %v4838_v59, %v4837_v8  ;;  %v2153_v8 = vmul.f32 %v6241_v39, %v6241_v39  ;;  %v2880_v40 = vadd.f32 %v2879_v21, %v2865_v13 }
 0x1c3   :  { %v4840_v16 = vpop.f32.mrf.mxu0  ;;  %v4903_v37 = vadd.f32 %v4902_v34, %v4901_v58  ;;  %v2841_v58 = vadd.f32 %v2840_v0, %v6287_v36  ;;  %v2167_v34 = vadd.f32 %v2166_v9, %v2152_v14  ;;  %v2867_v44 = vmul.f32 %v6310_v29, %v6310_v29 }
 0x1c4   :  { %v4904_v26 = vpop.f32.mrf.mxu1 }
 0x1c5   :  { %v4841_v50 = vpop.f32.mrf.mxu0  ;;  %v6318_v30 = vadd.f32 %v4903_v37, %v4839_v20  ;;  %v2168_v14 = vadd.f32 %v2167_v34, %v2153_v8 }
 0x1c6   :  { %v4905_v27 = vpop.f32.mrf.mxu1  ;;  %v4842_v41 = vadd.f32 %v4841_v50, %v4840_v16  ;;  %v2130_v16 = vadd.f32 %v2129_v61, %v6241_v39 }
 0x1c7   :  { %v4843_v47 = vpop.f32.mrf.mxu0  ;;  %v4906_v32 = vadd.f32 %v4905_v27, %v4904_v26  ;;  %v2842_v26 = vadd.f32 %v2841_v58, %v6296_v12 }
 0x1c8   :  { %v4907_v62 = vpop.f32.mrf.mxu1 }
 0x1c9   :  { %v4844_v28 = vpop.f32.mrf.mxu0  ;;  %v6326_v23 = vadd.f32 %v4906_v32, %v4842_v41  ;;  %v2843_v52 = vadd.f32 %v2842_v26, %v6304_v42 }
 0x1ca   :  { %v4908_v4 = vpop.f32.mrf.mxu1  ;;  %v4845_v50 = vadd.f32 %v4844_v28, %v4843_v47  ;;  %v2131_v47 = vadd.f32 %v2130_v16, %v6243_v60  ;;  %v2881_v28 = vadd.f32 %v2880_v40, %v2866_v33 }
 0x1cb   :  { %v4846_v15 = vpop.f32.mrf.mxu0  ;;  %v4909_v27 = vadd.f32 %v4908_v4, %v4907_v62  ;;  %v2155_v62 = vmul.f32 %v6245_v46, %v6245_v46  ;;  %v2868_v4 = vmul.f32 %v6318_v30, %v6318_v30  ;;  %v2844_v18 = vadd.f32 %v2843_v52, %v6310_v29 }
 0x1cc   :  { %v4910_v54 = vpop.f32.mrf.mxu1  ;;  %v2869_v41 = vmul.f32 %v6326_v23, %v6326_v23 }
 0x1cd   :  { %v4847_v7 = vpop.f32.mrf.mxu0  ;;  %v6335_v9 = vadd.f32 %v4909_v27, %v4845_v50 }
 0x1ce   :  { %v4911_v24 = vpop.f32.mrf.mxu1  ;;  %v4848_v45 = vadd.f32 %v4847_v7, %v4846_v15  ;;  %v2169_v15 = vadd.f32 %v2168_v14, %v2154_v38  ;;  %v2882_v7 = vadd.f32 %v2881_v28, %v2867_v44 }
 0x1cf   :  { %v4849_v59 = vpop.f32.mrf.mxu0  ;;  %v4912_v31 = vadd.f32 %v4911_v24, %v4910_v54  ;;  %6771 = vst [vmem:[#allocation36_spill] sm:$0xff] %v6335_v9  ;;  %v2132_v54 = vadd.f32 %v2131_v47, %v6245_v46  ;;  %v2845_v24 = vadd.f32 %v2844_v18, %v6318_v30  ;;  %v2870_v16 = vmul.f32 %v6335_v9, %v6335_v9 }
 0x1d0   :  { %v4913_v63 = vpop.f32.mrf.mxu1  ;;  %v2170_v21 = vadd.f32 %v2169_v15, %v2155_v62  ;;  %v2883_v33 = vadd.f32 %v2882_v7, %v2868_v4 }
 0x1d1   :  { %v4850_v55 = vpop.f32.mrf.mxu0  ;;  %v6341_v61 = vadd.f32 %v4912_v31, %v4848_v45  ;;  %v2133_v27 = vrot.slane %v2132_v54, 4 }
 0x1d2   :  { %v4914_v22 = vpop.f32.mrf.mxu1  ;;  %v4851_v0 = vadd.f32 %v4850_v55, %v4849_v59  ;;  %v2884_v55 = vadd.f32 %v2883_v33, %v2869_v41  ;;  %v2171_v31 = vrot.slane %v2170_v21, 4 }
 0x1d3   :  { %v4852_v20 = vpop.f32.mrf.mxu0  ;;  %v4915_v2 = vadd.f32 %v4914_v22, %v4913_v63  ;;  %6772 = vst [vmem:[#allocation37_spill] sm:$0xff] %v6341_v61  ;;  %v2846_v63 = vadd.f32 %v2845_v24, %v6326_v23  ;;  %v2871_v22 = vmul.f32 %v6341_v61, %v6341_v61  ;;  %v2134_v18 = vadd.f32 %v2133_v27, %v2132_v54 }
 0x1d4   :  { %v4916_v37 = vpop.f32.mrf.mxu1  ;;  %v2885_v47 = vadd.f32 %v2884_v55, %v2870_v16  ;;  %v2172_v24 = vadd.f32 %v2171_v31, %v2170_v21 }
 0x1d5   :  { %v4853_v13 = vpop.f32.mrf.mxu0  ;;  %v6346_v26 = vadd.f32 %v4915_v2, %v4851_v0  ;;  %v2847_v44 = vadd.f32 %v2846_v63, %v6335_v9  ;;  %v2135_v63 = vrot.slane %v2134_v18, 2 }
 0x1d6   :  { %v4917_v32 = vpop.f32.mrf.mxu1  ;;  %v4854_v8 = vadd.f32 %v4853_v13, %v4852_v20  ;;  %v2886_v13 = vadd.f32 %v2885_v47, %v2871_v22 }
 0x1d7   :  { %v4918_v58 = vadd.f32 %v4917_v32, %v4916_v37  ;;  %v4855_v34 = vpop.f32.mrf.mxu0  ;;  %6773 = vst [vmem:[#allocation38_spill] sm:$0xff] %v6346_v26  ;;  %v2848_v62 = vadd.f32 %v2847_v44, %v6341_v61  ;;  %v2872_v28 = vmul.f32 %v6346_v26, %v6346_v26 }
 0x1d8   :  { %v4919_v59 = vpop.f32.mrf.mxu1 }
 0x1d9   :  { %v4856_v50 = vpop.f32.mrf.mxu0  ;;  %v6351_v14 = vadd.f32 %v4918_v58, %v4854_v8  ;;  %v2849_v15 = vadd.f32 %v2848_v62, %v6346_v26  ;;  %v2887_v58 = vadd.f32 %v2886_v13, %v2872_v28 }
 0x1da   :  { %v4857_v38 = vadd.f32 %v4856_v50, %v4855_v34  ;;  %v4920_v40 = vpop.f32.mrf.mxu1 }
 0x1db   :  { %6774 = vst [vmem:[#allocation39_spill] sm:$0xff] %v6351_v14  ;;  %v4921_v52 = vadd.f32 %v4920_v40, %v4919_v59  ;;  %v4858_v45 = vpop.f32.mrf.mxu0  ;;  %v2873_v7 = vmul.f32 %v6351_v14, %v6351_v14  ;;  %v2850_v34 = vadd.f32 %v2849_v15, %v6351_v14  ;;  %v2173_v40 = vrot.slane %v2172_v24, 2 }
 0x1dc   :  { %v4922_v20 = vpop.f32.mrf.mxu1 }
 0x1dd   :  { %v6356_v4 = vadd.f32 %v4921_v52, %v4857_v38  ;;  %v4859_v37 = vpop.f32.mrf.mxu0  ;;  %v2888_v27 = vadd.f32 %v2887_v58, %v2873_v7  ;;  %v2174_v62 = vadd.f32 %v2173_v40, %v2172_v24 }
 0x1de   :  { %v4860_v0 = vadd.f32 %v4859_v37, %v4858_v45  ;;  %v4923_v2 = vpop.f32.mrf.mxu1  ;;  %v2136_v45 = vadd.f32 %v2135_v63, %v2134_v18 }
 0x1df   :  { %6775 = vst [vmem:[#allocation40_spill] sm:$0xff] %v6356_v4  ;;  %v4924_v41 = vadd.f32 %v4923_v2, %v4922_v20  ;;  %v4861_v32 = vpop.f32.mrf.mxu0  ;;  %v2874_v33 = vmul.f32 %v6356_v4, %v6356_v4  ;;  %v2851_v55 = vadd.f32 %v2850_v34, %v6356_v4  ;;  %v2175_v15 = vrot.slane %v2174_v62, 1 }
 0x1e0   :  { %v4925_v8 = vpop.f32.mrf.mxu1 }
 0x1e1   :  { %v6364_v59 = vadd.f32 %v4924_v41, %v4860_v0  ;;  %v4862_v54 = vpop.f32.mrf.mxu0  ;;  %v2889_v44 = vadd.f32 %v2888_v27, %v2874_v33  ;;  %v2137_v0 = vrot.slane %v2136_v45, 1  ;;  %v2176_v34 = vadd.f32 %v2175_v15, %v2174_v62 }
 0x1e2   :  { %v4863_v16 = vadd.f32 %v4862_v54, %v4861_v32  ;;  %v4926_v50 = vpop.f32.mrf.mxu1 }
 0x1e3   :  { %6776 = vst [vmem:[#allocation41_spill] sm:$0xff] %v6364_v59  ;;  %v2875_v38 = vmul.f32 %v6364_v59, %v6364_v59  ;;  %v4927_v21 = vadd.f32 %v4926_v50, %v4925_v8  ;;  %v2852_v22 = vadd.f32 %v2851_v55, %v6364_v59  ;;  %v2138_v32 = vadd.f32 %v2137_v0, %v2136_v45 }
 0x1e4   :  { %v2177_v24 = vadd.f32 %v2176_v34, %v6221_v48  ;;  %v2927_v45 = vlaneseq  ;;  %v2907_v48 = vld [vmem:[%s6696_s3] sm:$0x1]  ;;  %v6780_v34 = vld [vmem:[#allocation5_spill] sm:$0xff] }
 0x1e5   :  { %v6370_v52 = vadd.f32 %v4927_v21, %v4863_v16  ;;  %v2890_v31 = vadd.f32 %v2889_v44, %v2875_v38  ;;  %v2139_v54 = vadd.f32 %v2138_v32, %v6217_v25 }
 0x1e7   :  { %6777 = vst [vmem:[#allocation42_spill] sm:$0xff] %v6370_v52  ;;  %v2853_v20 = vadd.f32 %v2852_v22, %v6370_v52  ;;  %v2876_v47 = vmul.f32 %v6370_v52, %v6370_v52 }
 0x1e9   :  { %v2854_v28 = vrot.slane %v2853_v20, 4  ;;  %v2891_v37 = vadd.f32 %v2890_v31, %v2876_v47  ;;  %v2928_v31 = vshrl.u32 %v2927_v45, 7 }
 0x1eb   :  { %v2855_v2 = vadd.f32 %v2854_v28, %v2853_v20  ;;  %v2892_v13 = vrot.slane %v2891_v37, 4  ;;  %v2903_v20 = vld [vmem:[%s6695_s2] sm:$0x1]  ;;  %v2929_v25 = vsub.s32 0, %v2928_v31 }
 0x1ed   :  { %v2856_v7 = vrot.slane %v2855_v2, 2  ;;  %v2893_v41 = vadd.f32 %v2892_v13, %v2891_v37 }
 0x1ef   :  { %v2857_v8 = vadd.f32 %v2856_v7, %v2855_v2  ;;  %v2894_v58 = vrot.slane %v2893_v41, 2 }
 0x1f1   :  { %v2858_v18 = vrot.slane %v2857_v8, 1  ;;  %v2895_v33 = vadd.f32 %v2894_v58, %v2893_v41  ;;  %v6778_v41 = vld [vmem:[#allocation3_spill] sm:$0xff] }
 0x1f3   :  { %v2859_v63 = vadd.f32 %v2858_v18, %v2857_v8  ;;  %v2896_v16 = vrot.slane %v2895_v33, 1  ;;  %v6779_v8 = vld [vmem:[#allocation4_spill] sm:$0xff] }
 0x1f5   :  { %v2860_v50 = vadd.f32 %v2859_v63, %v2139_v54  ;;  %v2897_v27 = vadd.f32 %v2896_v16, %v2895_v33  ;;  %v6781_v33 = vld [vmem:[#allocation6_spill] sm:$0xff]  ;;  %v6782_v54 = vld [vmem:[#allocation7_spill] sm:$0xff]  ;;  %v6783_v63 = vld [vmem:[#allocation8_spill] sm:$0xff] }
 0x1f6   :  { %v6784_v16 = vld [vmem:[#allocation9_spill] sm:$0xff] }
 0x1f7   :  { %v2898_v55 = vadd.f32 %v2897_v27, %v2177_v24  ;;  %v2899_v38 = vmul.f32 0.001953125, %v2860_v50  ;;  %v6785_v24 = vld [vmem:[#allocation10_spill] sm:$0xff]  ;;  %v6786_v27 = vld [vmem:[#allocation11_spill] sm:$0xff] }
 0x1f9   :  { %v2900_v21 = vmul.f32 0.001953125, %v2898_v55  ;;  %v2901_v40 = vmul.f32 %v2899_v38, %v2899_v38 }
 0x1fb   :  { %v2902_v44 = vsub.f32 %v2900_v21, %v2901_v40  ;;  %v6788_v40 = vld [vmem:[#allocation13_spill] sm:$0xff] }
 0x1fd   :  { %v2904_v22 = vadd.f32 1e-05, %v2902_v44 }
 0x1ff   :  { %5248 = vrsqrt.f32 %v2904_v22  ;;  %v6789_v22 = vld [vmem:[#allocation14_spill] sm:$0xff] }
 0x20c   :  { %v5249_v47 = vpop.eup %5248 }
 0x20d   :  { %v2906_v62 = vmul.f32 %v5249_v47, %v2903_v20  ;;  %v6790_v20 = vld [vmem:[#allocation15_spill] sm:$0xff] }
 0x20f   :  { %v2908_v28 = vmul.f32 %v2906_v62, %v2899_v38  ;;  %v6383_v37 = vrot.slane %v2906_v62, %v2929_v25  ;;  %v6787_v38 = vld [vmem:[#allocation12_spill] sm:$0xff] }
 0x210   :  { %v6791_v62 = vld [vmem:[#allocation16_spill] sm:$0xff] }
 0x211   :  { %v2909_v0 = vsub.f32 %v2907_v48, %v2908_v28  ;;  %v2932_v2 = vmul.f32 %v6383_v37, %v5974_v49  ;;  %v2933_v13 = vmul.f32 %v6383_v37, %v5979_v57  ;;  %v2934_v15 = vmul.f32 %v6383_v37, %v5990_v3  ;;  %v6792_v28 = vld [vmem:[#allocation17_spill] sm:$0xff] }
 0x212   :  { %v2935_v7 = vmul.f32 %v6383_v37, %v5995_v11  ;;  %v2936_v32 = vmul.f32 %v6383_v37, %v6778_v41  ;;  %v2937_v58 = vmul.f32 %v6383_v37, %v6779_v8  ;;  %v2938_v18 = vmul.f32 %v6383_v37, %v6780_v34  ;;  %v6793_v8 = vld [vmem:[#allocation18_spill] sm:$0xff] }
 0x213   :  { %v2939_v49 = vmul.f32 %v6383_v37, %v6781_v33  ;;  %v2940_v57 = vmul.f32 %v6383_v37, %v6782_v54  ;;  %v2941_v3 = vmul.f32 %v6383_v37, %v6783_v63  ;;  %v2942_v11 = vmul.f32 %v6383_v37, %v6784_v16  ;;  %v6794_v33 = vld [vmem:[#allocation19_spill] sm:$0xff] }
 0x214   :  { %v2943_v50 = vmul.f32 %v6383_v37, %v6785_v24  ;;  %v2944_v55 = vmul.f32 %v6383_v37, %v6786_v27  ;;  %v2945_v21 = vmul.f32 %v6383_v37, %v6787_v38  ;;  %v2946_v44 = vmul.f32 %v6383_v37, %v6788_v40 }
 0x215   :  { %v2947_v45 = vmul.f32 %v6383_v37, %v6789_v22  ;;  %v6417_v31 = vrot.slane %v2909_v0, %v2929_v25  ;;  %v6421_v47 = vmul.f32 %v6383_v37, %v6790_v20  ;;  %v6425_v48 = vmul.f32 %v6383_v37, %v6791_v62  ;;  %v6795_v0 = vld [vmem:[#allocation20_spill] sm:$0xff] }
 0x216   :  { %v6429_v41 = vmul.f32 %v6383_v37, %v6792_v28  ;;  %v6433_v34 = vmul.f32 %v6383_v37, %v6793_v8  ;;  %v6437_v25 = vmul.f32 %v6383_v37, %v6794_v33  ;;  %v6441_v54 = vmul.f32 %v6383_v37, %v6795_v0 }
 0x217   :  { %v2954_v63 = vadd.f32 %v6417_v31, %v2932_v2  ;;  %v2955_v16 = vadd.f32 %v6417_v31, %v2933_v13  ;;  %v2956_v24 = vadd.f32 %v6417_v31, %v2934_v15  ;;  %v2957_v27 = vadd.f32 %v6417_v31, %v2935_v7 }
 0x218   :  { %v2958_v38 = vadd.f32 %v6417_v31, %v2936_v32  ;;  %v2959_v40 = vadd.f32 %v6417_v31, %v2937_v58  ;;  %v2960_v22 = vadd.f32 %v6417_v31, %v2938_v18  ;;  %v2961_v20 = vadd.f32 %v6417_v31, %v2939_v49 }
 0x219   :  { %v2962_v62 = vadd.f32 %v6417_v31, %v2940_v57  ;;  %v2963_v28 = vadd.f32 %v6417_v31, %v2941_v3  ;;  %v2964_v2 = vadd.f32 %v6417_v31, %v2942_v11  ;;  %v2965_v13 = vadd.f32 %v6417_v31, %v2943_v50 }
 0x21a   :  { %v2966_v15 = vadd.f32 %v6417_v31, %v2944_v55  ;;  %v2967_v7 = vadd.f32 %v6417_v31, %v2945_v21  ;;  %v2968_v32 = vadd.f32 %v6417_v31, %v2946_v44  ;;  %v2969_v58 = vadd.f32 %v6417_v31, %v2947_v45 }
 0x21b   :  { %v2970_v8 = vmax.f32 %v2954_v63, 0.0  ;;  %v2971_v18 = vmax.f32 %v2955_v16, 0.0  ;;  %v2972_v33 = vmax.f32 %v2956_v24, 0.0  ;;  %v2973_v49 = vmax.f32 %v2957_v27, 0.0 }
 0x21c   :  { %v2974_v0 = vmax.f32 %v2958_v38, 0.0  ;;  %v2975_v57 = vmax.f32 %v2959_v40, 0.0  ;;  %v2976_v52 = vmax.f32 %v2960_v22, 0.0  ;;  %v2977_v3 = vmax.f32 %v2961_v20, 0.0  ;;  %v6799_v38 = vld [vmem:[#allocation24_spill] sm:$0xff]  ;;  %v6801_v20 = vld [vmem:[#allocation26_spill] sm:$0xff] }
 0x21d   :  { %v2978_v59 = vmax.f32 %v2962_v62, 0.0  ;;  %v2979_v11 = vmax.f32 %v2963_v28, 0.0  ;;  %v2980_v4 = vmax.f32 %v2964_v2, 0.0  ;;  %v2981_v50 = vmax.f32 %v2965_v13, 0.0  ;;  %v6802_v28 = vld [vmem:[#allocation27_spill] sm:$0xff]  ;;  %v6803_v13 = vld [vmem:[#allocation28_spill] sm:$0xff] }
 0x21e   :  { %v2982_v14 = vmax.f32 %v2966_v15, 0.0  ;;  %v2983_v55 = vmax.f32 %v2967_v7, 0.0  ;;  %v2984_v26 = vmax.f32 %v2968_v32, 0.0  ;;  %v2985_v21 = vmax.f32 %v2969_v58, 0.0  ;;  %v6804_v7 = vld [vmem:[#allocation29_spill] sm:$0xff]  ;;  %v6805_v58 = vld [vmem:[#allocation30_spill] sm:$0xff] }
 0x21f   :  { %v4228_v61 = vpack.c.bf16 %v2971_v18, %v2970_v8  ;;  %v4233_v44 = vpack.c.bf16 %v2973_v49, %v2972_v33  ;;  %v4238_v9 = vpack.c.bf16 %v2975_v57, %v2974_v0  ;;  %v4243_v45 = vpack.c.bf16 %v2977_v3, %v2976_v52  ;;  %v6798_v52 = vld [vmem:[#allocation23_spill] sm:$0xff] }
 0x220   :  { %v4248_v63 = vpack.c.bf16 %v2979_v11, %v2978_v59  ;;  %v4253_v16 = vpack.c.bf16 %v2981_v50, %v2980_v4  ;;  %v4258_v24 = vpack.c.bf16 %v2983_v55, %v2982_v14  ;;  %v4263_v27 = vpack.c.bf16 %v2985_v21, %v2984_v26  ;;  %v6796_v59 = vld [vmem:[#allocation21_spill] sm:$0xff]  ;;  %v6797_v26 = vld [vmem:[#allocation22_spill] sm:$0xff] }
 0x221   :  { %4229 = vst [vmem:[%s6697_s4] sm:$0xff] %v4228_v61   ;;  %4385 = vst [vmem:[%s6697_s4 + $0x8] sm:$0xff] %v4233_v44   ;;  %v3088_v14 = vmul.f32 %v6383_v37, %v6796_v59  ;;  %v3089_v4 = vmul.f32 %v6383_v37, %v6797_v26  ;;  %v3090_v61 = vmul.f32 %v6383_v37, %v6798_v52 }
 0x222   :  { %4386 = vst [vmem:[%s6697_s4 + $0x10] sm:$0xff] %v4238_v9   ;;  %4387 = vst [vmem:[%s6697_s4 + $0x18] sm:$0xff] %v4243_v45   ;;  %v3091_v40 = vmul.f32 %v6383_v37, %v6799_v38  ;;  %v6800_v9 = vld [vmem:[#allocation25_spill] sm:$0xff]  ;;  %v3093_v62 = vmul.f32 %v6383_v37, %v6801_v20  ;;  %v3094_v2 = vmul.f32 %v6383_v37, %v6802_v28 }
 0x223   :  { %4388 = vst [vmem:[%s6697_s4 + $0x20] sm:$0xff] %v4248_v63   ;;  %4389 = vst [vmem:[%s6697_s4 + $0x28] sm:$0xff] %v4253_v16   ;;  %v3092_v22 = vmul.f32 %v6383_v37, %v6800_v9  ;;  %v3095_v15 = vmul.f32 %v6383_v37, %v6803_v13  ;;  %v3096_v32 = vmul.f32 %v6383_v37, %v6804_v7 }
 0x224   :  { %4390 = vst [vmem:[%s6697_s4 + $0x30] sm:$0xff] %v4258_v24   ;;  %4391 = vst [vmem:[%s6697_s4 + $0x38] sm:$0xff] %v4263_v27   ;;  %v3097_v8 = vmul.f32 %v6383_v37, %v6805_v58  ;;  %v3098_v18 = vadd.f32 %v6421_v47, %v6417_v31  ;;  %v3099_v33 = vadd.f32 %v6425_v48, %v6417_v31  ;;  %v6806_v58 = vld [vmem:[#allocation31_spill] sm:$0xff] }
 0x225   :  { %v3100_v49 = vadd.f32 %v6429_v41, %v6417_v31  ;;  %v3101_v0 = vadd.f32 %v6433_v34, %v6417_v31  ;;  %v3102_v57 = vadd.f32 %v6437_v25, %v6417_v31  ;;  %v3103_v3 = vadd.f32 %v6441_v54, %v6417_v31 }
 0x226   :  { %v3104_v11 = vadd.f32 %v3088_v14, %v6417_v31  ;;  %v3105_v50 = vadd.f32 %v3089_v4, %v6417_v31  ;;  %v3106_v47 = vadd.f32 %v3090_v61, %v6417_v31  ;;  %v3107_v48 = vadd.f32 %v3091_v40, %v6417_v31 }
 0x227   :  { %v3108_v55 = vadd.f32 %v3092_v22, %v6417_v31  ;;  %v3109_v41 = vadd.f32 %v3093_v62, %v6417_v31  ;;  %v3110_v34 = vadd.f32 %v3094_v2, %v6417_v31  ;;  %v3111_v21 = vadd.f32 %v3095_v15, %v6417_v31 }
 0x228   :  { %v3112_v25 = vadd.f32 %v3096_v32, %v6417_v31  ;;  %v3113_v54 = vadd.f32 %v3097_v8, %v6417_v31  ;;  %v3114_v44 = vmax.f32 %v3098_v18, 0.0  ;;  %v3115_v45 = vmax.f32 %v3099_v33, 0.0  ;;  %v6807_v18 = vld [vmem:[#allocation32_spill] sm:$0xff] }
 0x229   :  { %v3116_v63 = vmax.f32 %v3100_v49, 0.0  ;;  %v3117_v16 = vmax.f32 %v3101_v0, 0.0  ;;  %v3118_v24 = vmax.f32 %v3102_v57, 0.0  ;;  %v3119_v27 = vmax.f32 %v3103_v3, 0.0  ;;  %v6808_v49 = vld [vmem:[#allocation33_spill] sm:$0xff]  ;;  %v6809_v57 = vld [vmem:[#allocation34_spill] sm:$0xff] }
 0x22a   :  { %v3120_v59 = vmax.f32 %v3104_v11, 0.0  ;;  %v3121_v14 = vmax.f32 %v3105_v50, 0.0  ;;  %v3122_v26 = vmax.f32 %v3106_v47, 0.0  ;;  %v3123_v4 = vmax.f32 %v3107_v48, 0.0  ;;  %v6810_v11 = vld [vmem:[#allocation35_spill] sm:$0xff] }
 0x22b   :  { %v3124_v52 = vmax.f32 %v3108_v55, 0.0  ;;  %v3125_v61 = vmax.f32 %v3109_v41, 0.0  ;;  %v3126_v38 = vmax.f32 %v3110_v34, 0.0  ;;  %v3127_v40 = vmax.f32 %v3111_v21, 0.0 }
 0x22c   :  { %v3128_v9 = vmax.f32 %v3112_v25, 0.0  ;;  %v3129_v22 = vmax.f32 %v3113_v54, 0.0  ;;  %v4268_v20 = vpack.c.bf16 %v3115_v45, %v3114_v44  ;;  %v4273_v62 = vpack.c.bf16 %v3117_v16, %v3116_v63 }
 0x22d   :  { %v4278_v28 = vpack.c.bf16 %v3119_v27, %v3118_v24  ;;  %v4283_v2 = vpack.c.bf16 %v3121_v14, %v3120_v59  ;;  %v4288_v13 = vpack.c.bf16 %v3123_v4, %v3122_v26  ;;  %v4293_v15 = vpack.c.bf16 %v3125_v61, %v3124_v52 }
 0x22e   :  { %4392 = vst [vmem:[%s6697_s4 + $0x40] sm:$0xff] %v4268_v20   ;;  %4393 = vst [vmem:[%s6697_s4 + $0x48] sm:$0xff] %v4273_v62   ;;  %v4298_v7 = vpack.c.bf16 %v3127_v40, %v3126_v38  ;;  %v4303_v32 = vpack.c.bf16 %v3129_v22, %v3128_v9  ;;  %v3227_v8 = vmul.f32 %v6383_v37, %v6806_v58 }
 0x22f   :  { %v3228_v33 = vmul.f32 %v6383_v37, %v6807_v18  ;;  %4394 = vst [vmem:[%s6697_s4 + $0x50] sm:$0xff] %v4278_v28   ;;  %4395 = vst [vmem:[%s6697_s4 + $0x58] sm:$0xff] %v4283_v2   ;;  %v3229_v0 = vmul.f32 %v6383_v37, %v6808_v49  ;;  %v3230_v3 = vmul.f32 %v6383_v37, %v6809_v57 }
 0x230   :  { %4396 = vst [vmem:[%s6697_s4 + $0x60] sm:$0xff] %v4288_v13   ;;  %4397 = vst [vmem:[%s6697_s4 + $0x68] sm:$0xff] %v4293_v15   ;;  %v3231_v50 = vmul.f32 %v6383_v37, %v6810_v11  ;;  %v3232_v47 = vmul.f32 %v6383_v37, %v6225_v51  ;;  %v3233_v48 = vmul.f32 %v6383_v37, %v6227_v17 }
 0x231   :  { %4398 = vst [vmem:[%s6697_s4 + $0x70] sm:$0xff] %v4298_v7   ;;  %4399 = vst [vmem:[%s6697_s4 + $0x78] sm:$0xff] %v4303_v32   ;;  %v3234_v55 = vmul.f32 %v6383_v37, %v6229_v43  ;;  %v3235_v41 = vmul.f32 %v6383_v37, %v6231_v5  ;;  %v3236_v51 = vmul.f32 %v6383_v37, %v6233_v10 }
 0x232   :  { %v3237_v34 = vmul.f32 %v6383_v37, %v6235_v35  ;;  %v3238_v21 = vmul.f32 %v6383_v37, %v6237_v6  ;;  %v3239_v25 = vmul.f32 %v6383_v37, %v6239_v56  ;;  %v3240_v17 = vmul.f32 %v6383_v37, %v6241_v39 }
 0x233   :  { %v3241_v43 = vmul.f32 %v6383_v37, %v6243_v60  ;;  %v3242_v5 = vmul.f32 %v6383_v37, %v6245_v46  ;;  %v3243_v10 = vadd.f32 %v3227_v8, %v6417_v31  ;;  %v3244_v54 = vadd.f32 %v3228_v33, %v6417_v31 }
 0x234   :  { %v3245_v35 = vadd.f32 %v3229_v0, %v6417_v31  ;;  %v3246_v6 = vadd.f32 %v3230_v3, %v6417_v31  ;;  %v3247_v44 = vadd.f32 %v3231_v50, %v6417_v31  ;;  %v3248_v56 = vadd.f32 %v3232_v47, %v6417_v31 }
 0x235   :  { %v3249_v39 = vadd.f32 %v3233_v48, %v6417_v31  ;;  %v3250_v45 = vadd.f32 %v3234_v55, %v6417_v31  ;;  %v3251_v60 = vadd.f32 %v3235_v41, %v6417_v31  ;;  %v3252_v46 = vadd.f32 %v3236_v51, %v6417_v31  ;;  %v6811_v55 = vld [vmem:[#allocation36_spill] sm:$0xff]  ;;  %v6812_v41 = vld [vmem:[#allocation37_spill] sm:$0xff] }
 0x236   :  { %v3253_v63 = vadd.f32 %v3237_v34, %v6417_v31  ;;  %v3254_v16 = vadd.f32 %v3238_v21, %v6417_v31  ;;  %v3255_v24 = vadd.f32 %v3239_v25, %v6417_v31  ;;  %v3256_v27 = vadd.f32 %v3240_v17, %v6417_v31  ;;  %v6813_v34 = vld [vmem:[#allocation38_spill] sm:$0xff]  ;;  %v6814_v25 = vld [vmem:[#allocation39_spill] sm:$0xff] }
 0x237   :  { %v3257_v59 = vadd.f32 %v3241_v43, %v6417_v31  ;;  %v3258_v14 = vadd.f32 %v3242_v5, %v6417_v31  ;;  %v3259_v26 = vmax.f32 %v3243_v10, 0.0  ;;  %v3260_v4 = vmax.f32 %v3244_v54, 0.0  ;;  %v6815_v43 = vld [vmem:[#allocation40_spill] sm:$0xff]  ;;  %v6816_v5 = vld [vmem:[#allocation41_spill] sm:$0xff]  ;;  %v6817_v10 = vld [vmem:[#allocation42_spill] sm:$0xff] }
 0x238   :  { %v3261_v52 = vmax.f32 %v3245_v35, 0.0  ;;  %v3262_v61 = vmax.f32 %v3246_v6, 0.0  ;;  %v3263_v38 = vmax.f32 %v3247_v44, 0.0  ;;  %v3264_v40 = vmax.f32 %v3248_v56, 0.0 }
 0x239   :  { %v3265_v9 = vmax.f32 %v3249_v39, 0.0  ;;  %v3266_v22 = vmax.f32 %v3250_v45, 0.0  ;;  %v3267_v20 = vmax.f32 %v3251_v60, 0.0  ;;  %v3268_v62 = vmax.f32 %v3252_v46, 0.0 }
 0x23a   :  { %v3269_v28 = vmax.f32 %v3253_v63, 0.0  ;;  %v3270_v2 = vmax.f32 %v3254_v16, 0.0  ;;  %v3271_v13 = vmax.f32 %v3255_v24, 0.0  ;;  %v3272_v15 = vmax.f32 %v3256_v27, 0.0 }
 0x23b   :  { %v3273_v7 = vmax.f32 %v3257_v59, 0.0  ;;  %v3274_v32 = vmax.f32 %v3258_v14, 0.0  ;;  %v4308_v58 = vpack.c.bf16 %v3260_v4, %v3259_v26  ;;  %v4313_v8 = vpack.c.bf16 %v3262_v61, %v3261_v52 }
 0x23c   :  { %v4318_v18 = vpack.c.bf16 %v3264_v40, %v3263_v38  ;;  %v4323_v33 = vpack.c.bf16 %v3266_v22, %v3265_v9  ;;  %v4328_v49 = vpack.c.bf16 %v3268_v62, %v3267_v20  ;;  %v4333_v0 = vpack.c.bf16 %v3270_v2, %v3269_v28 }
 0x23d   :  { %4400 = vst [vmem:[%s6697_s4 + $0x80] sm:$0xff] %v4308_v58   ;;  %4401 = vst [vmem:[%s6697_s4 + $0x88] sm:$0xff] %v4313_v8   ;;  %v4338_v57 = vpack.c.bf16 %v3272_v15, %v3271_v13  ;;  %v4343_v3 = vpack.c.bf16 %v3274_v32, %v3273_v7  ;;  %v3372_v11 = vmul.f32 %v6383_v37, %v6277_v53 }
 0x23e   :  { %v3373_v50 = vmul.f32 %v6383_v37, %v6272_v19  ;;  %4402 = vst [vmem:[%s6697_s4 + $0x90] sm:$0xff] %v4318_v18   ;;  %4403 = vst [vmem:[%s6697_s4 + $0x98] sm:$0xff] %v4323_v33   ;;  %v3374_v53 = vmul.f32 %v6383_v37, %v6279_v1  ;;  %v3375_v19 = vmul.f32 %v6383_v37, %v6287_v36 }
 0x23f   :  { %4404 = vst [vmem:[%s6697_s4 + $0xa0] sm:$0xff] %v4328_v49   ;;  %4405 = vst [vmem:[%s6697_s4 + $0xa8] sm:$0xff] %v4333_v0   ;;  %v3376_v47 = vmul.f32 %v6383_v37, %v6296_v12  ;;  %v3377_v48 = vmul.f32 %v6383_v37, %v6304_v42  ;;  %v3378_v1 = vmul.f32 %v6383_v37, %v6310_v29 }
 0x240   :  { %4406 = vst [vmem:[%s6697_s4 + $0xb0] sm:$0xff] %v4338_v57   ;;  %4407 = vst [vmem:[%s6697_s4 + $0xb8] sm:$0xff] %v4343_v3   ;;  %v3379_v36 = vmul.f32 %v6383_v37, %v6318_v30  ;;  %v3380_v12 = vmul.f32 %v6383_v37, %v6326_v23  ;;  %v3381_v42 = vmul.f32 %v6383_v37, %v6811_v55 }
 0x241   :  { %v3382_v51 = vmul.f32 %v6383_v37, %v6812_v41  ;;  %v3383_v21 = vmul.f32 %v6383_v37, %v6813_v34  ;;  %v3384_v17 = vmul.f32 %v6383_v37, %v6814_v25  ;;  %v3385_v29 = vmul.f32 %v6383_v37, %v6815_v43 }
 0x242   :  { %v3386_v30 = vmul.f32 %v6383_v37, %v6816_v5  ;;  %v3387_v23 = vmul.f32 %v6383_v37, %v6817_v10  ;;  %v3388_v54 = vadd.f32 %v3372_v11, %v6417_v31  ;;  %v3389_v35 = vadd.f32 %v3373_v50, %v6417_v31 }
 0x243   :  { %v3390_v6 = vadd.f32 %v3374_v53, %v6417_v31  ;;  %v3391_v44 = vadd.f32 %v3375_v19, %v6417_v31  ;;  %v3392_v56 = vadd.f32 %v3376_v47, %v6417_v31  ;;  %v3393_v39 = vadd.f32 %v3377_v48, %v6417_v31 }
 0x244   :  { %v3394_v45 = vadd.f32 %v3378_v1, %v6417_v31  ;;  %v3395_v60 = vadd.f32 %v3379_v36, %v6417_v31  ;;  %v3396_v46 = vadd.f32 %v3380_v12, %v6417_v31  ;;  %v3397_v37 = vadd.f32 %v3381_v42, %v6417_v31 }
 0x245   :  { %v3398_v63 = vadd.f32 %v3382_v51, %v6417_v31  ;;  %v3399_v16 = vadd.f32 %v3383_v21, %v6417_v31  ;;  %v3400_v24 = vadd.f32 %v3384_v17, %v6417_v31  ;;  %v3401_v27 = vadd.f32 %v3385_v29, %v6417_v31 }
 0x246   :  { %v3402_v59 = vadd.f32 %v3386_v30, %v6417_v31  ;;  %v3403_v14 = vadd.f32 %v3387_v23, %v6417_v31  ;;  %v3404_v26 = vmax.f32 %v3388_v54, 0.0  ;;  %v3405_v4 = vmax.f32 %v3389_v35, 0.0 }
 0x247   :  { %v3406_v52 = vmax.f32 %v3390_v6, 0.0  ;;  %v3407_v61 = vmax.f32 %v3391_v44, 0.0  ;;  %v3408_v38 = vmax.f32 %v3392_v56, 0.0  ;;  %v3409_v40 = vmax.f32 %v3393_v39, 0.0 }
 0x248   :  { %v3410_v9 = vmax.f32 %v3394_v45, 0.0  ;;  %v3411_v22 = vmax.f32 %v3395_v60, 0.0  ;;  %v3412_v20 = vmax.f32 %v3396_v46, 0.0  ;;  %v3413_v62 = vmax.f32 %v3397_v37, 0.0 }
 0x249   :  { %v3414_v28 = vmax.f32 %v3398_v63, 0.0  ;;  %v3415_v2 = vmax.f32 %v3399_v16, 0.0  ;;  %v3416_v13 = vmax.f32 %v3400_v24, 0.0  ;;  %v3417_v15 = vmax.f32 %v3401_v27, 0.0 }
 0x24a   :  { %v3418_v7 = vmax.f32 %v3402_v59, 0.0  ;;  %v3419_v32 = vmax.f32 %v3403_v14, 0.0  ;;  %v4348_v58 = vpack.c.bf16 %v3405_v4, %v3404_v26  ;;  %v4353_v8 = vpack.c.bf16 %v3407_v61, %v3406_v52 }
 0x24b   :  { %v4358_v18 = vpack.c.bf16 %v3409_v40, %v3408_v38  ;;  %v4363_v31 = vpack.c.bf16 %v3411_v22, %v3410_v9  ;;  %v4368_v33 = vpack.c.bf16 %v3413_v62, %v3412_v20  ;;  %v4373_v49 = vpack.c.bf16 %v3415_v2, %v3414_v28 }
 0x24c   :  { %4408 = vst [vmem:[%s6697_s4 + $0xc0] sm:$0xff] %v4348_v58   ;;  %4409 = vst [vmem:[%s6697_s4 + $0xc8] sm:$0xff] %v4353_v8   ;;  %v4378_v0 = vpack.c.bf16 %v3417_v15, %v3416_v13  ;;  %v4383_v57 = vpack.c.bf16 %v3419_v32, %v3418_v7 }
 0x24d   :  { %4410 = vst [vmem:[%s6697_s4 + $0xd0] sm:$0xff] %v4358_v18   ;;  %4411 = vst [vmem:[%s6697_s4 + $0xd8] sm:$0xff] %v4363_v31  }
 0x24e   :  { %4412 = vst [vmem:[%s6697_s4 + $0xe0] sm:$0xff] %v4368_v33   ;;  %4413 = vst [vmem:[%s6697_s4 + $0xe8] sm:$0xff] %v4373_v49  }
 0x24f   :  { %4414 = vst [vmem:[%s6697_s4 + $0xf0] sm:$0xff] %v4378_v0   ;;  %4415 = vst [vmem:[%s6697_s4 + $0xf8] sm:$0xff] %v4383_v57  }

// kernel: generator_forward.7
= control target key start
LH: loop header
LB: loop body
LE: loop exit
PB: predicated region body
PF: predicated region fallthrough
CT: control target
= control target key end

     0   :  { %v4448_v0 = vmov 0   ;;  %s5896_s1 = inlined_call_operand.vmem [shape: bf16[4,256,128], index: 1, kind: input, shape index: {}]   ;;  %s5897_s0 = inlined_call_operand.vmem [shape: bf16[4,392,256], index: 0, kind: input, shape index: {}]   ;;  %s5898_s2 = inlined_call_operand.vmem [shape: f32[4,392,128], index: 2, kind: output, shape index: {}]  }
   0x1   :  { %436 = vmatprep.subr.bf16.mxu0 %v4448_v0  ;;  %1192 = vmatprep.subr.bf16.mxu1 %v4448_v0  ;;  %v3696_v1 = vld [vmem:[%s5896_s1 + $0x38] sm:$0xff]   ;;  %v3698_v3 = vld [vmem:[%s5896_s1 + $0x30] sm:$0xff]   ;;  %v3700_v5 = vld [vmem:[%s5896_s1 + $0x28] sm:$0xff]  }
   0x2   :  { %v3697_v2 = vld [vmem:[%s5896_s1 + $0xb8] sm:$0xff]   ;;  %437 = vmatpush1.bf16.msra.mxu0 %v3696_v1  ;;  %v3699_v4 = vld [vmem:[%s5896_s1 + $0xb0] sm:$0xff]   ;;  %v3701_v6 = vld [vmem:[%s5896_s1 + $0xa8] sm:$0xff]  }
   0x3   :  { %1193 = vmatpush1.bf16.msra.mxu1 %v3697_v2  ;;  %438 = vmatprep.subr.bf16.mxu0 %v4448_v0  ;;  %v3702_v7 = vld [vmem:[%s5896_s1 + $0x20] sm:$0xff]   ;;  %v3704_v9 = vld [vmem:[%s5896_s1 + $0x18] sm:$0xff]   ;;  %v3706_v11 = vld [vmem:[%s5896_s1 + $0x10] sm:$0xff]  }
   0x4   :  { %1194 = vmatprep.subr.bf16.mxu1 %v4448_v0  ;;  %v3703_v8 = vld [vmem:[%s5896_s1 + $0xa0] sm:$0xff]   ;;  %v3705_v10 = vld [vmem:[%s5896_s1 + $0x98] sm:$0xff]   ;;  %v3707_v12 = vld [vmem:[%s5896_s1 + $0x90] sm:$0xff]  }
   0x5   :  { %v3708_v13 = vld [vmem:[%s5896_s1 + $0x8] sm:$0xff]   ;;  %v3710_v15 = vld [vmem:[%s5896_s1] sm:$0xff]   ;;  %v3712_v17 = vld [vmem:[%s5896_s1 + $0x78] sm:$0xff]  }
   0x6   :  { %439 = vmatpush1.bf16.msra.mxu0 %v3698_v3  ;;  %v3709_v14 = vld [vmem:[%s5896_s1 + $0x88] sm:$0xff]   ;;  %v3711_v16 = vld [vmem:[%s5896_s1 + $0x80] sm:$0xff]   ;;  %v3713_v18 = vld [vmem:[%s5896_s1 + $0xf8] sm:$0xff]  }
   0x7   :  { %1195 = vmatpush1.bf16.msra.mxu1 %v3699_v4  ;;  %440 = vmatprep.subr.bf16.mxu0 %v4448_v0  ;;  %v3730_v19 = vld [vmem:[%s5897_s0 + $0x4] ss:$8 sps:$4 sm:$0xff]   ;;  %v3714_v20 = vld [vmem:[%s5896_s1 + $0x70] sm:$0xff]   ;;  %v3720_v27 = vld [vmem:[%s5896_s1 + $0x58] sm:$0xff]  }
   0x8   :  { %1196 = vmatprep.subr.bf16.mxu1 %v4448_v0  ;;  %v3733_v21 = vld [vmem:[%s5897_s0 + $0x18c] ss:$8 sps:$4 sm:$0xff]   ;;  %468 = vmatprep.mubr.bf16.mxu0 %v3730_v19  ;;  %v3718_v25 = vld [vmem:[%s5896_s1 + $0x60] sm:$0xff]   ;;  %v3721_v28 = vld [vmem:[%s5896_s1 + $0xd8] sm:$0xff]  }
   0x9   :  { %v3715_v22 = vld [vmem:[%s5896_s1 + $0xf0] sm:$0xff]   ;;  %1224 = vmatprep.mubr.bf16.mxu1 %v3733_v21  ;;  %v3716_v23 = vld [vmem:[%s5896_s1 + $0x68] sm:$0xff]   ;;  %v3719_v26 = vld [vmem:[%s5896_s1 + $0xe0] sm:$0xff]  }
   0xa   :  { %441 = vmatpush1.bf16.msra.mxu0 %v3700_v5  ;;  %v3717_v24 = vld [vmem:[%s5896_s1 + $0xe8] sm:$0xff]   ;;  %v3722_v29 = vld [vmem:[%s5896_s1 + $0x50] sm:$0xff]   ;;  %v3726_v33 = vld [vmem:[%s5896_s1 + $0x40] sm:$0xff]  }
   0xb   :  { %1197 = vmatpush1.bf16.msra.mxu1 %v3701_v6  ;;  %442 = vmatprep.subr.bf16.mxu0 %v4448_v0  ;;  %v3723_v30 = vld [vmem:[%s5896_s1 + $0xd0] sm:$0xff]   ;;  %v3724_v31 = vld [vmem:[%s5896_s1 + $0x48] sm:$0xff]   ;;  %v3727_v34 = vld [vmem:[%s5896_s1 + $0xc0] sm:$0xff]  }
   0xc   :  { %1198 = vmatprep.subr.bf16.mxu1 %v4448_v0  ;;  %v3725_v32 = vld [vmem:[%s5896_s1 + $0xc8] sm:$0xff]   ;;  %v3734_v37 = vld [vmem:[%s5896_s1 + $0x138] sm:$0xff]   ;;  %v3742_v41 = vld [vmem:[%s5896_s1 + $0x130] sm:$0xff]  }
   0xd   :  { %v3728_v35 = vld [vmem:[%s5897_s0] ss:$8 sps:$4 sm:$0xff]   ;;  %v3735_v38 = vld [vmem:[%s5896_s1 + $0x1b8] sm:$0xff]   ;;  %v3743_v42 = vld [vmem:[%s5896_s1 + $0x1b0] sm:$0xff]  }
   0xe   :  { %443 = vmatpush1.bf16.msra.mxu0 %v3702_v7  ;;  %v3731_v36 = vld [vmem:[%s5897_s0 + $0x188] ss:$8 sps:$4 sm:$0xff]   ;;  %v3736_v39 = vld [vmem:[%s5897_s0 + $0x14] ss:$8 sps:$4 sm:$0xff]   ;;  %v3741_v44 = vld [vmem:[%s5897_s0 + $0x198] ss:$8 sps:$4 sm:$0xff]  }
   0xf   :  { %1199 = vmatpush1.bf16.msra.mxu1 %v3703_v8  ;;  %444 = vmatprep.subr.bf16.mxu0 %v4448_v0  ;;  %v3738_v40 = vld [vmem:[%s5897_s0 + $0x19c] ss:$8 sps:$4 sm:$0xff]   ;;  %v3740_v43 = vld [vmem:[%s5897_s0 + $0x10] ss:$8 sps:$4 sm:$0xff]   ;;  %v3746_v46 = vld [vmem:[%s5897_s0 + $0x1ac] ss:$8 sps:$4 sm:$0xff]  }
  0x10   :  { %1200 = vmatprep.subr.bf16.mxu1 %v4448_v0  ;;  %v3744_v45 = vld [vmem:[%s5897_s0 + $0x24] ss:$8 sps:$4 sm:$0xff]   ;;  %v3748_v51 = vld [vmem:[%s5897_s0 + $0x20] ss:$8 sps:$4 sm:$0xff]   ;;  %v3750_v53 = vld [vmem:[%s5897_s0 + $0x34] ss:$8 sps:$4 sm:$0xff]  }
  0x11   :  { %v3756_v47 = vld [vmem:[%s5896_s1 + $0x128] sm:$0xff]   ;;  %v3768_v49 = vld [vmem:[%s5896_s1 + $0x120] sm:$0xff]   ;;  %v3778_v55 = vld [vmem:[%s5896_s1 + $0x118] sm:$0xff]  }
  0x12   :  { %445 = vmatpush1.bf16.msra.mxu0 %v3704_v9  ;;  %v3757_v48 = vld [vmem:[%s5896_s1 + $0x1a8] sm:$0xff]   ;;  %v3769_v50 = vld [vmem:[%s5896_s1 + $0x1a0] sm:$0xff]   ;;  %v3779_v56 = vld [vmem:[%s5896_s1 + $0x198] sm:$0xff]  }
  0x13   :  { %1201 = vmatpush1.bf16.msra.mxu1 %v3705_v10  ;;  %446 = vmatprep.subr.bf16.mxu0 %v4448_v0  ;;  %v3749_v52 = vld [vmem:[%s5897_s0 + $0x1a8] ss:$8 sps:$4 sm:$0xff]   ;;  %v3752_v54 = vld [vmem:[%s5897_s0 + $0x1bc] ss:$8 sps:$4 sm:$0xff]   ;;  %v3755_v60 = vld [vmem:[%s5897_s0 + $0x1b8] ss:$8 sps:$4 sm:$0xff]  }
  0x14   :  { %1202 = vmatprep.subr.bf16.mxu1 %v4448_v0  ;;  %v3754_v57 = vld [vmem:[%s5897_s0 + $0x30] ss:$8 sps:$4 sm:$0xff]   ;;  %v3758_v61 = vld [vmem:[%s5897_s0 + $0x44] ss:$8 sps:$4 sm:$0xff]   ;;  %v3762_v2 = vld [vmem:[%s5897_s0 + $0x40] ss:$8 sps:$4 sm:$0xff]  }
  0x15   :  { %v3792_v58 = vld [vmem:[%s5896_s1 + $0x110] sm:$0xff]   ;;  %v3800_v63 = vld [vmem:[%s5896_s1 + $0x108] sm:$0xff]   ;;  %v3814_v3 = vld [vmem:[%s5896_s1 + $0x100] sm:$0xff]  }
  0x16   :  { %447 = vmatpush1.bf16.msra.mxu0 %v3706_v11  ;;  %v3793_v59 = vld [vmem:[%s5896_s1 + $0x190] sm:$0xff]   ;;  %v3801_v1 = vld [vmem:[%s5896_s1 + $0x188] sm:$0xff]   ;;  %v3815_v4 = vld [vmem:[%s5896_s1 + $0x180] sm:$0xff]  }
  0x17   :  { %1203 = vmatpush1.bf16.msra.mxu1 %v3707_v12  ;;  %448 = vmatprep.subr.bf16.mxu0 %v4448_v0  ;;  %v3760_v62 = vld [vmem:[%s5897_s0 + $0x1cc] ss:$8 sps:$4 sm:$0xff]   ;;  %v3763_v5 = vld [vmem:[%s5897_s0 + $0x1c8] ss:$8 sps:$4 sm:$0xff]   ;;  %v3766_v7 = vld [vmem:[%s5897_s0 + $0x1dc] ss:$8 sps:$4 sm:$0xff]  }
  0x18   :  { %1204 = vmatprep.subr.bf16.mxu1 %v4448_v0  ;;  %v3764_v6 = vld [vmem:[%s5897_s0 + $0x54] ss:$8 sps:$4 sm:$0xff]   ;;  %v3770_v12 = vld [vmem:[%s5897_s0 + $0x50] ss:$8 sps:$4 sm:$0xff]   ;;  %v3858_v19 = vld [vmem:[%s5896_s1 + $0x160] sm:$0xff]  }
  0x19   :  { %v3822_v8 = vld [vmem:[%s5896_s1 + $0x178] sm:$0xff]   ;;  %v3836_v10 = vld [vmem:[%s5896_s1 + $0x170] sm:$0xff]  }
  0x1a   :  { %449 = vmatpush1.bf16.msra.mxu0 %v3708_v13  ;;  %v3823_v9 = vld [vmem:[%s5896_s1 + $0x1f8] sm:$0xff]   ;;  %v3837_v11 = vld [vmem:[%s5896_s1 + $0x1f0] sm:$0xff]  }
  0x1b   :  { %1205 = vmatpush1.bf16.msra.mxu1 %v3709_v14  ;;  %450 = vmatprep.subr.bf16.mxu0 %v4448_v0  ;;  %v3771_v13 = vld [vmem:[%s5897_s0 + $0x1d8] ss:$8 sps:$4 sm:$0xff]   ;;  %v3772_v14 = vld [vmem:[%s5897_s0 + $0x64] ss:$8 sps:$4 sm:$0xff]   ;;  %v3777_v21 = vld [vmem:[%s5897_s0 + $0x1e8] ss:$8 sps:$4 sm:$0xff]  }
  0x1c   :  { %1206 = vmatprep.subr.bf16.mxu1 %v4448_v0 }
  0x1e   :  { %451 = vmatpush1.bf16.msra.mxu0 %v3710_v15  ;;  %v3774_v15 = vld [vmem:[%s5897_s0 + $0x1ec] ss:$8 sps:$4 sm:$0xff]  }
  0x1f   :  { %1207 = vmatpush1.bf16.msra.mxu1 %v3711_v16  ;;  %452 = vmatprep.subr.bf16.mxu0 %v4448_v0  ;;  %v3844_v16 = vld [vmem:[%s5896_s1 + $0x168] sm:$0xff]  }
  0x20   :  { %1208 = vmatprep.subr.bf16.mxu1 %v4448_v0 }
  0x22   :  { %453 = vmatpush2.bf16.msra.mxu0 %v3712_v17  ;;  %v3845_v17 = vld [vmem:[%s5896_s1 + $0x1e8] sm:$0xff]  }
  0x23   :  { %1209 = vmatpush2.bf16.msra.mxu1 %v3713_v18  ;;  %454 = vmatprep.subr.bf16.mxu0 %v4448_v0  ;;  %v3776_v18 = vld [vmem:[%s5897_s0 + $0x60] ss:$8 sps:$4 sm:$0xff]  }
  0x24   :  { %1210 = vmatprep.subr.bf16.mxu1 %v4448_v0 }
  0x26   :  { %455 = vmatpush2.bf16.msra.mxu0 %v3714_v20  ;;  %v3859_v20 = vld [vmem:[%s5896_s1 + $0x1e0] sm:$0xff]  }
  0x27   :  { %1211 = vmatpush2.bf16.msra.mxu1 %v3715_v22  ;;  %456 = vmatprep.subr.bf16.mxu0 %v4448_v0  ;;  %v3780_v22 = vld [vmem:[%s5897_s0 + $0x74] ss:$8 sps:$4 sm:$0xff]  }
  0x28   :  { %1212 = vmatprep.subr.bf16.mxu1 %v4448_v0 }
  0x2a   :  { %457 = vmatpush2.bf16.msra.mxu0 %v3716_v23  ;;  %v3782_v23 = vld [vmem:[%s5897_s0 + $0x1fc] ss:$8 sps:$4 sm:$0xff]  }
  0x2b   :  { %1213 = vmatpush2.bf16.msra.mxu1 %v3717_v24  ;;  %458 = vmatprep.subr.bf16.mxu0 %v4448_v0  ;;  %v3870_v24 = vld [vmem:[%s5896_s1 + $0x158] sm:$0xff]  }
  0x2c   :  { %1214 = vmatprep.subr.bf16.mxu1 %v4448_v0 }
  0x2e   :  { %459 = vmatpush2.bf16.msra.mxu0 %v3718_v25  ;;  %v3871_v25 = vld [vmem:[%s5896_s1 + $0x1d8] sm:$0xff]  }
  0x2f   :  { %1215 = vmatpush2.bf16.msra.mxu1 %v3719_v26  ;;  %460 = vmatprep.subr.bf16.mxu0 %v4448_v0  ;;  %v3880_v26 = vld [vmem:[%s5896_s1 + $0x150] sm:$0xff]  }
  0x30   :  { %1216 = vmatprep.subr.bf16.mxu1 %v4448_v0 }
  0x32   :  { %461 = vmatpush2.bf16.msra.mxu0 %v3720_v27  ;;  %v3881_v27 = vld [vmem:[%s5896_s1 + $0x1d0] sm:$0xff]  }
  0x33   :  { %1217 = vmatpush2.bf16.msra.mxu1 %v3721_v28  ;;  %462 = vmatprep.subr.bf16.mxu0 %v4448_v0  ;;  %v3784_v28 = vld [vmem:[%s5897_s0 + $0x70] ss:$8 sps:$4 sm:$0xff]  }
  0x34   :  { %1218 = vmatprep.subr.bf16.mxu1 %v4448_v0 }
  0x36   :  { %463 = vmatpush2.bf16.msra.mxu0 %v3722_v29  ;;  %v3785_v29 = vld [vmem:[%s5897_s0 + $0x1f8] ss:$8 sps:$4 sm:$0xff]  }
  0x37   :  { %1219 = vmatpush2.bf16.msra.mxu1 %v3723_v30  ;;  %464 = vmatprep.subr.bf16.mxu0 %v4448_v0  ;;  %v3786_v30 = vld [vmem:[%s5897_s0 + $0x84] ss:$8 sps:$4 sm:$0xff]  }
  0x38   :  { %1220 = vmatprep.subr.bf16.mxu1 %v4448_v0 }
  0x3a   :  { %465 = vmatpush2.bf16.msra.mxu0 %v3724_v31  ;;  %v3788_v31 = vld [vmem:[%s5897_s0 + $0x20c] ss:$8 sps:$4 sm:$0xff]  }
  0x3b   :  { %1221 = vmatpush2.bf16.msra.mxu1 %v3725_v32  ;;  %466 = vmatprep.subr.bf16.mxu0 %v4448_v0  ;;  %v3894_v32 = vld [vmem:[%s5896_s1 + $0x148] sm:$0xff]  }
  0x3c   :  { %1222 = vmatprep.subr.bf16.mxu1 %v4448_v0 }
  0x3e   :  { %467 = vmatpush2.bf16.msra.mxu0 %v3726_v33  ;;  %v3895_v33 = vld [vmem:[%s5896_s1 + $0x1c8] sm:$0xff]  }
  0x3f   :  { %1223 = vmatpush2.bf16.msra.mxu1 %v3727_v34  ;;  %1949 = vmatprep.subr.bf16.mxu0 %v4448_v0  ;;  %v3790_v34 = vld [vmem:[%s5897_s0 + $0x80] ss:$8 sps:$4 sm:$0xff]  }
  0x40   :  { %2706 = vmatprep.subr.bf16.mxu1 %v4448_v0 }
  0x41   :  { %469 = vmatmul.mubr.bf16.vlgmr.msra.gmra.mxu0 %v3728_v35  ;;  %v3791_v35 = vld [vmem:[%s5897_s0 + $0x208] ss:$8 sps:$4 sm:$0xff]  }
  0x42   :  { %1225 = vmatmul.mubr.bf16.vlgmr.msra.gmra.mxu1 %v3731_v36  ;;  %1950 = vmatpush1.bf16.msra.mxu0 %v3734_v37  ;;  %v3794_v36 = vld [vmem:[%s5897_s0 + $0x94] ss:$8 sps:$4 sm:$0xff]  }
  0x43   :  { %2707 = vmatpush1.bf16.msra.mxu1 %v3735_v38  ;;  %476 = vmatprep.mubr.bf16.mxu0 %v3736_v39  ;;  %v3796_v37 = vld [vmem:[%s5897_s0 + $0x21c] ss:$8 sps:$4 sm:$0xff]  }
  0x44   :  { %1232 = vmatprep.mubr.bf16.mxu1 %v3738_v40  ;;  %1951 = vmatprep.subr.bf16.mxu0 %v4448_v0  ;;  %v3902_v38 = vld [vmem:[%s5896_s1 + $0x140] sm:$0xff]   ;;  %v3798_v40 = vld [vmem:[%s5897_s0 + $0x90] ss:$8 sps:$4 sm:$0xff]  }
  0x45   :  { %2708 = vmatprep.subr.bf16.mxu1 %v4448_v0  ;;  %v3903_v39 = vld [vmem:[%s5896_s1 + $0x1c0] sm:$0xff]  }
  0x46   :  { %1952 = vmatpush1.bf16.msra.mxu0 %v3742_v41  ;;  %v3802_v41 = vld [vmem:[%s5897_s0 + $0xa4] ss:$8 sps:$4 sm:$0xff]  }
  0x47   :  { %2709 = vmatpush1.bf16.msra.mxu1 %v3743_v42  ;;  %1953 = vmatprep.subr.bf16.mxu0 %v4448_v0  ;;  %v3804_v42 = vld [vmem:[%s5897_s0 + $0x22c] ss:$8 sps:$4 sm:$0xff]  }
  0x48   :  { %2710 = vmatprep.subr.bf16.mxu1 %v4448_v0 }
  0x49   :  { %477 = vmatmul.mubr.bf16.gmra.mxu0 %v3740_v43  ;;  %v3806_v43 = vld [vmem:[%s5897_s0 + $0xa0] ss:$8 sps:$4 sm:$0xff]  }
  0x4a   :  { %1233 = vmatmul.mubr.bf16.gmra.mxu1 %v3741_v44  ;;  %484 = vmatprep.mubr.bf16.mxu0 %v3744_v45  ;;  %v3807_v44 = vld [vmem:[%s5897_s0 + $0x228] ss:$8 sps:$4 sm:$0xff]   ;;  %v3808_v45 = vld [vmem:[%s5897_s0 + $0xb4] ss:$8 sps:$4 sm:$0xff]  }
  0x4b   :  { %1240 = vmatprep.mubr.bf16.mxu1 %v3746_v46  ;;  %1954 = vmatpush1.bf16.msra.mxu0 %v3756_v47  ;;  %v3810_v46 = vld [vmem:[%s5897_s0 + $0x23c] ss:$8 sps:$4 sm:$0xff]   ;;  %v3812_v47 = vld [vmem:[%s5897_s0 + $0xb0] ss:$8 sps:$4 sm:$0xff]  }
  0x4c   :  { %2711 = vmatpush1.bf16.msra.mxu1 %v3757_v48  ;;  %1955 = vmatprep.subr.bf16.mxu0 %v4448_v0  ;;  %v3813_v48 = vld [vmem:[%s5897_s0 + $0x238] ss:$8 sps:$4 sm:$0xff]  }
  0x4d   :  { %2712 = vmatprep.subr.bf16.mxu1 %v4448_v0 }
  0x4f   :  { %1956 = vmatpush1.bf16.msra.mxu0 %v3768_v49  ;;  %v3816_v49 = vld [vmem:[%s5897_s0 + $0xc4] ss:$8 sps:$4 sm:$0xff]  }
  0x50   :  { %2713 = vmatpush1.bf16.msra.mxu1 %v3769_v50  ;;  %1957 = vmatprep.subr.bf16.mxu0 %v4448_v0  ;;  %v3818_v50 = vld [vmem:[%s5897_s0 + $0x24c] ss:$8 sps:$4 sm:$0xff]  }
  0x51   :  { %485 = vmatmul.mubr.bf16.gmra.mxu0 %v3748_v51  ;;  %2714 = vmatprep.subr.bf16.mxu1 %v4448_v0  ;;  %v3820_v51 = vld [vmem:[%s5897_s0 + $0xc0] ss:$8 sps:$4 sm:$0xff]  }
  0x52   :  { %1241 = vmatmul.mubr.bf16.gmra.mxu1 %v3749_v52  ;;  %492 = vmatprep.mubr.bf16.mxu0 %v3750_v53  ;;  %v3821_v52 = vld [vmem:[%s5897_s0 + $0x248] ss:$8 sps:$4 sm:$0xff]   ;;  %v3824_v53 = vld [vmem:[%s5897_s0 + $0xd4] ss:$8 sps:$4 sm:$0xff]  }
  0x53   :  { %1248 = vmatprep.mubr.bf16.mxu1 %v3752_v54  ;;  %1958 = vmatpush1.bf16.msra.mxu0 %v3778_v55  ;;  %v3826_v54 = vld [vmem:[%s5897_s0 + $0x25c] ss:$8 sps:$4 sm:$0xff]   ;;  %v3828_v55 = vld [vmem:[%s5897_s0 + $0xd0] ss:$8 sps:$4 sm:$0xff]  }
  0x54   :  { %2715 = vmatpush1.bf16.msra.mxu1 %v3779_v56  ;;  %1959 = vmatprep.subr.bf16.mxu0 %v4448_v0  ;;  %v3829_v56 = vld [vmem:[%s5897_s0 + $0x258] ss:$8 sps:$4 sm:$0xff]  }
  0x55   :  { %2716 = vmatprep.subr.bf16.mxu1 %v4448_v0 }
  0x57   :  { %1960 = vmatpush1.bf16.msra.mxu0 %v3792_v58  ;;  %v3832_v58 = vld [vmem:[%s5897_s0 + $0x26c] ss:$8 sps:$4 sm:$0xff]  }
  0x58   :  { %2717 = vmatpush1.bf16.msra.mxu1 %v3793_v59  ;;  %1961 = vmatprep.subr.bf16.mxu0 %v4448_v0  ;;  %v3834_v59 = vld [vmem:[%s5897_s0 + $0xe0] ss:$8 sps:$4 sm:$0xff]  }
  0x59   :  { %493 = vmatmul.mubr.bf16.gmra.mxu0 %v3754_v57  ;;  %2718 = vmatprep.subr.bf16.mxu1 %v4448_v0  ;;  %v3830_v57 = vld [vmem:[%s5897_s0 + $0xe4] ss:$8 sps:$4 sm:$0xff]  }
  0x5a   :  { %1249 = vmatmul.mubr.bf16.gmra.mxu1 %v3755_v60  ;;  %500 = vmatprep.mubr.bf16.mxu0 %v3758_v61  ;;  %v3835_v60 = vld [vmem:[%s5897_s0 + $0x268] ss:$8 sps:$4 sm:$0xff]   ;;  %v3838_v61 = vld [vmem:[%s5897_s0 + $0xf4] ss:$8 sps:$4 sm:$0xff]  }
  0x5b   :  { %1256 = vmatprep.mubr.bf16.mxu1 %v3760_v62  ;;  %1962 = vmatpush1.bf16.msra.mxu0 %v3800_v63  ;;  %v3840_v62 = vld [vmem:[%s5897_s0 + $0x27c] ss:$8 sps:$4 sm:$0xff]   ;;  %v3842_v63 = vld [vmem:[%s5897_s0 + $0xf0] ss:$8 sps:$4 sm:$0xff]  }
  0x5c   :  { %2719 = vmatpush1.bf16.msra.mxu1 %v3801_v1  ;;  %1963 = vmatprep.subr.bf16.mxu0 %v4448_v0  ;;  %v3843_v1 = vld [vmem:[%s5897_s0 + $0x278] ss:$8 sps:$4 sm:$0xff]  }
  0x5d   :  { %2720 = vmatprep.subr.bf16.mxu1 %v4448_v0 }
  0x5f   :  { %1964 = vmatpush1.bf16.msra.mxu0 %v3814_v3  ;;  %v3848_v3 = vld [vmem:[%s5897_s0 + $0x28c] ss:$8 sps:$4 sm:$0xff]  }
  0x60   :  { %2721 = vmatpush1.bf16.msra.mxu1 %v3815_v4  ;;  %1965 = vmatprep.subr.bf16.mxu0 %v4448_v0  ;;  %v3850_v4 = vld [vmem:[%s5897_s0 + $0x100] ss:$8 sps:$4 sm:$0xff]  }
  0x61   :  { %501 = vmatmul.mubr.bf16.gmra.mxu0 %v3762_v2  ;;  %2722 = vmatprep.subr.bf16.mxu1 %v4448_v0  ;;  %v3846_v2 = vld [vmem:[%s5897_s0 + $0x104] ss:$8 sps:$4 sm:$0xff]  }
  0x62   :  { %1257 = vmatmul.mubr.bf16.gmra.mxu1 %v3763_v5  ;;  %508 = vmatprep.mubr.bf16.mxu0 %v3764_v6  ;;  %v3851_v5 = vld [vmem:[%s5897_s0 + $0x288] ss:$8 sps:$4 sm:$0xff]   ;;  %v3852_v6 = vld [vmem:[%s5897_s0 + $0x114] ss:$8 sps:$4 sm:$0xff]  }
  0x63   :  { %1264 = vmatprep.mubr.bf16.mxu1 %v3766_v7  ;;  %1966 = vmatpush2.bf16.msra.mxu0 %v3822_v8  ;;  %v3854_v7 = vld [vmem:[%s5897_s0 + $0x29c] ss:$8 sps:$4 sm:$0xff]   ;;  %v3856_v8 = vld [vmem:[%s5897_s0 + $0x110] ss:$8 sps:$4 sm:$0xff]  }
  0x64   :  { %2723 = vmatpush2.bf16.msra.mxu1 %v3823_v9  ;;  %1967 = vmatprep.subr.bf16.mxu0 %v4448_v0  ;;  %v3857_v9 = vld [vmem:[%s5897_s0 + $0x298] ss:$8 sps:$4 sm:$0xff]  }
  0x65   :  { %2724 = vmatprep.subr.bf16.mxu1 %v4448_v0 }
  0x67   :  { %1968 = vmatpush2.bf16.msra.mxu0 %v3836_v10  ;;  %v3860_v10 = vld [vmem:[%s5897_s0 + $0x124] ss:$8 sps:$4 sm:$0xff]  }
  0x68   :  { %2725 = vmatpush2.bf16.msra.mxu1 %v3837_v11  ;;  %1969 = vmatprep.subr.bf16.mxu0 %v4448_v0  ;;  %v3862_v11 = vld [vmem:[%s5897_s0 + $0x2ac] ss:$8 sps:$4 sm:$0xff]  }
  0x69   :  { %509 = vmatmul.mubr.bf16.gmra.mxu0 %v3770_v12  ;;  %2726 = vmatprep.subr.bf16.mxu1 %v4448_v0  ;;  %v3864_v12 = vld [vmem:[%s5897_s0 + $0x120] ss:$8 sps:$4 sm:$0xff]  }
  0x6a   :  { %1265 = vmatmul.mubr.bf16.gmra.mxu1 %v3771_v13  ;;  %516 = vmatprep.mubr.bf16.mxu0 %v3772_v14  ;;  %v3865_v13 = vld [vmem:[%s5897_s0 + $0x2a8] ss:$8 sps:$4 sm:$0xff]   ;;  %v3866_v14 = vld [vmem:[%s5897_s0 + $0x134] ss:$8 sps:$4 sm:$0xff]  }
  0x6b   :  { %1272 = vmatprep.mubr.bf16.mxu1 %v3774_v15  ;;  %1970 = vmatpush2.bf16.msra.mxu0 %v3844_v16  ;;  %v3868_v15 = vld [vmem:[%s5897_s0 + $0x2bc] ss:$8 sps:$4 sm:$0xff]   ;;  %v3872_v16 = vld [vmem:[%s5897_s0 + $0x130] ss:$8 sps:$4 sm:$0xff]  }
  0x6c   :  { %2727 = vmatpush2.bf16.msra.mxu1 %v3845_v17  ;;  %1971 = vmatprep.subr.bf16.mxu0 %v4448_v0  ;;  %v3873_v17 = vld [vmem:[%s5897_s0 + $0x2b8] ss:$8 sps:$4 sm:$0xff]  }
  0x6d   :  { %2728 = vmatprep.subr.bf16.mxu1 %v4448_v0 }
  0x6f   :  { %1972 = vmatpush2.bf16.msra.mxu0 %v3858_v19  ;;  %v3876_v19 = vld [vmem:[%s5897_s0 + $0x2cc] ss:$8 sps:$4 sm:$0xff]  }
  0x70   :  { %2729 = vmatpush2.bf16.msra.mxu1 %v3859_v20  ;;  %1973 = vmatprep.subr.bf16.mxu0 %v4448_v0  ;;  %v3878_v20 = vld [vmem:[%s5897_s0 + $0x140] ss:$8 sps:$4 sm:$0xff]  }
  0x71   :  { %517 = vmatmul.mubr.bf16.gmra.mxu0 %v3776_v18  ;;  %2730 = vmatprep.subr.bf16.mxu1 %v4448_v0  ;;  %v3874_v18 = vld [vmem:[%s5897_s0 + $0x144] ss:$8 sps:$4 sm:$0xff]  }
  0x72   :  { %1273 = vmatmul.mubr.bf16.gmra.mxu1 %v3777_v21  ;;  %524 = vmatprep.mubr.bf16.mxu0 %v3780_v22  ;;  %v3879_v21 = vld [vmem:[%s5897_s0 + $0x2c8] ss:$8 sps:$4 sm:$0xff]   ;;  %v3882_v22 = vld [vmem:[%s5897_s0 + $0x154] ss:$8 sps:$4 sm:$0xff]  }
  0x73   :  { %1280 = vmatprep.mubr.bf16.mxu1 %v3782_v23  ;;  %1974 = vmatpush2.bf16.msra.mxu0 %v3870_v24  ;;  %v3884_v23 = vld [vmem:[%s5897_s0 + $0x2dc] ss:$8 sps:$4 sm:$0xff]   ;;  %v3886_v24 = vld [vmem:[%s5897_s0 + $0x150] ss:$8 sps:$4 sm:$0xff]  }
  0x74   :  { %2731 = vmatpush2.bf16.msra.mxu1 %v3871_v25  ;;  %1975 = vmatprep.subr.bf16.mxu0 %v4448_v0  ;;  %v3887_v25 = vld [vmem:[%s5897_s0 + $0x2d8] ss:$8 sps:$4 sm:$0xff]  }
  0x75   :  { %2732 = vmatprep.subr.bf16.mxu1 %v4448_v0 }
  0x77   :  { %1976 = vmatpush2.bf16.msra.mxu0 %v3880_v26  ;;  %v3888_v26 = vld [vmem:[%s5897_s0 + $0x164] ss:$8 sps:$4 sm:$0xff]  }
  0x78   :  { %2733 = vmatpush2.bf16.msra.mxu1 %v3881_v27  ;;  %1977 = vmatprep.subr.bf16.mxu0 %v4448_v0  ;;  %v3890_v27 = vld [vmem:[%s5897_s0 + $0x2ec] ss:$8 sps:$4 sm:$0xff]  }
  0x79   :  { %525 = vmatmul.mubr.bf16.gmra.mxu0 %v3784_v28  ;;  %2734 = vmatprep.subr.bf16.mxu1 %v4448_v0  ;;  %v3892_v28 = vld [vmem:[%s5897_s0 + $0x160] ss:$8 sps:$4 sm:$0xff]  }
  0x7a   :  { %1281 = vmatmul.mubr.bf16.gmra.mxu1 %v3785_v29  ;;  %532 = vmatprep.mubr.bf16.mxu0 %v3786_v30  ;;  %v3893_v29 = vld [vmem:[%s5897_s0 + $0x2e8] ss:$8 sps:$4 sm:$0xff]   ;;  %v3896_v30 = vld [vmem:[%s5897_s0 + $0x174] ss:$8 sps:$4 sm:$0xff]  }
  0x7b   :  { %1288 = vmatprep.mubr.bf16.mxu1 %v3788_v31  ;;  %1978 = vmatpush2.bf16.msra.mxu0 %v3894_v32  ;;  %v3898_v31 = vld [vmem:[%s5897_s0 + $0x2fc] ss:$8 sps:$4 sm:$0xff]  }
  0x7c   :  { %2735 = vmatpush2.bf16.msra.mxu1 %v3895_v33  ;;  %1979 = vmatprep.subr.bf16.mxu0 %v4448_v0  ;;  %v60_v32 = vld [vmem:[%s5897_s0 + $0x180] sm:$0xff]  ;;  %v3155_v33 = vld [vmem:[%s5897_s0 + $0x308] sm:$0xff] }
  0x7d   :  { %2736 = vmatprep.subr.bf16.mxu1 %v4448_v0  ;;  %v3799_v0 = vld [vmem:[%s5897_s0 + $0x218] ss:$8 sps:$4 sm:$0xff]  }
  0x7f   :  { %1980 = vmatpush2.bf16.msra.mxu0 %v3902_v38  ;;  %v3089_v38 = vcombine.low %v60_v32, %v60_v32 }
  0x80   :  { %2737 = vmatpush2.bf16.msra.mxu1 %v3903_v39  ;;  %v3236_v39 = vcombine.low %v3155_v33, %v3155_v33 }
  0x81   :  { %533 = vmatmul.mubr.bf16.gmra.mxu0 %v3790_v34  ;;  %v3900_v34 = vld [vmem:[%s5897_s0 + $0x170] ss:$8 sps:$4 sm:$0xff]  }
  0x82   :  { %1289 = vmatmul.mubr.bf16.gmra.mxu1 %v3791_v35  ;;  %540 = vmatprep.mubr.bf16.mxu0 %v3794_v36  ;;  %v3901_v35 = vld [vmem:[%s5897_s0 + $0x2f8] ss:$8 sps:$4 sm:$0xff]   ;;  %v3090_v36 = vcombine.high %v60_v32, %v60_v32 }
  0x83   :  { %1296 = vmatprep.mubr.bf16.mxu1 %v3796_v37  ;;  %v3237_v37 = vcombine.high %v3155_v33, %v3155_v33  ;;  %v3937_v33 = vld [vmem:[%s5897_s0 + $0x4dc] ss:$8 sps:$4 sm:$0xff]  }
  0x89   :  { %541 = vmatmul.mubr.bf16.gmra.mxu0 %v3798_v40  ;;  %v3910_v40 = vld [vmem:[%s5897_s0 + $0x314] ss:$8 sps:$4 sm:$0xff]  }
  0x8a   :  { %1297 = vmatmul.mubr.bf16.gmra.mxu1 %v3799_v0  ;;  %548 = vmatprep.mubr.bf16.mxu0 %v3802_v41  ;;  %v3913_v0 = vld [vmem:[%s5897_s0 + $0x49c] ss:$8 sps:$4 sm:$0xff]  }
  0x8b   :  { %1304 = vmatprep.mubr.bf16.mxu1 %v3804_v42 }
  0x91   :  { %549 = vmatmul.mubr.bf16.gmra.mxu0 %v3806_v43 }
  0x92   :  { %1305 = vmatmul.mubr.bf16.gmra.mxu1 %v3807_v44  ;;  %556 = vmatprep.mubr.bf16.mxu0 %v3808_v45 }
  0x93   :  { %1312 = vmatprep.mubr.bf16.mxu1 %v3810_v46  ;;  %v3908_v46 = vld [vmem:[%s5897_s0 + $0x310] ss:$8 sps:$4 sm:$0xff]  }
  0x99   :  { %557 = vmatmul.mubr.bf16.gmra.mxu0 %v3812_v47 }
  0x9a   :  { %1313 = vmatmul.mubr.bf16.gmra.mxu1 %v3813_v48  ;;  %564 = vmatprep.mubr.bf16.mxu0 %v3816_v49  ;;  %v3911_v48 = vld [vmem:[%s5897_s0 + $0x498] ss:$8 sps:$4 sm:$0xff]   ;;  %v3914_v49 = vld [vmem:[%s5897_s0 + $0x324] ss:$8 sps:$4 sm:$0xff]  }
  0x9b   :  { %1320 = vmatprep.mubr.bf16.mxu1 %v3818_v50 }
  0xa1   :  { %565 = vmatmul.mubr.bf16.gmra.mxu0 %v3820_v51  ;;  %v3916_v51 = vld [vmem:[%s5897_s0 + $0x4ac] ss:$8 sps:$4 sm:$0xff]  }
  0xa2   :  { %1321 = vmatmul.mubr.bf16.gmra.mxu1 %v3821_v52  ;;  %572 = vmatprep.mubr.bf16.mxu0 %v3824_v53 }
  0xa3   :  { %1328 = vmatprep.mubr.bf16.mxu1 %v3826_v54 }
  0xa9   :  { %573 = vmatmul.mubr.bf16.gmra.mxu0 %v3828_v55 }
  0xaa   :  { %1329 = vmatmul.mubr.bf16.gmra.mxu1 %v3829_v56  ;;  %580 = vmatprep.mubr.bf16.mxu0 %v3830_v57 }
  0xab   :  { %1336 = vmatprep.mubr.bf16.mxu1 %v3832_v58  ;;  %v3918_v58 = vld [vmem:[%s5897_s0 + $0x320] ss:$8 sps:$4 sm:$0xff]  }
  0xb1   :  { %581 = vmatmul.mubr.bf16.gmra.mxu0 %v3834_v59 }
  0xb2   :  { %1337 = vmatmul.mubr.bf16.gmra.mxu1 %v3835_v60  ;;  %588 = vmatprep.mubr.bf16.mxu0 %v3838_v61  ;;  %v3919_v60 = vld [vmem:[%s5897_s0 + $0x4a8] ss:$8 sps:$4 sm:$0xff]   ;;  %v3920_v61 = vld [vmem:[%s5897_s0 + $0x334] ss:$8 sps:$4 sm:$0xff]  }
  0xb3   :  { %1344 = vmatprep.mubr.bf16.mxu1 %v3840_v62 }
  0xb9   :  { %589 = vmatmul.mubr.bf16.gmra.mxu0 %v3842_v63 }
  0xba   :  { %1345 = vmatmul.mubr.bf16.gmra.mxu1 %v3843_v1  ;;  %596 = vmatprep.mubr.bf16.mxu0 %v3846_v2  ;;  %v3922_v1 = vld [vmem:[%s5897_s0 + $0x4bc] ss:$8 sps:$4 sm:$0xff]  }
  0xbb   :  { %1352 = vmatprep.mubr.bf16.mxu1 %v3848_v3 }
  0xc1   :  { %597 = vmatmul.mubr.bf16.gmra.mxu0 %v3850_v4 }
  0xc2   :  { %1353 = vmatmul.mubr.bf16.gmra.mxu1 %v3851_v5  ;;  %604 = vmatprep.mubr.bf16.mxu0 %v3852_v6 }
  0xc3   :  { %1360 = vmatprep.mubr.bf16.mxu1 %v3854_v7 }
  0xc9   :  { %605 = vmatmul.mubr.bf16.gmra.mxu0 %v3856_v8 }
  0xca   :  { %1361 = vmatmul.mubr.bf16.gmra.mxu1 %v3857_v9  ;;  %612 = vmatprep.mubr.bf16.mxu0 %v3860_v10 }
  0xcb   :  { %1368 = vmatprep.mubr.bf16.mxu1 %v3862_v11  ;;  %v3924_v11 = vld [vmem:[%s5897_s0 + $0x330] ss:$8 sps:$4 sm:$0xff]  }
  0xd1   :  { %613 = vmatmul.mubr.bf16.gmra.mxu0 %v3864_v12 }
  0xd2   :  { %1369 = vmatmul.mubr.bf16.gmra.mxu1 %v3865_v13  ;;  %620 = vmatprep.mubr.bf16.mxu0 %v3866_v14  ;;  %v3925_v13 = vld [vmem:[%s5897_s0 + $0x4b8] ss:$8 sps:$4 sm:$0xff]   ;;  %v3928_v14 = vld [vmem:[%s5897_s0 + $0x344] ss:$8 sps:$4 sm:$0xff]  }
  0xd3   :  { %1376 = vmatprep.mubr.bf16.mxu1 %v3868_v15 }
  0xd9   :  { %621 = vmatmul.mubr.bf16.gmra.mxu0 %v3872_v16 }
  0xda   :  { %1377 = vmatmul.mubr.bf16.gmra.mxu1 %v3873_v17  ;;  %628 = vmatprep.mubr.bf16.mxu0 %v3874_v18  ;;  %v3931_v17 = vld [vmem:[%s5897_s0 + $0x4cc] ss:$8 sps:$4 sm:$0xff]  }
  0xdb   :  { %1384 = vmatprep.mubr.bf16.mxu1 %v3876_v19 }
  0xe1   :  { %629 = vmatmul.mubr.bf16.gmra.mxu0 %v3878_v20 }
  0xe2   :  { %1385 = vmatmul.mubr.bf16.gmra.mxu1 %v3879_v21  ;;  %636 = vmatprep.mubr.bf16.mxu0 %v3882_v22 }
  0xe3   :  { %1392 = vmatprep.mubr.bf16.mxu1 %v3884_v23 }
  0xe9   :  { %637 = vmatmul.mubr.bf16.gmra.mxu0 %v3886_v24 }
  0xea   :  { %1393 = vmatmul.mubr.bf16.gmra.mxu1 %v3887_v25  ;;  %644 = vmatprep.mubr.bf16.mxu0 %v3888_v26 }
  0xeb   :  { %1400 = vmatprep.mubr.bf16.mxu1 %v3890_v27  ;;  %v3926_v27 = vld [vmem:[%s5897_s0 + $0x340] ss:$8 sps:$4 sm:$0xff]  }
  0xf1   :  { %645 = vmatmul.mubr.bf16.gmra.mxu0 %v3892_v28 }
  0xf2   :  { %1401 = vmatmul.mubr.bf16.gmra.mxu1 %v3893_v29  ;;  %652 = vmatprep.mubr.bf16.mxu0 %v3896_v30  ;;  %v3929_v29 = vld [vmem:[%s5897_s0 + $0x4c8] ss:$8 sps:$4 sm:$0xff]   ;;  %v3934_v30 = vld [vmem:[%s5897_s0 + $0x354] ss:$8 sps:$4 sm:$0xff]  }
  0xf3   :  { %1408 = vmatprep.mubr.bf16.mxu1 %v3898_v31 }
  0xf9   :  { %653 = vmatmul.mubr.bf16.gmra.mxu0 %v3900_v34 }
  0xfa   :  { %1409 = vmatmul.mubr.bf16.gmra.mxu1 %v3901_v35  ;;  %660 = vmatprep.mubr.bf16.mxu0 %v3090_v36 }
  0xfb   :  { %1416 = vmatprep.mubr.bf16.mxu1 %v3237_v37 }
 0x101   :  { %v470_v41 = vpop.f32.mrf.mxu0  ;;  %661 = vmatmul.mubr.bf16.gmra.mxu0 %v3089_v38 }
 0x102   :  { %4056 = vtanh.f32 %v470_v41  ;;  %v1226_v42 = vpop.f32.mrf.mxu1  ;;  %1417 = vmatmul.mubr.bf16.gmra.mxu1 %v3236_v39  ;;  %1981 = vmatprep.mubr.bf16.mxu0 %v3910_v40 }
 0x103   :  { %4058 = vtanh.f32 %v1226_v42  ;;  %v472_v43 = vpop.f32.mrf.mxu0  ;;  %2738 = vmatprep.mubr.bf16.mxu1 %v3913_v0  ;;  %v3932_v42 = vld [vmem:[%s5897_s0 + $0x350] ss:$8 sps:$4 sm:$0xff]  }
 0x104   :  { %v1228_v44 = vpop.f32.mrf.mxu1 }
 0x105   :  { %v473_v45 = vpop.f32.mrf.mxu0  ;;  %v3935_v44 = vld [vmem:[%s5897_s0 + $0x4d8] ss:$8 sps:$4 sm:$0xff]  }
 0x106   :  { %4060 = vtanh.f32 %v473_v45  ;;  %v1229_v47 = vpop.f32.mrf.mxu1  ;;  %v3940_v45 = vld [vmem:[%s5897_s0 + $0x364] ss:$8 sps:$4 sm:$0xff]  }
 0x107   :  { %4062 = vtanh.f32 %v1229_v47  ;;  %v475_v50 = vpop.f32.mrf.mxu0 }
 0x108   :  { %v1231_v52 = vpop.f32.mrf.mxu1 }
 0x109   :  { %v478_v53 = vpop.f32.mrf.mxu0  ;;  %1982 = vmatmul.mubr.bf16.vlgmr.msra.gmra.mxu0 %v3908_v46 }
 0x10a   :  { %4064 = vtanh.f32 %v478_v53  ;;  %v1234_v54 = vpop.f32.mrf.mxu1  ;;  %2739 = vmatmul.mubr.bf16.vlgmr.msra.gmra.mxu1 %v3911_v48  ;;  %1989 = vmatprep.mubr.bf16.mxu0 %v3914_v49  ;;  %v3943_v48 = vld [vmem:[%s5897_s0 + $0x4ec] ss:$8 sps:$4 sm:$0xff]  }
 0x10b   :  { %4066 = vtanh.f32 %v1234_v54  ;;  %v480_v55 = vpop.f32.mrf.mxu0  ;;  %2746 = vmatprep.mubr.bf16.mxu1 %v3916_v51 }
 0x10c   :  { %v1236_v56 = vpop.f32.mrf.mxu1 }
 0x10d   :  { %v481_v57 = vpop.f32.mrf.mxu0 }
 0x10e   :  { %4068 = vtanh.f32 %v481_v57  ;;  %v1237_v59 = vpop.f32.mrf.mxu1 }
 0x10f   :  { %v4057_v62 = vpop.eup %4056  ;;  %4070 = vtanh.f32 %v1237_v59  ;;  %v483_v63 = vpop.f32.mrf.mxu0 }
 0x110   :  { %v4059_v2 = vpop.eup %4058  ;;  %717 = vst [vmem:[%s5898_s2] sm:$0xff] %v4057_v62  ;;  %v1239_v3 = vpop.f32.mrf.mxu1 }
 0x111   :  { %3254 = vst [vmem:[%s5898_s2 + $0x188] sm:$0xff] %v4059_v2  ;;  %v486_v4 = vpop.f32.mrf.mxu0  ;;  %1990 = vmatmul.mubr.bf16.gmra.mxu0 %v3918_v58  ;;  %v3938_v58 = vld [vmem:[%s5897_s0 + $0x360] ss:$8 sps:$4 sm:$0xff]  }
 0x112   :  { %4072 = vtanh.f32 %v486_v4  ;;  %v1242_v5 = vpop.f32.mrf.mxu1  ;;  %2747 = vmatmul.mubr.bf16.gmra.mxu1 %v3919_v60  ;;  %1997 = vmatprep.mubr.bf16.mxu0 %v3920_v61  ;;  %v3941_v60 = vld [vmem:[%s5897_s0 + $0x4e8] ss:$8 sps:$4 sm:$0xff]   ;;  %v3946_v61 = vld [vmem:[%s5897_s0 + $0x374] ss:$8 sps:$4 sm:$0xff]  }
 0x113   :  { %v4061_v6 = vpop.eup %4060  ;;  %4074 = vtanh.f32 %v1242_v5  ;;  %v488_v7 = vpop.f32.mrf.mxu0  ;;  %2754 = vmatprep.mubr.bf16.mxu1 %v3922_v1  ;;  %v3949_v1 = vld [vmem:[%s5897_s0 + $0x4fc] ss:$8 sps:$4 sm:$0xff]  }
 0x114   :  { %v4063_v8 = vpop.eup %4062  ;;  %718 = vst [vmem:[%s5898_s2 + $0x8] sm:$0xff] %v4061_v6  ;;  %v1244_v9 = vpop.f32.mrf.mxu1 }
 0x115   :  { %3255 = vst [vmem:[%s5898_s2 + $0x190] sm:$0xff] %v4063_v8  ;;  %v489_v10 = vpop.f32.mrf.mxu0 }
 0x116   :  { %4076 = vtanh.f32 %v489_v10  ;;  %v1245_v12 = vpop.f32.mrf.mxu1 }
 0x117   :  { %v4065_v15 = vpop.eup %4064  ;;  %4078 = vtanh.f32 %v1245_v12  ;;  %v491_v16 = vpop.f32.mrf.mxu0 }
 0x118   :  { %v4067_v18 = vpop.eup %4066  ;;  %719 = vst [vmem:[%s5898_s2 + $0x10] sm:$0xff] %v4065_v15  ;;  %v1247_v19 = vpop.f32.mrf.mxu1 }
 0x119   :  { %3256 = vst [vmem:[%s5898_s2 + $0x198] sm:$0xff] %v4067_v18  ;;  %v494_v20 = vpop.f32.mrf.mxu0  ;;  %1998 = vmatmul.mubr.bf16.gmra.mxu0 %v3924_v11  ;;  %v3944_v11 = vld [vmem:[%s5897_s0 + $0x370] ss:$8 sps:$4 sm:$0xff]  }
 0x11a   :  { %4080 = vtanh.f32 %v494_v20  ;;  %v1250_v21 = vpop.f32.mrf.mxu1  ;;  %2755 = vmatmul.mubr.bf16.gmra.mxu1 %v3925_v13  ;;  %2005 = vmatprep.mubr.bf16.mxu0 %v3928_v14  ;;  %v3947_v13 = vld [vmem:[%s5897_s0 + $0x4f8] ss:$8 sps:$4 sm:$0xff]   ;;  %v3952_v14 = vld [vmem:[%s5897_s0 + $0x384] ss:$8 sps:$4 sm:$0xff]  }
 0x11b   :  { %v4069_v22 = vpop.eup %4068  ;;  %4082 = vtanh.f32 %v1250_v21  ;;  %v496_v23 = vpop.f32.mrf.mxu0  ;;  %2762 = vmatprep.mubr.bf16.mxu1 %v3931_v17  ;;  %v3955_v17 = vld [vmem:[%s5897_s0 + $0x50c] ss:$8 sps:$4 sm:$0xff]  }
 0x11c   :  { %v4071_v24 = vpop.eup %4070  ;;  %720 = vst [vmem:[%s5898_s2 + $0x18] sm:$0xff] %v4069_v22  ;;  %v1252_v25 = vpop.f32.mrf.mxu1 }
 0x11d   :  { %3257 = vst [vmem:[%s5898_s2 + $0x1a0] sm:$0xff] %v4071_v24  ;;  %v497_v26 = vpop.f32.mrf.mxu0 }
 0x11e   :  { %4084 = vtanh.f32 %v497_v26  ;;  %v1253_v28 = vpop.f32.mrf.mxu1 }
 0x11f   :  { %v4073_v31 = vpop.eup %4072  ;;  %4086 = vtanh.f32 %v1253_v28  ;;  %v499_v32 = vpop.f32.mrf.mxu0 }
 0x120   :  { %v4075_v34 = vpop.eup %4074  ;;  %721 = vst [vmem:[%s5898_s2 + $0x20] sm:$0xff] %v4073_v31  ;;  %v1255_v35 = vpop.f32.mrf.mxu1 }
 0x121   :  { %3258 = vst [vmem:[%s5898_s2 + $0x1a8] sm:$0xff] %v4075_v34  ;;  %v502_v36 = vpop.f32.mrf.mxu0  ;;  %2006 = vmatmul.mubr.bf16.gmra.mxu0 %v3926_v27  ;;  %v3950_v27 = vld [vmem:[%s5897_s0 + $0x380] ss:$8 sps:$4 sm:$0xff]  }
 0x122   :  { %4088 = vtanh.f32 %v502_v36  ;;  %v1258_v37 = vpop.f32.mrf.mxu1  ;;  %2763 = vmatmul.mubr.bf16.gmra.mxu1 %v3929_v29  ;;  %2013 = vmatprep.mubr.bf16.mxu0 %v3934_v30  ;;  %v3953_v29 = vld [vmem:[%s5897_s0 + $0x508] ss:$8 sps:$4 sm:$0xff]   ;;  %v3958_v30 = vld [vmem:[%s5897_s0 + $0x394] ss:$8 sps:$4 sm:$0xff]  }
 0x123   :  { %v4077_v38 = vpop.eup %4076  ;;  %4090 = vtanh.f32 %v1258_v37  ;;  %v504_v39 = vpop.f32.mrf.mxu0  ;;  %2770 = vmatprep.mubr.bf16.mxu1 %v3937_v33  ;;  %v3961_v33 = vld [vmem:[%s5897_s0 + $0x51c] ss:$8 sps:$4 sm:$0xff]  }
 0x124   :  { %v4079_v40 = vpop.eup %4078  ;;  %722 = vst [vmem:[%s5898_s2 + $0x28] sm:$0xff] %v4077_v38  ;;  %v1260_v0 = vpop.f32.mrf.mxu1 }
 0x125   :  { %3259 = vst [vmem:[%s5898_s2 + $0x1b0] sm:$0xff] %v4079_v40  ;;  %v505_v41 = vpop.f32.mrf.mxu0 }
 0x126   :  { %4092 = vtanh.f32 %v505_v41  ;;  %v1261_v43 = vpop.f32.mrf.mxu1 }
 0x127   :  { %v4081_v46 = vpop.eup %4080  ;;  %4094 = vtanh.f32 %v1261_v43  ;;  %v507_v47 = vpop.f32.mrf.mxu0 }
 0x128   :  { %v4083_v49 = vpop.eup %4082  ;;  %723 = vst [vmem:[%s5898_s2 + $0x30] sm:$0xff] %v4081_v46  ;;  %v1263_v50 = vpop.f32.mrf.mxu1 }
 0x129   :  { %3260 = vst [vmem:[%s5898_s2 + $0x1b8] sm:$0xff] %v4083_v49  ;;  %v510_v51 = vpop.f32.mrf.mxu0  ;;  %2014 = vmatmul.mubr.bf16.gmra.mxu0 %v3932_v42  ;;  %v3956_v42 = vld [vmem:[%s5897_s0 + $0x390] ss:$8 sps:$4 sm:$0xff]  }
 0x12a   :  { %4096 = vtanh.f32 %v510_v51  ;;  %v1266_v52 = vpop.f32.mrf.mxu1  ;;  %2771 = vmatmul.mubr.bf16.gmra.mxu1 %v3935_v44  ;;  %2021 = vmatprep.mubr.bf16.mxu0 %v3940_v45  ;;  %v3959_v44 = vld [vmem:[%s5897_s0 + $0x518] ss:$8 sps:$4 sm:$0xff]   ;;  %v3964_v45 = vld [vmem:[%s5897_s0 + $0x3a4] ss:$8 sps:$4 sm:$0xff]  }
 0x12b   :  { %v4085_v53 = vpop.eup %4084  ;;  %4098 = vtanh.f32 %v1266_v52  ;;  %v512_v54 = vpop.f32.mrf.mxu0  ;;  %2778 = vmatprep.mubr.bf16.mxu1 %v3943_v48  ;;  %v3967_v48 = vld [vmem:[%s5897_s0 + $0x52c] ss:$8 sps:$4 sm:$0xff]  }
 0x12c   :  { %v4087_v55 = vpop.eup %4086  ;;  %724 = vst [vmem:[%s5898_s2 + $0x38] sm:$0xff] %v4085_v53  ;;  %v1268_v56 = vpop.f32.mrf.mxu1 }
 0x12d   :  { %3261 = vst [vmem:[%s5898_s2 + $0x1c0] sm:$0xff] %v4087_v55  ;;  %v513_v57 = vpop.f32.mrf.mxu0 }
 0x12e   :  { %4100 = vtanh.f32 %v513_v57  ;;  %v1269_v59 = vpop.f32.mrf.mxu1 }
 0x12f   :  { %v4089_v62 = vpop.eup %4088  ;;  %4102 = vtanh.f32 %v1269_v59  ;;  %v515_v63 = vpop.f32.mrf.mxu0 }
 0x130   :  { %v4091_v2 = vpop.eup %4090  ;;  %725 = vst [vmem:[%s5898_s2 + $0x40] sm:$0xff] %v4089_v62  ;;  %v1271_v3 = vpop.f32.mrf.mxu1 }
 0x131   :  { %3262 = vst [vmem:[%s5898_s2 + $0x1c8] sm:$0xff] %v4091_v2  ;;  %v518_v4 = vpop.f32.mrf.mxu0  ;;  %2022 = vmatmul.mubr.bf16.gmra.mxu0 %v3938_v58  ;;  %v3962_v58 = vld [vmem:[%s5897_s0 + $0x3a0] ss:$8 sps:$4 sm:$0xff]  }
 0x132   :  { %4104 = vtanh.f32 %v518_v4  ;;  %v1274_v5 = vpop.f32.mrf.mxu1  ;;  %2779 = vmatmul.mubr.bf16.gmra.mxu1 %v3941_v60  ;;  %2029 = vmatprep.mubr.bf16.mxu0 %v3946_v61  ;;  %v3965_v60 = vld [vmem:[%s5897_s0 + $0x528] ss:$8 sps:$4 sm:$0xff]   ;;  %v3970_v61 = vld [vmem:[%s5897_s0 + $0x3b4] ss:$8 sps:$4 sm:$0xff]  }
 0x133   :  { %v4093_v6 = vpop.eup %4092  ;;  %4106 = vtanh.f32 %v1274_v5  ;;  %v520_v7 = vpop.f32.mrf.mxu0  ;;  %2786 = vmatprep.mubr.bf16.mxu1 %v3949_v1  ;;  %v3973_v1 = vld [vmem:[%s5897_s0 + $0x53c] ss:$8 sps:$4 sm:$0xff]  }
 0x134   :  { %v4095_v8 = vpop.eup %4094  ;;  %726 = vst [vmem:[%s5898_s2 + $0x48] sm:$0xff] %v4093_v6  ;;  %v1276_v9 = vpop.f32.mrf.mxu1 }
 0x135   :  { %3263 = vst [vmem:[%s5898_s2 + $0x1d0] sm:$0xff] %v4095_v8  ;;  %v521_v10 = vpop.f32.mrf.mxu0 }
 0x136   :  { %4108 = vtanh.f32 %v521_v10  ;;  %v1277_v12 = vpop.f32.mrf.mxu1 }
 0x137   :  { %v4097_v15 = vpop.eup %4096  ;;  %4110 = vtanh.f32 %v1277_v12  ;;  %v523_v16 = vpop.f32.mrf.mxu0 }
 0x138   :  { %v4099_v18 = vpop.eup %4098  ;;  %727 = vst [vmem:[%s5898_s2 + $0x50] sm:$0xff] %v4097_v15  ;;  %v1279_v19 = vpop.f32.mrf.mxu1 }
 0x139   :  { %3264 = vst [vmem:[%s5898_s2 + $0x1d8] sm:$0xff] %v4099_v18  ;;  %v526_v20 = vpop.f32.mrf.mxu0  ;;  %2030 = vmatmul.mubr.bf16.gmra.mxu0 %v3944_v11  ;;  %v3968_v11 = vld [vmem:[%s5897_s0 + $0x3b0] ss:$8 sps:$4 sm:$0xff]  }
 0x13a   :  { %4112 = vtanh.f32 %v526_v20  ;;  %v1282_v21 = vpop.f32.mrf.mxu1  ;;  %2787 = vmatmul.mubr.bf16.gmra.mxu1 %v3947_v13  ;;  %2037 = vmatprep.mubr.bf16.mxu0 %v3952_v14  ;;  %v3971_v13 = vld [vmem:[%s5897_s0 + $0x538] ss:$8 sps:$4 sm:$0xff]   ;;  %v3976_v14 = vld [vmem:[%s5897_s0 + $0x3c4] ss:$8 sps:$4 sm:$0xff]  }
 0x13b   :  { %v4101_v22 = vpop.eup %4100  ;;  %4114 = vtanh.f32 %v1282_v21  ;;  %v528_v23 = vpop.f32.mrf.mxu0  ;;  %2794 = vmatprep.mubr.bf16.mxu1 %v3955_v17  ;;  %v3979_v17 = vld [vmem:[%s5897_s0 + $0x54c] ss:$8 sps:$4 sm:$0xff]  }
 0x13c   :  { %v4103_v24 = vpop.eup %4102  ;;  %728 = vst [vmem:[%s5898_s2 + $0x58] sm:$0xff] %v4101_v22  ;;  %v1284_v25 = vpop.f32.mrf.mxu1 }
 0x13d   :  { %3265 = vst [vmem:[%s5898_s2 + $0x1e0] sm:$0xff] %v4103_v24  ;;  %v529_v26 = vpop.f32.mrf.mxu0 }
 0x13e   :  { %4116 = vtanh.f32 %v529_v26  ;;  %v1285_v28 = vpop.f32.mrf.mxu1 }
 0x13f   :  { %v4105_v31 = vpop.eup %4104  ;;  %4118 = vtanh.f32 %v1285_v28  ;;  %v531_v32 = vpop.f32.mrf.mxu0 }
 0x140   :  { %v4107_v34 = vpop.eup %4106  ;;  %729 = vst [vmem:[%s5898_s2 + $0x60] sm:$0xff] %v4105_v31  ;;  %v1287_v35 = vpop.f32.mrf.mxu1 }
 0x141   :  { %3266 = vst [vmem:[%s5898_s2 + $0x1e8] sm:$0xff] %v4107_v34  ;;  %v534_v36 = vpop.f32.mrf.mxu0  ;;  %2038 = vmatmul.mubr.bf16.gmra.mxu0 %v3950_v27  ;;  %v3974_v27 = vld [vmem:[%s5897_s0 + $0x3c0] ss:$8 sps:$4 sm:$0xff]  }
 0x142   :  { %4120 = vtanh.f32 %v534_v36  ;;  %v1290_v37 = vpop.f32.mrf.mxu1  ;;  %2795 = vmatmul.mubr.bf16.gmra.mxu1 %v3953_v29  ;;  %2045 = vmatprep.mubr.bf16.mxu0 %v3958_v30  ;;  %v3977_v29 = vld [vmem:[%s5897_s0 + $0x548] ss:$8 sps:$4 sm:$0xff]   ;;  %v3982_v30 = vld [vmem:[%s5897_s0 + $0x3d4] ss:$8 sps:$4 sm:$0xff]  }
 0x143   :  { %v4109_v38 = vpop.eup %4108  ;;  %4122 = vtanh.f32 %v1290_v37  ;;  %v536_v39 = vpop.f32.mrf.mxu0  ;;  %2802 = vmatprep.mubr.bf16.mxu1 %v3961_v33  ;;  %v3985_v33 = vld [vmem:[%s5897_s0 + $0x55c] ss:$8 sps:$4 sm:$0xff]  }
 0x144   :  { %v4111_v40 = vpop.eup %4110  ;;  %730 = vst [vmem:[%s5898_s2 + $0x68] sm:$0xff] %v4109_v38  ;;  %v1292_v0 = vpop.f32.mrf.mxu1 }
 0x145   :  { %3267 = vst [vmem:[%s5898_s2 + $0x1f0] sm:$0xff] %v4111_v40  ;;  %v537_v41 = vpop.f32.mrf.mxu0 }
 0x146   :  { %4124 = vtanh.f32 %v537_v41  ;;  %v1293_v43 = vpop.f32.mrf.mxu1 }
 0x147   :  { %v4113_v46 = vpop.eup %4112  ;;  %4126 = vtanh.f32 %v1293_v43  ;;  %v539_v47 = vpop.f32.mrf.mxu0 }
 0x148   :  { %v4115_v49 = vpop.eup %4114  ;;  %731 = vst [vmem:[%s5898_s2 + $0x70] sm:$0xff] %v4113_v46  ;;  %v1295_v50 = vpop.f32.mrf.mxu1 }
 0x149   :  { %3268 = vst [vmem:[%s5898_s2 + $0x1f8] sm:$0xff] %v4115_v49  ;;  %v542_v51 = vpop.f32.mrf.mxu0  ;;  %2046 = vmatmul.mubr.bf16.gmra.mxu0 %v3956_v42  ;;  %v3980_v42 = vld [vmem:[%s5897_s0 + $0x3d0] ss:$8 sps:$4 sm:$0xff]  }
 0x14a   :  { %4128 = vtanh.f32 %v542_v51  ;;  %v1298_v52 = vpop.f32.mrf.mxu1  ;;  %2803 = vmatmul.mubr.bf16.gmra.mxu1 %v3959_v44  ;;  %2053 = vmatprep.mubr.bf16.mxu0 %v3964_v45  ;;  %v3983_v44 = vld [vmem:[%s5897_s0 + $0x558] ss:$8 sps:$4 sm:$0xff]   ;;  %v3988_v45 = vld [vmem:[%s5897_s0 + $0x3e4] ss:$8 sps:$4 sm:$0xff]  }
 0x14b   :  { %v4117_v53 = vpop.eup %4116  ;;  %4130 = vtanh.f32 %v1298_v52  ;;  %v544_v54 = vpop.f32.mrf.mxu0  ;;  %2810 = vmatprep.mubr.bf16.mxu1 %v3967_v48  ;;  %v3991_v48 = vld [vmem:[%s5897_s0 + $0x56c] ss:$8 sps:$4 sm:$0xff]  }
 0x14c   :  { %v4119_v55 = vpop.eup %4118  ;;  %732 = vst [vmem:[%s5898_s2 + $0x78] sm:$0xff] %v4117_v53  ;;  %v1300_v56 = vpop.f32.mrf.mxu1 }
 0x14d   :  { %3269 = vst [vmem:[%s5898_s2 + $0x200] sm:$0xff] %v4119_v55  ;;  %v545_v57 = vpop.f32.mrf.mxu0 }
 0x14e   :  { %4132 = vtanh.f32 %v545_v57  ;;  %v1301_v59 = vpop.f32.mrf.mxu1 }
 0x14f   :  { %v4121_v62 = vpop.eup %4120  ;;  %4134 = vtanh.f32 %v1301_v59  ;;  %v547_v63 = vpop.f32.mrf.mxu0 }
 0x150   :  { %v4123_v2 = vpop.eup %4122  ;;  %733 = vst [vmem:[%s5898_s2 + $0x80] sm:$0xff] %v4121_v62  ;;  %v1303_v3 = vpop.f32.mrf.mxu1 }
 0x151   :  { %3270 = vst [vmem:[%s5898_s2 + $0x208] sm:$0xff] %v4123_v2  ;;  %v550_v4 = vpop.f32.mrf.mxu0  ;;  %2054 = vmatmul.mubr.bf16.gmra.mxu0 %v3962_v58  ;;  %v3986_v58 = vld [vmem:[%s5897_s0 + $0x3e0] ss:$8 sps:$4 sm:$0xff]  }
 0x152   :  { %4136 = vtanh.f32 %v550_v4  ;;  %v1306_v5 = vpop.f32.mrf.mxu1  ;;  %2811 = vmatmul.mubr.bf16.gmra.mxu1 %v3965_v60  ;;  %2061 = vmatprep.mubr.bf16.mxu0 %v3970_v61  ;;  %v3989_v60 = vld [vmem:[%s5897_s0 + $0x568] ss:$8 sps:$4 sm:$0xff]   ;;  %v3994_v61 = vld [vmem:[%s5897_s0 + $0x3f4] ss:$8 sps:$4 sm:$0xff]  }
 0x153   :  { %v4125_v6 = vpop.eup %4124  ;;  %4138 = vtanh.f32 %v1306_v5  ;;  %v552_v7 = vpop.f32.mrf.mxu0  ;;  %2818 = vmatprep.mubr.bf16.mxu1 %v3973_v1  ;;  %v3997_v1 = vld [vmem:[%s5897_s0 + $0x57c] ss:$8 sps:$4 sm:$0xff]  }
 0x154   :  { %v4127_v8 = vpop.eup %4126  ;;  %734 = vst [vmem:[%s5898_s2 + $0x88] sm:$0xff] %v4125_v6  ;;  %v1308_v9 = vpop.f32.mrf.mxu1 }
 0x155   :  { %3271 = vst [vmem:[%s5898_s2 + $0x210] sm:$0xff] %v4127_v8  ;;  %v553_v10 = vpop.f32.mrf.mxu0 }
 0x156   :  { %4140 = vtanh.f32 %v553_v10  ;;  %v1309_v12 = vpop.f32.mrf.mxu1 }
 0x157   :  { %v4129_v15 = vpop.eup %4128  ;;  %4142 = vtanh.f32 %v1309_v12  ;;  %v555_v16 = vpop.f32.mrf.mxu0 }
 0x158   :  { %v4131_v18 = vpop.eup %4130  ;;  %735 = vst [vmem:[%s5898_s2 + $0x90] sm:$0xff] %v4129_v15  ;;  %v1311_v19 = vpop.f32.mrf.mxu1 }
 0x159   :  { %3272 = vst [vmem:[%s5898_s2 + $0x218] sm:$0xff] %v4131_v18  ;;  %v558_v20 = vpop.f32.mrf.mxu0  ;;  %2062 = vmatmul.mubr.bf16.gmra.mxu0 %v3968_v11  ;;  %v3992_v11 = vld [vmem:[%s5897_s0 + $0x3f0] ss:$8 sps:$4 sm:$0xff]  }
 0x15a   :  { %4144 = vtanh.f32 %v558_v20  ;;  %v1314_v21 = vpop.f32.mrf.mxu1  ;;  %2819 = vmatmul.mubr.bf16.gmra.mxu1 %v3971_v13  ;;  %2069 = vmatprep.mubr.bf16.mxu0 %v3976_v14  ;;  %v3995_v13 = vld [vmem:[%s5897_s0 + $0x578] ss:$8 sps:$4 sm:$0xff]   ;;  %v4000_v14 = vld [vmem:[%s5897_s0 + $0x404] ss:$8 sps:$4 sm:$0xff]  }
 0x15b   :  { %v4133_v22 = vpop.eup %4132  ;;  %4146 = vtanh.f32 %v1314_v21  ;;  %v560_v23 = vpop.f32.mrf.mxu0  ;;  %2826 = vmatprep.mubr.bf16.mxu1 %v3979_v17  ;;  %v4003_v17 = vld [vmem:[%s5897_s0 + $0x58c] ss:$8 sps:$4 sm:$0xff]  }
 0x15c   :  { %v4135_v24 = vpop.eup %4134  ;;  %736 = vst [vmem:[%s5898_s2 + $0x98] sm:$0xff] %v4133_v22  ;;  %v1316_v25 = vpop.f32.mrf.mxu1 }
 0x15d   :  { %3273 = vst [vmem:[%s5898_s2 + $0x220] sm:$0xff] %v4135_v24  ;;  %v561_v26 = vpop.f32.mrf.mxu0 }
 0x15e   :  { %4148 = vtanh.f32 %v561_v26  ;;  %v1317_v28 = vpop.f32.mrf.mxu1 }
 0x15f   :  { %v4137_v31 = vpop.eup %4136  ;;  %4150 = vtanh.f32 %v1317_v28  ;;  %v563_v32 = vpop.f32.mrf.mxu0 }
 0x160   :  { %v4139_v34 = vpop.eup %4138  ;;  %737 = vst [vmem:[%s5898_s2 + $0xa0] sm:$0xff] %v4137_v31  ;;  %v1319_v35 = vpop.f32.mrf.mxu1 }
 0x161   :  { %3274 = vst [vmem:[%s5898_s2 + $0x228] sm:$0xff] %v4139_v34  ;;  %v566_v36 = vpop.f32.mrf.mxu0  ;;  %2070 = vmatmul.mubr.bf16.gmra.mxu0 %v3974_v27  ;;  %v3998_v27 = vld [vmem:[%s5897_s0 + $0x400] ss:$8 sps:$4 sm:$0xff]  }
 0x162   :  { %4152 = vtanh.f32 %v566_v36  ;;  %v1322_v37 = vpop.f32.mrf.mxu1  ;;  %2827 = vmatmul.mubr.bf16.gmra.mxu1 %v3977_v29  ;;  %2077 = vmatprep.mubr.bf16.mxu0 %v3982_v30  ;;  %v4001_v29 = vld [vmem:[%s5897_s0 + $0x588] ss:$8 sps:$4 sm:$0xff]   ;;  %v4006_v30 = vld [vmem:[%s5897_s0 + $0x414] ss:$8 sps:$4 sm:$0xff]  }
 0x163   :  { %v4141_v38 = vpop.eup %4140  ;;  %4154 = vtanh.f32 %v1322_v37  ;;  %v568_v39 = vpop.f32.mrf.mxu0  ;;  %2834 = vmatprep.mubr.bf16.mxu1 %v3985_v33  ;;  %v4009_v33 = vld [vmem:[%s5897_s0 + $0x59c] ss:$8 sps:$4 sm:$0xff]  }
 0x164   :  { %v4143_v40 = vpop.eup %4142  ;;  %738 = vst [vmem:[%s5898_s2 + $0xa8] sm:$0xff] %v4141_v38  ;;  %v1324_v0 = vpop.f32.mrf.mxu1 }
 0x165   :  { %3275 = vst [vmem:[%s5898_s2 + $0x230] sm:$0xff] %v4143_v40  ;;  %v569_v41 = vpop.f32.mrf.mxu0 }
 0x166   :  { %4156 = vtanh.f32 %v569_v41  ;;  %v1325_v43 = vpop.f32.mrf.mxu1 }
 0x167   :  { %v4145_v46 = vpop.eup %4144  ;;  %4158 = vtanh.f32 %v1325_v43  ;;  %v571_v47 = vpop.f32.mrf.mxu0 }
 0x168   :  { %v4147_v49 = vpop.eup %4146  ;;  %739 = vst [vmem:[%s5898_s2 + $0xb0] sm:$0xff] %v4145_v46  ;;  %v1327_v50 = vpop.f32.mrf.mxu1 }
 0x169   :  { %3276 = vst [vmem:[%s5898_s2 + $0x238] sm:$0xff] %v4147_v49  ;;  %v574_v51 = vpop.f32.mrf.mxu0  ;;  %2078 = vmatmul.mubr.bf16.gmra.mxu0 %v3980_v42  ;;  %v4004_v42 = vld [vmem:[%s5897_s0 + $0x410] ss:$8 sps:$4 sm:$0xff]  }
 0x16a   :  { %4160 = vtanh.f32 %v574_v51  ;;  %v1330_v52 = vpop.f32.mrf.mxu1  ;;  %2835 = vmatmul.mubr.bf16.gmra.mxu1 %v3983_v44  ;;  %2085 = vmatprep.mubr.bf16.mxu0 %v3988_v45  ;;  %v4007_v44 = vld [vmem:[%s5897_s0 + $0x598] ss:$8 sps:$4 sm:$0xff]   ;;  %v4012_v45 = vld [vmem:[%s5897_s0 + $0x424] ss:$8 sps:$4 sm:$0xff]  }
 0x16b   :  { %v4149_v53 = vpop.eup %4148  ;;  %4162 = vtanh.f32 %v1330_v52  ;;  %v576_v54 = vpop.f32.mrf.mxu0  ;;  %2842 = vmatprep.mubr.bf16.mxu1 %v3991_v48  ;;  %v4015_v48 = vld [vmem:[%s5897_s0 + $0x5ac] ss:$8 sps:$4 sm:$0xff]  }
 0x16c   :  { %v4151_v55 = vpop.eup %4150  ;;  %740 = vst [vmem:[%s5898_s2 + $0xb8] sm:$0xff] %v4149_v53  ;;  %v1332_v56 = vpop.f32.mrf.mxu1 }
 0x16d   :  { %3277 = vst [vmem:[%s5898_s2 + $0x240] sm:$0xff] %v4151_v55  ;;  %v577_v57 = vpop.f32.mrf.mxu0 }
 0x16e   :  { %4164 = vtanh.f32 %v577_v57  ;;  %v1333_v59 = vpop.f32.mrf.mxu1 }
 0x16f   :  { %v4153_v62 = vpop.eup %4152  ;;  %4166 = vtanh.f32 %v1333_v59  ;;  %v579_v63 = vpop.f32.mrf.mxu0 }
 0x170   :  { %v4155_v2 = vpop.eup %4154  ;;  %741 = vst [vmem:[%s5898_s2 + $0xc0] sm:$0xff] %v4153_v62  ;;  %v1335_v3 = vpop.f32.mrf.mxu1 }
 0x171   :  { %3278 = vst [vmem:[%s5898_s2 + $0x248] sm:$0xff] %v4155_v2  ;;  %v582_v4 = vpop.f32.mrf.mxu0  ;;  %2086 = vmatmul.mubr.bf16.gmra.mxu0 %v3986_v58  ;;  %v4010_v58 = vld [vmem:[%s5897_s0 + $0x420] ss:$8 sps:$4 sm:$0xff]  }
 0x172   :  { %4168 = vtanh.f32 %v582_v4  ;;  %v1338_v5 = vpop.f32.mrf.mxu1  ;;  %2843 = vmatmul.mubr.bf16.gmra.mxu1 %v3989_v60  ;;  %2093 = vmatprep.mubr.bf16.mxu0 %v3994_v61  ;;  %v4013_v60 = vld [vmem:[%s5897_s0 + $0x5a8] ss:$8 sps:$4 sm:$0xff]   ;;  %v4018_v61 = vld [vmem:[%s5897_s0 + $0x434] ss:$8 sps:$4 sm:$0xff]  }
 0x173   :  { %v4157_v6 = vpop.eup %4156  ;;  %4170 = vtanh.f32 %v1338_v5  ;;  %v584_v7 = vpop.f32.mrf.mxu0  ;;  %2850 = vmatprep.mubr.bf16.mxu1 %v3997_v1  ;;  %v4021_v1 = vld [vmem:[%s5897_s0 + $0x5bc] ss:$8 sps:$4 sm:$0xff]  }
 0x174   :  { %v4159_v8 = vpop.eup %4158  ;;  %742 = vst [vmem:[%s5898_s2 + $0xc8] sm:$0xff] %v4157_v6  ;;  %v1340_v9 = vpop.f32.mrf.mxu1 }
 0x175   :  { %3279 = vst [vmem:[%s5898_s2 + $0x250] sm:$0xff] %v4159_v8  ;;  %v585_v10 = vpop.f32.mrf.mxu0 }
 0x176   :  { %4172 = vtanh.f32 %v585_v10  ;;  %v1341_v12 = vpop.f32.mrf.mxu1 }
 0x177   :  { %v4161_v15 = vpop.eup %4160  ;;  %4174 = vtanh.f32 %v1341_v12  ;;  %v587_v16 = vpop.f32.mrf.mxu0 }
 0x178   :  { %v4163_v18 = vpop.eup %4162  ;;  %743 = vst [vmem:[%s5898_s2 + $0xd0] sm:$0xff] %v4161_v15  ;;  %v1343_v19 = vpop.f32.mrf.mxu1 }
 0x179   :  { %3280 = vst [vmem:[%s5898_s2 + $0x258] sm:$0xff] %v4163_v18  ;;  %v590_v20 = vpop.f32.mrf.mxu0  ;;  %2094 = vmatmul.mubr.bf16.gmra.mxu0 %v3992_v11  ;;  %v4016_v11 = vld [vmem:[%s5897_s0 + $0x430] ss:$8 sps:$4 sm:$0xff]  }
 0x17a   :  { %4176 = vtanh.f32 %v590_v20  ;;  %v1346_v21 = vpop.f32.mrf.mxu1  ;;  %2851 = vmatmul.mubr.bf16.gmra.mxu1 %v3995_v13  ;;  %2101 = vmatprep.mubr.bf16.mxu0 %v4000_v14  ;;  %v4019_v13 = vld [vmem:[%s5897_s0 + $0x5b8] ss:$8 sps:$4 sm:$0xff]   ;;  %v4024_v14 = vld [vmem:[%s5897_s0 + $0x444] ss:$8 sps:$4 sm:$0xff]  }
 0x17b   :  { %v4165_v22 = vpop.eup %4164  ;;  %4178 = vtanh.f32 %v1346_v21  ;;  %v592_v23 = vpop.f32.mrf.mxu0  ;;  %2858 = vmatprep.mubr.bf16.mxu1 %v4003_v17  ;;  %v4027_v17 = vld [vmem:[%s5897_s0 + $0x5cc] ss:$8 sps:$4 sm:$0xff]  }
 0x17c   :  { %v4167_v24 = vpop.eup %4166  ;;  %744 = vst [vmem:[%s5898_s2 + $0xd8] sm:$0xff] %v4165_v22  ;;  %v1348_v25 = vpop.f32.mrf.mxu1 }
 0x17d   :  { %3281 = vst [vmem:[%s5898_s2 + $0x260] sm:$0xff] %v4167_v24  ;;  %v593_v26 = vpop.f32.mrf.mxu0 }
 0x17e   :  { %4180 = vtanh.f32 %v593_v26  ;;  %v1349_v28 = vpop.f32.mrf.mxu1 }
 0x17f   :  { %v4169_v31 = vpop.eup %4168  ;;  %4182 = vtanh.f32 %v1349_v28  ;;  %v595_v32 = vpop.f32.mrf.mxu0 }
 0x180   :  { %v4171_v34 = vpop.eup %4170  ;;  %745 = vst [vmem:[%s5898_s2 + $0xe0] sm:$0xff] %v4169_v31  ;;  %v1351_v35 = vpop.f32.mrf.mxu1 }
 0x181   :  { %3282 = vst [vmem:[%s5898_s2 + $0x268] sm:$0xff] %v4171_v34  ;;  %v598_v36 = vpop.f32.mrf.mxu0  ;;  %2102 = vmatmul.mubr.bf16.gmra.mxu0 %v3998_v27  ;;  %v4022_v27 = vld [vmem:[%s5897_s0 + $0x440] ss:$8 sps:$4 sm:$0xff]  }
 0x182   :  { %4184 = vtanh.f32 %v598_v36  ;;  %v1354_v37 = vpop.f32.mrf.mxu1  ;;  %2859 = vmatmul.mubr.bf16.gmra.mxu1 %v4001_v29  ;;  %2109 = vmatprep.mubr.bf16.mxu0 %v4006_v30  ;;  %v4025_v29 = vld [vmem:[%s5897_s0 + $0x5c8] ss:$8 sps:$4 sm:$0xff]   ;;  %v4030_v30 = vld [vmem:[%s5897_s0 + $0x454] ss:$8 sps:$4 sm:$0xff]  }
 0x183   :  { %v4173_v38 = vpop.eup %4172  ;;  %4186 = vtanh.f32 %v1354_v37  ;;  %v600_v39 = vpop.f32.mrf.mxu0  ;;  %2866 = vmatprep.mubr.bf16.mxu1 %v4009_v33  ;;  %v4033_v33 = vld [vmem:[%s5897_s0 + $0x5dc] ss:$8 sps:$4 sm:$0xff]  }
 0x184   :  { %v4175_v40 = vpop.eup %4174  ;;  %746 = vst [vmem:[%s5898_s2 + $0xe8] sm:$0xff] %v4173_v38  ;;  %v1356_v0 = vpop.f32.mrf.mxu1 }
 0x185   :  { %3283 = vst [vmem:[%s5898_s2 + $0x270] sm:$0xff] %v4175_v40  ;;  %v601_v41 = vpop.f32.mrf.mxu0 }
 0x186   :  { %4188 = vtanh.f32 %v601_v41  ;;  %v1357_v43 = vpop.f32.mrf.mxu1 }
 0x187   :  { %v4177_v46 = vpop.eup %4176  ;;  %4190 = vtanh.f32 %v1357_v43  ;;  %v603_v47 = vpop.f32.mrf.mxu0 }
 0x188   :  { %v4179_v49 = vpop.eup %4178  ;;  %747 = vst [vmem:[%s5898_s2 + $0xf0] sm:$0xff] %v4177_v46  ;;  %v1359_v50 = vpop.f32.mrf.mxu1 }
 0x189   :  { %3284 = vst [vmem:[%s5898_s2 + $0x278] sm:$0xff] %v4179_v49  ;;  %v606_v51 = vpop.f32.mrf.mxu0  ;;  %2110 = vmatmul.mubr.bf16.gmra.mxu0 %v4004_v42  ;;  %v4028_v42 = vld [vmem:[%s5897_s0 + $0x450] ss:$8 sps:$4 sm:$0xff]  }
 0x18a   :  { %4192 = vtanh.f32 %v606_v51  ;;  %v1362_v52 = vpop.f32.mrf.mxu1  ;;  %2867 = vmatmul.mubr.bf16.gmra.mxu1 %v4007_v44  ;;  %2117 = vmatprep.mubr.bf16.mxu0 %v4012_v45  ;;  %v4031_v44 = vld [vmem:[%s5897_s0 + $0x5d8] ss:$8 sps:$4 sm:$0xff]   ;;  %v4036_v45 = vld [vmem:[%s5897_s0 + $0x464] ss:$8 sps:$4 sm:$0xff]  }
 0x18b   :  { %v4181_v53 = vpop.eup %4180  ;;  %4194 = vtanh.f32 %v1362_v52  ;;  %v608_v54 = vpop.f32.mrf.mxu0  ;;  %2874 = vmatprep.mubr.bf16.mxu1 %v4015_v48  ;;  %v4039_v48 = vld [vmem:[%s5897_s0 + $0x5ec] ss:$8 sps:$4 sm:$0xff]  }
 0x18c   :  { %v4183_v55 = vpop.eup %4182  ;;  %748 = vst [vmem:[%s5898_s2 + $0xf8] sm:$0xff] %v4181_v53  ;;  %v1364_v56 = vpop.f32.mrf.mxu1 }
 0x18d   :  { %3285 = vst [vmem:[%s5898_s2 + $0x280] sm:$0xff] %v4183_v55  ;;  %v609_v57 = vpop.f32.mrf.mxu0 }
 0x18e   :  { %4196 = vtanh.f32 %v609_v57  ;;  %v1365_v59 = vpop.f32.mrf.mxu1 }
 0x18f   :  { %v4185_v62 = vpop.eup %4184  ;;  %4198 = vtanh.f32 %v1365_v59  ;;  %v611_v63 = vpop.f32.mrf.mxu0 }
 0x190   :  { %v4187_v2 = vpop.eup %4186  ;;  %749 = vst [vmem:[%s5898_s2 + $0x100] sm:$0xff] %v4185_v62  ;;  %v1367_v3 = vpop.f32.mrf.mxu1 }
 0x191   :  { %3286 = vst [vmem:[%s5898_s2 + $0x288] sm:$0xff] %v4187_v2  ;;  %v614_v4 = vpop.f32.mrf.mxu0  ;;  %2118 = vmatmul.mubr.bf16.gmra.mxu0 %v4010_v58  ;;  %v4034_v58 = vld [vmem:[%s5897_s0 + $0x460] ss:$8 sps:$4 sm:$0xff]  }
 0x192   :  { %4200 = vtanh.f32 %v614_v4  ;;  %v1370_v5 = vpop.f32.mrf.mxu1  ;;  %2875 = vmatmul.mubr.bf16.gmra.mxu1 %v4013_v60  ;;  %2125 = vmatprep.mubr.bf16.mxu0 %v4018_v61  ;;  %v4037_v60 = vld [vmem:[%s5897_s0 + $0x5e8] ss:$8 sps:$4 sm:$0xff]   ;;  %v4042_v61 = vld [vmem:[%s5897_s0 + $0x474] ss:$8 sps:$4 sm:$0xff]  }
 0x193   :  { %v4189_v6 = vpop.eup %4188  ;;  %4202 = vtanh.f32 %v1370_v5  ;;  %v616_v7 = vpop.f32.mrf.mxu0  ;;  %2882 = vmatprep.mubr.bf16.mxu1 %v4021_v1  ;;  %v4045_v1 = vld [vmem:[%s5897_s0 + $0x5fc] ss:$8 sps:$4 sm:$0xff]  }
 0x194   :  { %v4191_v8 = vpop.eup %4190  ;;  %750 = vst [vmem:[%s5898_s2 + $0x108] sm:$0xff] %v4189_v6  ;;  %v1372_v9 = vpop.f32.mrf.mxu1 }
 0x195   :  { %3287 = vst [vmem:[%s5898_s2 + $0x290] sm:$0xff] %v4191_v8  ;;  %v617_v10 = vpop.f32.mrf.mxu0 }
 0x196   :  { %4204 = vtanh.f32 %v617_v10  ;;  %v1373_v12 = vpop.f32.mrf.mxu1 }
 0x197   :  { %v4193_v15 = vpop.eup %4192  ;;  %4206 = vtanh.f32 %v1373_v12  ;;  %v619_v16 = vpop.f32.mrf.mxu0 }
 0x198   :  { %v4195_v18 = vpop.eup %4194  ;;  %751 = vst [vmem:[%s5898_s2 + $0x110] sm:$0xff] %v4193_v15  ;;  %v1375_v19 = vpop.f32.mrf.mxu1 }
 0x199   :  { %3288 = vst [vmem:[%s5898_s2 + $0x298] sm:$0xff] %v4195_v18  ;;  %v622_v20 = vpop.f32.mrf.mxu0  ;;  %2126 = vmatmul.mubr.bf16.gmra.mxu0 %v4016_v11  ;;  %v4040_v11 = vld [vmem:[%s5897_s0 + $0x470] ss:$8 sps:$4 sm:$0xff]  }
 0x19a   :  { %4208 = vtanh.f32 %v622_v20  ;;  %v1378_v21 = vpop.f32.mrf.mxu1  ;;  %2883 = vmatmul.mubr.bf16.gmra.mxu1 %v4019_v13  ;;  %2133 = vmatprep.mubr.bf16.mxu0 %v4024_v14  ;;  %v4043_v13 = vld [vmem:[%s5897_s0 + $0x5f8] ss:$8 sps:$4 sm:$0xff]   ;;  %v4048_v14 = vld [vmem:[%s5897_s0 + $0x484] ss:$8 sps:$4 sm:$0xff]  }
 0x19b   :  { %v4197_v22 = vpop.eup %4196  ;;  %4210 = vtanh.f32 %v1378_v21  ;;  %v624_v23 = vpop.f32.mrf.mxu0  ;;  %2890 = vmatprep.mubr.bf16.mxu1 %v4027_v17  ;;  %v4051_v17 = vld [vmem:[%s5897_s0 + $0x60c] ss:$8 sps:$4 sm:$0xff]  }
 0x19c   :  { %v4199_v24 = vpop.eup %4198  ;;  %752 = vst [vmem:[%s5898_s2 + $0x118] sm:$0xff] %v4197_v22  ;;  %v1380_v25 = vpop.f32.mrf.mxu1 }
 0x19d   :  { %3289 = vst [vmem:[%s5898_s2 + $0x2a0] sm:$0xff] %v4199_v24  ;;  %v625_v26 = vpop.f32.mrf.mxu0  ;;  %v3351_v24 = vld [vmem:[%s5897_s0 + $0x490] sm:$0xff] }
 0x19e   :  { %4212 = vtanh.f32 %v625_v26  ;;  %v1381_v28 = vpop.f32.mrf.mxu1 }
 0x19f   :  { %v4201_v31 = vpop.eup %4200  ;;  %4214 = vtanh.f32 %v1381_v28  ;;  %v627_v32 = vpop.f32.mrf.mxu0 }
 0x1a0   :  { %v4203_v34 = vpop.eup %4202  ;;  %753 = vst [vmem:[%s5898_s2 + $0x120] sm:$0xff] %v4201_v31  ;;  %v1383_v35 = vpop.f32.mrf.mxu1  ;;  %v4049_v31 = vld [vmem:[%s5897_s0 + $0x608] ss:$8 sps:$4 sm:$0xff]   ;;  %v3433_v32 = vcombine.high %v3351_v24, %v3351_v24 }
 0x1a1   :  { %3290 = vst [vmem:[%s5898_s2 + $0x2a8] sm:$0xff] %v4203_v34  ;;  %v630_v36 = vpop.f32.mrf.mxu0  ;;  %2134 = vmatmul.mubr.bf16.gmra.mxu0 %v4022_v27  ;;  %v3547_v27 = vld [vmem:[%s5897_s0 + $0x618] sm:$0xff] }
 0x1a2   :  { %4216 = vtanh.f32 %v630_v36  ;;  %v1386_v37 = vpop.f32.mrf.mxu1  ;;  %2891 = vmatmul.mubr.bf16.gmra.mxu1 %v4025_v29  ;;  %2141 = vmatprep.mubr.bf16.mxu0 %v4030_v30  ;;  %v4046_v29 = vld [vmem:[%s5897_s0 + $0x480] ss:$8 sps:$4 sm:$0xff]   ;;  %v3629_v35 = vcombine.high %v3547_v27, %v3547_v27 }
 0x1a3   :  { %v4205_v38 = vpop.eup %4204  ;;  %4218 = vtanh.f32 %v1386_v37  ;;  %v632_v39 = vpop.f32.mrf.mxu0  ;;  %2898 = vmatprep.mubr.bf16.mxu1 %v4033_v33 }
 0x1a4   :  { %v4207_v40 = vpop.eup %4206  ;;  %754 = vst [vmem:[%s5898_s2 + $0x128] sm:$0xff] %v4205_v38  ;;  %v1388_v0 = vpop.f32.mrf.mxu1 }
 0x1a5   :  { %3291 = vst [vmem:[%s5898_s2 + $0x2b0] sm:$0xff] %v4207_v40  ;;  %v633_v41 = vpop.f32.mrf.mxu0 }
 0x1a6   :  { %4220 = vtanh.f32 %v633_v41  ;;  %v1389_v43 = vpop.f32.mrf.mxu1 }
 0x1a7   :  { %v4209_v46 = vpop.eup %4208  ;;  %4222 = vtanh.f32 %v1389_v43  ;;  %v635_v47 = vpop.f32.mrf.mxu0 }
 0x1a8   :  { %v4211_v49 = vpop.eup %4210  ;;  %755 = vst [vmem:[%s5898_s2 + $0x130] sm:$0xff] %v4209_v46  ;;  %v1391_v50 = vpop.f32.mrf.mxu1  ;;  %v3628_v46 = vcombine.low %v3547_v27, %v3547_v27 }
 0x1a9   :  { %3292 = vst [vmem:[%s5898_s2 + $0x2b8] sm:$0xff] %v4211_v49  ;;  %v638_v51 = vpop.f32.mrf.mxu0  ;;  %2142 = vmatmul.mubr.bf16.gmra.mxu0 %v4028_v42 }
 0x1aa   :  { %4224 = vtanh.f32 %v638_v51  ;;  %v1394_v52 = vpop.f32.mrf.mxu1  ;;  %2899 = vmatmul.mubr.bf16.gmra.mxu1 %v4031_v44  ;;  %2149 = vmatprep.mubr.bf16.mxu0 %v4036_v45  ;;  %v3432_v44 = vcombine.low %v3351_v24, %v3351_v24 }
 0x1ab   :  { %v4213_v53 = vpop.eup %4212  ;;  %4226 = vtanh.f32 %v1394_v52  ;;  %v640_v54 = vpop.f32.mrf.mxu0  ;;  %2906 = vmatprep.mubr.bf16.mxu1 %v4039_v48 }
 0x1ac   :  { %v4215_v55 = vpop.eup %4214  ;;  %756 = vst [vmem:[%s5898_s2 + $0x138] sm:$0xff] %v4213_v53  ;;  %v1396_v56 = vpop.f32.mrf.mxu1 }
 0x1ad   :  { %3293 = vst [vmem:[%s5898_s2 + $0x2c0] sm:$0xff] %v4215_v55  ;;  %v641_v57 = vpop.f32.mrf.mxu0 }
 0x1ae   :  { %4228 = vtanh.f32 %v641_v57  ;;  %v1397_v59 = vpop.f32.mrf.mxu1 }
 0x1af   :  { %v4217_v62 = vpop.eup %4216  ;;  %4230 = vtanh.f32 %v1397_v59  ;;  %v643_v63 = vpop.f32.mrf.mxu0 }
 0x1b0   :  { %v4219_v2 = vpop.eup %4218  ;;  %757 = vst [vmem:[%s5898_s2 + $0x140] sm:$0xff] %v4217_v62  ;;  %v1399_v3 = vpop.f32.mrf.mxu1 }
 0x1b1   :  { %3294 = vst [vmem:[%s5898_s2 + $0x2c8] sm:$0xff] %v4219_v2  ;;  %v646_v4 = vpop.f32.mrf.mxu0  ;;  %2150 = vmatmul.mubr.bf16.gmra.mxu0 %v4034_v58 }
 0x1b2   :  { %4232 = vtanh.f32 %v646_v4  ;;  %v1402_v5 = vpop.f32.mrf.mxu1  ;;  %2907 = vmatmul.mubr.bf16.gmra.mxu1 %v4037_v60  ;;  %2157 = vmatprep.mubr.bf16.mxu0 %v4042_v61 }
 0x1b3   :  { %v4221_v6 = vpop.eup %4220  ;;  %4234 = vtanh.f32 %v1402_v5  ;;  %v648_v7 = vpop.f32.mrf.mxu0  ;;  %2914 = vmatprep.mubr.bf16.mxu1 %v4045_v1 }
 0x1b4   :  { %v4223_v8 = vpop.eup %4222  ;;  %758 = vst [vmem:[%s5898_s2 + $0x148] sm:$0xff] %v4221_v6  ;;  %v1404_v9 = vpop.f32.mrf.mxu1 }
 0x1b5   :  { %3295 = vst [vmem:[%s5898_s2 + $0x2d0] sm:$0xff] %v4223_v8  ;;  %v649_v10 = vpop.f32.mrf.mxu0 }
 0x1b6   :  { %4236 = vtanh.f32 %v649_v10  ;;  %v1405_v12 = vpop.f32.mrf.mxu1 }
 0x1b7   :  { %v4225_v15 = vpop.eup %4224  ;;  %4238 = vtanh.f32 %v1405_v12  ;;  %v651_v16 = vpop.f32.mrf.mxu0 }
 0x1b8   :  { %v4227_v18 = vpop.eup %4226  ;;  %759 = vst [vmem:[%s5898_s2 + $0x150] sm:$0xff] %v4225_v15  ;;  %v1407_v19 = vpop.f32.mrf.mxu1 }
 0x1b9   :  { %3296 = vst [vmem:[%s5898_s2 + $0x2d8] sm:$0xff] %v4227_v18  ;;  %v654_v20 = vpop.f32.mrf.mxu0  ;;  %2158 = vmatmul.mubr.bf16.gmra.mxu0 %v4040_v11 }
 0x1ba   :  { %4240 = vtanh.f32 %v654_v20  ;;  %v1410_v21 = vpop.f32.mrf.mxu1  ;;  %2915 = vmatmul.mubr.bf16.gmra.mxu1 %v4043_v13  ;;  %2165 = vmatprep.mubr.bf16.mxu0 %v4048_v14 }
 0x1bb   :  { %v4229_v22 = vpop.eup %4228  ;;  %4242 = vtanh.f32 %v1410_v21  ;;  %v656_v23 = vpop.f32.mrf.mxu0  ;;  %2922 = vmatprep.mubr.bf16.mxu1 %v4051_v17 }
 0x1bc   :  { %v4231_v25 = vpop.eup %4230  ;;  %760 = vst [vmem:[%s5898_s2 + $0x158] sm:$0xff] %v4229_v22  ;;  %v1412_v26 = vpop.f32.mrf.mxu1 }
 0x1bd   :  { %3297 = vst [vmem:[%s5898_s2 + $0x2e0] sm:$0xff] %v4231_v25  ;;  %v657_v28 = vpop.f32.mrf.mxu0 }
 0x1be   :  { %4244 = vtanh.f32 %v657_v28  ;;  %v1413_v30 = vpop.f32.mrf.mxu1 }
 0x1bf   :  { %v4233_v33 = vpop.eup %4232  ;;  %4246 = vtanh.f32 %v1413_v30  ;;  %v659_v34 = vpop.f32.mrf.mxu0 }
 0x1c0   :  { %v4235_v36 = vpop.eup %4234  ;;  %761 = vst [vmem:[%s5898_s2 + $0x160] sm:$0xff] %v4233_v33  ;;  %v1415_v37 = vpop.f32.mrf.mxu1 }
 0x1c1   :  { %3298 = vst [vmem:[%s5898_s2 + $0x2e8] sm:$0xff] %v4235_v36  ;;  %v662_v38 = vpop.f32.mrf.mxu0  ;;  %2166 = vmatmul.mubr.bf16.gmra.mxu0 %v4046_v29 }
 0x1c2   :  { %4248 = vtanh.f32 %v662_v38  ;;  %v1418_v39 = vpop.f32.mrf.mxu1  ;;  %2923 = vmatmul.mubr.bf16.gmra.mxu1 %v4049_v31  ;;  %2173 = vmatprep.mubr.bf16.mxu0 %v3433_v32 }
 0x1c3   :  { %v4237_v40 = vpop.eup %4236  ;;  %4250 = vtanh.f32 %v1418_v39  ;;  %v664_v0 = vpop.f32.mrf.mxu0  ;;  %2930 = vmatprep.mubr.bf16.mxu1 %v3629_v35 }
 0x1c4   :  { %v4239_v41 = vpop.eup %4238  ;;  %762 = vst [vmem:[%s5898_s2 + $0x168] sm:$0xff] %v4237_v40  ;;  %v1420_v42 = vpop.f32.mrf.mxu1 }
 0x1c5   :  { %3299 = vst [vmem:[%s5898_s2 + $0x2f0] sm:$0xff] %v4239_v41  ;;  %v665_v43 = vpop.f32.mrf.mxu0 }
 0x1c6   :  { %v1421_v45 = vpop.f32.mrf.mxu1 }
 0x1c7   :  { %v4241_v47 = vpop.eup %4240  ;;  %v666_v48 = vpop.f32.mrf.mxu0 }
 0x1c8   :  { %v4243_v49 = vpop.eup %4242  ;;  %763 = vst [vmem:[%s5898_s2 + $0x170] sm:$0xff] %v4241_v47  ;;  %v1422_v50 = vpop.f32.mrf.mxu1 }
 0x1c9   :  { %3300 = vst [vmem:[%s5898_s2 + $0x2f8] sm:$0xff] %v4243_v49  ;;  %v1983_v51 = vpop.f32.mrf.mxu0  ;;  %2174 = vmatmul.mubr.bf16.gmra.mxu0 %v3432_v44 }
 0x1ca   :  { %4252 = vtanh.f32 %v1983_v51  ;;  %v2740_v52 = vpop.f32.mrf.mxu1  ;;  %2931 = vmatmul.mubr.bf16.gmra.mxu1 %v3628_v46 }
 0x1cb   :  { %v4245_v53 = vpop.eup %4244  ;;  %4254 = vtanh.f32 %v2740_v52  ;;  %v1985_v54 = vpop.f32.mrf.mxu0 }
 0x1cc   :  { %v4247_v55 = vpop.eup %4246  ;;  %764 = vst [vmem:[%s5898_s2 + $0x178] sm:$0xff] %v4245_v53  ;;  %v2742_v56 = vpop.f32.mrf.mxu1 }
 0x1cd   :  { %3301 = vst [vmem:[%s5898_s2 + $0x300] sm:$0xff] %v4247_v55  ;;  %v1986_v57 = vpop.f32.mrf.mxu0 }
 0x1ce   :  { %4256 = vtanh.f32 %v1986_v57  ;;  %v2743_v58 = vpop.f32.mrf.mxu1 }
 0x1cf   :  { %v4249_v59 = vpop.eup %4248  ;;  %4258 = vtanh.f32 %v2743_v58  ;;  %v1988_v60 = vpop.f32.mrf.mxu0 }
 0x1d0   :  { %v4251_v61 = vpop.eup %4250  ;;  %765 = vst [vmem:[%s5898_s2 + $0x180] sm:$0xff] %v4249_v59  ;;  %v2745_v62 = vpop.f32.mrf.mxu1 }
 0x1d1   :  { %3302 = vst [vmem:[%s5898_s2 + $0x308] sm:$0xff] %v4251_v61  ;;  %v1991_v63 = vpop.f32.mrf.mxu0 }
 0x1d2   :  { %4260 = vtanh.f32 %v1991_v63  ;;  %v2748_v1 = vpop.f32.mrf.mxu1 }
 0x1d3   :  { %4262 = vtanh.f32 %v2748_v1  ;;  %v1993_v2 = vpop.f32.mrf.mxu0 }
 0x1d4   :  { %v2750_v3 = vpop.f32.mrf.mxu1 }
 0x1d5   :  { %v1994_v4 = vpop.f32.mrf.mxu0 }
 0x1d6   :  { %4264 = vtanh.f32 %v1994_v4  ;;  %v2751_v5 = vpop.f32.mrf.mxu1 }
 0x1d7   :  { %v4253_v6 = vpop.eup %4252  ;;  %4266 = vtanh.f32 %v2751_v5  ;;  %v1996_v7 = vpop.f32.mrf.mxu0 }
 0x1d8   :  { %v4255_v8 = vpop.eup %4254  ;;  %3450 = vst [vmem:[%s5898_s2 + $0x310] sm:$0xff] %v4253_v6  ;;  %v2753_v9 = vpop.f32.mrf.mxu1 }
 0x1d9   :  { %3646 = vst [vmem:[%s5898_s2 + $0x498] sm:$0xff] %v4255_v8  ;;  %v1999_v10 = vpop.f32.mrf.mxu0 }
 0x1da   :  { %4268 = vtanh.f32 %v1999_v10  ;;  %v2756_v11 = vpop.f32.mrf.mxu1 }
 0x1db   :  { %v4257_v12 = vpop.eup %4256  ;;  %4270 = vtanh.f32 %v2756_v11  ;;  %v2001_v13 = vpop.f32.mrf.mxu0 }
 0x1dc   :  { %v4259_v14 = vpop.eup %4258  ;;  %3451 = vst [vmem:[%s5898_s2 + $0x318] sm:$0xff] %v4257_v12  ;;  %v2758_v15 = vpop.f32.mrf.mxu1 }
 0x1dd   :  { %3647 = vst [vmem:[%s5898_s2 + $0x4a0] sm:$0xff] %v4259_v14  ;;  %v2002_v16 = vpop.f32.mrf.mxu0 }
 0x1de   :  { %4272 = vtanh.f32 %v2002_v16  ;;  %v2759_v17 = vpop.f32.mrf.mxu1 }
 0x1df   :  { %v4261_v18 = vpop.eup %4260  ;;  %4274 = vtanh.f32 %v2759_v17  ;;  %v2004_v19 = vpop.f32.mrf.mxu0 }
 0x1e0   :  { %v4263_v20 = vpop.eup %4262  ;;  %3452 = vst [vmem:[%s5898_s2 + $0x320] sm:$0xff] %v4261_v18  ;;  %v2761_v21 = vpop.f32.mrf.mxu1 }
 0x1e1   :  { %3648 = vst [vmem:[%s5898_s2 + $0x4a8] sm:$0xff] %v4263_v20  ;;  %v2007_v22 = vpop.f32.mrf.mxu0 }
 0x1e2   :  { %4276 = vtanh.f32 %v2007_v22  ;;  %v2764_v23 = vpop.f32.mrf.mxu1 }
 0x1e3   :  { %v4265_v24 = vpop.eup %4264  ;;  %4278 = vtanh.f32 %v2764_v23  ;;  %v2009_v25 = vpop.f32.mrf.mxu0 }
 0x1e4   :  { %v4267_v26 = vpop.eup %4266  ;;  %3453 = vst [vmem:[%s5898_s2 + $0x328] sm:$0xff] %v4265_v24  ;;  %v2766_v27 = vpop.f32.mrf.mxu1 }
 0x1e5   :  { %3649 = vst [vmem:[%s5898_s2 + $0x4b0] sm:$0xff] %v4267_v26  ;;  %v2010_v28 = vpop.f32.mrf.mxu0 }
 0x1e6   :  { %4280 = vtanh.f32 %v2010_v28  ;;  %v2767_v29 = vpop.f32.mrf.mxu1 }
 0x1e7   :  { %v4269_v30 = vpop.eup %4268  ;;  %4282 = vtanh.f32 %v2767_v29  ;;  %v2012_v31 = vpop.f32.mrf.mxu0 }
 0x1e8   :  { %v4271_v32 = vpop.eup %4270  ;;  %3454 = vst [vmem:[%s5898_s2 + $0x330] sm:$0xff] %v4269_v30  ;;  %v2769_v33 = vpop.f32.mrf.mxu1 }
 0x1e9   :  { %3650 = vst [vmem:[%s5898_s2 + $0x4b8] sm:$0xff] %v4271_v32  ;;  %v2015_v34 = vpop.f32.mrf.mxu0 }
 0x1ea   :  { %4284 = vtanh.f32 %v2015_v34  ;;  %v2772_v35 = vpop.f32.mrf.mxu1 }
 0x1eb   :  { %v4273_v36 = vpop.eup %4272  ;;  %4286 = vtanh.f32 %v2772_v35  ;;  %v2017_v37 = vpop.f32.mrf.mxu0 }
 0x1ec   :  { %v4275_v38 = vpop.eup %4274  ;;  %3455 = vst [vmem:[%s5898_s2 + $0x338] sm:$0xff] %v4273_v36  ;;  %v2774_v39 = vpop.f32.mrf.mxu1 }
 0x1ed   :  { %3651 = vst [vmem:[%s5898_s2 + $0x4c0] sm:$0xff] %v4275_v38  ;;  %v2018_v40 = vpop.f32.mrf.mxu0 }
 0x1ee   :  { %4288 = vtanh.f32 %v2018_v40  ;;  %v2775_v0 = vpop.f32.mrf.mxu1 }
 0x1ef   :  { %v4277_v41 = vpop.eup %4276  ;;  %4290 = vtanh.f32 %v2775_v0  ;;  %v2020_v42 = vpop.f32.mrf.mxu0 }
 0x1f0   :  { %v4279_v43 = vpop.eup %4278  ;;  %3456 = vst [vmem:[%s5898_s2 + $0x340] sm:$0xff] %v4277_v41  ;;  %v2777_v44 = vpop.f32.mrf.mxu1 }
 0x1f1   :  { %3652 = vst [vmem:[%s5898_s2 + $0x4c8] sm:$0xff] %v4279_v43  ;;  %v2023_v45 = vpop.f32.mrf.mxu0 }
 0x1f2   :  { %4292 = vtanh.f32 %v2023_v45  ;;  %v2780_v46 = vpop.f32.mrf.mxu1 }
 0x1f3   :  { %v4281_v47 = vpop.eup %4280  ;;  %4294 = vtanh.f32 %v2780_v46  ;;  %v2025_v48 = vpop.f32.mrf.mxu0 }
 0x1f4   :  { %v4283_v49 = vpop.eup %4282  ;;  %3457 = vst [vmem:[%s5898_s2 + $0x348] sm:$0xff] %v4281_v47  ;;  %v2782_v50 = vpop.f32.mrf.mxu1 }
 0x1f5   :  { %3653 = vst [vmem:[%s5898_s2 + $0x4d0] sm:$0xff] %v4283_v49  ;;  %v2026_v51 = vpop.f32.mrf.mxu0 }
 0x1f6   :  { %4296 = vtanh.f32 %v2026_v51  ;;  %v2783_v52 = vpop.f32.mrf.mxu1 }
 0x1f7   :  { %v4285_v53 = vpop.eup %4284  ;;  %4298 = vtanh.f32 %v2783_v52  ;;  %v2028_v54 = vpop.f32.mrf.mxu0 }
 0x1f8   :  { %v4287_v55 = vpop.eup %4286  ;;  %3458 = vst [vmem:[%s5898_s2 + $0x350] sm:$0xff] %v4285_v53  ;;  %v2785_v56 = vpop.f32.mrf.mxu1 }
 0x1f9   :  { %3654 = vst [vmem:[%s5898_s2 + $0x4d8] sm:$0xff] %v4287_v55  ;;  %v2031_v57 = vpop.f32.mrf.mxu0 }
 0x1fa   :  { %4300 = vtanh.f32 %v2031_v57  ;;  %v2788_v58 = vpop.f32.mrf.mxu1 }
 0x1fb   :  { %v4289_v59 = vpop.eup %4288  ;;  %4302 = vtanh.f32 %v2788_v58  ;;  %v2033_v60 = vpop.f32.mrf.mxu0 }
 0x1fc   :  { %v4291_v61 = vpop.eup %4290  ;;  %3459 = vst [vmem:[%s5898_s2 + $0x358] sm:$0xff] %v4289_v59  ;;  %v2790_v62 = vpop.f32.mrf.mxu1 }
 0x1fd   :  { %3655 = vst [vmem:[%s5898_s2 + $0x4e0] sm:$0xff] %v4291_v61  ;;  %v2034_v63 = vpop.f32.mrf.mxu0 }
 0x1fe   :  { %4304 = vtanh.f32 %v2034_v63  ;;  %v2791_v1 = vpop.f32.mrf.mxu1 }
 0x1ff   :  { %v4293_v2 = vpop.eup %4292  ;;  %4306 = vtanh.f32 %v2791_v1  ;;  %v2036_v3 = vpop.f32.mrf.mxu0 }
 0x200   :  { %v4295_v4 = vpop.eup %4294  ;;  %3460 = vst [vmem:[%s5898_s2 + $0x360] sm:$0xff] %v4293_v2  ;;  %v2793_v5 = vpop.f32.mrf.mxu1 }
 0x201   :  { %3656 = vst [vmem:[%s5898_s2 + $0x4e8] sm:$0xff] %v4295_v4  ;;  %v2039_v6 = vpop.f32.mrf.mxu0 }
 0x202   :  { %4308 = vtanh.f32 %v2039_v6  ;;  %v2796_v7 = vpop.f32.mrf.mxu1 }
 0x203   :  { %v4297_v8 = vpop.eup %4296  ;;  %4310 = vtanh.f32 %v2796_v7  ;;  %v2041_v9 = vpop.f32.mrf.mxu0 }
 0x204   :  { %v4299_v10 = vpop.eup %4298  ;;  %3461 = vst [vmem:[%s5898_s2 + $0x368] sm:$0xff] %v4297_v8  ;;  %v2798_v11 = vpop.f32.mrf.mxu1 }
 0x205   :  { %3657 = vst [vmem:[%s5898_s2 + $0x4f0] sm:$0xff] %v4299_v10  ;;  %v2042_v12 = vpop.f32.mrf.mxu0 }
 0x206   :  { %4312 = vtanh.f32 %v2042_v12  ;;  %v2799_v13 = vpop.f32.mrf.mxu1 }
 0x207   :  { %v4301_v14 = vpop.eup %4300  ;;  %4314 = vtanh.f32 %v2799_v13  ;;  %v2044_v15 = vpop.f32.mrf.mxu0 }
 0x208   :  { %v4303_v16 = vpop.eup %4302  ;;  %3462 = vst [vmem:[%s5898_s2 + $0x370] sm:$0xff] %v4301_v14  ;;  %v2801_v17 = vpop.f32.mrf.mxu1 }
 0x209   :  { %3658 = vst [vmem:[%s5898_s2 + $0x4f8] sm:$0xff] %v4303_v16  ;;  %v2047_v18 = vpop.f32.mrf.mxu0 }
 0x20a   :  { %4316 = vtanh.f32 %v2047_v18  ;;  %v2804_v19 = vpop.f32.mrf.mxu1 }
 0x20b   :  { %v4305_v20 = vpop.eup %4304  ;;  %4318 = vtanh.f32 %v2804_v19  ;;  %v2049_v21 = vpop.f32.mrf.mxu0 }
 0x20c   :  { %v4307_v22 = vpop.eup %4306  ;;  %3463 = vst [vmem:[%s5898_s2 + $0x378] sm:$0xff] %v4305_v20  ;;  %v2806_v23 = vpop.f32.mrf.mxu1 }
 0x20d   :  { %3659 = vst [vmem:[%s5898_s2 + $0x500] sm:$0xff] %v4307_v22  ;;  %v2050_v24 = vpop.f32.mrf.mxu0 }
 0x20e   :  { %4320 = vtanh.f32 %v2050_v24  ;;  %v2807_v25 = vpop.f32.mrf.mxu1 }
 0x20f   :  { %v4309_v26 = vpop.eup %4308  ;;  %4322 = vtanh.f32 %v2807_v25  ;;  %v2052_v27 = vpop.f32.mrf.mxu0 }
 0x210   :  { %v4311_v28 = vpop.eup %4310  ;;  %3464 = vst [vmem:[%s5898_s2 + $0x380] sm:$0xff] %v4309_v26  ;;  %v2809_v29 = vpop.f32.mrf.mxu1 }
 0x211   :  { %3660 = vst [vmem:[%s5898_s2 + $0x508] sm:$0xff] %v4311_v28  ;;  %v2055_v30 = vpop.f32.mrf.mxu0 }
 0x212   :  { %4324 = vtanh.f32 %v2055_v30  ;;  %v2812_v31 = vpop.f32.mrf.mxu1 }
 0x213   :  { %v4313_v32 = vpop.eup %4312  ;;  %4326 = vtanh.f32 %v2812_v31  ;;  %v2057_v33 = vpop.f32.mrf.mxu0 }
 0x214   :  { %v4315_v34 = vpop.eup %4314  ;;  %3465 = vst [vmem:[%s5898_s2 + $0x388] sm:$0xff] %v4313_v32  ;;  %v2814_v35 = vpop.f32.mrf.mxu1 }
 0x215   :  { %3661 = vst [vmem:[%s5898_s2 + $0x510] sm:$0xff] %v4315_v34  ;;  %v2058_v36 = vpop.f32.mrf.mxu0 }
 0x216   :  { %4328 = vtanh.f32 %v2058_v36  ;;  %v2815_v37 = vpop.f32.mrf.mxu1 }
 0x217   :  { %v4317_v38 = vpop.eup %4316  ;;  %4330 = vtanh.f32 %v2815_v37  ;;  %v2060_v39 = vpop.f32.mrf.mxu0 }
 0x218   :  { %v4319_v40 = vpop.eup %4318  ;;  %3466 = vst [vmem:[%s5898_s2 + $0x390] sm:$0xff] %v4317_v38  ;;  %v2817_v0 = vpop.f32.mrf.mxu1 }
 0x219   :  { %3662 = vst [vmem:[%s5898_s2 + $0x518] sm:$0xff] %v4319_v40  ;;  %v2063_v41 = vpop.f32.mrf.mxu0 }
 0x21a   :  { %4332 = vtanh.f32 %v2063_v41  ;;  %v2820_v42 = vpop.f32.mrf.mxu1 }
 0x21b   :  { %v4321_v43 = vpop.eup %4320  ;;  %4334 = vtanh.f32 %v2820_v42  ;;  %v2065_v44 = vpop.f32.mrf.mxu0 }
 0x21c   :  { %v4323_v45 = vpop.eup %4322  ;;  %3467 = vst [vmem:[%s5898_s2 + $0x398] sm:$0xff] %v4321_v43  ;;  %v2822_v46 = vpop.f32.mrf.mxu1 }
 0x21d   :  { %3663 = vst [vmem:[%s5898_s2 + $0x520] sm:$0xff] %v4323_v45  ;;  %v2066_v47 = vpop.f32.mrf.mxu0 }
 0x21e   :  { %4336 = vtanh.f32 %v2066_v47  ;;  %v2823_v48 = vpop.f32.mrf.mxu1 }
 0x21f   :  { %v4325_v49 = vpop.eup %4324  ;;  %4338 = vtanh.f32 %v2823_v48  ;;  %v2068_v50 = vpop.f32.mrf.mxu0 }
 0x220   :  { %v4327_v51 = vpop.eup %4326  ;;  %3468 = vst [vmem:[%s5898_s2 + $0x3a0] sm:$0xff] %v4325_v49  ;;  %v2825_v52 = vpop.f32.mrf.mxu1 }
 0x221   :  { %3664 = vst [vmem:[%s5898_s2 + $0x528] sm:$0xff] %v4327_v51  ;;  %v2071_v53 = vpop.f32.mrf.mxu0 }
 0x222   :  { %4340 = vtanh.f32 %v2071_v53  ;;  %v2828_v54 = vpop.f32.mrf.mxu1 }
 0x223   :  { %v4329_v55 = vpop.eup %4328  ;;  %4342 = vtanh.f32 %v2828_v54  ;;  %v2073_v56 = vpop.f32.mrf.mxu0 }
 0x224   :  { %v4331_v57 = vpop.eup %4330  ;;  %3469 = vst [vmem:[%s5898_s2 + $0x3a8] sm:$0xff] %v4329_v55  ;;  %v2830_v58 = vpop.f32.mrf.mxu1 }
 0x225   :  { %3665 = vst [vmem:[%s5898_s2 + $0x530] sm:$0xff] %v4331_v57  ;;  %v2074_v59 = vpop.f32.mrf.mxu0 }
 0x226   :  { %4344 = vtanh.f32 %v2074_v59  ;;  %v2831_v60 = vpop.f32.mrf.mxu1 }
 0x227   :  { %v4333_v61 = vpop.eup %4332  ;;  %4346 = vtanh.f32 %v2831_v60  ;;  %v2076_v62 = vpop.f32.mrf.mxu0 }
 0x228   :  { %v4335_v63 = vpop.eup %4334  ;;  %3470 = vst [vmem:[%s5898_s2 + $0x3b0] sm:$0xff] %v4333_v61  ;;  %v2833_v1 = vpop.f32.mrf.mxu1 }
 0x229   :  { %3666 = vst [vmem:[%s5898_s2 + $0x538] sm:$0xff] %v4335_v63  ;;  %v2079_v2 = vpop.f32.mrf.mxu0 }
 0x22a   :  { %4348 = vtanh.f32 %v2079_v2  ;;  %v2836_v3 = vpop.f32.mrf.mxu1 }
 0x22b   :  { %v4337_v4 = vpop.eup %4336  ;;  %4350 = vtanh.f32 %v2836_v3  ;;  %v2081_v5 = vpop.f32.mrf.mxu0 }
 0x22c   :  { %v4339_v6 = vpop.eup %4338  ;;  %3471 = vst [vmem:[%s5898_s2 + $0x3b8] sm:$0xff] %v4337_v4  ;;  %v2838_v7 = vpop.f32.mrf.mxu1 }
 0x22d   :  { %3667 = vst [vmem:[%s5898_s2 + $0x540] sm:$0xff] %v4339_v6  ;;  %v2082_v8 = vpop.f32.mrf.mxu0 }
 0x22e   :  { %4352 = vtanh.f32 %v2082_v8  ;;  %v2839_v9 = vpop.f32.mrf.mxu1 }
 0x22f   :  { %v4341_v10 = vpop.eup %4340  ;;  %4354 = vtanh.f32 %v2839_v9  ;;  %v2084_v11 = vpop.f32.mrf.mxu0 }
 0x230   :  { %v4343_v12 = vpop.eup %4342  ;;  %3472 = vst [vmem:[%s5898_s2 + $0x3c0] sm:$0xff] %v4341_v10  ;;  %v2841_v13 = vpop.f32.mrf.mxu1 }
 0x231   :  { %3668 = vst [vmem:[%s5898_s2 + $0x548] sm:$0xff] %v4343_v12  ;;  %v2087_v14 = vpop.f32.mrf.mxu0 }
 0x232   :  { %4356 = vtanh.f32 %v2087_v14  ;;  %v2844_v15 = vpop.f32.mrf.mxu1 }
 0x233   :  { %v4345_v16 = vpop.eup %4344  ;;  %4358 = vtanh.f32 %v2844_v15  ;;  %v2089_v17 = vpop.f32.mrf.mxu0 }
 0x234   :  { %v4347_v18 = vpop.eup %4346  ;;  %3473 = vst [vmem:[%s5898_s2 + $0x3c8] sm:$0xff] %v4345_v16  ;;  %v2846_v19 = vpop.f32.mrf.mxu1 }
 0x235   :  { %3669 = vst [vmem:[%s5898_s2 + $0x550] sm:$0xff] %v4347_v18  ;;  %v2090_v20 = vpop.f32.mrf.mxu0 }
 0x236   :  { %4360 = vtanh.f32 %v2090_v20  ;;  %v2847_v21 = vpop.f32.mrf.mxu1 }
 0x237   :  { %v4349_v22 = vpop.eup %4348  ;;  %4362 = vtanh.f32 %v2847_v21  ;;  %v2092_v23 = vpop.f32.mrf.mxu0 }
 0x238   :  { %v4351_v24 = vpop.eup %4350  ;;  %3474 = vst [vmem:[%s5898_s2 + $0x3d0] sm:$0xff] %v4349_v22  ;;  %v2849_v25 = vpop.f32.mrf.mxu1 }
 0x239   :  { %3670 = vst [vmem:[%s5898_s2 + $0x558] sm:$0xff] %v4351_v24  ;;  %v2095_v26 = vpop.f32.mrf.mxu0 }
 0x23a   :  { %4364 = vtanh.f32 %v2095_v26  ;;  %v2852_v27 = vpop.f32.mrf.mxu1 }
 0x23b   :  { %v4353_v28 = vpop.eup %4352  ;;  %4366 = vtanh.f32 %v2852_v27  ;;  %v2097_v29 = vpop.f32.mrf.mxu0 }
 0x23c   :  { %v4355_v30 = vpop.eup %4354  ;;  %3475 = vst [vmem:[%s5898_s2 + $0x3d8] sm:$0xff] %v4353_v28  ;;  %v2854_v31 = vpop.f32.mrf.mxu1 }
 0x23d   :  { %3671 = vst [vmem:[%s5898_s2 + $0x560] sm:$0xff] %v4355_v30  ;;  %v2098_v32 = vpop.f32.mrf.mxu0 }
 0x23e   :  { %4368 = vtanh.f32 %v2098_v32  ;;  %v2855_v33 = vpop.f32.mrf.mxu1 }
 0x23f   :  { %v4357_v34 = vpop.eup %4356  ;;  %4370 = vtanh.f32 %v2855_v33  ;;  %v2100_v35 = vpop.f32.mrf.mxu0 }
 0x240   :  { %v4359_v36 = vpop.eup %4358  ;;  %3476 = vst [vmem:[%s5898_s2 + $0x3e0] sm:$0xff] %v4357_v34  ;;  %v2857_v37 = vpop.f32.mrf.mxu1 }
 0x241   :  { %3672 = vst [vmem:[%s5898_s2 + $0x568] sm:$0xff] %v4359_v36  ;;  %v2103_v38 = vpop.f32.mrf.mxu0 }
 0x242   :  { %4372 = vtanh.f32 %v2103_v38  ;;  %v2860_v39 = vpop.f32.mrf.mxu1 }
 0x243   :  { %v4361_v40 = vpop.eup %4360  ;;  %4374 = vtanh.f32 %v2860_v39  ;;  %v2105_v0 = vpop.f32.mrf.mxu0 }
 0x244   :  { %v4363_v41 = vpop.eup %4362  ;;  %3477 = vst [vmem:[%s5898_s2 + $0x3e8] sm:$0xff] %v4361_v40  ;;  %v2862_v42 = vpop.f32.mrf.mxu1 }
 0x245   :  { %3673 = vst [vmem:[%s5898_s2 + $0x570] sm:$0xff] %v4363_v41  ;;  %v2106_v43 = vpop.f32.mrf.mxu0 }
 0x246   :  { %4376 = vtanh.f32 %v2106_v43  ;;  %v2863_v44 = vpop.f32.mrf.mxu1 }
 0x247   :  { %v4365_v45 = vpop.eup %4364  ;;  %4378 = vtanh.f32 %v2863_v44  ;;  %v2108_v46 = vpop.f32.mrf.mxu0 }
 0x248   :  { %v4367_v47 = vpop.eup %4366  ;;  %3478 = vst [vmem:[%s5898_s2 + $0x3f0] sm:$0xff] %v4365_v45  ;;  %v2865_v48 = vpop.f32.mrf.mxu1 }
 0x249   :  { %3674 = vst [vmem:[%s5898_s2 + $0x578] sm:$0xff] %v4367_v47  ;;  %v2111_v49 = vpop.f32.mrf.mxu0 }
 0x24a   :  { %4380 = vtanh.f32 %v2111_v49  ;;  %v2868_v50 = vpop.f32.mrf.mxu1 }
 0x24b   :  { %v4369_v51 = vpop.eup %4368  ;;  %4382 = vtanh.f32 %v2868_v50  ;;  %v2113_v52 = vpop.f32.mrf.mxu0 }
 0x24c   :  { %v4371_v53 = vpop.eup %4370  ;;  %3479 = vst [vmem:[%s5898_s2 + $0x3f8] sm:$0xff] %v4369_v51  ;;  %v2870_v54 = vpop.f32.mrf.mxu1 }
 0x24d   :  { %3675 = vst [vmem:[%s5898_s2 + $0x580] sm:$0xff] %v4371_v53  ;;  %v2114_v55 = vpop.f32.mrf.mxu0 }
 0x24e   :  { %4384 = vtanh.f32 %v2114_v55  ;;  %v2871_v56 = vpop.f32.mrf.mxu1 }
 0x24f   :  { %v4373_v57 = vpop.eup %4372  ;;  %4386 = vtanh.f32 %v2871_v56  ;;  %v2116_v58 = vpop.f32.mrf.mxu0 }
 0x250   :  { %v4375_v59 = vpop.eup %4374  ;;  %3480 = vst [vmem:[%s5898_s2 + $0x400] sm:$0xff] %v4373_v57  ;;  %v2873_v60 = vpop.f32.mrf.mxu1 }
 0x251   :  { %3676 = vst [vmem:[%s5898_s2 + $0x588] sm:$0xff] %v4375_v59  ;;  %v2119_v61 = vpop.f32.mrf.mxu0 }
 0x252   :  { %4388 = vtanh.f32 %v2119_v61  ;;  %v2876_v62 = vpop.f32.mrf.mxu1 }
 0x253   :  { %v4377_v63 = vpop.eup %4376  ;;  %4390 = vtanh.f32 %v2876_v62  ;;  %v2121_v1 = vpop.f32.mrf.mxu0 }
 0x254   :  { %v4379_v2 = vpop.eup %4378  ;;  %3481 = vst [vmem:[%s5898_s2 + $0x408] sm:$0xff] %v4377_v63  ;;  %v2878_v3 = vpop.f32.mrf.mxu1 }
 0x255   :  { %3677 = vst [vmem:[%s5898_s2 + $0x590] sm:$0xff] %v4379_v2  ;;  %v2122_v4 = vpop.f32.mrf.mxu0 }
 0x256   :  { %4392 = vtanh.f32 %v2122_v4  ;;  %v2879_v5 = vpop.f32.mrf.mxu1 }
 0x257   :  { %v4381_v6 = vpop.eup %4380  ;;  %4394 = vtanh.f32 %v2879_v5  ;;  %v2124_v7 = vpop.f32.mrf.mxu0 }
 0x258   :  { %v4383_v8 = vpop.eup %4382  ;;  %3482 = vst [vmem:[%s5898_s2 + $0x410] sm:$0xff] %v4381_v6  ;;  %v2881_v9 = vpop.f32.mrf.mxu1 }
 0x259   :  { %3678 = vst [vmem:[%s5898_s2 + $0x598] sm:$0xff] %v4383_v8  ;;  %v2127_v10 = vpop.f32.mrf.mxu0 }
 0x25a   :  { %4396 = vtanh.f32 %v2127_v10  ;;  %v2884_v11 = vpop.f32.mrf.mxu1 }
 0x25b   :  { %v4385_v12 = vpop.eup %4384  ;;  %4398 = vtanh.f32 %v2884_v11  ;;  %v2129_v13 = vpop.f32.mrf.mxu0 }
 0x25c   :  { %v4387_v14 = vpop.eup %4386  ;;  %3483 = vst [vmem:[%s5898_s2 + $0x418] sm:$0xff] %v4385_v12  ;;  %v2886_v15 = vpop.f32.mrf.mxu1 }
 0x25d   :  { %3679 = vst [vmem:[%s5898_s2 + $0x5a0] sm:$0xff] %v4387_v14  ;;  %v2130_v16 = vpop.f32.mrf.mxu0 }
 0x25e   :  { %4400 = vtanh.f32 %v2130_v16  ;;  %v2887_v17 = vpop.f32.mrf.mxu1 }
 0x25f   :  { %v4389_v18 = vpop.eup %4388  ;;  %4402 = vtanh.f32 %v2887_v17  ;;  %v2132_v19 = vpop.f32.mrf.mxu0 }
 0x260   :  { %v4391_v20 = vpop.eup %4390  ;;  %3484 = vst [vmem:[%s5898_s2 + $0x420] sm:$0xff] %v4389_v18  ;;  %v2889_v21 = vpop.f32.mrf.mxu1 }
 0x261   :  { %3680 = vst [vmem:[%s5898_s2 + $0x5a8] sm:$0xff] %v4391_v20  ;;  %v2135_v22 = vpop.f32.mrf.mxu0 }
 0x262   :  { %4404 = vtanh.f32 %v2135_v22  ;;  %v2892_v23 = vpop.f32.mrf.mxu1 }
 0x263   :  { %v4393_v24 = vpop.eup %4392  ;;  %4406 = vtanh.f32 %v2892_v23  ;;  %v2137_v25 = vpop.f32.mrf.mxu0 }
 0x264   :  { %v4395_v26 = vpop.eup %4394  ;;  %3485 = vst [vmem:[%s5898_s2 + $0x428] sm:$0xff] %v4393_v24  ;;  %v2894_v27 = vpop.f32.mrf.mxu1 }
 0x265   :  { %3681 = vst [vmem:[%s5898_s2 + $0x5b0] sm:$0xff] %v4395_v26  ;;  %v2138_v28 = vpop.f32.mrf.mxu0 }
 0x266   :  { %4408 = vtanh.f32 %v2138_v28  ;;  %v2895_v29 = vpop.f32.mrf.mxu1 }
 0x267   :  { %v4397_v30 = vpop.eup %4396  ;;  %4410 = vtanh.f32 %v2895_v29  ;;  %v2140_v31 = vpop.f32.mrf.mxu0 }
 0x268   :  { %v4399_v32 = vpop.eup %4398  ;;  %3486 = vst [vmem:[%s5898_s2 + $0x430] sm:$0xff] %v4397_v30  ;;  %v2897_v33 = vpop.f32.mrf.mxu1 }
 0x269   :  { %3682 = vst [vmem:[%s5898_s2 + $0x5b8] sm:$0xff] %v4399_v32  ;;  %v2143_v34 = vpop.f32.mrf.mxu0 }
 0x26a   :  { %4412 = vtanh.f32 %v2143_v34  ;;  %v2900_v35 = vpop.f32.mrf.mxu1 }
 0x26b   :  { %v4401_v36 = vpop.eup %4400  ;;  %4414 = vtanh.f32 %v2900_v35  ;;  %v2145_v37 = vpop.f32.mrf.mxu0 }
 0x26c   :  { %v4403_v38 = vpop.eup %4402  ;;  %3487 = vst [vmem:[%s5898_s2 + $0x438] sm:$0xff] %v4401_v36  ;;  %v2902_v39 = vpop.f32.mrf.mxu1 }
 0x26d   :  { %3683 = vst [vmem:[%s5898_s2 + $0x5c0] sm:$0xff] %v4403_v38  ;;  %v2146_v40 = vpop.f32.mrf.mxu0 }
 0x26e   :  { %4416 = vtanh.f32 %v2146_v40  ;;  %v2903_v0 = vpop.f32.mrf.mxu1 }
 0x26f   :  { %v4405_v41 = vpop.eup %4404  ;;  %4418 = vtanh.f32 %v2903_v0  ;;  %v2148_v42 = vpop.f32.mrf.mxu0 }
 0x270   :  { %v4407_v43 = vpop.eup %4406  ;;  %3488 = vst [vmem:[%s5898_s2 + $0x440] sm:$0xff] %v4405_v41  ;;  %v2905_v44 = vpop.f32.mrf.mxu1 }
 0x271   :  { %3684 = vst [vmem:[%s5898_s2 + $0x5c8] sm:$0xff] %v4407_v43  ;;  %v2151_v45 = vpop.f32.mrf.mxu0 }
 0x272   :  { %4420 = vtanh.f32 %v2151_v45  ;;  %v2908_v46 = vpop.f32.mrf.mxu1 }
 0x273   :  { %v4409_v47 = vpop.eup %4408  ;;  %4422 = vtanh.f32 %v2908_v46  ;;  %v2153_v48 = vpop.f32.mrf.mxu0 }
 0x274   :  { %v4411_v49 = vpop.eup %4410  ;;  %3489 = vst [vmem:[%s5898_s2 + $0x448] sm:$0xff] %v4409_v47  ;;  %v2910_v50 = vpop.f32.mrf.mxu1 }
 0x275   :  { %3685 = vst [vmem:[%s5898_s2 + $0x5d0] sm:$0xff] %v4411_v49  ;;  %v2154_v51 = vpop.f32.mrf.mxu0 }
 0x276   :  { %4424 = vtanh.f32 %v2154_v51  ;;  %v2911_v52 = vpop.f32.mrf.mxu1 }
 0x277   :  { %v4413_v53 = vpop.eup %4412  ;;  %4426 = vtanh.f32 %v2911_v52  ;;  %v2156_v54 = vpop.f32.mrf.mxu0 }
 0x278   :  { %v4415_v55 = vpop.eup %4414  ;;  %3490 = vst [vmem:[%s5898_s2 + $0x450] sm:$0xff] %v4413_v53  ;;  %v2913_v56 = vpop.f32.mrf.mxu1 }
 0x279   :  { %3686 = vst [vmem:[%s5898_s2 + $0x5d8] sm:$0xff] %v4415_v55  ;;  %v2159_v57 = vpop.f32.mrf.mxu0 }
 0x27a   :  { %4428 = vtanh.f32 %v2159_v57  ;;  %v2916_v58 = vpop.f32.mrf.mxu1 }
 0x27b   :  { %v4417_v59 = vpop.eup %4416  ;;  %4430 = vtanh.f32 %v2916_v58  ;;  %v2161_v60 = vpop.f32.mrf.mxu0 }
 0x27c   :  { %v4419_v61 = vpop.eup %4418  ;;  %3491 = vst [vmem:[%s5898_s2 + $0x458] sm:$0xff] %v4417_v59  ;;  %v2918_v62 = vpop.f32.mrf.mxu1 }
 0x27d   :  { %3687 = vst [vmem:[%s5898_s2 + $0x5e0] sm:$0xff] %v4419_v61  ;;  %v2162_v63 = vpop.f32.mrf.mxu0 }
 0x27e   :  { %4432 = vtanh.f32 %v2162_v63  ;;  %v2919_v1 = vpop.f32.mrf.mxu1 }
 0x27f   :  { %v4421_v2 = vpop.eup %4420  ;;  %4434 = vtanh.f32 %v2919_v1  ;;  %v2164_v3 = vpop.f32.mrf.mxu0 }
 0x280   :  { %v4423_v4 = vpop.eup %4422  ;;  %3492 = vst [vmem:[%s5898_s2 + $0x460] sm:$0xff] %v4421_v2  ;;  %v2921_v5 = vpop.f32.mrf.mxu1 }
 0x281   :  { %3688 = vst [vmem:[%s5898_s2 + $0x5e8] sm:$0xff] %v4423_v4  ;;  %v2167_v6 = vpop.f32.mrf.mxu0 }
 0x282   :  { %4436 = vtanh.f32 %v2167_v6  ;;  %v2924_v7 = vpop.f32.mrf.mxu1 }
 0x283   :  { %v4425_v8 = vpop.eup %4424  ;;  %4438 = vtanh.f32 %v2924_v7  ;;  %v2169_v9 = vpop.f32.mrf.mxu0 }
 0x284   :  { %v4427_v10 = vpop.eup %4426  ;;  %3493 = vst [vmem:[%s5898_s2 + $0x468] sm:$0xff] %v4425_v8  ;;  %v2926_v11 = vpop.f32.mrf.mxu1 }
 0x285   :  { %3689 = vst [vmem:[%s5898_s2 + $0x5f0] sm:$0xff] %v4427_v10  ;;  %v2170_v12 = vpop.f32.mrf.mxu0 }
 0x286   :  { %4440 = vtanh.f32 %v2170_v12  ;;  %v2927_v13 = vpop.f32.mrf.mxu1 }
 0x287   :  { %v4429_v14 = vpop.eup %4428  ;;  %4442 = vtanh.f32 %v2927_v13  ;;  %v2172_v15 = vpop.f32.mrf.mxu0 }
 0x288   :  { %v4431_v16 = vpop.eup %4430  ;;  %3494 = vst [vmem:[%s5898_s2 + $0x470] sm:$0xff] %v4429_v14  ;;  %v2929_v17 = vpop.f32.mrf.mxu1 }
 0x289   :  { %3690 = vst [vmem:[%s5898_s2 + $0x5f8] sm:$0xff] %v4431_v16  ;;  %v2175_v18 = vpop.f32.mrf.mxu0 }
 0x28a   :  { %4444 = vtanh.f32 %v2175_v18  ;;  %v2932_v19 = vpop.f32.mrf.mxu1 }
 0x28b   :  { %v4433_v20 = vpop.eup %4432  ;;  %4446 = vtanh.f32 %v2932_v19  ;;  %v2177_v21 = vpop.f32.mrf.mxu0 }
 0x28c   :  { %v4435_v22 = vpop.eup %4434  ;;  %3495 = vst [vmem:[%s5898_s2 + $0x478] sm:$0xff] %v4433_v20  ;;  %v2934_v23 = vpop.f32.mrf.mxu1 }
 0x28d   :  { %3691 = vst [vmem:[%s5898_s2 + $0x600] sm:$0xff] %v4435_v22  ;;  %v2178_v24 = vpop.f32.mrf.mxu0 }
 0x28e   :  { %v2935_v25 = vpop.f32.mrf.mxu1 }
 0x28f   :  { %v4437_v26 = vpop.eup %4436  ;;  %v2179_v27 = vpop.f32.mrf.mxu0 }
 0x290   :  { %v4439_v28 = vpop.eup %4438  ;;  %3496 = vst [vmem:[%s5898_s2 + $0x480] sm:$0xff] %v4437_v26  ;;  %v2936_v29 = vpop.f32.mrf.mxu1 }
 0x291   :  { %3692 = vst [vmem:[%s5898_s2 + $0x608] sm:$0xff] %v4439_v28 }
 0x293   :  { %v4441_v30 = vpop.eup %4440 }
 0x294   :  { %v4443_v31 = vpop.eup %4442  ;;  %3497 = vst [vmem:[%s5898_s2 + $0x488] sm:$0xff] %v4441_v30 }
 0x295   :  { %3693 = vst [vmem:[%s5898_s2 + $0x610] sm:$0xff] %v4443_v31 }
 0x297   :  { %v4445_v32 = vpop.eup %4444 }
 0x298   :  { %v4447_v33 = vpop.eup %4446  ;;  %3498 = vst [vmem:[%s5898_s2 + $0x490] sm:$0xff] %v4445_v32 }
 0x299   :  { %3694 = vst [vmem:[%s5898_s2 + $0x618] sm:$0xff] %v4447_v33 }

</bundles_post_ra>
